<compile_context>
chip_gen: v6e
topology: v6e:2x2x1
jax: 0.10.0
libtpu: 0.0.40
codegen_flags: <defaults>
</compile_context>

<pallas_src>
import functools
import math

import jax
import jax.numpy as jnp
from jax.experimental import pallas as pl
from jax.experimental.pallas import tpu as pltpu


# ============================ Pallas kernels ============================

def _linear_kernel(x_ref, w_ref, b_ref, o_ref, *, act):
    y = jnp.dot(x_ref[...], w_ref[...], preferred_element_type=jnp.float32) + b_ref[...]
    if act == "relu":
        y = jnp.maximum(y, 0.0)
    elif act == "sigmoid":
        y = jax.nn.sigmoid(y)
    o_ref[...] = y.astype(o_ref.dtype)


def linear2d(x2, w, b, act="none"):
    """y = x2 @ w + b on a single whole-array VMEM block (x2 is (M, K))."""
    M = x2.shape[0]
    N = w.shape[1]
    return pl.pallas_call(
        functools.partial(_linear_kernel, act=act),
        out_shape=jax.ShapeDtypeStruct((M, N), jnp.float32),
    )(x2, w, b.reshape(1, N))


def _mlp2_kernel(x_ref, w1_ref, b1_ref, w2_ref, b2_ref, o_ref, *, final_act):
    h = jnp.dot(x_ref[...], w1_ref[...], preferred_element_type=jnp.float32) + b1_ref[...]
    h = jnp.maximum(h, 0.0)
    y = jnp.dot(h, w2_ref[...], preferred_element_type=jnp.float32) + b2_ref[...]
    if final_act == "sigmoid":
        y = jax.nn.sigmoid(y)
    o_ref[...] = y


def mlp2(x2, w1, b1, w2, b2, final_act="none"):
    """Fused Linear->ReLU->Linear(->Sigmoid); intermediate never leaves VMEM."""
    M = x2.shape[0]
    N = w2.shape[1]
    return pl.pallas_call(
        functools.partial(_mlp2_kernel, final_act=final_act),
        out_shape=jax.ShapeDtypeStruct((M, N), jnp.float32),
    )(x2, w1, b1.reshape(1, -1), w2, b2.reshape(1, -1))


def _sinkhorn_block_kernel(x_ref, u_ref, w1_ref, b1_ref, w2_ref, b2_ref, o_ref,
                           *, n_iters, temp, D):
    """matlayer_left/right (packed) + zmat + Gumbel noise + Sinkhorn + permmat @ x."""
    B, L, _ = x_ref.shape
    x = x_ref[...]
    x2 = x.reshape(B * L, D)
    # layer 1 weights concatenated (D, 2D); layer 2 block-diagonal (2D, 2D): lane-dense.
    h = jnp.maximum(jnp.dot(x2, w1_ref[...], preferred_element_type=jnp.float32)
                    + b1_ref[...], 0.0)
    z = jnp.dot(h, w2_ref[...], preferred_element_type=jnp.float32) + b2_ref[...]
    zl = z[:, :D].reshape(B, L, D)
    zr = z[:, D:].reshape(B, L, D)
    zmat = jnp.einsum('bld,bmd->blm', zl, zr, preferred_element_type=jnp.float32)

    # sample_gumbel with self.eps = 1:  -log(1 - log(U + 1))
    noise = -jnp.log(1.0 - jnp.log(u_ref[...] + 1.0))
    la = (zmat + noise) * (1.0 / temp)

    def lse(v, axis):
        m = jnp.max(v, axis=axis, keepdims=True)
        return m + jnp.log(jnp.sum(jnp.exp(v - m), axis=axis, keepdims=True))

    def body(_, la):
        la = la - lse(la, axis=2)   # torch logsumexp(dim=2): row normalization
        la = la - lse(la, axis=1)   # torch logsumexp(dim=1): column normalization
        return la

    la = jax.lax.fori_loop(0, n_iters, body, la)
    perm = jnp.exp(la)
    o_ref[...] = jnp.einsum('blm,bmd->bld', perm, x, preferred_element_type=jnp.float32)


def sinkhorn_permute(x, u, w1, b1, w2, b2, n_iters=20, temp=0.1):
    B, L, D = x.shape
    return pl.pallas_call(
        functools.partial(_sinkhorn_block_kernel, n_iters=n_iters, temp=temp, D=D),
        out_shape=jax.ShapeDtypeStruct((B, L, D), jnp.float32),
    )(x, u, w1, b1.reshape(1, -1), w2, b2.reshape(1, -1))


def _tlayer_kernel(x_ref, inw_ref, inb_ref, outw_ref, outb_ref,
                   ff1w_ref, ff1b_ref, ff2w_ref, ff2b_ref,
                   ln1g_ref, ln1b_ref, ln2g_ref, ln2b_ref, o_ref, *, nhead, eps):
    """One full TransformerEncoderLayer (post-norm, relu) on a (N, S, E) tile.

    N = independent ("torch batch") axis, S = attention axis. All intermediates
    (incl. the (N*S, dff) FFN activation) stay in VMEM.
    """
    N, S, E = x_ref.shape
    dh = E // nhead
    scale = 1.0 / math.sqrt(dh)

    def ln(v, g, b):
        mu = jnp.mean(v, axis=-1, keepdims=True)
        var = jnp.mean((v - mu) ** 2, axis=-1, keepdims=True)
        return (v - mu) * jax.lax.rsqrt(var + eps) * g + b

    x = x_ref[...]
    x2 = x.reshape(N * S, E)
    qkv = (jnp.dot(x2, inw_ref[...], preferred_element_type=jnp.float32)
           + inb_ref[...]).reshape(N, S, 3 * E)

    heads = []
    for hh in range(nhead):                       # static unroll over heads
        q = qkv[:, :, hh * dh:(hh + 1) * dh] * scale
        k = qkv[:, :, E + hh * dh:E + (hh + 1) * dh]
        v = qkv[:, :, 2 * E + hh * dh:2 * E + (hh + 1) * dh]
        s = jnp.einsum('nqd,nkd->nqk', q, k, preferred_element_type=jnp.float32)
        s = s - jnp.max(s, axis=-1, keepdims=True)
        p = jnp.exp(s)
        p = p * pl.reciprocal(jnp.sum(p, axis=-1, keepdims=True), approx=True)
        heads.append(jnp.einsum('nqk,nkd->nqd', p, v, preferred_element_type=jnp.float32))
    attn = jnp.concatenate(heads, axis=-1).reshape(N * S, E)
    attn = jnp.dot(attn, outw_ref[...], preferred_element_type=jnp.float32) + outb_ref[...]

    h1 = ln(x2 + attn, ln1g_ref[...], ln1b_ref[...])

    # FFN: bf16 MXU operands, f32 accumulate; elementwise math stays f32 (v5e-friendly).
    f = jnp.dot(h1.astype(jnp.bfloat16), ff1w_ref[...],
                preferred_element_type=jnp.float32) + ff1b_ref[...]
    f = jnp.maximum(f, 0.0)
    f = jnp.dot(f.astype(jnp.bfloat16), ff2w_ref[...],
                preferred_element_type=jnp.float32) + ff2b_ref[...]

    h2 = ln(h1 + f, ln2g_ref[...], ln2b_ref[...])
    o_ref[...] = h2.reshape(N, S, E)


def transformer_layer(x_nse, p, nhead, eps=1e-5):
    N, S, E = x_nse.shape
    return pl.pallas_call(
        functools.partial(_tlayer_kernel, nhead=nhead, eps=eps),
        out_shape=jax.ShapeDtypeStruct((N, S, E), jnp.float32),
        compiler_params=pltpu.CompilerParams(vmem_limit_bytes=32 * 1024 * 1024),
    )(x_nse, p["in_w"], p["in_b"].reshape(1, -1),
      p["out_w"], p["out_b"].reshape(1, -1),
      p["ff1_w"], p["ff1_b"].reshape(1, -1),
      p["ff2_w"], p["ff2_b"].reshape(1, -1),
      p["ln1_g"].reshape(1, -1), p["ln1_b"].reshape(1, -1),
      p["ln2_g"].reshape(1, -1), p["ln2_b"].reshape(1, -1))


def _gru_layer_kernel(*refs, H, apply_fc):
    """One GRU layer, time loop inside the kernel (time-major input (L, B, In)).

    Input gates for all timesteps are precomputed with three lane-dense matmuls
    (gate-major scratches avoid per-step lane slicing), then a pl.loop runs the
    recurrence with the hidden state held in VMEM. Optionally fuses the final fc.
    """
    if apply_fc:
        (x_ref, wih_ref, whh_ref, bih_ref, bhh_ref, fcw_ref, fcb_ref,
         o_ref, gxr, gxz, gxn, hstate, hbuf) = refs
    else:
        (x_ref, wih_ref, whh_ref, bih_ref, bhh_ref,
         o_ref, gxr, gxz, gxn, hstate, hbuf) = refs
        fcw_ref = fcb_ref = None

    L, B, In = x_ref.shape
    x2 = x_ref[...].reshape(L * B, In)
    wih = wih_ref[...]
    whh = whh_ref[...]
    bih = bih_ref[...]
    bhh = bhh_ref[...]
    # gate splits done ONCE, outside the time loop (static lane slices)
    wir, wiz, win_ = wih[:, :H], wih[:, H:2 * H], wih[:, 2 * H:]
    whr, whz, whn = whh[:, :H], whh[:, H:2 * H], whh[:, 2 * H:]
    bir, biz, bin_ = bih[:, :H], bih[:, H:2 * H], bih[:, 2 * H:]
    bhr, bhz, bhn = bhh[:, :H], bhh[:, H:2 * H], bhh[:, 2 * H:]

    # precompute all input gates for every timestep (r/z absorb both biases)
    gxr[...] = (jnp.dot(x2, wir, preferred_element_type=jnp.float32) + bir + bhr).reshape(L, B, H)
    gxz[...] = (jnp.dot(x2, wiz, preferred_element_type=jnp.float32) + biz + bhz).reshape(L, B, H)
    gxn[...] = (jnp.dot(x2, win_, preferred_element_type=jnp.float32) + bin_).reshape(L, B, H)
    hstate[...] = jnp.zeros_like(hstate)

    @pl.loop(0, L)
    def _(t):
        h = hstate[...]
        ghr = jnp.dot(h, whr, preferred_element_type=jnp.float32)
        ghz = jnp.dot(h, whz, preferred_element_type=jnp.float32)
        ghn = jnp.dot(h, whn, preferred_element_type=jnp.float32) + bhn
        r = jax.nn.sigmoid(gxr[t] + ghr)
        z = jax.nn.sigmoid(gxz[t] + ghz)
        n = jnp.tanh(gxn[t] + r * ghn)
        h_new = (1.0 - z) * n + z * h
        hstate[...] = h_new
        hbuf[t] = h_new

    if apply_fc:
        hs = hbuf[...].reshape(L * B, H)
        y = jnp.dot(hs, fcw_ref[...], preferred_element_type=jnp.float32) + fcb_ref[...]
        o_ref[...] = y.reshape(L, B, fcw_ref.shape[1])
    else:
        o_ref[...] = hbuf[...]


def gru_layer(x_lbi, lp, fc_w=None, fc_b=None):
    L, B, _ = x_lbi.shape
    H = lp["w_hh"].shape[0]
    apply_fc = fc_w is not None
    out_dim = fc_w.shape[1] if apply_fc else H
    args = [x_lbi, lp["w_ih"], lp["w_hh"],
            lp["b_ih"].reshape(1, -1), lp["b_hh"].reshape(1, -1)]
    if apply_fc:
        args += [fc_w, fc_b.reshape(1, -1)]
    return pl.pallas_call(
        functools.partial(_gru_layer_kernel, H=H, apply_fc=apply_fc),
        out_shape=jax.ShapeDtypeStruct((L, B, out_dim), jnp.float32),
        scratch_shapes=[pltpu.VMEM((L, B, H), jnp.float32),   # gx_r
                        pltpu.VMEM((L, B, H), jnp.float32),   # gx_z
                        pltpu.VMEM((L, B, H), jnp.float32),   # gx_n
                        pltpu.VMEM((B, H), jnp.float32),      # h state
                        pltpu.VMEM((L, B, H), jnp.float32)],  # hidden sequence
    )(*args)


# ============================ model forward ============================

@functools.partial(jax.jit, static_argnames=("num_heads",))
def forward(params, x, noise_key, num_heads):
    B, L, D = x.shape

    # ---- fused: matlayers + Gumbel noise + Sinkhorn(20) + permmat @ x  (1 launch) ----
    U = jax.random.uniform(noise_key, (B, L, L), jnp.float32)
    x_wbias = sinkhorn_permute(x, U, params["sk_w1"], params["sk_b1"],
                               params["sk_w2"], params["sk_b2"], n_iters=20, temp=0.1)

    # ---- both branches stacked along the transformer's independent (torch "N") axis ----
    xin = jnp.concatenate([x, x_wbias], axis=1)                    # (B, 2L, D)
    N2 = 2 * L
    Eg = params["g_layers"][0]["in_w"].shape[0]
    Gd = Eg - L
    GF = params["gf_w"].shape[1]

    # packed gembed|fembed linear (lane-dense output, both embeddings in one launch)
    emb = linear2d(xin.reshape(B * N2, D), params["gf_w"], params["gf_b"]).reshape(B, N2, GF)
    gemb, femb = emb[..., :Gd], emb[..., Gd:]

    eye = jnp.eye(L, dtype=jnp.float32)
    eye2 = jnp.broadcast_to(jnp.concatenate([eye, eye], axis=0), (B, N2, L))
    gtx = jnp.concatenate([gemb, eye2], axis=-1)                   # (B, 2L, Eg)

    # torch batch_first=False: attention over original batch axis B; kernel layout (N, S, E)
    t = jnp.transpose(gtx, (1, 0, 2))                              # (2L, B, Eg)
    for lp in params["g_layers"]:
        t = transformer_layer(t, lp, num_heads)
    gtx_out = jnp.transpose(t, (1, 0, 2))                          # (B, 2L, Eg)

    O = params["gp_w2"].shape[0]
    yhat_stack = mlp2(gtx_out.reshape(B * N2, Eg),
                      params["gp_w1"], params["gp_b1"],
                      params["gp_w2"], params["gp_b2"],
                      final_act="sigmoid").reshape(B, N2, O)
    yhat = yhat_stack[:, :L, :]                                    # non-bias branch

    ftx = jnp.concatenate([femb, yhat_stack], axis=-1)             # (B, 2L, Ef)
    t = jnp.transpose(ftx, (1, 0, 2))
    for lp in params["f_layers"]:
        t = transformer_layer(t, lp, num_heads)
    ftx_out = jnp.transpose(t, (1, 0, 2))                          # (B, 2L, Ef)
    Ef = ftx_out.shape[-1]

    # per-branch sum over sequence positions, then the torch repeat_interleave layout
    # scramble (flatten -> repeat each element L times -> reshape), exactly as the reference.
    gl = ftx_out.reshape(B, 2, L, Ef).sum(axis=2)                  # (B, 2, Ef)

    def scramble(g):
        return jnp.repeat(g.reshape(-1), L).reshape(-1, L, Ef)

    rep1, rep2 = scramble(gl[:, 0]), scramble(gl[:, 1])

    # GRU input uses the ORIGINAL x in both branches (as in the reference code)
    gru_in = jnp.concatenate(
        [jnp.concatenate([x, rep1], axis=-1),
         jnp.concatenate([x, rep2], axis=-1)], axis=0)             # (2B, L, D+Ef)

    # GRU: time-major, one fused kernel per layer, fc fused into the last layer
    h = jnp.transpose(gru_in, (1, 0, 2))                           # (L, 2B, D+Ef)
    n_gru = len(params["gru_layers"])
    for i, lp in enumerate(params["gru_layers"]):
        last = (i == n_gru - 1)
        h = gru_layer(h, lp,
                      params["fc_w"] if last else None,
                      params["fc_b"] if last else None)
    y = jnp.transpose(h, (1, 0, 2))                                # (2B, L, O)
    yhat_out, yhat_out_wbias = y[:B], y[B:]
    return yhat_out, yhat_out_wbias, yhat


# ============================ parameter init ============================

def init_params(key, cfg):
    L, D = cfg["seq_len"], cfg["seq_dim"]
    Gd, Fd, O, H = cfg["g_embed_dim"], cfg["f_embed_dim"], cfg["output_dim"], cfg["hidden_size"]
    nl = cfg["num_layers"]
    dff = cfg["dim_feedforward"]
    Eg, Ef = Gd + L, Fd + O

    keys = iter(jax.random.split(key, 512))

    def W(shape, scale=0.1):
        return jax.random.normal(next(keys), shape, jnp.float32) * scale

    def tlayer(E):
        return dict(
            in_w=W((E, 3 * E)), in_b=W((3 * E,)),
            out_w=W((E, E)), out_b=W((E,)),
            # FFN weights kept in bf16 for the MXU; accumulation stays f32 in-kernel
            ff1_w=W((E, dff)).astype(jnp.bfloat16), ff1_b=W((dff,)),
            ff2_w=W((dff, E)).astype(jnp.bfloat16), ff2_b=W((E,)),
            ln1_g=jnp.ones((E,), jnp.float32), ln1_b=jnp.zeros((E,), jnp.float32),
            ln2_g=jnp.ones((E,), jnp.float32), ln2_b=jnp.zeros((E,), jnp.float32),
        )

    # matlayer_left / matlayer_right packed: layer-1 concatenated, layer-2 block-diagonal
    mll_w1, mlr_w1 = W((D, D)), W((D, D))
    mll_w2, mlr_w2 = W((D, D)), W((D, D))
    sk_w1 = jnp.concatenate([mll_w1, mlr_w1], axis=1)              # (D, 2D)
    sk_b1 = jnp.concatenate([W((D,)), W((D,))])
    sk_w2 = jnp.zeros((2 * D, 2 * D), jnp.float32)
    sk_w2 = sk_w2.at[:D, :D].set(mll_w2).at[D:, D:].set(mlr_w2)    # (2D, 2D) block-diag
    sk_b2 = jnp.concatenate([W((D,)), W((D,))])

    # gembed / fembed packed into one lane-dense linear
    gf_w = jnp.concatenate([W((D, Gd)), W((D, Fd))], axis=1)
    gf_b = jnp.concatenate([W((Gd,)), W((Fd,))])

    gru_layers = []
    in_size = D + Fd + O   # seq_dim + gru_latent_dim
    for _ in range(nl):
        gru_layers.append(dict(
            w_ih=W((in_size, 3 * H)), b_ih=W((3 * H,)),
            w_hh=W((H, 3 * H)), b_hh=W((3 * H,)),
        ))
        in_size = H

    return dict(
        sk_w1=sk_w1, sk_b1=sk_b1, sk_w2=sk_w2, sk_b2=sk_b2,
        gf_w=gf_w, gf_b=gf_b,
        g_layers=[tlayer(Eg) for _ in range(nl)],
        f_layers=[tlayer(Ef) for _ in range(nl)],
        gp_w1=W((Eg, O)), gp_b1=W((O,)), gp_w2=W((O, O)), gp_b2=W((O,)),
        gru_layers=gru_layers,
        fc_w=W((H, O)), fc_b=W((O,)),
    )


# ============================ main ============================

if __name__ == "__main__":
    cfg = dict(seq_len=8, seq_dim=16, g_embed_dim=8, f_embed_dim=8, output_dim=4,
               num_layers=2, num_heads=2, hidden_size=32, dropout_rate=0.0,
               dim_feedforward=2048)   # torch TransformerEncoderLayer default d_ff
    key = jax.random.PRNGKey(0)
    pkey, xkey, nkey = jax.random.split(key, 3)
    params = init_params(pkey, cfg)

    B = 2
    x = jax.random.normal(xkey, (B, cfg["seq_len"], cfg["seq_dim"]), jnp.float32)

    yhat_out, yhat_out_wbias, yhat = forward(params, x, nkey, num_heads=cfg["num_heads"])
    jax.block_until_ready((yhat_out, yhat_out_wbias, yhat))

    assert yhat_out.shape == (B, cfg["seq_len"], cfg["output_dim"])
    assert yhat_out_wbias.shape == (B, cfg["seq_len"], cfg["output_dim"])
    assert yhat.shape == (B, cfg["seq_len"], cfg["output_dim"])
    assert all(bool(jnp.all(jnp.isfinite(t))) for t in (yhat_out, yhat_out_wbias, yhat))
    print("KERNEL_OK")
</pallas_src>

<mosaic_0001>
module attributes {stable_mosaic.version = 11 : i64} {
  func.func @_sinkhorn_block_kernel(%arg0: memref<2x8x16xf32, #tpu.memory_space<vmem>>, %arg1: memref<2x8x8xf32, #tpu.memory_space<vmem>>, %arg2: memref<16x32xf32, #tpu.memory_space<vmem>>, %arg3: memref<1x32xf32, #tpu.memory_space<vmem>>, %arg4: memref<32x32xf32, #tpu.memory_space<vmem>>, %arg5: memref<1x32xf32, #tpu.memory_space<vmem>>, %arg6: memref<2x8x16xf32, #tpu.memory_space<vmem>>) attributes {dimension_semantics = [], scalar_prefetch = 0 : i64, scratch_operands = 0 : i64, tpu.core_type = #tpu.core_type<tc>} {
    %c0 = arith.constant 0 : index
    %c0_0 = arith.constant 0 : index
    %c0_1 = arith.constant 0 : index
    %0 = vector.load %arg0[%c0, %c0_0, %c0_1] : memref<2x8x16xf32, #tpu.memory_space<vmem>>, vector<2x8x16xf32>
    %1 = vector.shape_cast %0 : vector<2x8x16xf32> to vector<16x16xf32>
    %c0_2 = arith.constant 0 : index
    %c0_3 = arith.constant 0 : index
    %2 = vector.load %arg2[%c0_2, %c0_3] : memref<16x32xf32, #tpu.memory_space<vmem>>, vector<16x32xf32>
    %cst = arith.constant dense<0.000000e+00> : vector<16x32xf32>
    %3 = tpu.matmul %1, %2, %cst {dimension_numbers = #tpu.dot_dimension_numbers<[1], [0], [0], [1], [0, 0, 1, 1], [], []>} : vector<16x16xf32>, vector<16x32xf32>, vector<16x32xf32> -> vector<16x32xf32>
    %c0_4 = arith.constant 0 : index
    %c0_5 = arith.constant 0 : index
    %4 = vector.load %arg3[%c0_4, %c0_5] : memref<1x32xf32, #tpu.memory_space<vmem>>, vector<1x32xf32>
    %5 = vector.broadcast %4 : vector<1x32xf32> to vector<16x32xf32>
    %6 = arith.addf %3, %5 : vector<16x32xf32>
    %cst_6 = arith.constant 0.000000e+00 : f32
    %7 = vector.broadcast %cst_6 : f32 to vector<16x32xf32>
    %8 = arith.maximumf %6, %7 : vector<16x32xf32>
    %c0_7 = arith.constant 0 : index
    %c0_8 = arith.constant 0 : index
    %9 = vector.load %arg4[%c0_7, %c0_8] : memref<32x32xf32, #tpu.memory_space<vmem>>, vector<32x32xf32>
    %cst_9 = arith.constant dense<0.000000e+00> : vector<16x32xf32>
    %10 = tpu.matmul %8, %9, %cst_9 {dimension_numbers = #tpu.dot_dimension_numbers<[1], [0], [0], [1], [0, 0, 1, 1], [], []>} : vector<16x32xf32>, vector<32x32xf32>, vector<16x32xf32> -> vector<16x32xf32>
    %c0_10 = arith.constant 0 : index
    %c0_11 = arith.constant 0 : index
    %11 = vector.load %arg5[%c0_10, %c0_11] : memref<1x32xf32, #tpu.memory_space<vmem>>, vector<1x32xf32>
    %12 = vector.broadcast %11 : vector<1x32xf32> to vector<16x32xf32>
    %13 = arith.addf %10, %12 : vector<16x32xf32>
    %14 = vector.extract_strided_slice %13 {offsets = [0, 0], sizes = [16, 16], strides = [1, 1]} : vector<16x32xf32> to vector<16x16xf32>
    %15 = vector.shape_cast %14 : vector<16x16xf32> to vector<2x8x16xf32>
    %16 = vector.extract_strided_slice %13 {offsets = [0, 16], sizes = [16, 16], strides = [1, 1]} : vector<16x32xf32> to vector<16x16xf32>
    %17 = vector.shape_cast %16 : vector<16x16xf32> to vector<2x8x16xf32>
    "tpu.trace_start"() <{level = 10 : i32, message = "bld,bmd->blm"}> : () -> ()
    %cst_12 = arith.constant dense<0.000000e+00> : vector<2x8x8xf32>
    %18 = tpu.matmul %15, %17, %cst_12 {dimension_numbers = #tpu.dot_dimension_numbers<[2], [2], [1], [1], [0, 0, 0, 1, 1, 1], [0], [0]>} : vector<2x8x16xf32>, vector<2x8x16xf32>, vector<2x8x8xf32> -> vector<2x8x8xf32>
    "tpu.trace_stop"() : () -> ()
    %c0_13 = arith.constant 0 : index
    %c0_14 = arith.constant 0 : index
    %c0_15 = arith.constant 0 : index
    %19 = vector.load %arg1[%c0_13, %c0_14, %c0_15] : memref<2x8x8xf32, #tpu.memory_space<vmem>>, vector<2x8x8xf32>
    %cst_16 = arith.constant 1.000000e+00 : f32
    %20 = vector.broadcast %cst_16 : f32 to vector<2x8x8xf32>
    %21 = arith.addf %19, %20 : vector<2x8x8xf32>
    %22 = math.log %21 : vector<2x8x8xf32>
    %cst_17 = arith.constant 1.000000e+00 : f32
    %23 = vector.broadcast %cst_17 : f32 to vector<2x8x8xf32>
    %24 = arith.subf %23, %22 : vector<2x8x8xf32>
    %25 = math.log %24 : vector<2x8x8xf32>
    %cst_18 = arith.constant 0.000000e+00 : f32
    %26 = vector.broadcast %cst_18 : f32 to vector<2x8x8xf32>
    %27 = arith.subf %26, %25 : vector<2x8x8xf32>
    %28 = arith.addf %18, %27 : vector<2x8x8xf32>
    %cst_19 = arith.constant 1.000000e+01 : f32
    %29 = vector.broadcast %cst_19 : f32 to vector<2x8x8xf32>
    %30 = arith.mulf %28, %29 : vector<2x8x8xf32>
    %c0_i32 = arith.constant 0 : i32
    %c20_i32 = arith.constant 20 : i32
    %31 = arith.addi %c0_i32, %c20_i32 : i32
    %c1_i32 = arith.constant 1 : i32
    %32 = scf.for %arg7 = %c0_i32 to %31 step %c1_i32 iter_args(%arg8 = %30) -> (vector<2x8x8xf32>)  : i32 {
      %cst_24 = arith.constant dense<0xFF800000> : vector<2x8xf32>
      %36 = vector.multi_reduction <maximumf>, %arg8, %cst_24 [2] : vector<2x8x8xf32> to vector<2x8xf32>
      %37 = vector.shape_cast %36 : vector<2x8xf32> to vector<2x8x1xf32>
      %38 = vector.broadcast %37 : vector<2x8x1xf32> to vector<2x8x8xf32>
      %39 = arith.subf %arg8, %38 : vector<2x8x8xf32>
      %40 = math.exp %39 : vector<2x8x8xf32>
      %cst_25 = arith.constant dense<0.000000e+00> : vector<2x8xf32>
      %41 = vector.multi_reduction <add>, %40, %cst_25 [2] : vector<2x8x8xf32> to vector<2x8xf32>
      %42 = vector.shape_cast %41 : vector<2x8xf32> to vector<2x8x1xf32>
      %43 = math.log %42 : vector<2x8x1xf32>
      %44 = arith.addf %37, %43 : vector<2x8x1xf32>
      %45 = vector.broadcast %44 : vector<2x8x1xf32> to vector<2x8x8xf32>
      %46 = arith.subf %arg8, %45 : vector<2x8x8xf32>
      %cst_26 = arith.constant dense<0xFF800000> : vector<2x8xf32>
      %47 = vector.multi_reduction <maximumf>, %46, %cst_26 [1] : vector<2x8x8xf32> to vector<2x8xf32>
      %48 = vector.shape_cast %47 : vector<2x8xf32> to vector<2x1x8xf32>
      %49 = vector.broadcast %48 : vector<2x1x8xf32> to vector<2x8x8xf32>
      %50 = arith.subf %46, %49 : vector<2x8x8xf32>
      %51 = math.exp %50 : vector<2x8x8xf32>
      %cst_27 = arith.constant dense<0.000000e+00> : vector<2x8xf32>
      %52 = vector.multi_reduction <add>, %51, %cst_27 [1] : vector<2x8x8xf32> to vector<2x8xf32>
      %53 = vector.shape_cast %52 : vector<2x8xf32> to vector<2x1x8xf32>
      %54 = math.log %53 : vector<2x1x8xf32>
      %55 = arith.addf %48, %54 : vector<2x1x8xf32>
      %56 = vector.broadcast %55 : vector<2x1x8xf32> to vector<2x8x8xf32>
      %57 = arith.subf %46, %56 : vector<2x8x8xf32>
      scf.yield %57 : vector<2x8x8xf32>
    }
    %33 = math.exp %32 : vector<2x8x8xf32>
    "tpu.trace_start"() <{level = 10 : i32, message = "blm,bmd->bld"}> : () -> ()
    %cst_20 = arith.constant dense<0.000000e+00> : vector<2x8x16xf32>
    %34 = tpu.matmul %33, %0, %cst_20 {dimension_numbers = #tpu.dot_dimension_numbers<[2], [1], [1], [2], [0, 0, 0, 1, 1, 2], [0], [0]>} : vector<2x8x8xf32>, vector<2x8x16xf32>, vector<2x8x16xf32> -> vector<2x8x16xf32>
    "tpu.trace_stop"() : () -> ()
    %c0_21 = arith.constant 0 : index
    %c0_22 = arith.constant 0 : index
    %c0_23 = arith.constant 0 : index
    %35 = vector.load %arg6[%c0_21, %c0_22, %c0_23] : memref<2x8x16xf32, #tpu.memory_space<vmem>>, vector<2x8x16xf32>
    tpu.vector_store %arg6[%c0_21, %c0_22, %c0_23], %34 {strides = array<i32>} : memref<2x8x16xf32, #tpu.memory_space<vmem>>, vector<2x8x16xf32>,
    return
  }
}

module attributes {stable_mosaic.version = 11 : i64} {
  func.func @_linear_kernel(%arg0: memref<32x16xf32, #tpu.memory_space<vmem>>, %arg1: memref<16x16xf32, #tpu.memory_space<vmem>>, %arg2: memref<1x16xf32, #tpu.memory_space<vmem>>, %arg3: memref<32x16xf32, #tpu.memory_space<vmem>>) attributes {dimension_semantics = [], scalar_prefetch = 0 : i64, scratch_operands = 0 : i64, tpu.core_type = #tpu.core_type<tc>} {
    %c0 = arith.constant 0 : index
    %c0_0 = arith.constant 0 : index
    %0 = vector.load %arg0[%c0, %c0_0] : memref<32x16xf32, #tpu.memory_space<vmem>>, vector<32x16xf32>
    %c0_1 = arith.constant 0 : index
    %c0_2 = arith.constant 0 : index
    %1 = vector.load %arg1[%c0_1, %c0_2] : memref<16x16xf32, #tpu.memory_space<vmem>>, vector<16x16xf32>
    %cst = arith.constant dense<0.000000e+00> : vector<32x16xf32>
    %2 = tpu.matmul %0, %1, %cst {dimension_numbers = #tpu.dot_dimension_numbers<[1], [0], [0], [1], [0, 0, 1, 1], [], []>} : vector<32x16xf32>, vector<16x16xf32>, vector<32x16xf32> -> vector<32x16xf32>
    %c0_3 = arith.constant 0 : index
    %c0_4 = arith.constant 0 : index
    %3 = vector.load %arg2[%c0_3, %c0_4] : memref<1x16xf32, #tpu.memory_space<vmem>>, vector<1x16xf32>
    %4 = vector.broadcast %3 : vector<1x16xf32> to vector<32x16xf32>
    %5 = arith.addf %2, %4 : vector<32x16xf32>
    %c0_5 = arith.constant 0 : index
    %c0_6 = arith.constant 0 : index
    %6 = vector.load %arg3[%c0_5, %c0_6] : memref<32x16xf32, #tpu.memory_space<vmem>>, vector<32x16xf32>
    tpu.vector_store %arg3[%c0_5, %c0_6], %5 {strides = array<i32>} : memref<32x16xf32, #tpu.memory_space<vmem>>, vector<32x16xf32>,
    return
  }
}

module attributes {stable_mosaic.version = 11 : i64} {
  func.func @_tlayer_kernel(%arg0: memref<16x2x16xf32, #tpu.memory_space<vmem>>, %arg1: memref<16x48xf32, #tpu.memory_space<vmem>>, %arg2: memref<1x48xf32, #tpu.memory_space<vmem>>, %arg3: memref<16x16xf32, #tpu.memory_space<vmem>>, %arg4: memref<1x16xf32, #tpu.memory_space<vmem>>, %arg5: memref<16x2048xbf16, #tpu.memory_space<vmem>>, %arg6: memref<1x2048xf32, #tpu.memory_space<vmem>>, %arg7: memref<2048x16xbf16, #tpu.memory_space<vmem>>, %arg8: memref<1x16xf32, #tpu.memory_space<vmem>>, %arg9: memref<1x16xf32, #tpu.memory_space<vmem>>, %arg10: memref<1x16xf32, #tpu.memory_space<vmem>>, %arg11: memref<1x16xf32, #tpu.memory_space<vmem>>, %arg12: memref<1x16xf32, #tpu.memory_space<vmem>>, %arg13: memref<16x2x16xf32, #tpu.memory_space<vmem>>) attributes {dimension_semantics = [], scalar_prefetch = 0 : i64, scratch_operands = 0 : i64, tpu.core_type = #tpu.core_type<tc>} {
    %c0 = arith.constant 0 : index
    %c0_0 = arith.constant 0 : index
    %c0_1 = arith.constant 0 : index
    %0 = vector.load %arg0[%c0, %c0_0, %c0_1] : memref<16x2x16xf32, #tpu.memory_space<vmem>>, vector<16x2x16xf32>
    %1 = vector.shape_cast %0 : vector<16x2x16xf32> to vector<32x16xf32>
    %c0_2 = arith.constant 0 : index
    %c0_3 = arith.constant 0 : index
    %2 = vector.load %arg1[%c0_2, %c0_3] : memref<16x48xf32, #tpu.memory_space<vmem>>, vector<16x48xf32>
    %cst = arith.constant dense<0.000000e+00> : vector<32x48xf32>
    %3 = tpu.matmul %1, %2, %cst {dimension_numbers = #tpu.dot_dimension_numbers<[1], [0], [0], [1], [0, 0, 1, 1], [], []>} : vector<32x16xf32>, vector<16x48xf32>, vector<32x48xf32> -> vector<32x48xf32>
    %c0_4 = arith.constant 0 : index
    %c0_5 = arith.constant 0 : index
    %4 = vector.load %arg2[%c0_4, %c0_5] : memref<1x48xf32, #tpu.memory_space<vmem>>, vector<1x48xf32>
    %5 = vector.broadcast %4 : vector<1x48xf32> to vector<32x48xf32>
    %6 = arith.addf %3, %5 : vector<32x48xf32>
    %7 = vector.shape_cast %6 : vector<32x48xf32> to vector<16x2x48xf32>
    %8 = vector.extract_strided_slice %7 {offsets = [0, 0, 0], sizes = [16, 2, 8], strides = [1, 1, 1]} : vector<16x2x48xf32> to vector<16x2x8xf32>
    %cst_6 = arith.constant 0.353553385 : f32
    %9 = vector.broadcast %cst_6 : f32 to vector<16x2x8xf32>
    %10 = arith.mulf %8, %9 : vector<16x2x8xf32>
    %11 = vector.extract_strided_slice %7 {offsets = [0, 0, 16], sizes = [16, 2, 8], strides = [1, 1, 1]} : vector<16x2x48xf32> to vector<16x2x8xf32>
    %12 = vector.extract_strided_slice %7 {offsets = [0, 0, 32], sizes = [16, 2, 8], strides = [1, 1, 1]} : vector<16x2x48xf32> to vector<16x2x8xf32>
    "tpu.trace_start"() <{level = 10 : i32, message = "nqd,nkd->nqk"}> : () -> ()
    %cst_7 = arith.constant dense<0.000000e+00> : vector<16x2x2xf32>
    %13 = tpu.matmul %10, %11, %cst_7 {dimension_numbers = #tpu.dot_dimension_numbers<[2], [2], [1], [1], [0, 0, 0, 1, 1, 1], [0], [0]>} : vector<16x2x8xf32>, vector<16x2x8xf32>, vector<16x2x2xf32> -> vector<16x2x2xf32>
    "tpu.trace_stop"() : () -> ()
    %cst_8 = arith.constant dense<0xFF800000> : vector<16x2xf32>
    %14 = vector.multi_reduction <maximumf>, %13, %cst_8 [2] : vector<16x2x2xf32> to vector<16x2xf32>
    %15 = vector.shape_cast %14 : vector<16x2xf32> to vector<16x2x1xf32>
    %16 = vector.broadcast %15 : vector<16x2x1xf32> to vector<16x2x2xf32>
    %17 = arith.subf %13, %16 : vector<16x2x2xf32>
    %18 = math.exp %17 : vector<16x2x2xf32>
    %cst_9 = arith.constant dense<0.000000e+00> : vector<16x2xf32>
    %19 = vector.multi_reduction <add>, %18, %cst_9 [2] : vector<16x2x2xf32> to vector<16x2xf32>
    %20 = vector.shape_cast %19 : vector<16x2xf32> to vector<16x2x1xf32>
    %21 = tpu.reciprocal %20 {approx = true} : vector<16x2x1xf32> -> vector<16x2x1xf32>
    %22 = vector.broadcast %21 : vector<16x2x1xf32> to vector<16x2x2xf32>
    %23 = arith.mulf %18, %22 : vector<16x2x2xf32>
    "tpu.trace_start"() <{level = 10 : i32, message = "nqk,nkd->nqd"}> : () -> ()
    %cst_10 = arith.constant dense<0.000000e+00> : vector<16x2x8xf32>
    %24 = tpu.matmul %23, %12, %cst_10 {dimension_numbers = #tpu.dot_dimension_numbers<[2], [1], [1], [2], [0, 0, 0, 1, 1, 2], [0], [0]>} : vector<16x2x2xf32>, vector<16x2x8xf32>, vector<16x2x8xf32> -> vector<16x2x8xf32>
    "tpu.trace_stop"() : () -> ()
    %25 = vector.extract_strided_slice %7 {offsets = [0, 0, 8], sizes = [16, 2, 8], strides = [1, 1, 1]} : vector<16x2x48xf32> to vector<16x2x8xf32>
    %cst_11 = arith.constant 0.353553385 : f32
    %26 = vector.broadcast %cst_11 : f32 to vector<16x2x8xf32>
    %27 = arith.mulf %25, %26 : vector<16x2x8xf32>
    %28 = vector.extract_strided_slice %7 {offsets = [0, 0, 24], sizes = [16, 2, 8], strides = [1, 1, 1]} : vector<16x2x48xf32> to vector<16x2x8xf32>
    %29 = vector.extract_strided_slice %7 {offsets = [0, 0, 40], sizes = [16, 2, 8], strides = [1, 1, 1]} : vector<16x2x48xf32> to vector<16x2x8xf32>
    "tpu.trace_start"() <{level = 10 : i32, message = "nqd,nkd->nqk"}> : () -> ()
    %cst_12 = arith.constant dense<0.000000e+00> : vector<16x2x2xf32>
    %30 = tpu.matmul %27, %28, %cst_12 {dimension_numbers = #tpu.dot_dimension_numbers<[2], [2], [1], [1], [0, 0, 0, 1, 1, 1], [0], [0]>} : vector<16x2x8xf32>, vector<16x2x8xf32>, vector<16x2x2xf32> -> vector<16x2x2xf32>
    "tpu.trace_stop"() : () -> ()
    %cst_13 = arith.constant dense<0xFF800000> : vector<16x2xf32>
    %31 = vector.multi_reduction <maximumf>, %30, %cst_13 [2] : vector<16x2x2xf32> to vector<16x2xf32>
    %32 = vector.shape_cast %31 : vector<16x2xf32> to vector<16x2x1xf32>
    %33 = vector.broadcast %32 : vector<16x2x1xf32> to vector<16x2x2xf32>
    %34 = arith.subf %30, %33 : vector<16x2x2xf32>
    %35 = math.exp %34 : vector<16x2x2xf32>
    %cst_14 = arith.constant dense<0.000000e+00> : vector<16x2xf32>
    %36 = vector.multi_reduction <add>, %35, %cst_14 [2] : vector<16x2x2xf32> to vector<16x2xf32>
    %37 = vector.shape_cast %36 : vector<16x2xf32> to vector<16x2x1xf32>
    %38 = tpu.reciprocal %37 {approx = true} : vector<16x2x1xf32> -> vector<16x2x1xf32>
    %39 = vector.broadcast %38 : vector<16x2x1xf32> to vector<16x2x2xf32>
    %40 = arith.mulf %35, %39 : vector<16x2x2xf32>
    "tpu.trace_start"() <{level = 10 : i32, message = "nqk,nkd->nqd"}> : () -> ()
    %cst_15 = arith.constant dense<0.000000e+00> : vector<16x2x8xf32>
    %41 = tpu.matmul %40, %29, %cst_15 {dimension_numbers = #tpu.dot_dimension_numbers<[2], [1], [1], [2], [0, 0, 0, 1, 1, 2], [0], [0]>} : vector<16x2x2xf32>, vector<16x2x8xf32>, vector<16x2x8xf32> -> vector<16x2x8xf32>
    "tpu.trace_stop"() : () -> ()
    %42 = tpu.concatenate %24, %41 in 2 : vector<16x2x8xf32>, vector<16x2x8xf32> -> vector<16x2x16xf32>
    %43 = vector.shape_cast %42 : vector<16x2x16xf32> to vector<32x16xf32>
    %c0_16 = arith.constant 0 : index
    %c0_17 = arith.constant 0 : index
    %44 = vector.load %arg3[%c0_16, %c0_17] : memref<16x16xf32, #tpu.memory_space<vmem>>, vector<16x16xf32>
    %cst_18 = arith.constant dense<0.000000e+00> : vector<32x16xf32>
    %45 = tpu.matmul %43, %44, %cst_18 {dimension_numbers = #tpu.dot_dimension_numbers<[1], [0], [0], [1], [0, 0, 1, 1], [], []>} : vector<32x16xf32>, vector<16x16xf32>, vector<32x16xf32> -> vector<32x16xf32>
    %c0_19 = arith.constant 0 : index
    %c0_20 = arith.constant 0 : index
    %46 = vector.load %arg4[%c0_19, %c0_20] : memref<1x16xf32, #tpu.memory_space<vmem>>, vector<1x16xf32>
    %47 = vector.broadcast %46 : vector<1x16xf32> to vector<32x16xf32>
    %48 = arith.addf %45, %47 : vector<32x16xf32>
    %49 = arith.addf %1, %48 : vector<32x16xf32>
    %c0_21 = arith.constant 0 : index
    %c0_22 = arith.constant 0 : index
    %50 = vector.load %arg9[%c0_21, %c0_22] : memref<1x16xf32, #tpu.memory_space<vmem>>, vector<1x16xf32>
    %c0_23 = arith.constant 0 : index
    %c0_24 = arith.constant 0 : index
    %51 = vector.load %arg10[%c0_23, %c0_24] : memref<1x16xf32, #tpu.memory_space<vmem>>, vector<1x16xf32>
    %cst_25 = arith.constant dense<0.000000e+00> : vector<32xf32>
    %52 = vector.multi_reduction <add>, %49, %cst_25 [1] : vector<32x16xf32> to vector<32xf32>
    %53 = vector.shape_cast %52 : vector<32xf32> to vector<32x1xf32>
    %cst_26 = arith.constant 1.600000e+01 : f32
    %54 = vector.broadcast %cst_26 : f32 to vector<32x1xf32>
    %55 = arith.divf %53, %54 : vector<32x1xf32>
    %56 = vector.broadcast %55 : vector<32x1xf32> to vector<32x16xf32>
    %57 = arith.subf %49, %56 : vector<32x16xf32>
    %58 = arith.mulf %57, %57 : vector<32x16xf32>
    %cst_27 = arith.constant dense<0.000000e+00> : vector<32xf32>
    %59 = vector.multi_reduction <add>, %58, %cst_27 [1] : vector<32x16xf32> to vector<32xf32>
    %60 = vector.shape_cast %59 : vector<32xf32> to vector<32x1xf32>
    %cst_28 = arith.constant 1.600000e+01 : f32
    %61 = vector.broadcast %cst_28 : f32 to vector<32x1xf32>
    %62 = arith.divf %60, %61 : vector<32x1xf32>
    %63 = vector.broadcast %55 : vector<32x1xf32> to vector<32x16xf32>
    %64 = arith.subf %49, %63 : vector<32x16xf32>
    %cst_29 = arith.constant 9.99999974E-6 : f32
    %65 = vector.broadcast %cst_29 : f32 to vector<32x1xf32>
    %66 = arith.addf %62, %65 : vector<32x1xf32>
    %67 = math.rsqrt %66 : vector<32x1xf32>
    %68 = vector.broadcast %67 : vector<32x1xf32> to vector<32x16xf32>
    %69 = arith.mulf %64, %68 : vector<32x16xf32>
    %70 = vector.broadcast %50 : vector<1x16xf32> to vector<32x16xf32>
    %71 = arith.mulf %69, %70 : vector<32x16xf32>
    %72 = vector.broadcast %51 : vector<1x16xf32> to vector<32x16xf32>
    %73 = arith.addf %71, %72 : vector<32x16xf32>
    %74 = arith.truncf %73 : vector<32x16xf32> to vector<32x16xbf16>
    %c0_30 = arith.constant 0 : index
    %c0_31 = arith.constant 0 : index
    %75 = vector.load %arg5[%c0_30, %c0_31] : memref<16x2048xbf16, #tpu.memory_space<vmem>>, vector<16x2048xbf16>
    %cst_32 = arith.constant dense<0.000000e+00> : vector<32x2048xf32>
    %76 = tpu.matmul %74, %75, %cst_32 {dimension_numbers = #tpu.dot_dimension_numbers<[1], [0], [0], [1], [0, 0, 1, 1], [], []>} : vector<32x16xbf16>, vector<16x2048xbf16>, vector<32x2048xf32> -> vector<32x2048xf32>
    %c0_33 = arith.constant 0 : index
    %c0_34 = arith.constant 0 : index
    %77 = vector.load %arg6[%c0_33, %c0_34] : memref<1x2048xf32, #tpu.memory_space<vmem>>, vector<1x2048xf32>
    %78 = vector.broadcast %77 : vector<1x2048xf32> to vector<32x2048xf32>
    %79 = arith.addf %76, %78 : vector<32x2048xf32>
    %cst_35 = arith.constant 0.000000e+00 : f32
    %80 = vector.broadcast %cst_35 : f32 to vector<32x2048xf32>
    %81 = arith.maximumf %79, %80 : vector<32x2048xf32>
    %82 = arith.truncf %81 : vector<32x2048xf32> to vector<32x2048xbf16>
    %c0_36 = arith.constant 0 : index
    %c0_37 = arith.constant 0 : index
    %83 = vector.load %arg7[%c0_36, %c0_37] : memref<2048x16xbf16, #tpu.memory_space<vmem>>, vector<2048x16xbf16>
    %cst_38 = arith.constant dense<0.000000e+00> : vector<32x16xf32>
    %84 = tpu.matmul %82, %83, %cst_38 {dimension_numbers = #tpu.dot_dimension_numbers<[1], [0], [0], [1], [0, 0, 1, 1], [], []>} : vector<32x2048xbf16>, vector<2048x16xbf16>, vector<32x16xf32> -> vector<32x16xf32>
    %c0_39 = arith.constant 0 : index
    %c0_40 = arith.constant 0 : index
    %85 = vector.load %arg8[%c0_39, %c0_40] : memref<1x16xf32, #tpu.memory_space<vmem>>, vector<1x16xf32>
    %86 = vector.broadcast %85 : vector<1x16xf32> to vector<32x16xf32>
    %87 = arith.addf %84, %86 : vector<32x16xf32>
    %88 = arith.addf %73, %87 : vector<32x16xf32>
    %c0_41 = arith.constant 0 : index
    %c0_42 = arith.constant 0 : index
    %89 = vector.load %arg11[%c0_41, %c0_42] : memref<1x16xf32, #tpu.memory_space<vmem>>, vector<1x16xf32>
    %c0_43 = arith.constant 0 : index
    %c0_44 = arith.constant 0 : index
    %90 = vector.load %arg12[%c0_43, %c0_44] : memref<1x16xf32, #tpu.memory_space<vmem>>, vector<1x16xf32>
    %cst_45 = arith.constant dense<0.000000e+00> : vector<32xf32>
    %91 = vector.multi_reduction <add>, %88, %cst_45 [1] : vector<32x16xf32> to vector<32xf32>
    %92 = vector.shape_cast %91 : vector<32xf32> to vector<32x1xf32>
    %cst_46 = arith.constant 1.600000e+01 : f32
    %93 = vector.broadcast %cst_46 : f32 to vector<32x1xf32>
    %94 = arith.divf %92, %93 : vector<32x1xf32>
    %95 = vector.broadcast %94 : vector<32x1xf32> to vector<32x16xf32>
    %96 = arith.subf %88, %95 : vector<32x16xf32>
    %97 = arith.mulf %96, %96 : vector<32x16xf32>
    %cst_47 = arith.constant dense<0.000000e+00> : vector<32xf32>
    %98 = vector.multi_reduction <add>, %97, %cst_47 [1] : vector<32x16xf32> to vector<32xf32>
    %99 = vector.shape_cast %98 : vector<32xf32> to vector<32x1xf32>
    %cst_48 = arith.constant 1.600000e+01 : f32
    %100 = vector.broadcast %cst_48 : f32 to vector<32x1xf32>
    %101 = arith.divf %99, %100 : vector<32x1xf32>
    %102 = vector.broadcast %94 : vector<32x1xf32> to vector<32x16xf32>
    %103 = arith.subf %88, %102 : vector<32x16xf32>
    %cst_49 = arith.constant 9.99999974E-6 : f32
    %104 = vector.broadcast %cst_49 : f32 to vector<32x1xf32>
    %105 = arith.addf %101, %104 : vector<32x1xf32>
    %106 = math.rsqrt %105 : vector<32x1xf32>
    %107 = vector.broadcast %106 : vector<32x1xf32> to vector<32x16xf32>
    %108 = arith.mulf %103, %107 : vector<32x16xf32>
    %109 = vector.broadcast %89 : vector<1x16xf32> to vector<32x16xf32>
    %110 = arith.mulf %108, %109 : vector<32x16xf32>
    %111 = vector.broadcast %90 : vector<1x16xf32> to vector<32x16xf32>
    %112 = arith.addf %110, %111 : vector<32x16xf32>
    %113 = vector.shape_cast %112 : vector<32x16xf32> to vector<16x2x16xf32>
    %c0_50 = arith.constant 0 : index
    %c0_51 = arith.constant 0 : index
    %c0_52 = arith.constant 0 : index
    %114 = vector.load %arg13[%c0_50, %c0_51, %c0_52] : memref<16x2x16xf32, #tpu.memory_space<vmem>>, vector<16x2x16xf32>
    tpu.vector_store %arg13[%c0_50, %c0_51, %c0_52], %113 {strides = array<i32>} : memref<16x2x16xf32, #tpu.memory_space<vmem>>, vector<16x2x16xf32>,
    return
  }
}

module attributes {stable_mosaic.version = 11 : i64} {
  func.func @_mlp2_kernel(%arg0: memref<32x16xf32, #tpu.memory_space<vmem>>, %arg1: memref<16x4xf32, #tpu.memory_space<vmem>>, %arg2: memref<1x4xf32, #tpu.memory_space<vmem>>, %arg3: memref<4x4xf32, #tpu.memory_space<vmem>>, %arg4: memref<1x4xf32, #tpu.memory_space<vmem>>, %arg5: memref<32x4xf32, #tpu.memory_space<vmem>>) attributes {dimension_semantics = [], scalar_prefetch = 0 : i64, scratch_operands = 0 : i64, tpu.core_type = #tpu.core_type<tc>} {
    %c0 = arith.constant 0 : index
    %c0_0 = arith.constant 0 : index
    %0 = vector.load %arg0[%c0, %c0_0] : memref<32x16xf32, #tpu.memory_space<vmem>>, vector<32x16xf32>
    %c0_1 = arith.constant 0 : index
    %c0_2 = arith.constant 0 : index
    %1 = vector.load %arg1[%c0_1, %c0_2] : memref<16x4xf32, #tpu.memory_space<vmem>>, vector<16x4xf32>
    %cst = arith.constant dense<0.000000e+00> : vector<32x4xf32>
    %2 = tpu.matmul %0, %1, %cst {dimension_numbers = #tpu.dot_dimension_numbers<[1], [0], [0], [1], [0, 0, 1, 1], [], []>} : vector<32x16xf32>, vector<16x4xf32>, vector<32x4xf32> -> vector<32x4xf32>
    %c0_3 = arith.constant 0 : index
    %c0_4 = arith.constant 0 : index
    %3 = vector.load %arg2[%c0_3, %c0_4] : memref<1x4xf32, #tpu.memory_space<vmem>>, vector<1x4xf32>
    %4 = vector.broadcast %3 : vector<1x4xf32> to vector<32x4xf32>
    %5 = arith.addf %2, %4 : vector<32x4xf32>
    %cst_5 = arith.constant 0.000000e+00 : f32
    %6 = vector.broadcast %cst_5 : f32 to vector<32x4xf32>
    %7 = arith.maximumf %5, %6 : vector<32x4xf32>
    %c0_6 = arith.constant 0 : index
    %c0_7 = arith.constant 0 : index
    %8 = vector.load %arg3[%c0_6, %c0_7] : memref<4x4xf32, #tpu.memory_space<vmem>>, vector<4x4xf32>
    %cst_8 = arith.constant dense<0.000000e+00> : vector<32x4xf32>
    %9 = tpu.matmul %7, %8, %cst_8 {dimension_numbers = #tpu.dot_dimension_numbers<[1], [0], [0], [1], [0, 0, 1, 1], [], []>} : vector<32x4xf32>, vector<4x4xf32>, vector<32x4xf32> -> vector<32x4xf32>
    %c0_9 = arith.constant 0 : index
    %c0_10 = arith.constant 0 : index
    %10 = vector.load %arg4[%c0_9, %c0_10] : memref<1x4xf32, #tpu.memory_space<vmem>>, vector<1x4xf32>
    %11 = vector.broadcast %10 : vector<1x4xf32> to vector<32x4xf32>
    %12 = arith.addf %9, %11 : vector<32x4xf32>
    %13 = arith.negf %12 : vector<32x4xf32>
    %14 = math.exp %13 : vector<32x4xf32>
    %cst_11 = arith.constant 1.000000e+00 : f32
    %15 = vector.broadcast %cst_11 : f32 to vector<32x4xf32>
    %16 = arith.addf %15, %14 : vector<32x4xf32>
    %17 = arith.divf %15, %16 : vector<32x4xf32>
    %c0_12 = arith.constant 0 : index
    %c0_13 = arith.constant 0 : index
    %18 = vector.load %arg5[%c0_12, %c0_13] : memref<32x4xf32, #tpu.memory_space<vmem>>, vector<32x4xf32>
    tpu.vector_store %arg5[%c0_12, %c0_13], %17 {strides = array<i32>} : memref<32x4xf32, #tpu.memory_space<vmem>>, vector<32x4xf32>,
    return
  }
}

module attributes {stable_mosaic.version = 11 : i64} {
  func.func @_tlayer_kernel(%arg0: memref<16x2x12xf32, #tpu.memory_space<vmem>>, %arg1: memref<12x36xf32, #tpu.memory_space<vmem>>, %arg2: memref<1x36xf32, #tpu.memory_space<vmem>>, %arg3: memref<12x12xf32, #tpu.memory_space<vmem>>, %arg4: memref<1x12xf32, #tpu.memory_space<vmem>>, %arg5: memref<12x2048xbf16, #tpu.memory_space<vmem>>, %arg6: memref<1x2048xf32, #tpu.memory_space<vmem>>, %arg7: memref<2048x12xbf16, #tpu.memory_space<vmem>>, %arg8: memref<1x12xf32, #tpu.memory_space<vmem>>, %arg9: memref<1x12xf32, #tpu.memory_space<vmem>>, %arg10: memref<1x12xf32, #tpu.memory_space<vmem>>, %arg11: memref<1x12xf32, #tpu.memory_space<vmem>>, %arg12: memref<1x12xf32, #tpu.memory_space<vmem>>, %arg13: memref<16x2x12xf32, #tpu.memory_space<vmem>>) attributes {dimension_semantics = [], scalar_prefetch = 0 : i64, scratch_operands = 0 : i64, tpu.core_type = #tpu.core_type<tc>} {
    %c0 = arith.constant 0 : index
    %c0_0 = arith.constant 0 : index
    %c0_1 = arith.constant 0 : index
    %0 = vector.load %arg0[%c0, %c0_0, %c0_1] : memref<16x2x12xf32, #tpu.memory_space<vmem>>, vector<16x2x12xf32>
    %1 = vector.shape_cast %0 : vector<16x2x12xf32> to vector<32x12xf32>
    %c0_2 = arith.constant 0 : index
    %c0_3 = arith.constant 0 : index
    %2 = vector.load %arg1[%c0_2, %c0_3] : memref<12x36xf32, #tpu.memory_space<vmem>>, vector<12x36xf32>
    %cst = arith.constant dense<0.000000e+00> : vector<32x36xf32>
    %3 = tpu.matmul %1, %2, %cst {dimension_numbers = #tpu.dot_dimension_numbers<[1], [0], [0], [1], [0, 0, 1, 1], [], []>} : vector<32x12xf32>, vector<12x36xf32>, vector<32x36xf32> -> vector<32x36xf32>
    %c0_4 = arith.constant 0 : index
    %c0_5 = arith.constant 0 : index
    %4 = vector.load %arg2[%c0_4, %c0_5] : memref<1x36xf32, #tpu.memory_space<vmem>>, vector<1x36xf32>
    %5 = vector.broadcast %4 : vector<1x36xf32> to vector<32x36xf32>
    %6 = arith.addf %3, %5 : vector<32x36xf32>
    %7 = vector.shape_cast %6 : vector<32x36xf32> to vector<16x2x36xf32>
    %8 = vector.extract_strided_slice %7 {offsets = [0, 0, 0], sizes = [16, 2, 6], strides = [1, 1, 1]} : vector<16x2x36xf32> to vector<16x2x6xf32>
    %cst_6 = arith.constant 0.408248305 : f32
    %9 = vector.broadcast %cst_6 : f32 to vector<16x2x6xf32>
    %10 = arith.mulf %8, %9 : vector<16x2x6xf32>
    %11 = vector.extract_strided_slice %7 {offsets = [0, 0, 12], sizes = [16, 2, 6], strides = [1, 1, 1]} : vector<16x2x36xf32> to vector<16x2x6xf32>
    %12 = vector.extract_strided_slice %7 {offsets = [0, 0, 24], sizes = [16, 2, 6], strides = [1, 1, 1]} : vector<16x2x36xf32> to vector<16x2x6xf32>
    "tpu.trace_start"() <{level = 10 : i32, message = "nqd,nkd->nqk"}> : () -> ()
    %cst_7 = arith.constant dense<0.000000e+00> : vector<16x2x2xf32>
    %13 = tpu.matmul %10, %11, %cst_7 {dimension_numbers = #tpu.dot_dimension_numbers<[2], [2], [1], [1], [0, 0, 0, 1, 1, 1], [0], [0]>} : vector<16x2x6xf32>, vector<16x2x6xf32>, vector<16x2x2xf32> -> vector<16x2x2xf32>
    "tpu.trace_stop"() : () -> ()
    %cst_8 = arith.constant dense<0xFF800000> : vector<16x2xf32>
    %14 = vector.multi_reduction <maximumf>, %13, %cst_8 [2] : vector<16x2x2xf32> to vector<16x2xf32>
    %15 = vector.shape_cast %14 : vector<16x2xf32> to vector<16x2x1xf32>
    %16 = vector.broadcast %15 : vector<16x2x1xf32> to vector<16x2x2xf32>
    %17 = arith.subf %13, %16 : vector<16x2x2xf32>
    %18 = math.exp %17 : vector<16x2x2xf32>
    %cst_9 = arith.constant dense<0.000000e+00> : vector<16x2xf32>
    %19 = vector.multi_reduction <add>, %18, %cst_9 [2] : vector<16x2x2xf32> to vector<16x2xf32>
    %20 = vector.shape_cast %19 : vector<16x2xf32> to vector<16x2x1xf32>
    %21 = tpu.reciprocal %20 {approx = true} : vector<16x2x1xf32> -> vector<16x2x1xf32>
    %22 = vector.broadcast %21 : vector<16x2x1xf32> to vector<16x2x2xf32>
    %23 = arith.mulf %18, %22 : vector<16x2x2xf32>
    "tpu.trace_start"() <{level = 10 : i32, message = "nqk,nkd->nqd"}> : () -> ()
    %cst_10 = arith.constant dense<0.000000e+00> : vector<16x2x6xf32>
    %24 = tpu.matmul %23, %12, %cst_10 {dimension_numbers = #tpu.dot_dimension_numbers<[2], [1], [1], [2], [0, 0, 0, 1, 1, 2], [0], [0]>} : vector<16x2x2xf32>, vector<16x2x6xf32>, vector<16x2x6xf32> -> vector<16x2x6xf32>
    "tpu.trace_stop"() : () -> ()
    %25 = vector.extract_strided_slice %7 {offsets = [0, 0, 6], sizes = [16, 2, 6], strides = [1, 1, 1]} : vector<16x2x36xf32> to vector<16x2x6xf32>
    %cst_11 = arith.constant 0.408248305 : f32
    %26 = vector.broadcast %cst_11 : f32 to vector<16x2x6xf32>
    %27 = arith.mulf %25, %26 : vector<16x2x6xf32>
    %28 = vector.extract_strided_slice %7 {offsets = [0, 0, 18], sizes = [16, 2, 6], strides = [1, 1, 1]} : vector<16x2x36xf32> to vector<16x2x6xf32>
    %29 = vector.extract_strided_slice %7 {offsets = [0, 0, 30], sizes = [16, 2, 6], strides = [1, 1, 1]} : vector<16x2x36xf32> to vector<16x2x6xf32>
    "tpu.trace_start"() <{level = 10 : i32, message = "nqd,nkd->nqk"}> : () -> ()
    %cst_12 = arith.constant dense<0.000000e+00> : vector<16x2x2xf32>
    %30 = tpu.matmul %27, %28, %cst_12 {dimension_numbers = #tpu.dot_dimension_numbers<[2], [2], [1], [1], [0, 0, 0, 1, 1, 1], [0], [0]>} : vector<16x2x6xf32>, vector<16x2x6xf32>, vector<16x2x2xf32> -> vector<16x2x2xf32>
    "tpu.trace_stop"() : () -> ()
    %cst_13 = arith.constant dense<0xFF800000> : vector<16x2xf32>
    %31 = vector.multi_reduction <maximumf>, %30, %cst_13 [2] : vector<16x2x2xf32> to vector<16x2xf32>
    %32 = vector.shape_cast %31 : vector<16x2xf32> to vector<16x2x1xf32>
    %33 = vector.broadcast %32 : vector<16x2x1xf32> to vector<16x2x2xf32>
    %34 = arith.subf %30, %33 : vector<16x2x2xf32>
    %35 = math.exp %34 : vector<16x2x2xf32>
    %cst_14 = arith.constant dense<0.000000e+00> : vector<16x2xf32>
    %36 = vector.multi_reduction <add>, %35, %cst_14 [2] : vector<16x2x2xf32> to vector<16x2xf32>
    %37 = vector.shape_cast %36 : vector<16x2xf32> to vector<16x2x1xf32>
    %38 = tpu.reciprocal %37 {approx = true} : vector<16x2x1xf32> -> vector<16x2x1xf32>
    %39 = vector.broadcast %38 : vector<16x2x1xf32> to vector<16x2x2xf32>
    %40 = arith.mulf %35, %39 : vector<16x2x2xf32>
    "tpu.trace_start"() <{level = 10 : i32, message = "nqk,nkd->nqd"}> : () -> ()
    %cst_15 = arith.constant dense<0.000000e+00> : vector<16x2x6xf32>
    %41 = tpu.matmul %40, %29, %cst_15 {dimension_numbers = #tpu.dot_dimension_numbers<[2], [1], [1], [2], [0, 0, 0, 1, 1, 2], [0], [0]>} : vector<16x2x2xf32>, vector<16x2x6xf32>, vector<16x2x6xf32> -> vector<16x2x6xf32>
    "tpu.trace_stop"() : () -> ()
    %42 = tpu.concatenate %24, %41 in 2 : vector<16x2x6xf32>, vector<16x2x6xf32> -> vector<16x2x12xf32>
    %43 = vector.shape_cast %42 : vector<16x2x12xf32> to vector<32x12xf32>
    %c0_16 = arith.constant 0 : index
    %c0_17 = arith.constant 0 : index
    %44 = vector.load %arg3[%c0_16, %c0_17] : memref<12x12xf32, #tpu.memory_space<vmem>>, vector<12x12xf32>
    %cst_18 = arith.constant dense<0.000000e+00> : vector<32x12xf32>
    %45 = tpu.matmul %43, %44, %cst_18 {dimension_numbers = #tpu.dot_dimension_numbers<[1], [0], [0], [1], [0, 0, 1, 1], [], []>} : vector<32x12xf32>, vector<12x12xf32>, vector<32x12xf32> -> vector<32x12xf32>
    %c0_19 = arith.constant 0 : index
    %c0_20 = arith.constant 0 : index
    %46 = vector.load %arg4[%c0_19, %c0_20] : memref<1x12xf32, #tpu.memory_space<vmem>>, vector<1x12xf32>
    %47 = vector.broadcast %46 : vector<1x12xf32> to vector<32x12xf32>
    %48 = arith.addf %45, %47 : vector<32x12xf32>
    %49 = arith.addf %1, %48 : vector<32x12xf32>
    %c0_21 = arith.constant 0 : index
    %c0_22 = arith.constant 0 : index
    %50 = vector.load %arg9[%c0_21, %c0_22] : memref<1x12xf32, #tpu.memory_space<vmem>>, vector<1x12xf32>
    %c0_23 = arith.constant 0 : index
    %c0_24 = arith.constant 0 : index
    %51 = vector.load %arg10[%c0_23, %c0_24] : memref<1x12xf32, #tpu.memory_space<vmem>>, vector<1x12xf32>
    %cst_25 = arith.constant dense<0.000000e+00> : vector<32xf32>
    %52 = vector.multi_reduction <add>, %49, %cst_25 [1] : vector<32x12xf32> to vector<32xf32>
    %53 = vector.shape_cast %52 : vector<32xf32> to vector<32x1xf32>
    %cst_26 = arith.constant 1.200000e+01 : f32
    %54 = vector.broadcast %cst_26 : f32 to vector<32x1xf32>
    %55 = arith.divf %53, %54 : vector<32x1xf32>
    %56 = vector.broadcast %55 : vector<32x1xf32> to vector<32x12xf32>
    %57 = arith.subf %49, %56 : vector<32x12xf32>
    %58 = arith.mulf %57, %57 : vector<32x12xf32>
    %cst_27 = arith.constant dense<0.000000e+00> : vector<32xf32>
    %59 = vector.multi_reduction <add>, %58, %cst_27 [1] : vector<32x12xf32> to vector<32xf32>
    %60 = vector.shape_cast %59 : vector<32xf32> to vector<32x1xf32>
    %cst_28 = arith.constant 1.200000e+01 : f32
    %61 = vector.broadcast %cst_28 : f32 to vector<32x1xf32>
    %62 = arith.divf %60, %61 : vector<32x1xf32>
    %63 = vector.broadcast %55 : vector<32x1xf32> to vector<32x12xf32>
    %64 = arith.subf %49, %63 : vector<32x12xf32>
    %cst_29 = arith.constant 9.99999974E-6 : f32
    %65 = vector.broadcast %cst_29 : f32 to vector<32x1xf32>
    %66 = arith.addf %62, %65 : vector<32x1xf32>
    %67 = math.rsqrt %66 : vector<32x1xf32>
    %68 = vector.broadcast %67 : vector<32x1xf32> to vector<32x12xf32>
    %69 = arith.mulf %64, %68 : vector<32x12xf32>
    %70 = vector.broadcast %50 : vector<1x12xf32> to vector<32x12xf32>
    %71 = arith.mulf %69, %70 : vector<32x12xf32>
    %72 = vector.broadcast %51 : vector<1x12xf32> to vector<32x12xf32>
    %73 = arith.addf %71, %72 : vector<32x12xf32>
    %74 = arith.truncf %73 : vector<32x12xf32> to vector<32x12xbf16>
    %c0_30 = arith.constant 0 : index
    %c0_31 = arith.constant 0 : index
    %75 = vector.load %arg5[%c0_30, %c0_31] : memref<12x2048xbf16, #tpu.memory_space<vmem>>, vector<12x2048xbf16>
    %cst_32 = arith.constant dense<0.000000e+00> : vector<32x2048xf32>
    %76 = tpu.matmul %74, %75, %cst_32 {dimension_numbers = #tpu.dot_dimension_numbers<[1], [0], [0], [1], [0, 0, 1, 1], [], []>} : vector<32x12xbf16>, vector<12x2048xbf16>, vector<32x2048xf32> -> vector<32x2048xf32>
    %c0_33 = arith.constant 0 : index
    %c0_34 = arith.constant 0 : index
    %77 = vector.load %arg6[%c0_33, %c0_34] : memref<1x2048xf32, #tpu.memory_space<vmem>>, vector<1x2048xf32>
    %78 = vector.broadcast %77 : vector<1x2048xf32> to vector<32x2048xf32>
    %79 = arith.addf %76, %78 : vector<32x2048xf32>
    %cst_35 = arith.constant 0.000000e+00 : f32
    %80 = vector.broadcast %cst_35 : f32 to vector<32x2048xf32>
    %81 = arith.maximumf %79, %80 : vector<32x2048xf32>
    %82 = arith.truncf %81 : vector<32x2048xf32> to vector<32x2048xbf16>
    %c0_36 = arith.constant 0 : index
    %c0_37 = arith.constant 0 : index
    %83 = vector.load %arg7[%c0_36, %c0_37] : memref<2048x12xbf16, #tpu.memory_space<vmem>>, vector<2048x12xbf16>
    %cst_38 = arith.constant dense<0.000000e+00> : vector<32x12xf32>
    %84 = tpu.matmul %82, %83, %cst_38 {dimension_numbers = #tpu.dot_dimension_numbers<[1], [0], [0], [1], [0, 0, 1, 1], [], []>} : vector<32x2048xbf16>, vector<2048x12xbf16>, vector<32x12xf32> -> vector<32x12xf32>
    %c0_39 = arith.constant 0 : index
    %c0_40 = arith.constant 0 : index
    %85 = vector.load %arg8[%c0_39, %c0_40] : memref<1x12xf32, #tpu.memory_space<vmem>>, vector<1x12xf32>
    %86 = vector.broadcast %85 : vector<1x12xf32> to vector<32x12xf32>
    %87 = arith.addf %84, %86 : vector<32x12xf32>
    %88 = arith.addf %73, %87 : vector<32x12xf32>
    %c0_41 = arith.constant 0 : index
    %c0_42 = arith.constant 0 : index
    %89 = vector.load %arg11[%c0_41, %c0_42] : memref<1x12xf32, #tpu.memory_space<vmem>>, vector<1x12xf32>
    %c0_43 = arith.constant 0 : index
    %c0_44 = arith.constant 0 : index
    %90 = vector.load %arg12[%c0_43, %c0_44] : memref<1x12xf32, #tpu.memory_space<vmem>>, vector<1x12xf32>
    %cst_45 = arith.constant dense<0.000000e+00> : vector<32xf32>
    %91 = vector.multi_reduction <add>, %88, %cst_45 [1] : vector<32x12xf32> to vector<32xf32>
    %92 = vector.shape_cast %91 : vector<32xf32> to vector<32x1xf32>
    %cst_46 = arith.constant 1.200000e+01 : f32
    %93 = vector.broadcast %cst_46 : f32 to vector<32x1xf32>
    %94 = arith.divf %92, %93 : vector<32x1xf32>
    %95 = vector.broadcast %94 : vector<32x1xf32> to vector<32x12xf32>
    %96 = arith.subf %88, %95 : vector<32x12xf32>
    %97 = arith.mulf %96, %96 : vector<32x12xf32>
    %cst_47 = arith.constant dense<0.000000e+00> : vector<32xf32>
    %98 = vector.multi_reduction <add>, %97, %cst_47 [1] : vector<32x12xf32> to vector<32xf32>
    %99 = vector.shape_cast %98 : vector<32xf32> to vector<32x1xf32>
    %cst_48 = arith.constant 1.200000e+01 : f32
    %100 = vector.broadcast %cst_48 : f32 to vector<32x1xf32>
    %101 = arith.divf %99, %100 : vector<32x1xf32>
    %102 = vector.broadcast %94 : vector<32x1xf32> to vector<32x12xf32>
    %103 = arith.subf %88, %102 : vector<32x12xf32>
    %cst_49 = arith.constant 9.99999974E-6 : f32
    %104 = vector.broadcast %cst_49 : f32 to vector<32x1xf32>
    %105 = arith.addf %101, %104 : vector<32x1xf32>
    %106 = math.rsqrt %105 : vector<32x1xf32>
    %107 = vector.broadcast %106 : vector<32x1xf32> to vector<32x12xf32>
    %108 = arith.mulf %103, %107 : vector<32x12xf32>
    %109 = vector.broadcast %89 : vector<1x12xf32> to vector<32x12xf32>
    %110 = arith.mulf %108, %109 : vector<32x12xf32>
    %111 = vector.broadcast %90 : vector<1x12xf32> to vector<32x12xf32>
    %112 = arith.addf %110, %111 : vector<32x12xf32>
    %113 = vector.shape_cast %112 : vector<32x12xf32> to vector<16x2x12xf32>
    %c0_50 = arith.constant 0 : index
    %c0_51 = arith.constant 0 : index
    %c0_52 = arith.constant 0 : index
    %114 = vector.load %arg13[%c0_50, %c0_51, %c0_52] : memref<16x2x12xf32, #tpu.memory_space<vmem>>, vector<16x2x12xf32>
    tpu.vector_store %arg13[%c0_50, %c0_51, %c0_52], %113 {strides = array<i32>} : memref<16x2x12xf32, #tpu.memory_space<vmem>>, vector<16x2x12xf32>,
    return
  }
}

module attributes {stable_mosaic.version = 11 : i64} {
  func.func @_gru_layer_kernel(%arg0: memref<8x4x28xf32, #tpu.memory_space<vmem>>, %arg1: memref<28x96xf32, #tpu.memory_space<vmem>>, %arg2: memref<32x96xf32, #tpu.memory_space<vmem>>, %arg3: memref<1x96xf32, #tpu.memory_space<vmem>>, %arg4: memref<1x96xf32, #tpu.memory_space<vmem>>, %arg5: memref<8x4x32xf32, #tpu.memory_space<vmem>>, %arg6: memref<8x4x32xf32, #tpu.memory_space<vmem>>, %arg7: memref<8x4x32xf32, #tpu.memory_space<vmem>>, %arg8: memref<8x4x32xf32, #tpu.memory_space<vmem>>, %arg9: memref<4x32xf32, #tpu.memory_space<vmem>>, %arg10: memref<8x4x32xf32, #tpu.memory_space<vmem>>) attributes {dimension_semantics = [], scalar_prefetch = 0 : i64, scratch_operands = 5 : i64, tpu.core_type = #tpu.core_type<tc>} {
    %c0 = arith.constant 0 : index
    %c0_0 = arith.constant 0 : index
    %c0_1 = arith.constant 0 : index
    %0 = vector.load %arg0[%c0, %c0_0, %c0_1] : memref<8x4x28xf32, #tpu.memory_space<vmem>>, vector<8x4x28xf32>
    %1 = vector.shape_cast %0 : vector<8x4x28xf32> to vector<32x28xf32>
    %c0_2 = arith.constant 0 : index
    %c0_3 = arith.constant 0 : index
    %2 = vector.load %arg1[%c0_2, %c0_3] : memref<28x96xf32, #tpu.memory_space<vmem>>, vector<28x96xf32>
    %c0_4 = arith.constant 0 : index
    %c0_5 = arith.constant 0 : index
    %3 = vector.load %arg2[%c0_4, %c0_5] : memref<32x96xf32, #tpu.memory_space<vmem>>, vector<32x96xf32>
    %c0_6 = arith.constant 0 : index
    %c0_7 = arith.constant 0 : index
    %4 = vector.load %arg3[%c0_6, %c0_7] : memref<1x96xf32, #tpu.memory_space<vmem>>, vector<1x96xf32>
    %c0_8 = arith.constant 0 : index
    %c0_9 = arith.constant 0 : index
    %5 = vector.load %arg4[%c0_8, %c0_9] : memref<1x96xf32, #tpu.memory_space<vmem>>, vector<1x96xf32>
    %6 = vector.extract_strided_slice %2 {offsets = [0, 0], sizes = [28, 32], strides = [1, 1]} : vector<28x96xf32> to vector<28x32xf32>
    %7 = vector.extract_strided_slice %2 {offsets = [0, 32], sizes = [28, 32], strides = [1, 1]} : vector<28x96xf32> to vector<28x32xf32>
    %8 = vector.extract_strided_slice %2 {offsets = [0, 64], sizes = [28, 32], strides = [1, 1]} : vector<28x96xf32> to vector<28x32xf32>
    %9 = vector.extract_strided_slice %3 {offsets = [0, 0], sizes = [32, 32], strides = [1, 1]} : vector<32x96xf32> to vector<32x32xf32>
    %10 = vector.extract_strided_slice %3 {offsets = [0, 32], sizes = [32, 32], strides = [1, 1]} : vector<32x96xf32> to vector<32x32xf32>
    %11 = vector.extract_strided_slice %3 {offsets = [0, 64], sizes = [32, 32], strides = [1, 1]} : vector<32x96xf32> to vector<32x32xf32>
    %12 = vector.extract_strided_slice %4 {offsets = [0, 0], sizes = [1, 32], strides = [1, 1]} : vector<1x96xf32> to vector<1x32xf32>
    %13 = vector.extract_strided_slice %4 {offsets = [0, 32], sizes = [1, 32], strides = [1, 1]} : vector<1x96xf32> to vector<1x32xf32>
    %14 = vector.extract_strided_slice %4 {offsets = [0, 64], sizes = [1, 32], strides = [1, 1]} : vector<1x96xf32> to vector<1x32xf32>
    %15 = vector.extract_strided_slice %5 {offsets = [0, 0], sizes = [1, 32], strides = [1, 1]} : vector<1x96xf32> to vector<1x32xf32>
    %16 = vector.extract_strided_slice %5 {offsets = [0, 32], sizes = [1, 32], strides = [1, 1]} : vector<1x96xf32> to vector<1x32xf32>
    %17 = vector.extract_strided_slice %5 {offsets = [0, 64], sizes = [1, 32], strides = [1, 1]} : vector<1x96xf32> to vector<1x32xf32>
    %cst = arith.constant dense<0.000000e+00> : vector<32x32xf32>
    %18 = tpu.matmul %1, %6, %cst {dimension_numbers = #tpu.dot_dimension_numbers<[1], [0], [0], [1], [0, 0, 1, 1], [], []>} : vector<32x28xf32>, vector<28x32xf32>, vector<32x32xf32> -> vector<32x32xf32>
    %19 = vector.broadcast %12 : vector<1x32xf32> to vector<32x32xf32>
    %20 = arith.addf %18, %19 : vector<32x32xf32>
    %21 = vector.broadcast %15 : vector<1x32xf32> to vector<32x32xf32>
    %22 = arith.addf %20, %21 : vector<32x32xf32>
    %23 = vector.shape_cast %22 : vector<32x32xf32> to vector<8x4x32xf32>
    %c0_10 = arith.constant 0 : index
    %c0_11 = arith.constant 0 : index
    %c0_12 = arith.constant 0 : index
    %24 = vector.load %arg6[%c0_10, %c0_11, %c0_12] : memref<8x4x32xf32, #tpu.memory_space<vmem>>, vector<8x4x32xf32>
    tpu.vector_store %arg6[%c0_10, %c0_11, %c0_12], %23 {strides = array<i32>} : memref<8x4x32xf32, #tpu.memory_space<vmem>>, vector<8x4x32xf32>,
    %cst_13 = arith.constant dense<0.000000e+00> : vector<32x32xf32>
    %25 = tpu.matmul %1, %7, %cst_13 {dimension_numbers = #tpu.dot_dimension_numbers<[1], [0], [0], [1], [0, 0, 1, 1], [], []>} : vector<32x28xf32>, vector<28x32xf32>, vector<32x32xf32> -> vector<32x32xf32>
    %26 = vector.broadcast %13 : vector<1x32xf32> to vector<32x32xf32>
    %27 = arith.addf %25, %26 : vector<32x32xf32>
    %28 = vector.broadcast %16 : vector<1x32xf32> to vector<32x32xf32>
    %29 = arith.addf %27, %28 : vector<32x32xf32>
    %30 = vector.shape_cast %29 : vector<32x32xf32> to vector<8x4x32xf32>
    %c0_14 = arith.constant 0 : index
    %c0_15 = arith.constant 0 : index
    %c0_16 = arith.constant 0 : index
    %31 = vector.load %arg7[%c0_14, %c0_15, %c0_16] : memref<8x4x32xf32, #tpu.memory_space<vmem>>, vector<8x4x32xf32>
    tpu.vector_store %arg7[%c0_14, %c0_15, %c0_16], %30 {strides = array<i32>} : memref<8x4x32xf32, #tpu.memory_space<vmem>>, vector<8x4x32xf32>,
    %cst_17 = arith.constant dense<0.000000e+00> : vector<32x32xf32>
    %32 = tpu.matmul %1, %8, %cst_17 {dimension_numbers = #tpu.dot_dimension_numbers<[1], [0], [0], [1], [0, 0, 1, 1], [], []>} : vector<32x28xf32>, vector<28x32xf32>, vector<32x32xf32> -> vector<32x32xf32>
    %33 = vector.broadcast %14 : vector<1x32xf32> to vector<32x32xf32>
    %34 = arith.addf %32, %33 : vector<32x32xf32>
    %35 = vector.shape_cast %34 : vector<32x32xf32> to vector<8x4x32xf32>
    %c0_18 = arith.constant 0 : index
    %c0_19 = arith.constant 0 : index
    %c0_20 = arith.constant 0 : index
    %36 = vector.load %arg8[%c0_18, %c0_19, %c0_20] : memref<8x4x32xf32, #tpu.memory_space<vmem>>, vector<8x4x32xf32>
    tpu.vector_store %arg8[%c0_18, %c0_19, %c0_20], %35 {strides = array<i32>} : memref<8x4x32xf32, #tpu.memory_space<vmem>>, vector<8x4x32xf32>,
    %cst_21 = arith.constant 0.000000e+00 : f32
    %37 = vector.broadcast %cst_21 : f32 to vector<4x32xf32>
    %c0_22 = arith.constant 0 : index
    %c0_23 = arith.constant 0 : index
    %38 = vector.load %arg9[%c0_22, %c0_23] : memref<4x32xf32, #tpu.memory_space<vmem>>, vector<4x32xf32>
    tpu.vector_store %arg9[%c0_22, %c0_23], %37 {strides = array<i32>} : memref<4x32xf32, #tpu.memory_space<vmem>>, vector<4x32xf32>,
    %c0_i32 = arith.constant 0 : i32
    %c8_i32 = arith.constant 8 : i32
    %39 = arith.addi %c0_i32, %c8_i32 : i32
    %c1_i32 = arith.constant 1 : i32
    scf.for %arg11 = %c0_i32 to %39 step %c1_i32  : i32 {
      %c1_i32_31 = arith.constant 1 : i32
      %42 = arith.muli %arg11, %c1_i32_31 : i32
      %c0_i32_32 = arith.constant 0 : i32
      %43 = arith.addi %c0_i32_32, %42 : i32
      %c0_33 = arith.constant 0 : index
      %c0_34 = arith.constant 0 : index
      %44 = vector.load %arg9[%c0_33, %c0_34] : memref<4x32xf32, #tpu.memory_space<vmem>>, vector<4x32xf32>
      %cst_35 = arith.constant dense<0.000000e+00> : vector<4x32xf32>
      %45 = tpu.matmul %44, %9, %cst_35 {dimension_numbers = #tpu.dot_dimension_numbers<[1], [0], [0], [1], [0, 0, 1, 1], [], []>} : vector<4x32xf32>, vector<32x32xf32>, vector<4x32xf32> -> vector<4x32xf32>
      %cst_36 = arith.constant dense<0.000000e+00> : vector<4x32xf32>
      %46 = tpu.matmul %44, %10, %cst_36 {dimension_numbers = #tpu.dot_dimension_numbers<[1], [0], [0], [1], [0, 0, 1, 1], [], []>} : vector<4x32xf32>, vector<32x32xf32>, vector<4x32xf32> -> vector<4x32xf32>
      %cst_37 = arith.constant dense<0.000000e+00> : vector<4x32xf32>
      %47 = tpu.matmul %44, %11, %cst_37 {dimension_numbers = #tpu.dot_dimension_numbers<[1], [0], [0], [1], [0, 0, 1, 1], [], []>} : vector<4x32xf32>, vector<32x32xf32>, vector<4x32xf32> -> vector<4x32xf32>
      %48 = vector.broadcast %17 : vector<1x32xf32> to vector<4x32xf32>
      %49 = arith.addf %47, %48 : vector<4x32xf32>
      %50 = arith.index_cast %43 : i32 to index
      %c0_38 = arith.constant 0 : index
      %c0_39 = arith.constant 0 : index
      %51 = vector.load %arg6[%50, %c0_38, %c0_39] : memref<8x4x32xf32, #tpu.memory_space<vmem>>, vector<1x4x32xf32>
      %52 = vector.shape_cast %51 : vector<1x4x32xf32> to vector<4x32xf32>
      %53 = arith.addf %52, %45 : vector<4x32xf32>
      %54 = arith.negf %53 : vector<4x32xf32>
      %55 = math.exp %54 : vector<4x32xf32>
      %cst_40 = arith.constant 1.000000e+00 : f32
      %56 = vector.broadcast %cst_40 : f32 to vector<4x32xf32>
      %57 = arith.addf %56, %55 : vector<4x32xf32>
      %58 = arith.divf %56, %57 : vector<4x32xf32>
      %59 = arith.index_cast %43 : i32 to index
      %c0_41 = arith.constant 0 : index
      %c0_42 = arith.constant 0 : index
      %60 = vector.load %arg7[%59, %c0_41, %c0_42] : memref<8x4x32xf32, #tpu.memory_space<vmem>>, vector<1x4x32xf32>
      %61 = vector.shape_cast %60 : vector<1x4x32xf32> to vector<4x32xf32>
      %62 = arith.addf %61, %46 : vector<4x32xf32>
      %63 = arith.negf %62 : vector<4x32xf32>
      %64 = math.exp %63 : vector<4x32xf32>
      %cst_43 = arith.constant 1.000000e+00 : f32
      %65 = vector.broadcast %cst_43 : f32 to vector<4x32xf32>
      %66 = arith.addf %65, %64 : vector<4x32xf32>
      %67 = arith.divf %65, %66 : vector<4x32xf32>
      %68 = arith.index_cast %43 : i32 to index
      %c0_44 = arith.constant 0 : index
      %c0_45 = arith.constant 0 : index
      %69 = vector.load %arg8[%68, %c0_44, %c0_45] : memref<8x4x32xf32, #tpu.memory_space<vmem>>, vector<1x4x32xf32>
      %70 = vector.shape_cast %69 : vector<1x4x32xf32> to vector<4x32xf32>
      %71 = arith.mulf %58, %49 : vector<4x32xf32>
      %72 = arith.addf %70, %71 : vector<4x32xf32>
      %73 = math.tanh %72 : vector<4x32xf32>
      %cst_46 = arith.constant 1.000000e+00 : f32
      %74 = vector.broadcast %cst_46 : f32 to vector<4x32xf32>
      %75 = arith.subf %74, %67 : vector<4x32xf32>
      %76 = arith.mulf %75, %73 : vector<4x32xf32>
      %77 = arith.mulf %67, %44 : vector<4x32xf32>
      %78 = arith.addf %76, %77 : vector<4x32xf32>
      %c0_47 = arith.constant 0 : index
      %c0_48 = arith.constant 0 : index
      %79 = vector.load %arg9[%c0_47, %c0_48] : memref<4x32xf32, #tpu.memory_space<vmem>>, vector<4x32xf32>
      tpu.vector_store %arg9[%c0_47, %c0_48], %78 {strides = array<i32>} : memref<4x32xf32, #tpu.memory_space<vmem>>, vector<4x32xf32>,
      %80 = arith.index_cast %43 : i32 to index
      %c0_49 = arith.constant 0 : index
      %c0_50 = arith.constant 0 : index
      %81 = vector.load %arg10[%80, %c0_49, %c0_50] : memref<8x4x32xf32, #tpu.memory_space<vmem>>, vector<1x4x32xf32>
      %82 = vector.shape_cast %81 : vector<1x4x32xf32> to vector<4x32xf32>
      %83 = vector.shape_cast %78 : vector<4x32xf32> to vector<1x4x32xf32>
      tpu.vector_store %arg10[%80, %c0_49, %c0_50], %83 {strides = array<i32>} : memref<8x4x32xf32, #tpu.memory_space<vmem>>, vector<1x4x32xf32>,
    }
    %c8_i32_24 = arith.constant 8 : i32
    %c0_25 = arith.constant 0 : index
    %c0_26 = arith.constant 0 : index
    %c0_27 = arith.constant 0 : index
    %40 = vector.load %arg10[%c0_25, %c0_26, %c0_27] : memref<8x4x32xf32, #tpu.memory_space<vmem>>, vector<8x4x32xf32>
    %c0_28 = arith.constant 0 : index
    %c0_29 = arith.constant 0 : index
    %c0_30 = arith.constant 0 : index
    %41 = vector.load %arg5[%c0_28, %c0_29, %c0_30] : memref<8x4x32xf32, #tpu.memory_space<vmem>>, vector<8x4x32xf32>
    tpu.vector_store %arg5[%c0_28, %c0_29, %c0_30], %40 {strides = array<i32>} : memref<8x4x32xf32, #tpu.memory_space<vmem>>, vector<8x4x32xf32>,
    return
  }
}

module attributes {stable_mosaic.version = 11 : i64} {
  func.func @_gru_layer_kernel(%arg0: memref<8x4x32xf32, #tpu.memory_space<vmem>>, %arg1: memref<32x96xf32, #tpu.memory_space<vmem>>, %arg2: memref<32x96xf32, #tpu.memory_space<vmem>>, %arg3: memref<1x96xf32, #tpu.memory_space<vmem>>, %arg4: memref<1x96xf32, #tpu.memory_space<vmem>>, %arg5: memref<32x4xf32, #tpu.memory_space<vmem>>, %arg6: memref<1x4xf32, #tpu.memory_space<vmem>>, %arg7: memref<8x4x4xf32, #tpu.memory_space<vmem>>, %arg8: memref<8x4x32xf32, #tpu.memory_space<vmem>>, %arg9: memref<8x4x32xf32, #tpu.memory_space<vmem>>, %arg10: memref<8x4x32xf32, #tpu.memory_space<vmem>>, %arg11: memref<4x32xf32, #tpu.memory_space<vmem>>, %arg12: memref<8x4x32xf32, #tpu.memory_space<vmem>>) attributes {dimension_semantics = [], scalar_prefetch = 0 : i64, scratch_operands = 5 : i64, tpu.core_type = #tpu.core_type<tc>} {
    %c0 = arith.constant 0 : index
    %c0_0 = arith.constant 0 : index
    %c0_1 = arith.constant 0 : index
    %0 = vector.load %arg0[%c0, %c0_0, %c0_1] : memref<8x4x32xf32, #tpu.memory_space<vmem>>, vector<8x4x32xf32>
    %1 = vector.shape_cast %0 : vector<8x4x32xf32> to vector<32x32xf32>
    %c0_2 = arith.constant 0 : index
    %c0_3 = arith.constant 0 : index
    %2 = vector.load %arg1[%c0_2, %c0_3] : memref<32x96xf32, #tpu.memory_space<vmem>>, vector<32x96xf32>
    %c0_4 = arith.constant 0 : index
    %c0_5 = arith.constant 0 : index
    %3 = vector.load %arg2[%c0_4, %c0_5] : memref<32x96xf32, #tpu.memory_space<vmem>>, vector<32x96xf32>
    %c0_6 = arith.constant 0 : index
    %c0_7 = arith.constant 0 : index
    %4 = vector.load %arg3[%c0_6, %c0_7] : memref<1x96xf32, #tpu.memory_space<vmem>>, vector<1x96xf32>
    %c0_8 = arith.constant 0 : index
    %c0_9 = arith.constant 0 : index
    %5 = vector.load %arg4[%c0_8, %c0_9] : memref<1x96xf32, #tpu.memory_space<vmem>>, vector<1x96xf32>
    %6 = vector.extract_strided_slice %2 {offsets = [0, 0], sizes = [32, 32], strides = [1, 1]} : vector<32x96xf32> to vector<32x32xf32>
    %7 = vector.extract_strided_slice %2 {offsets = [0, 32], sizes = [32, 32], strides = [1, 1]} : vector<32x96xf32> to vector<32x32xf32>
    %8 = vector.extract_strided_slice %2 {offsets = [0, 64], sizes = [32, 32], strides = [1, 1]} : vector<32x96xf32> to vector<32x32xf32>
    %9 = vector.extract_strided_slice %3 {offsets = [0, 0], sizes = [32, 32], strides = [1, 1]} : vector<32x96xf32> to vector<32x32xf32>
    %10 = vector.extract_strided_slice %3 {offsets = [0, 32], sizes = [32, 32], strides = [1, 1]} : vector<32x96xf32> to vector<32x32xf32>
    %11 = vector.extract_strided_slice %3 {offsets = [0, 64], sizes = [32, 32], strides = [1, 1]} : vector<32x96xf32> to vector<32x32xf32>
    %12 = vector.extract_strided_slice %4 {offsets = [0, 0], sizes = [1, 32], strides = [1, 1]} : vector<1x96xf32> to vector<1x32xf32>
    %13 = vector.extract_strided_slice %4 {offsets = [0, 32], sizes = [1, 32], strides = [1, 1]} : vector<1x96xf32> to vector<1x32xf32>
    %14 = vector.extract_strided_slice %4 {offsets = [0, 64], sizes = [1, 32], strides = [1, 1]} : vector<1x96xf32> to vector<1x32xf32>
    %15 = vector.extract_strided_slice %5 {offsets = [0, 0], sizes = [1, 32], strides = [1, 1]} : vector<1x96xf32> to vector<1x32xf32>
    %16 = vector.extract_strided_slice %5 {offsets = [0, 32], sizes = [1, 32], strides = [1, 1]} : vector<1x96xf32> to vector<1x32xf32>
    %17 = vector.extract_strided_slice %5 {offsets = [0, 64], sizes = [1, 32], strides = [1, 1]} : vector<1x96xf32> to vector<1x32xf32>
    %cst = arith.constant dense<0.000000e+00> : vector<32x32xf32>
    %18 = tpu.matmul %1, %6, %cst {dimension_numbers = #tpu.dot_dimension_numbers<[1], [0], [0], [1], [0, 0, 1, 1], [], []>} : vector<32x32xf32>, vector<32x32xf32>, vector<32x32xf32> -> vector<32x32xf32>
    %19 = vector.broadcast %12 : vector<1x32xf32> to vector<32x32xf32>
    %20 = arith.addf %18, %19 : vector<32x32xf32>
    %21 = vector.broadcast %15 : vector<1x32xf32> to vector<32x32xf32>
    %22 = arith.addf %20, %21 : vector<32x32xf32>
    %23 = vector.shape_cast %22 : vector<32x32xf32> to vector<8x4x32xf32>
    %c0_10 = arith.constant 0 : index
    %c0_11 = arith.constant 0 : index
    %c0_12 = arith.constant 0 : index
    %24 = vector.load %arg8[%c0_10, %c0_11, %c0_12] : memref<8x4x32xf32, #tpu.memory_space<vmem>>, vector<8x4x32xf32>
    tpu.vector_store %arg8[%c0_10, %c0_11, %c0_12], %23 {strides = array<i32>} : memref<8x4x32xf32, #tpu.memory_space<vmem>>, vector<8x4x32xf32>,
    %cst_13 = arith.constant dense<0.000000e+00> : vector<32x32xf32>
    %25 = tpu.matmul %1, %7, %cst_13 {dimension_numbers = #tpu.dot_dimension_numbers<[1], [0], [0], [1], [0, 0, 1, 1], [], []>} : vector<32x32xf32>, vector<32x32xf32>, vector<32x32xf32> -> vector<32x32xf32>
    %26 = vector.broadcast %13 : vector<1x32xf32> to vector<32x32xf32>
    %27 = arith.addf %25, %26 : vector<32x32xf32>
    %28 = vector.broadcast %16 : vector<1x32xf32> to vector<32x32xf32>
    %29 = arith.addf %27, %28 : vector<32x32xf32>
    %30 = vector.shape_cast %29 : vector<32x32xf32> to vector<8x4x32xf32>
    %c0_14 = arith.constant 0 : index
    %c0_15 = arith.constant 0 : index
    %c0_16 = arith.constant 0 : index
    %31 = vector.load %arg9[%c0_14, %c0_15, %c0_16] : memref<8x4x32xf32, #tpu.memory_space<vmem>>, vector<8x4x32xf32>
    tpu.vector_store %arg9[%c0_14, %c0_15, %c0_16], %30 {strides = array<i32>} : memref<8x4x32xf32, #tpu.memory_space<vmem>>, vector<8x4x32xf32>,
    %cst_17 = arith.constant dense<0.000000e+00> : vector<32x32xf32>
    %32 = tpu.matmul %1, %8, %cst_17 {dimension_numbers = #tpu.dot_dimension_numbers<[1], [0], [0], [1], [0, 0, 1, 1], [], []>} : vector<32x32xf32>, vector<32x32xf32>, vector<32x32xf32> -> vector<32x32xf32>
    %33 = vector.broadcast %14 : vector<1x32xf32> to vector<32x32xf32>
    %34 = arith.addf %32, %33 : vector<32x32xf32>
    %35 = vector.shape_cast %34 : vector<32x32xf32> to vector<8x4x32xf32>
    %c0_18 = arith.constant 0 : index
    %c0_19 = arith.constant 0 : index
    %c0_20 = arith.constant 0 : index
    %36 = vector.load %arg10[%c0_18, %c0_19, %c0_20] : memref<8x4x32xf32, #tpu.memory_space<vmem>>, vector<8x4x32xf32>
    tpu.vector_store %arg10[%c0_18, %c0_19, %c0_20], %35 {strides = array<i32>} : memref<8x4x32xf32, #tpu.memory_space<vmem>>, vector<8x4x32xf32>,
    %cst_21 = arith.constant 0.000000e+00 : f32
    %37 = vector.broadcast %cst_21 : f32 to vector<4x32xf32>
    %c0_22 = arith.constant 0 : index
    %c0_23 = arith.constant 0 : index
    %38 = vector.load %arg11[%c0_22, %c0_23] : memref<4x32xf32, #tpu.memory_space<vmem>>, vector<4x32xf32>
    tpu.vector_store %arg11[%c0_22, %c0_23], %37 {strides = array<i32>} : memref<4x32xf32, #tpu.memory_space<vmem>>, vector<4x32xf32>,
    %c0_i32 = arith.constant 0 : i32
    %c8_i32 = arith.constant 8 : i32
    %39 = arith.addi %c0_i32, %c8_i32 : i32
    %c1_i32 = arith.constant 1 : i32
    scf.for %arg13 = %c0_i32 to %39 step %c1_i32  : i32 {
      %c1_i32_36 = arith.constant 1 : i32
      %49 = arith.muli %arg13, %c1_i32_36 : i32
      %c0_i32_37 = arith.constant 0 : i32
      %50 = arith.addi %c0_i32_37, %49 : i32
      %c0_38 = arith.constant 0 : index
      %c0_39 = arith.constant 0 : index
      %51 = vector.load %arg11[%c0_38, %c0_39] : memref<4x32xf32, #tpu.memory_space<vmem>>, vector<4x32xf32>
      %cst_40 = arith.constant dense<0.000000e+00> : vector<4x32xf32>
      %52 = tpu.matmul %51, %9, %cst_40 {dimension_numbers = #tpu.dot_dimension_numbers<[1], [0], [0], [1], [0, 0, 1, 1], [], []>} : vector<4x32xf32>, vector<32x32xf32>, vector<4x32xf32> -> vector<4x32xf32>
      %cst_41 = arith.constant dense<0.000000e+00> : vector<4x32xf32>
      %53 = tpu.matmul %51, %10, %cst_41 {dimension_numbers = #tpu.dot_dimension_numbers<[1], [0], [0], [1], [0, 0, 1, 1], [], []>} : vector<4x32xf32>, vector<32x32xf32>, vector<4x32xf32> -> vector<4x32xf32>
      %cst_42 = arith.constant dense<0.000000e+00> : vector<4x32xf32>
      %54 = tpu.matmul %51, %11, %cst_42 {dimension_numbers = #tpu.dot_dimension_numbers<[1], [0], [0], [1], [0, 0, 1, 1], [], []>} : vector<4x32xf32>, vector<32x32xf32>, vector<4x32xf32> -> vector<4x32xf32>
      %55 = vector.broadcast %17 : vector<1x32xf32> to vector<4x32xf32>
      %56 = arith.addf %54, %55 : vector<4x32xf32>
      %57 = arith.index_cast %50 : i32 to index
      %c0_43 = arith.constant 0 : index
      %c0_44 = arith.constant 0 : index
      %58 = vector.load %arg8[%57, %c0_43, %c0_44] : memref<8x4x32xf32, #tpu.memory_space<vmem>>, vector<1x4x32xf32>
      %59 = vector.shape_cast %58 : vector<1x4x32xf32> to vector<4x32xf32>
      %60 = arith.addf %59, %52 : vector<4x32xf32>
      %61 = arith.negf %60 : vector<4x32xf32>
      %62 = math.exp %61 : vector<4x32xf32>
      %cst_45 = arith.constant 1.000000e+00 : f32
      %63 = vector.broadcast %cst_45 : f32 to vector<4x32xf32>
      %64 = arith.addf %63, %62 : vector<4x32xf32>
      %65 = arith.divf %63, %64 : vector<4x32xf32>
      %66 = arith.index_cast %50 : i32 to index
      %c0_46 = arith.constant 0 : index
      %c0_47 = arith.constant 0 : index
      %67 = vector.load %arg9[%66, %c0_46, %c0_47] : memref<8x4x32xf32, #tpu.memory_space<vmem>>, vector<1x4x32xf32>
      %68 = vector.shape_cast %67 : vector<1x4x32xf32> to vector<4x32xf32>
      %69 = arith.addf %68, %53 : vector<4x32xf32>
      %70 = arith.negf %69 : vector<4x32xf32>
      %71 = math.exp %70 : vector<4x32xf32>
      %cst_48 = arith.constant 1.000000e+00 : f32
      %72 = vector.broadcast %cst_48 : f32 to vector<4x32xf32>
      %73 = arith.addf %72, %71 : vector<4x32xf32>
      %74 = arith.divf %72, %73 : vector<4x32xf32>
      %75 = arith.index_cast %50 : i32 to index
      %c0_49 = arith.constant 0 : index
      %c0_50 = arith.constant 0 : index
      %76 = vector.load %arg10[%75, %c0_49, %c0_50] : memref<8x4x32xf32, #tpu.memory_space<vmem>>, vector<1x4x32xf32>
      %77 = vector.shape_cast %76 : vector<1x4x32xf32> to vector<4x32xf32>
      %78 = arith.mulf %65, %56 : vector<4x32xf32>
      %79 = arith.addf %77, %78 : vector<4x32xf32>
      %80 = math.tanh %79 : vector<4x32xf32>
      %cst_51 = arith.constant 1.000000e+00 : f32
      %81 = vector.broadcast %cst_51 : f32 to vector<4x32xf32>
      %82 = arith.subf %81, %74 : vector<4x32xf32>
      %83 = arith.mulf %82, %80 : vector<4x32xf32>
      %84 = arith.mulf %74, %51 : vector<4x32xf32>
      %85 = arith.addf %83, %84 : vector<4x32xf32>
      %c0_52 = arith.constant 0 : index
      %c0_53 = arith.constant 0 : index
      %86 = vector.load %arg11[%c0_52, %c0_53] : memref<4x32xf32, #tpu.memory_space<vmem>>, vector<4x32xf32>
      tpu.vector_store %arg11[%c0_52, %c0_53], %85 {strides = array<i32>} : memref<4x32xf32, #tpu.memory_space<vmem>>, vector<4x32xf32>,
      %87 = arith.index_cast %50 : i32 to index
      %c0_54 = arith.constant 0 : index
      %c0_55 = arith.constant 0 : index
      %88 = vector.load %arg12[%87, %c0_54, %c0_55] : memref<8x4x32xf32, #tpu.memory_space<vmem>>, vector<1x4x32xf32>
      %89 = vector.shape_cast %88 : vector<1x4x32xf32> to vector<4x32xf32>
      %90 = vector.shape_cast %85 : vector<4x32xf32> to vector<1x4x32xf32>
      tpu.vector_store %arg12[%87, %c0_54, %c0_55], %90 {strides = array<i32>} : memref<8x4x32xf32, #tpu.memory_space<vmem>>, vector<1x4x32xf32>,
    }
    %c8_i32_24 = arith.constant 8 : i32
    %c0_25 = arith.constant 0 : index
    %c0_26 = arith.constant 0 : index
    %c0_27 = arith.constant 0 : index
    %40 = vector.load %arg12[%c0_25, %c0_26, %c0_27] : memref<8x4x32xf32, #tpu.memory_space<vmem>>, vector<8x4x32xf32>
    %41 = vector.shape_cast %40 : vector<8x4x32xf32> to vector<32x32xf32>
    %c0_28 = arith.constant 0 : index
    %c0_29 = arith.constant 0 : index
    %42 = vector.load %arg5[%c0_28, %c0_29] : memref<32x4xf32, #tpu.memory_space<vmem>>, vector<32x4xf32>
    %cst_30 = arith.constant dense<0.000000e+00> : vector<32x4xf32>
    %43 = tpu.matmul %41, %42, %cst_30 {dimension_numbers = #tpu.dot_dimension_numbers<[1], [0], [0], [1], [0, 0, 1, 1], [], []>} : vector<32x32xf32>, vector<32x4xf32>, vector<32x4xf32> -> vector<32x4xf32>
    %c0_31 = arith.constant 0 : index
    %c0_32 = arith.constant 0 : index
    %44 = vector.load %arg6[%c0_31, %c0_32] : memref<1x4xf32, #tpu.memory_space<vmem>>, vector<1x4xf32>
    %45 = vector.broadcast %44 : vector<1x4xf32> to vector<32x4xf32>
    %46 = arith.addf %43, %45 : vector<32x4xf32>
    %47 = vector.shape_cast %46 : vector<32x4xf32> to vector<8x4x4xf32>
    %c0_33 = arith.constant 0 : index
    %c0_34 = arith.constant 0 : index
    %c0_35 = arith.constant 0 : index
    %48 = vector.load %arg7[%c0_33, %c0_34, %c0_35] : memref<8x4x4xf32, #tpu.memory_space<vmem>>, vector<8x4x4xf32>
    tpu.vector_store %arg7[%c0_33, %c0_34, %c0_35], %47 {strides = array<i32>} : memref<8x4x4xf32, #tpu.memory_space<vmem>>, vector<8x4x4xf32>,
    return
  }
}

</mosaic_0001>

<bundles_post_ra>
// kernel: forward.10
= control target key start
LH: loop header
LB: loop body
LE: loop exit
PB: predicated region body
PF: predicated region fallthrough
CT: control target
= control target key end

     0   :  { %vm27_vm0 = vcmask 130048   ;;  %s219_s1 = inlined_call_operand.vmem [shape: f32[16,16], index: 1, kind: input, shape index: {}]   ;;  %s220_s0 = inlined_call_operand.vmem [shape: f32[32,16], index: 0, kind: input, shape index: {}]   ;;  %s221_s2 = inlined_call_operand.vmem [shape: f32[1,16], index: 2, kind: input, shape index: {}]   ;;  %s222_s3 = inlined_call_operand.vmem [shape: f32[32,16], index: 3, kind: output, shape index: {}]  }
   0x1   :  { %v19_v0 = vld [vmem:[%s219_s1 + $0x8] sm:$0xff]  ;;  %v18_v1 = vld [vmem:[%s219_s1] sm:$0xff]  ;;  %v16_v3 = vld [vmem:[%s220_s0 + $0x10] sm:$0xff] }
   0x2   :  { %144 = vmatprep.subr.mxu0 %v19_v0  ;;  %154 = vmatprep.subr.mxu1 %v19_v0  ;;  %v14_v2 = vld [vmem:[%s220_s0] sm:$0xff]  ;;  %v15_v4 = vld [vmem:[%s220_s0 + $0x8] sm:$0xff]  ;;  %v17_v5 = vld [vmem:[%s220_s0 + $0x18] sm:$0xff] }
   0x3   :  { %145 = vmatpush3.msra.mxu0 %v19_v0  ;;  %156 = vmatpush3.msra.mxu1 %v19_v0  ;;  %v133_v6 = vld [vmem:[%s221_s2] ss:$0 sm:$0xff] }
   0x4   :  { %146 = vmatprep.subr.mxu0 %v18_v1  ;;  %155 = vmatprep.subr.mxu1 %v18_v1 }
   0x5   :  { %147 = vmatpush3.msra.mxu0 %v18_v1  ;;  %157 = vmatpush3.msra.mxu1 %v18_v1 }
   0x6   :  { %148 = vmatprep.mubr.msk.f32.mxu0 %vm27_vm0, %v14_v2  ;;  %151 = vmatprep.mubr.msk.f32.mxu1 %vm27_vm0, %v16_v3 }
   0x7   :  { %149 = vmatmul.mubr.msk.f32.vlgmr.msra.gmra.mxu0 %vm27_vm0, %v15_v4  ;;  %152 = vmatmul.mubr.msk.f32.vlgmr.msra.gmra.mxu1 %vm27_vm0, %v17_v5 }
  0xc7   :  { %v150_v7 = vpop.f32.mrf.mxu0  ;;  %v153_v8 = vpop.f32.mrf.mxu1 }
  0xc8   :  { %v112_v9 = vadd.f32 %v150_v7, %v133_v6  ;;  %v122_v10 = vadd.f32 %v153_v8, %v133_v6 }
  0xc9   :  { %v106_v11 = vpop.f32.mrf.mxu0  ;;  %v116_v12 = vpop.f32.mrf.mxu1 }
  0xca   :  { %126 = vst.msk [vmem:[%s222_s3 + $0x8] sm:$0xff] %vm27_vm0, %v112_v9  ;;  %128 = vst.msk [vmem:[%s222_s3 + $0x18] sm:$0xff] %vm27_vm0, %v122_v10  ;;  %v107_v13 = vadd.f32 %v133_v6, %v106_v11  ;;  %v117_v14 = vadd.f32 %v133_v6, %v116_v12 }
  0xcc   :  { %125 = vst.msk [vmem:[%s222_s3] sm:$0xff] %vm27_vm0, %v107_v13  ;;  %127 = vst.msk [vmem:[%s222_s3 + $0x10] sm:$0xff] %vm27_vm0, %v117_v14 }

// kernel: forward.9
= control target key start
LH: loop header
LB: loop body
LE: loop exit
PB: predicated region body
PF: predicated region fallthrough
CT: control target
= control target key end

     0   :  { %vm34_vm0 = vcmask 130048   ;;  %vm129_vm1 = vcmask 261120   ;;  %v775_v15 = vmov 0.0   ;;  %vm776_vm2 = vmmov 0   ;;  %s911_s2 = inlined_call_operand.vmem [shape: f32[16,32], index: 2, kind: input, shape index: {}]   ;;  %s912_s6 = inlined_call_operand.vmem [shape: f32[2,8,16], index: 6, kind: output, shape index: {}]   ;;  %s913_s0 = inlined_call_operand.vmem [shape: f32[2,8,16], index: 0, kind: input, shape index: {}]   ;;  %s914_s4 = inlined_call_operand.vmem [shape: f32[32,32], index: 4, kind: input, shape index: {}]   ;;  %s915_s3 = inlined_call_operand.vmem [shape: f32[1,32], index: 3, kind: input, shape index: {}]   ;;  %s916_s5 = inlined_call_operand.vmem [shape: f32[1,32], index: 5, kind: input, shape index: {}]   ;;  %s917_s1 = inlined_call_operand.vmem [shape: f32[2,8,8], index: 1, kind: input, shape index: {}]  }
   0x1   :  { %v26_v0 = vld [vmem:[%s911_s2 + $0x8] sm:$0xff]  ;;  %v25_v1 = vld [vmem:[%s911_s2] sm:$0xff]  ;;  %v121_v4 = vld [vmem:[%s914_s4 + $0x18] sm:$0xff] }
   0x2   :  { %v822_v2 = vld [vmem:[%s913_s0] sm:$0xff]  ;;  %658 = vmatprep.subr.mxu0 %v26_v0  ;;  %v829_v3 = vld [vmem:[%s913_s0 + $0x8] sm:$0xff]  ;;  %665 = vmatprep.subr.mxu1 %v121_v4  ;;  %v120_v5 = vld [vmem:[%s914_s4 + $0x10] sm:$0xff] }
   0x3   :  { %662 = vmatprep.mubr.msk.f32.mxu0 %vm34_vm0, %v822_v2  ;;  %659 = vmatpush3.msra.mxu0 %v26_v0  ;;  %v119_v6 = vld [vmem:[%s914_s4 + $0x8] sm:$0xff]  ;;  %v118_v7 = vld [vmem:[%s914_s4] sm:$0xff] }
   0x4   :  { %660 = vmatprep.subr.mxu0 %v25_v1  ;;  %666 = vmatpush3.msra.mxu1 %v121_v4  ;;  %v628_v8 = vld [vmem:[%s915_s3] ss:$0 sm:$0xff]  ;;  %s777_s3 = smov 112   ;;  %v212_v25 = vld [vmem:[%s917_s1 + $0x8] sm:$0xff] }
   0x5   :  { %661 = vmatpush3.msra.mxu0 %v25_v1  ;;  %667 = vmatprep.subr.mxu1 %v120_v5  ;;  %v631_v17 = vld [vmem:[%s916_s5] ss:$0 sm:$0xff]  ;;  %v214_v26 = vadd.f32 1.0, %v212_v25 }
   0x6   :  { %663 = vmatmul.mubr.msk.f32.vlgmr.msra.gmra.mxu0 %vm34_vm0, %v829_v3  ;;  %668 = vmatpush3.msra.mxu1 %v120_v5  ;;  %v211_v23 = vld [vmem:[%s917_s1] sm:$0xff]  ;;  %s871_s1 = smov 0  }
   0x7   :  { %669 = vmatprep.subr.mxu1 %v119_v6  ;;  %676 = vmatprep.subr.mxu0 %v775_v15  ;;  %v213_v24 = vadd.f32 1.0, %v211_v23 }
   0x8   :  { %670 = vmatpush3.msra.mxu1 %v119_v6  ;;  %678 = vmatprep.mubr.msk.f32.mxu0 %vm776_vm2, %v775_v15 }
   0x9   :  { %671 = vmatprep.subr.mxu1 %v118_v7  ;;  %723 = vlog2.f32 %v213_v24 }
   0xa   :  { %672 = vmatpush3.msra.mxu1 %v118_v7  ;;  %725 = vlog2.f32 %v214_v26 }
  0x16   :  { %v724_v27 = vpop.eup %723 }
  0x17   :  { %v216_v28 = vmul.f32 0.6931472, %v724_v27  ;;  %v726_v29 = vpop.eup %725 }
  0x18   :  { %v218_v31 = vmul.f32 0.6931472, %v726_v29 }
  0x19   :  { %v219_v30 = vsub.f32 1.0, %v216_v28 }
  0x1a   :  { %v220_v32 = vsub.f32 1.0, %v218_v31 }
  0x1b   :  { %727 = vlog2.f32 %v219_v30 }
  0x1c   :  { %729 = vlog2.f32 %v220_v32 }
  0x28   :  { %v728_v33 = vpop.eup %727 }
  0x29   :  { %v222_v34 = vmul.f32 0.6931472, %v728_v33  ;;  %v730_v35 = vpop.eup %729 }
  0x2a   :  { %v224_v37 = vmul.f32 0.6931472, %v730_v35 }
  0x2b   :  { %v225_v36 = vsub.f32 0.0, %v222_v34 }
  0x2c   :  { %v226_v40 = vsub.f32 0.0, %v224_v37 }
  0xc6   :  { %v664_v9 = vpop.f32.mrf.mxu0 }
  0xc7   :  { %v113_v10 = vadd.f32 %v664_v9, %v628_v8 }
  0xc8   :  { %v107_v11 = vpop.f32.mrf.mxu0 }
  0xc9   :  { %v108_v12 = vadd.f32 %v628_v8, %v107_v11  ;;  %v117_v14 = vmax.f32 %v113_v10, 0.0 }
  0xcb   :  { %v116_v13 = vmax.f32 %v108_v12, 0.0 }
  0xcd   :  { %673 = vmatprep.mubr.msk.f32.mxu1 %vm129_vm1, %v116_v13 }
  0xce   :  { %674 = vmatmul.mubr.msk.f32.vlgmr.msra.gmra.mxu1 %vm129_vm1, %v117_v14 }
 0x18e   :  { %v675_v16 = vpop.f32.mrf.mxu1 }
 0x18f   :  { %v208_v20 = vadd.f32 %v675_v16, %v631_v17 }
 0x190   :  { %v202_v18 = vpop.f32.mrf.mxu1 }
 0x191   :  { %v203_v19 = vadd.f32 %v631_v17, %v202_v18 }
 0x193   :  { %228 = vrot.lane.b32.xlu0 %v203_v19, %s777_s3 }
 0x197   :  { %305 = vrot.lane.b32.xlu0 %v208_v20, %s777_s3 }
 0x205   :  { %v229_v21 = vpop.permute.xlu0 %228 }
 0x206   :  { %677 = vmatpush3.xpose.msk.msra.mxu0 %vm34_vm0, %v229_v21 }
 0x207   :  { %681 = vmatprep.subr.mxu0 %v775_v15 }
 0x209   :  { %679 = vmatmul.mubr.msk.f32.vlgmr.msra.gmra.mxu0 %vm34_vm0, %v203_v19  ;;  %v306_v22 = vpop.permute.xlu0 %305 }
 0x20a   :  { %682 = vmatpush3.xpose.msk.msra.mxu0 %vm34_vm0, %v306_v22  ;;  %683 = vmatprep.mubr.msk.f32.mxu0 %vm776_vm2, %v775_v15 }
 0x20d   :  { %684 = vmatmul.mubr.msk.f32.vlgmr.msra.gmra.mxu0 %vm34_vm0, %v208_v20 }
 0x2c9   :  { %v300_v38 = vpop.f32.mrf.mxu0 }
 0x2ca   :  { %v301_v39 = vadd.f32 %v300_v38, %v225_v36 }
 0x2cb   :  { %v680_v41 = vpop.f32.mrf.mxu0 }
 0x2cc   :  { %v381_v42 = vmul.f32 10.0, %v301_v39  }
 0x2cd   :  { %v377_v43 = vpop.f32.mrf.mxu0 }
 0x2ce   :  { %v378_v44 = vadd.f32 %v377_v43, %v226_v40 }
 0x2cf   :  { %v685_v45 = vpop.f32.mrf.mxu0 }
 0x2d0   :  { %v382_v46 = vmul.f32 10.0, %v378_v44  }
 0x2d1 LB: > { %vm391_vm3 = vcmask 64512   ;;  %s388_s1 = sadd.s32 1, %s773_s1   ;;  %s773_s1 = sphi %s871_s1, %s388_s1   ;;  %v769_v42 = vphi %v381_v42, %v919_v42   ;;  %v765_v46 = vphi %v382_v46, %v918_v46  }
 0x2d2   : > { %v392_v47 = vsel %vm391_vm3, %v769_v42, -inf  ;;  %v395_v48 = vsel %vm391_vm3, %v765_v46, -inf  ;;  %p385_p0 = scmp.ge.s32.totalorder %s388_s1, 20  }
 0x2d3   : > { %393 = vmax.xlane.f32.xlu0 %v392_v47  ;;  %686 = vmatprep.subr.mxu1 (%p385_p0), %v775_v15 }
 0x2d4   :  { %691 = vmatprep.subr.mxu0 (%p385_p0), %v775_v15  ;;  %687 = vmatpush3.msra.mxu1 (%p385_p0), %v822_v2 }
 0x2d5   :  { %688 = vmatprep.mubr.msk.f32.mxu1 (%p385_p0), %vm776_vm2, %v775_v15  ;;  %692 = vmatpush3.msra.mxu0 (%p385_p0), %v829_v3 }
 0x2d6   :  { %693 = vmatprep.mubr.msk.f32.mxu0 (%p385_p0), %vm776_vm2, %v775_v15 }
 0x2d7   : > { %396 = vmax.xlane.f32.xlu0 %v395_v48 }
 0x35c   : > { %v394_v49 = vpop.xlane.xlu0 %393 }
 0x35d   : > { %v398_v50 = vsub.f32 %v769_v42, %v394_v49 }
 0x35f   : > { %v400_v51 = vmul.f32 1.442695, %v398_v50 }
 0x360   : > { %v397_v52 = vpop.xlane.xlu0 %396 }
 0x361   : > { %731 = vpow2.f32 %v400_v51  ;;  %v399_v53 = vsub.f32 %v765_v46, %v397_v52 }
 0x363   : > { %v402_v54 = vmul.f32 1.442695, %v399_v53 }
 0x365   : > { %733 = vpow2.f32 %v402_v54 }
 0x36e   : > { %v732_v55 = vpop.eup %731 }
 0x36f   : > { %v404_v56 = vsel %vm391_vm3, %v732_v55, 0.0 }
 0x370   : > { %405 = vadd.xlane.f32.xlu1 %v404_v56 }
 0x372   : > { %v734_v57 = vpop.eup %733 }
 0x373   : > { %v407_v58 = vsel %vm391_vm3, %v734_v57, 0.0 }
 0x374   : > { %408 = vadd.xlane.f32.xlu1 %v407_v58 }
 0x3f9   : > { %v406_v59 = vpop.xlane.xlu1 %405 }
 0x3fa   : > { %735 = vlog2.f32 %v406_v59 }
 0x3fd   : > { %v409_v60 = vpop.xlane.xlu1 %408 }
 0x3fe   : > { %737 = vlog2.f32 %v409_v60 }
 0x407   : > { %v736_v61 = vpop.eup %735 }
 0x408   : > { %v411_v62 = vmul.f32 0.6931472, %v736_v61 }
 0x40a   : > { %v414_v63 = vadd.f32 %v411_v62, %v394_v49 }
 0x40b   : > { %v738_v0 = vpop.eup %737 }
 0x40c   : > { %v416_v1 = vsub.f32 %v769_v42, %v414_v63  ;;  %v413_v4 = vmul.f32 0.6931472, %v738_v0 }
 0x40e   : > { %v418_v5 = vsel %vm391_vm3, %v416_v1, -inf  ;;  %v415_v6 = vadd.f32 %v413_v4, %v397_v52 }
 0x40f   : > { %v419_v7 = vrot.slane %v418_v5, 4 }
 0x410   : > { %v417_v8 = vsub.f32 %v765_v46, %v415_v6 }
 0x411   : > { %v420_v9 = vmax.f32 %v418_v5, %v419_v7 }
 0x412   : > { %v425_v10 = vsel %vm391_vm3, %v417_v8, -inf }
 0x413   : > { %v421_v11 = vrot.slane %v420_v9, 2  ;;  %v426_v12 = vrot.slane %v425_v10, 4 }
 0x415   : > { %v422_v13 = vmax.f32 %v420_v9, %v421_v11  ;;  %v427_v14 = vmax.f32 %v425_v10, %v426_v12 }
 0x417   : > { %v423_v16 = vrot.slane %v422_v13, 1  ;;  %v428_v17 = vrot.slane %v427_v14, 2 }
 0x419   : > { %v424_v18 = vmax.f32 %v422_v13, %v423_v16  ;;  %v429_v19 = vmax.f32 %v427_v14, %v428_v17 }
 0x41b   : > { %v432_v20 = vsub.f32 %v416_v1, %v424_v18  ;;  %v430_v21 = vrot.slane %v429_v19, 1 }
 0x41d   : > { %v434_v22 = vmul.f32 1.442695, %v432_v20  ;;  %v431_v23 = vmax.f32 %v429_v19, %v430_v21 }
 0x41f   : > { %739 = vpow2.f32 %v434_v22  ;;  %v433_v24 = vsub.f32 %v417_v8, %v431_v23 }
 0x421   : > { %v436_v25 = vmul.f32 1.442695, %v433_v24 }
 0x423   : > { %741 = vpow2.f32 %v436_v25 }
 0x42c   : > { %v740_v26 = vpop.eup %739 }
 0x42d   : > { %v438_v27 = vsel %vm391_vm3, %v740_v26, 0.0 }
 0x42e   : > { %v439_v28 = vrot.slane %v438_v27, 4 }
 0x430   : > { %v742_v29 = vpop.eup %741  ;;  %v440_v30 = vadd.f32 %v439_v28, %v438_v27 }
 0x431   : > { %v445_v31 = vsel %vm391_vm3, %v742_v29, 0.0 }
 0x432   : > { %v441_v32 = vrot.slane %v440_v30, 2  ;;  %v446_v33 = vrot.slane %v445_v31, 4 }
 0x434   : > { %v442_v34 = vadd.f32 %v441_v32, %v440_v30  ;;  %v447_v35 = vadd.f32 %v446_v33, %v445_v31 }
 0x436   : > { %v443_v36 = vrot.slane %v442_v34, 1  ;;  %v448_v37 = vrot.slane %v447_v35, 2 }
 0x438   : > { %v444_v38 = vadd.f32 %v443_v36, %v442_v34  ;;  %v449_v39 = vadd.f32 %v448_v37, %v447_v35 }
 0x43a   : > { %743 = vlog2.f32 %v444_v38  ;;  %v450_v40 = vrot.slane %v449_v39, 1 }
 0x43c   : > { %v451_v41 = vadd.f32 %v450_v40, %v449_v39 }
 0x43e   : > { %745 = vlog2.f32 %v451_v41 }
 0x447   : > { %v744_v42 = vpop.eup %743 }
 0x448   : > { %v453_v43 = vmul.f32 0.6931472, %v744_v42 }
 0x44a   : > { %v456_v44 = vadd.f32 %v453_v43, %v424_v18 }
 0x44b   : > { %v746_v45 = vpop.eup %745 }
 0x44c   : > { %v458_v47 = vsub.f32 %v416_v1, %v456_v44   ;;  %v455_v46 = vmul.f32 0.6931472, %v746_v45 }
 0x44e   : > { %v457_v48 = vadd.f32 %v455_v46, %v431_v23  ;;  %v919_v42 = vmov %v458_v47  ;;  %387 = sbr.rel (!%p385_p0) target bundleno = 721 (0x2d1), region = 51  ;;  %v460_v50 = vmul.f32 (%p385_p0), 1.442695, %v458_v47 }
 0x450   : > { %v459_v49 = vsub.f32 %v417_v8, %v457_v48   ;;  %747 = vpow2.f32 (%p385_p0), %v460_v50 }
 0x452   : > { %v918_v46 = vmov %v459_v49  ;;  %v462_v51 = vmul.f32 (%p385_p0), 1.442695, %v459_v49 }
 0x454   :  { %749 = vpow2.f32 %v462_v51 }
 0x45d   :  { %v748_v52 = vpop.eup %747 }
 0x45e   :  { %689 = vmatmul.mubr.msk.f32.vlgmr.msra.gmra.mxu1 %vm391_vm3, %v748_v52 }
 0x461   :  { %v750_v53 = vpop.eup %749 }
 0x462   :  { %694 = vmatmul.mubr.msk.f32.vlgmr.msra.gmra.mxu0 %vm391_vm3, %v750_v53 }
 0x51e   :  { %v534_v54 = vpop.f32.mrf.mxu1 }
 0x51f   :  { %611 = vst.msk [vmem:[%s912_s6] sm:$0xff] %vm34_vm0, %v534_v54 }
 0x520   :  { %v690_v3 = vpop.f32.mrf.mxu1 }
 0x522   :  { %v607_v2 = vpop.f32.mrf.mxu0 }
 0x523   :  { %612 = vst.msk [vmem:[%s912_s6 + $0x8] sm:$0xff] %vm34_vm0, %v607_v2 }
 0x524   :  { %v695_v15 = vpop.f32.mrf.mxu0 }

// kernel: forward.13
= control target key start
LH: loop header
LB: loop body
LE: loop exit
PB: predicated region body
PF: predicated region fallthrough
CT: control target
= control target key end

     0   :  { %vm33_vm0 = vcmask 130048   ;;  %vm156_vm1 = vcmask 1043456   ;;  %vm143_vm2 = vcmask 31744   ;;  %s414_s1 = inlined_call_operand.vmem [shape: f32[16,4], index: 1, kind: input, shape index: {}]   ;;  %s415_s0 = inlined_call_operand.vmem [shape: f32[32,16], index: 0, kind: input, shape index: {}]   ;;  %s416_s3 = inlined_call_operand.vmem [shape: f32[4,4], index: 3, kind: input, shape index: {}]   ;;  %s417_s2 = inlined_call_operand.vmem [shape: f32[1,4], index: 2, kind: input, shape index: {}]   ;;  %s418_s4 = inlined_call_operand.vmem [shape: f32[1,4], index: 4, kind: input, shape index: {}]   ;;  %s419_s5 = inlined_call_operand.vmem [shape: f32[32,4], index: 5, kind: output, shape index: {}]  }
   0x1   :  { %v25_v0 = vld [vmem:[%s414_s1 + $0x8] sm:$0xff]  ;;  %v24_v1 = vld [vmem:[%s414_s1] sm:$0xff]  ;;  %v22_v4 = vld [vmem:[%s415_s0 + $0x10] sm:$0xff] }
   0x2   :  { %v20_v2 = vld [vmem:[%s415_s0] sm:$0xff]  ;;  %303 = vmatprep.subr.mxu0 %v25_v0  ;;  %v21_v3 = vld [vmem:[%s415_s0 + $0x8] sm:$0xff]  ;;  %v23_v5 = vld [vmem:[%s415_s0 + $0x18] sm:$0xff] }
   0x3   :  { %307 = vmatprep.mubr.msk.f32.mxu0 %vm33_vm0, %v20_v2  ;;  %304 = vmatpush3.msra.mxu0 %v25_v0  ;;  %v135_v6 = vld [vmem:[%s416_s3] sm:$0xf] }
   0x4   :  { %305 = vmatprep.subr.mxu0 %v24_v1  ;;  %313 = vmatprep.subr.msk.mxu1 %vm156_vm1, %v135_v6  ;;  %v277_v7 = vld [vmem:[%s417_s2] ss:$0 sm:$0xff] }
   0x5   :  { %306 = vmatpush3.msra.mxu0 %v24_v1  ;;  %314 = vmatpush3.msk.msra.mxu1 %vm156_vm1, %v135_v6  ;;  %v282_v20 = vld [vmem:[%s418_s4] ss:$0 sm:$0xff] }
   0x6   :  { %308 = vmatmul.mubr.msk.f32.vlgmr.msra.gmra.mxu0 %vm33_vm0, %v21_v3 }
   0x7   :  { %310 = vmatprep.mubr.msk.f32.mxu0 %vm33_vm0, %v22_v4 }
   0xa   :  { %311 = vmatmul.mubr.msk.f32.gmra.mxu0 %vm33_vm0, %v23_v5 }
  0xc6   :  { %v309_v8 = vpop.f32.mrf.mxu0 }
  0xc7   :  { %v118_v9 = vadd.f32 %v309_v8, %v277_v7 }
  0xc8   :  { %v112_v10 = vpop.f32.mrf.mxu0 }
  0xc9   :  { %v113_v11 = vadd.f32 %v277_v7, %v112_v10  ;;  %v132_v14 = vmax.f32 %v118_v9, 0.0 }
  0xca   :  { %v312_v12 = vpop.f32.mrf.mxu0 }
  0xcb   :  { %v131_v13 = vmax.f32 %v113_v11, 0.0  ;;  %v128_v15 = vadd.f32 %v312_v12, %v277_v7 }
  0xcc   :  { %v122_v16 = vpop.f32.mrf.mxu0 }
  0xcd   :  { %v123_v17 = vadd.f32 %v277_v7, %v122_v16  ;;  %315 = vmatprep.mubr.msk.f32.mxu1 %vm143_vm2, %v131_v13  ;;  %v134_v19 = vmax.f32 %v128_v15, 0.0 }
  0xce   :  { %316 = vmatmul.mubr.msk.f32.vlgmr.msra.gmra.mxu1 %vm143_vm2, %v132_v14 }
  0xcf   :  { %v133_v18 = vmax.f32 %v123_v17, 0.0 }
  0xd1   :  { %318 = vmatprep.mubr.msk.f32.mxu1 %vm143_vm2, %v133_v18 }
  0xd2   :  { %319 = vmatmul.mubr.msk.f32.gmra.mxu1 %vm143_vm2, %v134_v19 }
 0x18e   :  { %v317_v21 = vpop.f32.mrf.mxu1 }
 0x18f   :  { %v232_v22 = vadd.f32 %v317_v21, %v282_v20 }
 0x190   :  { %v226_v23 = vpop.f32.mrf.mxu1 }
 0x191   :  { %v289_v24 = vmul.f32 -1.442695, %v232_v22  ;;  %v227_v25 = vadd.f32 %v282_v20, %v226_v23 }
 0x192   :  { %v320_v26 = vpop.f32.mrf.mxu1 }
 0x193   :  { %321 = vpow2.f32 %v289_v24  ;;  %v288_v27 = vmul.f32 -1.442695, %v227_v25  ;;  %v242_v28 = vadd.f32 %v320_v26, %v282_v20 }
 0x194   :  { %v236_v29 = vpop.f32.mrf.mxu1 }
 0x195   :  { %323 = vpow2.f32 %v288_v27  ;;  %v291_v30 = vmul.f32 -1.442695, %v242_v28  ;;  %v237_v31 = vadd.f32 %v282_v20, %v236_v29 }
 0x197   :  { %325 = vpow2.f32 %v291_v30  ;;  %v290_v32 = vmul.f32 -1.442695, %v237_v31 }
 0x199   :  { %327 = vpow2.f32 %v290_v32 }
 0x1a0   :  { %v322_v33 = vpop.eup %321 }
 0x1a1   :  { %v258_v34 = vadd.f32 1.0, %v322_v33 }
 0x1a2   :  { %v324_v35 = vpop.eup %323 }
 0x1a3   :  { %329 = vrcp.f32 %v258_v34  ;;  %v257_v36 = vadd.f32 1.0, %v324_v35 }
 0x1a4   :  { %v326_v37 = vpop.eup %325 }
 0x1a5   :  { %331 = vrcp.f32 %v257_v36  ;;  %v260_v38 = vadd.f32 1.0, %v326_v37 }
 0x1a6   :  { %v328_v39 = vpop.eup %327 }
 0x1a7   :  { %333 = vrcp.f32 %v260_v38  ;;  %v259_v40 = vadd.f32 1.0, %v328_v39 }
 0x1a9   :  { %335 = vrcp.f32 %v259_v40 }
 0x1b0   :  { %v330_v41 = vpop.eup %329 }
 0x1b1   :  { %270 = vst.msk [vmem:[%s419_s5 + $0x8] sm:$0xff] %vm143_vm2, %v330_v41 }
 0x1b2   :  { %v332_v42 = vpop.eup %331 }
 0x1b3   :  { %269 = vst.msk [vmem:[%s419_s5] sm:$0xff] %vm143_vm2, %v332_v42 }
 0x1b4   :  { %v334_v43 = vpop.eup %333 }
 0x1b5   :  { %272 = vst.msk [vmem:[%s419_s5 + $0x18] sm:$0xff] %vm143_vm2, %v334_v43 }
 0x1b6   :  { %v336_v44 = vpop.eup %335 }
 0x1b7   :  { %271 = vst.msk [vmem:[%s419_s5 + $0x10] sm:$0xff] %vm143_vm2, %v336_v44 }

// kernel: squeeze.6
= control target key start
LH: loop header
LB: loop body
LE: loop exit
PB: predicated region body
PF: predicated region fallthrough
CT: control target
= control target key end

     0   :  { %vm8_vm0 = vcmask 97280   ;;  %vm14_vm1 = vcmask 195680   ;;  %s42_s0 = inlined_call_operand.vmem [shape: f32[2,1,12], index: 0, kind: input, shape index: {}]   ;;  %s43_s1 = inlined_call_operand.vmem [shape: f32[24], index: 1, kind: output, shape index: {}]  }
   0x1   :  { %v5_v0 = vld [vmem:[%s42_s0] sm:$0x3]  ;;  %s25_s0 = smov 12  }
   0x2   :  { %6 = vst [vmem:[#allocation1] sm:$0x3] %v5_v0 }
   0x9   :  { %v11_v1 = vld [vmem:[#allocation1 + $0x1] sm:$0x1]   ;;  %v7_v2 = vld [vmem:[#allocation1] sm:$0x1]  }
   0xa   :  { %12 = vrot.lane.b32.xlu0 %v11_v1, %s25_s0  ;;  %9 = vst.msk [vmem:[#allocation0] sm:$0x1] %vm8_vm0, %v7_v2  }
  0x7c   :  { %v13_v3 = vpop.permute.xlu0 %12  }
  0x7d   :  { %15 = vst.msk [vmem:[#allocation0] sm:$0x1] %vm14_vm1, %v13_v3  }
  0x84   :  { %v20_v4 = vld [vmem:[#allocation0] sm:$0x1] }
  0x85   :  { %23 = vst [vmem:[%s43_s1] sm:$0x1] %v20_v4 }

// kernel: forward.16
= control target key start
LH: loop header
LB: loop body
LE: loop exit
PB: predicated region body
PF: predicated region fallthrough
CT: control target
= control target key end

     0   :  { %vm65_vm0 = vcmask 1043456   ;;  %s936_s24 = smov 96   ;;  %vm56_vm1 = vcmask 228352   ;;  %s937_s12 = smov 64   ;;  %vm176_vm2 = vcmask 257024   ;;  %v938_v14 = vmov 0.0   ;;  %s1163_s1 = inlined_call_operand.vmem [shape: f32[28,96], index: 1, kind: input, shape index: {}]   ;;  %s1164_s2 = inlined_call_operand.vmem [shape: f32[32,96], index: 2, kind: input, shape index: {}]   ;;  %s1165_s5 = inlined_call_operand.vmem [shape: f32[8,4,32], index: 5, kind: output, shape index: {}]   ;;  %s1166_s0 = inlined_call_operand.vmem [shape: f32[8,4,28], index: 0, kind: input, shape index: {}]   ;;  %s1167_s3 = inlined_call_operand.vmem [shape: f32[1,96], index: 3, kind: input, shape index: {}]   ;;  %s1168_s4 = inlined_call_operand.vmem [shape: f32[1,96], index: 4, kind: input, shape index: {}]  }
   0x1   :  { %v31_v0 = vld [vmem:[%s1163_s1 + $0x18] sm:$0xf]  ;;  %v29_v1 = vld [vmem:[%s1163_s1 + $0x8] sm:$0xff]  ;;  %v30_v2 = vld [vmem:[%s1163_s1 + $0x10] sm:$0xff]  ;;  %437 = vst.msk [vmem:[#allocation5] sm:$0xf] %vm176_vm2, %v938_v14 }
   0x2   :  { %194 = vrot.lane.b32.xlu0 %v31_v0, %s936_s24  ;;  %190 = vrot.lane.b32.xlu1 %v29_v1, %s936_s24  ;;  %v28_v3 = vld [vmem:[%s1163_s1] sm:$0xff]  ;;  %v995_v5 = vld [vmem:[%s1164_s2 + $0x8] sm:$0xff] }
   0x3   :  { %v990_v4 = vld [vmem:[%s1164_s2] sm:$0xff]  ;;  %v1000_v6 = vld [vmem:[%s1164_s2 + $0x10] sm:$0xff]  ;;  %v1005_v7 = vld [vmem:[%s1164_s2 + $0x18] sm:$0xff]  ;;  %816 = vmatprep.subr.msk.mxu0 %vm65_vm0, %v31_v0 }
   0x4   :  { %817 = vmatpush3.msk.msra.mxu0 %vm65_vm0, %v31_v0  ;;  %v914_v8 = vld [vmem:[%s1166_s0] sm:$0xff]   ;;  %v915_v9 = vld [vmem:[%s1166_s0 + $0x8] sm:$0xff]   ;;  %v916_v10 = vld [vmem:[%s1166_s0 + $0x10] sm:$0xff]  }
   0x5   :  { %818 = vmatprep.subr.mxu0 %v30_v2  ;;  %824 = vmatprep.mubr.msk.f32.mxu0 %vm56_vm1, %v914_v8  ;;  %v917_v11 = vld [vmem:[%s1166_s0 + $0x18] sm:$0xff]   ;;  %v1030_v12 = vld [vmem:[%s1167_s3] ss:$0 sm:$0xff]  ;;  %s1089_s0 = smov 0  }
   0x6   :  { %192 = vrot.lane.b32.xlu0 %v30_v2, %s936_s24  ;;  %188 = vrot.lane.b32.xlu1 %v28_v3, %s936_s24  ;;  %v1035_v13 = vld [vmem:[%s1168_s4] ss:$0 sm:$0xff] }
   0x7   :  { %819 = vmatpush3.msra.mxu0 %v30_v2  ;;  %838 = vmatprep.mubr.msk.f32.mxu1 %vm56_vm1, %v914_v8 }
   0x8   :  { %820 = vmatprep.subr.mxu0 %v29_v1 }
   0x9   :  { %821 = vmatpush3.msra.mxu0 %v29_v1 }
   0xa   :  { %322 = vrot.lane.b32.xlu0 %v31_v0, %s937_s12  ;;  %320 = vrot.lane.b32.xlu1 %v30_v2, %s937_s12 }
   0xb   :  { %822 = vmatprep.subr.mxu0 %v28_v3 }
   0xc   :  { %823 = vmatpush3.msra.mxu0 %v28_v3 }
   0xd   :  { %825 = vmatmul.mubr.msk.f32.vlgmr.msra.gmra.mxu0 %vm56_vm1, %v915_v9 }
   0xe   :  { %318 = vrot.lane.b32.xlu0 %v29_v1, %s937_s12  ;;  %316 = vrot.lane.b32.xlu1 %v28_v3, %s937_s12 }
   0xf   :  { %827 = vmatprep.mubr.msk.f32.mxu0 %vm56_vm1, %v916_v10 }
  0x11   :  { %828 = vmatmul.mubr.msk.f32.gmra.mxu0 %vm56_vm1, %v917_v11 }
  0x12   :  { %852 = vmatprep.mubr.msk.f32.mxu0 %vm56_vm1, %v914_v8  ;;  %199 = vrot.lane.b32.xlu0 %v1030_v12, %s936_s24 }
  0x13   :  { %289 = vrot.lane.b32.xlu1 %v1035_v13, %s936_s24 }
  0x16   :  { %327 = vrot.lane.b32.xlu0 %v1030_v12, %s937_s12 }
  0x74   :  { %v195_v15 = vpop.permute.xlu0 %194  ;;  %v191_v16 = vpop.permute.xlu1 %190 }
  0x75   :  { %830 = vmatprep.subr.msk.mxu1 %vm65_vm0, %v195_v15 }
  0x76   :  { %831 = vmatpush3.msk.msra.mxu1 %vm65_vm0, %v195_v15 }
  0x78   :  { %v193_v17 = vpop.permute.xlu0 %192  ;;  %v189_v18 = vpop.permute.xlu1 %188 }
  0x79   :  { %832 = vmatprep.subr.mxu1 %v193_v17 }
  0x7a   :  { %833 = vmatpush3.msra.mxu1 %v193_v17 }
  0x7b   :  { %834 = vmatprep.subr.mxu1 %v191_v16 }
  0x7c   :  { %835 = vmatpush3.msra.mxu1 %v191_v16  ;;  %v323_v19 = vpop.permute.xlu0 %322  ;;  %v321_v20 = vpop.permute.xlu1 %320 }
  0x7d   :  { %836 = vmatprep.subr.mxu1 %v189_v18  ;;  %844 = vmatprep.subr.msk.mxu0 %vm65_vm0, %v323_v19 }
  0x7e   :  { %837 = vmatpush3.msra.mxu1 %v189_v18  ;;  %845 = vmatpush3.msk.msra.mxu0 %vm65_vm0, %v323_v19 }
  0x7f   :  { %891 = vmatprep.subr.msk.mxu1 %vm65_vm0, %v323_v19  ;;  %839 = vmatmul.mubr.msk.f32.vlgmr.msra.gmra.mxu1 %vm56_vm1, %v915_v9 }
  0x80   :  { %895 = vmatpush3.msk.msra.mxu1 %vm65_vm0, %v323_v19  ;;  %846 = vmatprep.subr.mxu0 %v321_v20  ;;  %v319_v21 = vpop.permute.xlu0 %318  ;;  %v317_v22 = vpop.permute.xlu1 %316 }
  0x81   :  { %892 = vmatprep.subr.mxu1 %v321_v20  ;;  %847 = vmatpush3.msra.mxu0 %v321_v20 }
  0x82   :  { %841 = vmatprep.mubr.msk.f32.mxu1 %vm56_vm1, %v916_v10  ;;  %896 = vmatpush3.msra.mxu1 %v321_v20 }
  0x83   :  { %848 = vmatprep.subr.mxu0 %v319_v21  ;;  %842 = vmatmul.mubr.msk.f32.gmra.mxu1 %vm56_vm1, %v917_v11 }
  0x84   :  { %893 = vmatprep.subr.mxu1 %v319_v21  ;;  %849 = vmatpush3.msra.mxu0 %v319_v21  ;;  %v200_v39 = vpop.permute.xlu0 %199 }
  0x85   :  { %897 = vmatpush3.msra.mxu1 %v319_v21  ;;  %850 = vmatprep.subr.mxu0 %v317_v22  ;;  %v290_v41 = vpop.permute.xlu1 %289 }
  0x86   :  { %894 = vmatprep.subr.mxu1 %v317_v22  ;;  %851 = vmatpush3.msra.mxu0 %v317_v22 }
  0x87   :  { %898 = vmatpush3.msra.mxu1 %v317_v22  ;;  %853 = vmatmul.mubr.msk.f32.vlgmr.msra.gmra.mxu0 %vm56_vm1, %v915_v9 }
  0x88   :  { %855 = vmatprep.mubr.msk.f32.mxu1 %vm56_vm1, %v916_v10  ;;  %v328_v51 = vpop.permute.xlu0 %327 }
  0x89   :  { %856 = vmatmul.mubr.msk.f32.vlgmr.msra.gmra.mxu1 %vm56_vm1, %v917_v11 }
  0xcd   :  { %v826_v23 = vpop.f32.mrf.mxu0 }
  0xce   :  { %v141_v24 = vadd.f32 %v826_v23, %v1030_v12 }
  0xcf   :  { %v135_v25 = vpop.f32.mrf.mxu0 }
  0xd0   :  { %v161_v26 = vadd.f32 %v1035_v13, %v141_v24  ;;  %v136_v27 = vadd.f32 %v1030_v12, %v135_v25 }
  0xd1   :  { %v829_v28 = vpop.f32.mrf.mxu0 }
  0xd2   :  { %v169_v29 = vcombine.high %v161_v26, %v161_v26  ;;  %179 = vst.msk [vmem:[#allocation2 + $0x8] sm:$0xf] %vm176_vm2, %v161_v26  ;;  %v160_v30 = vadd.f32 %v1035_v13, %v136_v27  ;;  %v151_v31 = vadd.f32 %v829_v28, %v1030_v12 }
  0xd3   :  { %v145_v32 = vpop.f32.mrf.mxu0 }
  0xd4   :  { %180 = vst.msk [vmem:[#allocation2 + $0xc] sm:$0xf] %vm176_vm2, %v169_v29  ;;  %v168_v33 = vcombine.high %v160_v30, %v160_v30  ;;  %177 = vst.msk [vmem:[#allocation2] sm:$0xf] %vm176_vm2, %v160_v30  ;;  %v163_v34 = vadd.f32 %v1035_v13, %v151_v31  ;;  %v146_v35 = vadd.f32 %v1030_v12, %v145_v32 }
  0xd6   :  { %178 = vst.msk [vmem:[#allocation2 + $0x4] sm:$0xf] %vm176_vm2, %v168_v33  ;;  %v171_v36 = vcombine.high %v163_v34, %v163_v34  ;;  %183 = vst.msk [vmem:[#allocation2 + $0x18] sm:$0xf] %vm176_vm2, %v163_v34  ;;  %v162_v37 = vadd.f32 %v1035_v13, %v146_v35 }
  0xd8   :  { %184 = vst.msk [vmem:[#allocation2 + $0x1c] sm:$0xf] %vm176_vm2, %v171_v36  ;;  %v170_v38 = vcombine.high %v162_v37, %v162_v37  ;;  %181 = vst.msk [vmem:[#allocation2 + $0x10] sm:$0xf] %vm176_vm2, %v162_v37 }
  0xda   :  { %182 = vst.msk [vmem:[#allocation2 + $0x14] sm:$0xf] %vm176_vm2, %v170_v38 }
 0x13f   :  { %v840_v40 = vpop.f32.mrf.mxu1 }
 0x140   :  { %v276_v42 = vadd.f32 %v840_v40, %v200_v39 }
 0x141   :  { %v270_v43 = vpop.f32.mrf.mxu1 }
 0x142   :  { %v271_v44 = vadd.f32 %v270_v43, %v200_v39  ;;  %v293_v45 = vadd.f32 %v290_v41, %v276_v42 }
 0x143   :  { %v843_v46 = vpop.f32.mrf.mxu1 }
 0x144   :  { %v292_v47 = vadd.f32 %v290_v41, %v271_v44  ;;  %v301_v48 = vcombine.high %v293_v45, %v293_v45  ;;  %310 = vst.msk [vmem:[#allocation3 + $0x8] sm:$0xf] %vm176_vm2, %v293_v45  ;;  %v286_v49 = vadd.f32 %v843_v46, %v200_v39 }
 0x145   :  { %v280_v50 = vpop.f32.mrf.mxu1 }
 0x146   :  { %v300_v52 = vcombine.high %v292_v47, %v292_v47  ;;  %308 = vst.msk [vmem:[#allocation3] sm:$0xf] %vm176_vm2, %v292_v47  ;;  %311 = vst.msk [vmem:[#allocation3 + $0xc] sm:$0xf] %vm176_vm2, %v301_v48  ;;  %v295_v53 = vadd.f32 %v290_v41, %v286_v49  ;;  %v281_v54 = vadd.f32 %v280_v50, %v200_v39 }
 0x147   :  { %v854_v55 = vpop.f32.mrf.mxu0 }
 0x148   :  { %309 = vst.msk [vmem:[#allocation3 + $0x4] sm:$0xf] %vm176_vm2, %v300_v52  ;;  %v303_v56 = vcombine.high %v295_v53, %v295_v53  ;;  %314 = vst.msk [vmem:[#allocation3 + $0x18] sm:$0xf] %vm176_vm2, %v295_v53  ;;  %v294_v57 = vadd.f32 %v290_v41, %v281_v54  ;;  %v404_v58 = vadd.f32 %v854_v55, %v328_v51 }
 0x149   :  { %v857_v59 = vpop.f32.mrf.mxu1  ;;  %v398_v60 = vpop.f32.mrf.mxu0 }
 0x14a   :  { %315 = vst.msk [vmem:[#allocation3 + $0x1c] sm:$0xf] %vm176_vm2, %v303_v56  ;;  %v302_v61 = vcombine.high %v294_v57, %v294_v57  ;;  %312 = vst.msk [vmem:[#allocation3 + $0x10] sm:$0xf] %vm176_vm2, %v294_v57  ;;  %v414_v62 = vadd.f32 %v857_v59, %v328_v51  ;;  %v422_v63 = vcombine.high %v404_v58, %v404_v58 }
 0x14b   :  { %431 = vst.msk [vmem:[#allocation4 + $0x8] sm:$0xf] %vm176_vm2, %v404_v58  ;;  %v399_v0 = vadd.f32 %v398_v60, %v328_v51  ;;  %v408_v1 = vpop.f32.mrf.mxu1 }
 0x14c   :  { %313 = vst.msk [vmem:[#allocation3 + $0x14] sm:$0xf] %vm176_vm2, %v302_v61  ;;  %v424_v2 = vcombine.high %v414_v62, %v414_v62  ;;  %432 = vst.msk [vmem:[#allocation4 + $0xc] sm:$0xf] %vm176_vm2, %v422_v63  ;;  %v409_v8 = vadd.f32 %v408_v1, %v328_v51 }
 0x14d   :  { %435 = vst.msk [vmem:[#allocation4 + $0x18] sm:$0xf] %vm176_vm2, %v414_v62  ;;  %v421_v3 = vcombine.high %v399_v0, %v399_v0  ;;  %429 = vst.msk [vmem:[#allocation4] sm:$0xf] %vm176_vm2, %v399_v0 }
 0x14e   :  { %436 = vst.msk [vmem:[#allocation4 + $0x1c] sm:$0xf] %vm176_vm2, %v424_v2  ;;  %v423_v9 = vcombine.high %v409_v8, %v409_v8  ;;  %433 = vst.msk [vmem:[#allocation4 + $0x10] sm:$0xf] %vm176_vm2, %v409_v8 }
 0x14f   :  { %430 = vst.msk [vmem:[#allocation4 + $0x4] sm:$0xf] %vm176_vm2, %v421_v3 }
 0x150   :  { %434 = vst.msk [vmem:[#allocation4 + $0x14] sm:$0xf] %vm176_vm2, %v423_v9 }
 0x151 LB: > { %s939_s3 = smov 96   ;;  %v940_v10 = vmov 0.0   ;;  %vm941_vm3 = vmmov 0   ;;  %s942_s4 = smov 64   ;;  %v1105_v11 = vld [vmem:[#allocation5] sm:$0xf]  ;;  %s934_s0 = sphi %s1089_s0, %s443_s0  }
 0x152   : > { %529 = vrot.lane.b32.xlu0 %v1005_v7, %s939_s3  ;;  %525 = vrot.lane.b32.xlu1 %v995_v5, %s939_s3  ;;  %vm445_vm4 = vcmask 261120   ;;  %s1119_s21 = sshll.u32 %s934_s0, 2  ;;  %s443_s0 = sadd.s32 1, %s934_s0  }
 0x153   : > { %858 = vmatprep.subr.mxu0 %v940_v10  ;;  %866 = vmatprep.mubr.msk.f32.mxu0 %vm941_vm3, %v940_v10  ;;  %s691_s22 = scalar_lea.vmem [#allocation2], %s1119_s21  ;;  %s700_s23 = scalar_lea.vmem [#allocation3], %s1119_s21 }
 0x154   : > { %859 = vmatpush3.msra.mxu0 %v1005_v7  ;;  %869 = vmatprep.subr.mxu1 %v940_v10  ;;  %v692_v23 = vld [vmem:[%s691_s22] sm:$0xf]  ;;  %s709_s24 = scalar_lea.vmem [#allocation4], %s1119_s21  ;;  %s719_s25 = scalar_lea.vmem [#allocation6], %s1119_s21 }
 0x155   : > { %860 = vmatprep.subr.mxu0 %v940_v10  ;;  %877 = vmatprep.mubr.msk.f32.mxu1 %vm941_vm3, %v940_v10  ;;  %v701_v28 = vld [vmem:[%s700_s23] sm:$0xf]  ;;  %p440_p0 = scmp.ge.s32.totalorder %s443_s0, 8  }
 0x156   : > { %527 = vrot.lane.b32.xlu0 %v1000_v6, %s939_s3  ;;  %523 = vrot.lane.b32.xlu1 %v990_v4, %s939_s3 }
 0x157   : > { %861 = vmatpush3.msra.mxu0 %v1000_v6  ;;  %v710_v39 = vld [vmem:[%s709_s24] sm:$0xf] }
 0x158   : > { %862 = vmatprep.subr.mxu0 %v940_v10 }
 0x159   : > { %863 = vmatpush3.msra.mxu0 %v995_v5 }
 0x15a   : > { %611 = vrot.lane.b32.xlu0 %v1005_v7, %s942_s4  ;;  %609 = vrot.lane.b32.xlu1 %v1000_v6, %s942_s4 }
 0x15b   : > { %864 = vmatprep.subr.mxu0 %v940_v10 }
 0x15c   : > { %865 = vmatpush3.msra.mxu0 %v990_v4 }
 0x15d   : > { %867 = vmatmul.mubr.msk.f32.vlgmr.msra.gmra.mxu0 %vm445_vm4, %v1105_v11  ;;  %880 = vmatprep.subr.mxu0 %v940_v10 }
 0x15e   : > { %607 = vrot.lane.b32.xlu0 %v995_v5, %s942_s4  ;;  %605 = vrot.lane.b32.xlu1 %v990_v4, %s942_s4 }
 0x15f   : > { %888 = vmatprep.mubr.msk.f32.mxu0 %vm941_vm3, %v940_v10 }
 0x162   : > { %617 = vrot.lane.b32.xlu0 %v1035_v13, %s942_s4 }
 0x1c4   : > { %v530_v12 = vpop.permute.xlu0 %529  ;;  %v526_v14 = vpop.permute.xlu1 %525 }
 0x1c5   : > { %870 = vmatpush3.msra.mxu1 %v530_v12 }
 0x1c6   : > { %871 = vmatprep.subr.mxu1 %v940_v10 }
 0x1c8   : > { %v528_v15 = vpop.permute.xlu0 %527  ;;  %v524_v16 = vpop.permute.xlu1 %523 }
 0x1c9   : > { %872 = vmatpush3.msra.mxu1 %v528_v15 }
 0x1ca   : > { %873 = vmatprep.subr.mxu1 %v940_v10 }
 0x1cb   : > { %874 = vmatpush3.msra.mxu1 %v526_v14 }
 0x1cc   : > { %875 = vmatprep.subr.mxu1 %v940_v10  ;;  %v612_v17 = vpop.permute.xlu0 %611  ;;  %v610_v18 = vpop.permute.xlu1 %609 }
 0x1cd   : > { %876 = vmatpush3.msra.mxu1 %v524_v16  ;;  %881 = vmatpush3.msra.mxu0 %v612_v17 }
 0x1ce   : > { %878 = vmatmul.mubr.msk.f32.vlgmr.msra.gmra.mxu1 %vm445_vm4, %v1105_v11  ;;  %882 = vmatprep.subr.mxu0 %v940_v10 }
 0x1cf   : > { %883 = vmatpush3.msra.mxu0 %v610_v18 }
 0x1d0   : > { %v608_v19 = vpop.permute.xlu0 %607  ;;  %884 = vmatprep.subr.mxu0 %v940_v10  ;;  %v606_v20 = vpop.permute.xlu1 %605 }
 0x1d1   : > { %885 = vmatpush3.msra.mxu0 %v608_v19 }
 0x1d2   : > { %886 = vmatprep.subr.mxu0 %v940_v10 }
 0x1d3   : > { %887 = vmatpush3.msra.mxu0 %v606_v20 }
 0x1d4   : > { %889 = vmatmul.mubr.msk.f32.vlgmr.msra.gmra.mxu0 %vm445_vm4, %v1105_v11  ;;  %v618_v33 = vpop.permute.xlu0 %617 }
 0x21d   : > { %v515_v21 = vpop.f32.mrf.mxu0 }
 0x21e   : > { %v693_v24 = vadd.f32 %v692_v23, %v515_v21 }
 0x21f   : > { %v868_v22 = vpop.f32.mrf.mxu0 }
 0x220   : > { %v775_v25 = vmul.f32 -1.442695, %v693_v24 }
 0x222   : > { %918 = vpow2.f32 %v775_v25 }
 0x22f   : > { %v919_v26 = vpop.eup %918 }
 0x230   : > { %v697_v27 = vadd.f32 1.0, %v919_v26 }
 0x232   : > { %920 = vrcp.f32 %v697_v27 }
 0x23f   : > { %v921_v37 = vpop.eup %920 }
 0x28e   : > { %v601_v29 = vpop.f32.mrf.mxu1 }
 0x28f   : > { %v702_v30 = vadd.f32 %v701_v28, %v601_v29 }
 0x290   : > { %v879_v31 = vpop.f32.mrf.mxu1 }
 0x291   : > { %v776_v32 = vmul.f32 -1.442695, %v702_v30 }
 0x293   : > { %922 = vpow2.f32 %v776_v32 }
 0x294   : > { %v686_v34 = vpop.f32.mrf.mxu0 }
 0x295   : > { %v687_v35 = vadd.f32 %v686_v34, %v618_v33 }
 0x296   : > { %v890_v36 = vpop.f32.mrf.mxu0 }
 0x297   : > { %v711_v38 = vmul.f32 %v921_v37, %v687_v35 }
 0x299   : > { %v712_v40 = vadd.f32 %v711_v38, %v710_v39 }
 0x29b   : > { %924 = vtanh.f32 %v712_v40 }
 0x2a0   : > { %v923_v41 = vpop.eup %922 }
 0x2a1   : > { %v706_v42 = vadd.f32 1.0, %v923_v41 }
 0x2a3   : > { %926 = vrcp.f32 %v706_v42 }
 0x2a8   : > { %v925_v43 = vpop.eup %924 }
 0x2b0   : > { %v927_v44 = vpop.eup %926 }
 0x2b1   : > { %v714_v45 = vsub.f32 1.0, %v927_v44  ;;  %v716_v46 = vmul.f32 %v927_v44, %v1105_v11 }
 0x2b3   : > { %v715_v47 = vmul.f32 %v925_v43, %v714_v45  ;;  %442 = sbr.rel (!%p440_p0) target bundleno = 337 (0x151), region = 51 }
 0x2b5   : > { %v717_v48 = vadd.f32 %v716_v46, %v715_v47 }
 0x2b7   : > { %718 = vst.msk [vmem:[#allocation5] sm:$0xf] %vm176_vm2, %v717_v48  ;;  %720 = vst.msk [vmem:[%s719_s25] sm:$0xf] %vm176_vm2, %v717_v48 }
 0x2be   :  { %v721_v49 = vld [vmem:[#allocation6] sm:$0xf]  ;;  %v722_v50 = vld [vmem:[#allocation6 + $0x4] sm:$0xf]  ;;  %v723_v51 = vld [vmem:[#allocation6 + $0x8] sm:$0xf] }
 0x2bf   :  { %729 = vst.msk [vmem:[%s1165_s5] sm:$0xf] %vm176_vm2, %v721_v49  ;;  %730 = vst.msk [vmem:[%s1165_s5 + $0x4] sm:$0xf] %vm176_vm2, %v722_v50  ;;  %v724_v52 = vld [vmem:[#allocation6 + $0xc] sm:$0xf] }
 0x2c0   :  { %731 = vst.msk [vmem:[%s1165_s5 + $0x8] sm:$0xf] %vm176_vm2, %v723_v51  ;;  %v725_v53 = vld [vmem:[#allocation6 + $0x10] sm:$0xf]  ;;  %v726_v4 = vld [vmem:[#allocation6 + $0x14] sm:$0xf] }
 0x2c1   :  { %732 = vst.msk [vmem:[%s1165_s5 + $0xc] sm:$0xf] %vm176_vm2, %v724_v52  ;;  %733 = vst.msk [vmem:[%s1165_s5 + $0x10] sm:$0xf] %vm176_vm2, %v725_v53  ;;  %v727_v5 = vld [vmem:[#allocation6 + $0x18] sm:$0xf] }
 0x2c2   :  { %734 = vst.msk [vmem:[%s1165_s5 + $0x14] sm:$0xf] %vm176_vm2, %v726_v4  ;;  %v728_v6 = vld [vmem:[#allocation6 + $0x1c] sm:$0xf]  ;;  %735 = vst.msk [vmem:[%s1165_s5 + $0x18] sm:$0xf] %vm176_vm2, %v727_v5 }
 0x2c3   :  { %736 = vst.msk [vmem:[%s1165_s5 + $0x1c] sm:$0xf] %vm176_vm2, %v728_v6 }

// kernel: forward.17
= control target key start
LH: loop header
LB: loop body
LE: loop exit
PB: predicated region body
PF: predicated region fallthrough
CT: control target
= control target key end

     0   :  { %s1101_s30 = smov 96   ;;  %vm62_vm0 = vcmask 261120   ;;  %s1102_s20 = smov 64   ;;  %vm178_vm1 = vcmask 257024   ;;  %v1103_v14 = vmov 0.0   ;;  %s1349_s1 = inlined_call_operand.vmem [shape: f32[32,96], index: 1, kind: input, shape index: {}]   ;;  %s1350_s2 = inlined_call_operand.vmem [shape: f32[32,96], index: 2, kind: input, shape index: {}]   ;;  %s1351_s5 = inlined_call_operand.vmem [shape: f32[32,4], index: 5, kind: input, shape index: {}]   ;;  %s1352_s6 = inlined_call_operand.vmem [shape: f32[1,4], index: 6, kind: input, shape index: {}]   ;;  %s1353_s7 = inlined_call_operand.vmem [shape: f32[8,4,4], index: 7, kind: output, shape index: {}]   ;;  %s1354_s0 = inlined_call_operand.vmem [shape: f32[8,4,32], index: 0, kind: input, shape index: {}]   ;;  %s1355_s3 = inlined_call_operand.vmem [shape: f32[1,96], index: 3, kind: input, shape index: {}]   ;;  %s1356_s4 = inlined_call_operand.vmem [shape: f32[1,96], index: 4, kind: input, shape index: {}]  }
   0x1   :  { %v37_v0 = vld [vmem:[%s1349_s1 + $0x18] sm:$0xff]  ;;  %v35_v1 = vld [vmem:[%s1349_s1 + $0x8] sm:$0xff]  ;;  %v36_v2 = vld [vmem:[%s1349_s1 + $0x10] sm:$0xff]  ;;  %438 = vst.msk [vmem:[#allocation5] sm:$0xf] %vm178_vm1, %v1103_v14 }
   0x2   :  { %197 = vrot.lane.b32.xlu0 %v37_v0, %s1101_s30  ;;  %193 = vrot.lane.b32.xlu1 %v35_v1, %s1101_s30  ;;  %v34_v3 = vld [vmem:[%s1349_s1] sm:$0xff]  ;;  %v1170_v5 = vld [vmem:[%s1350_s2 + $0x8] sm:$0xff] }
   0x3   :  { %v1165_v4 = vld [vmem:[%s1350_s2] sm:$0xff]  ;;  %v1175_v6 = vld [vmem:[%s1350_s2 + $0x10] sm:$0xff]  ;;  %v1180_v7 = vld [vmem:[%s1350_s2 + $0x18] sm:$0xff]  ;;  %955 = vmatprep.subr.mxu0 %v37_v0 }
   0x4   :  { %956 = vmatpush3.msra.mxu0 %v37_v0  ;;  %v1075_v8 = vld [vmem:[%s1354_s0] sm:$0xff]   ;;  %v1076_v9 = vld [vmem:[%s1354_s0 + $0x8] sm:$0xff]   ;;  %v1077_v10 = vld [vmem:[%s1354_s0 + $0x10] sm:$0xff]  }
   0x5   :  { %957 = vmatprep.subr.mxu0 %v36_v2  ;;  %963 = vmatprep.mubr.msk.f32.mxu0 %vm62_vm0, %v1075_v8  ;;  %v1078_v11 = vld [vmem:[%s1354_s0 + $0x18] sm:$0xff]   ;;  %v1203_v12 = vld [vmem:[%s1355_s3] ss:$0 sm:$0xff]  ;;  %s1256_s0 = smov 0  }
   0x6   :  { %195 = vrot.lane.b32.xlu0 %v36_v2, %s1101_s30  ;;  %191 = vrot.lane.b32.xlu1 %v34_v3, %s1101_s30  ;;  %v1208_v13 = vld [vmem:[%s1356_s4] ss:$0 sm:$0xff] }
   0x7   :  { %958 = vmatpush3.msra.mxu0 %v36_v2  ;;  %977 = vmatprep.mubr.msk.f32.mxu1 %vm62_vm0, %v1075_v8 }
   0x8   :  { %959 = vmatprep.subr.mxu0 %v35_v1 }
   0x9   :  { %960 = vmatpush3.msra.mxu0 %v35_v1 }
   0xa   :  { %324 = vrot.lane.b32.xlu0 %v37_v0, %s1102_s20  ;;  %322 = vrot.lane.b32.xlu1 %v36_v2, %s1102_s20 }
   0xb   :  { %961 = vmatprep.subr.mxu0 %v34_v3 }
   0xc   :  { %962 = vmatpush3.msra.mxu0 %v34_v3 }
   0xd   :  { %964 = vmatmul.mubr.msk.f32.vlgmr.msra.gmra.mxu0 %vm62_vm0, %v1076_v9 }
   0xe   :  { %320 = vrot.lane.b32.xlu0 %v35_v1, %s1102_s20  ;;  %318 = vrot.lane.b32.xlu1 %v34_v3, %s1102_s20 }
   0xf   :  { %966 = vmatprep.mubr.msk.f32.mxu0 %vm62_vm0, %v1077_v10 }
  0x11   :  { %967 = vmatmul.mubr.msk.f32.gmra.mxu0 %vm62_vm0, %v1078_v11 }
  0x12   :  { %991 = vmatprep.mubr.msk.f32.mxu0 %vm62_vm0, %v1075_v8  ;;  %203 = vrot.lane.b32.xlu0 %v1203_v12, %s1101_s30 }
  0x13   :  { %291 = vrot.lane.b32.xlu1 %v1208_v13, %s1101_s30 }
  0x16   :  { %330 = vrot.lane.b32.xlu0 %v1203_v12, %s1102_s20 }
  0x74   :  { %v198_v15 = vpop.permute.xlu0 %197  ;;  %v194_v16 = vpop.permute.xlu1 %193 }
  0x75   :  { %969 = vmatprep.subr.mxu1 %v198_v15 }
  0x76   :  { %970 = vmatpush3.msra.mxu1 %v198_v15 }
  0x78   :  { %v196_v17 = vpop.permute.xlu0 %195  ;;  %v192_v18 = vpop.permute.xlu1 %191 }
  0x79   :  { %971 = vmatprep.subr.mxu1 %v196_v17 }
  0x7a   :  { %972 = vmatpush3.msra.mxu1 %v196_v17 }
  0x7b   :  { %973 = vmatprep.subr.mxu1 %v194_v16 }
  0x7c   :  { %974 = vmatpush3.msra.mxu1 %v194_v16  ;;  %v325_v19 = vpop.permute.xlu0 %324  ;;  %v323_v20 = vpop.permute.xlu1 %322 }
  0x7d   :  { %975 = vmatprep.subr.mxu1 %v192_v18  ;;  %983 = vmatprep.subr.mxu0 %v325_v19 }
  0x7e   :  { %976 = vmatpush3.msra.mxu1 %v192_v18  ;;  %984 = vmatpush3.msra.mxu0 %v325_v19 }
  0x7f   :  { %1044 = vmatprep.subr.mxu1 %v325_v19  ;;  %978 = vmatmul.mubr.msk.f32.vlgmr.msra.gmra.mxu1 %vm62_vm0, %v1076_v9 }
  0x80   :  { %1048 = vmatpush3.msra.mxu1 %v325_v19  ;;  %985 = vmatprep.subr.mxu0 %v323_v20  ;;  %v321_v21 = vpop.permute.xlu0 %320  ;;  %v319_v22 = vpop.permute.xlu1 %318 }
  0x81   :  { %1045 = vmatprep.subr.mxu1 %v323_v20  ;;  %986 = vmatpush3.msra.mxu0 %v323_v20 }
  0x82   :  { %980 = vmatprep.mubr.msk.f32.mxu1 %vm62_vm0, %v1077_v10  ;;  %1049 = vmatpush3.msra.mxu1 %v323_v20 }
  0x83   :  { %987 = vmatprep.subr.mxu0 %v321_v21  ;;  %981 = vmatmul.mubr.msk.f32.gmra.mxu1 %vm62_vm0, %v1078_v11 }
  0x84   :  { %1046 = vmatprep.subr.mxu1 %v321_v21  ;;  %988 = vmatpush3.msra.mxu0 %v321_v21  ;;  %v204_v39 = vpop.permute.xlu0 %203 }
  0x85   :  { %1050 = vmatpush3.msra.mxu1 %v321_v21  ;;  %989 = vmatprep.subr.mxu0 %v319_v22  ;;  %v292_v41 = vpop.permute.xlu1 %291 }
  0x86   :  { %1047 = vmatprep.subr.mxu1 %v319_v22  ;;  %990 = vmatpush3.msra.mxu0 %v319_v22 }
  0x87   :  { %1051 = vmatpush3.msra.mxu1 %v319_v22  ;;  %992 = vmatmul.mubr.msk.f32.vlgmr.msra.gmra.mxu0 %vm62_vm0, %v1076_v9 }
  0x88   :  { %994 = vmatprep.mubr.msk.f32.mxu1 %vm62_vm0, %v1077_v10  ;;  %v331_v51 = vpop.permute.xlu0 %330 }
  0x89   :  { %995 = vmatmul.mubr.msk.f32.vlgmr.msra.gmra.mxu1 %vm62_vm0, %v1078_v11 }
  0xcd   :  { %v965_v23 = vpop.f32.mrf.mxu0 }
  0xce   :  { %v143_v24 = vadd.f32 %v965_v23, %v1203_v12 }
  0xcf   :  { %v137_v25 = vpop.f32.mrf.mxu0 }
  0xd0   :  { %v163_v26 = vadd.f32 %v1208_v13, %v143_v24  ;;  %v138_v27 = vadd.f32 %v1203_v12, %v137_v25 }
  0xd1   :  { %v968_v28 = vpop.f32.mrf.mxu0 }
  0xd2   :  { %v171_v29 = vcombine.high %v163_v26, %v163_v26  ;;  %181 = vst.msk [vmem:[#allocation2 + $0x8] sm:$0xf] %vm178_vm1, %v163_v26  ;;  %v162_v30 = vadd.f32 %v1208_v13, %v138_v27  ;;  %v153_v31 = vadd.f32 %v968_v28, %v1203_v12 }
  0xd3   :  { %v147_v32 = vpop.f32.mrf.mxu0 }
  0xd4   :  { %182 = vst.msk [vmem:[#allocation2 + $0xc] sm:$0xf] %vm178_vm1, %v171_v29  ;;  %v170_v33 = vcombine.high %v162_v30, %v162_v30  ;;  %179 = vst.msk [vmem:[#allocation2] sm:$0xf] %vm178_vm1, %v162_v30  ;;  %v165_v34 = vadd.f32 %v1208_v13, %v153_v31  ;;  %v148_v35 = vadd.f32 %v1203_v12, %v147_v32 }
  0xd6   :  { %180 = vst.msk [vmem:[#allocation2 + $0x4] sm:$0xf] %vm178_vm1, %v170_v33  ;;  %v173_v36 = vcombine.high %v165_v34, %v165_v34  ;;  %185 = vst.msk [vmem:[#allocation2 + $0x18] sm:$0xf] %vm178_vm1, %v165_v34  ;;  %v164_v37 = vadd.f32 %v1208_v13, %v148_v35 }
  0xd8   :  { %186 = vst.msk [vmem:[#allocation2 + $0x1c] sm:$0xf] %vm178_vm1, %v173_v36  ;;  %v172_v38 = vcombine.high %v164_v37, %v164_v37  ;;  %183 = vst.msk [vmem:[#allocation2 + $0x10] sm:$0xf] %vm178_vm1, %v164_v37 }
  0xda   :  { %184 = vst.msk [vmem:[#allocation2 + $0x14] sm:$0xf] %vm178_vm1, %v172_v38 }
 0x13f   :  { %v979_v40 = vpop.f32.mrf.mxu1 }
 0x140   :  { %v278_v42 = vadd.f32 %v979_v40, %v204_v39 }
 0x141   :  { %v272_v43 = vpop.f32.mrf.mxu1 }
 0x142   :  { %v273_v44 = vadd.f32 %v272_v43, %v204_v39  ;;  %v295_v45 = vadd.f32 %v292_v41, %v278_v42 }
 0x143   :  { %v982_v46 = vpop.f32.mrf.mxu1 }
 0x144   :  { %v294_v47 = vadd.f32 %v292_v41, %v273_v44  ;;  %v303_v48 = vcombine.high %v295_v45, %v295_v45  ;;  %312 = vst.msk [vmem:[#allocation3 + $0x8] sm:$0xf] %vm178_vm1, %v295_v45  ;;  %v288_v49 = vadd.f32 %v982_v46, %v204_v39 }
 0x145   :  { %v282_v50 = vpop.f32.mrf.mxu1 }
 0x146   :  { %v302_v52 = vcombine.high %v294_v47, %v294_v47  ;;  %310 = vst.msk [vmem:[#allocation3] sm:$0xf] %vm178_vm1, %v294_v47  ;;  %313 = vst.msk [vmem:[#allocation3 + $0xc] sm:$0xf] %vm178_vm1, %v303_v48  ;;  %v297_v53 = vadd.f32 %v292_v41, %v288_v49  ;;  %v283_v54 = vadd.f32 %v282_v50, %v204_v39 }
 0x147   :  { %v993_v55 = vpop.f32.mrf.mxu0 }
 0x148   :  { %311 = vst.msk [vmem:[#allocation3 + $0x4] sm:$0xf] %vm178_vm1, %v302_v52  ;;  %v305_v56 = vcombine.high %v297_v53, %v297_v53  ;;  %316 = vst.msk [vmem:[#allocation3 + $0x18] sm:$0xf] %vm178_vm1, %v297_v53  ;;  %v296_v57 = vadd.f32 %v292_v41, %v283_v54  ;;  %v405_v58 = vadd.f32 %v993_v55, %v331_v51 }
 0x149   :  { %v996_v59 = vpop.f32.mrf.mxu1  ;;  %v399_v60 = vpop.f32.mrf.mxu0 }
 0x14a   :  { %317 = vst.msk [vmem:[#allocation3 + $0x1c] sm:$0xf] %vm178_vm1, %v305_v56  ;;  %v304_v61 = vcombine.high %v296_v57, %v296_v57  ;;  %314 = vst.msk [vmem:[#allocation3 + $0x10] sm:$0xf] %vm178_vm1, %v296_v57  ;;  %v415_v62 = vadd.f32 %v996_v59, %v331_v51  ;;  %v423_v63 = vcombine.high %v405_v58, %v405_v58 }
 0x14b   :  { %432 = vst.msk [vmem:[#allocation4 + $0x8] sm:$0xf] %vm178_vm1, %v405_v58  ;;  %v400_v0 = vadd.f32 %v399_v60, %v331_v51  ;;  %v409_v1 = vpop.f32.mrf.mxu1 }
 0x14c   :  { %315 = vst.msk [vmem:[#allocation3 + $0x14] sm:$0xf] %vm178_vm1, %v304_v61  ;;  %v425_v2 = vcombine.high %v415_v62, %v415_v62  ;;  %433 = vst.msk [vmem:[#allocation4 + $0xc] sm:$0xf] %vm178_vm1, %v423_v63  ;;  %v410_v8 = vadd.f32 %v409_v1, %v331_v51 }
 0x14d   :  { %436 = vst.msk [vmem:[#allocation4 + $0x18] sm:$0xf] %vm178_vm1, %v415_v62  ;;  %v422_v3 = vcombine.high %v400_v0, %v400_v0  ;;  %430 = vst.msk [vmem:[#allocation4] sm:$0xf] %vm178_vm1, %v400_v0 }
 0x14e   :  { %437 = vst.msk [vmem:[#allocation4 + $0x1c] sm:$0xf] %vm178_vm1, %v425_v2  ;;  %v424_v9 = vcombine.high %v410_v8, %v410_v8  ;;  %434 = vst.msk [vmem:[#allocation4 + $0x10] sm:$0xf] %vm178_vm1, %v410_v8 }
 0x14f   :  { %431 = vst.msk [vmem:[#allocation4 + $0x4] sm:$0xf] %vm178_vm1, %v422_v3 }
 0x150   :  { %435 = vst.msk [vmem:[#allocation4 + $0x14] sm:$0xf] %vm178_vm1, %v424_v9 }
 0x151 LB: > { %s1104_s3 = smov 96   ;;  %v1105_v10 = vmov 0.0   ;;  %vm1106_vm2 = vmmov 0   ;;  %s1107_s4 = smov 64   ;;  %v1272_v11 = vld [vmem:[#allocation5] sm:$0xf]  ;;  %s1099_s0 = sphi %s1256_s0, %s444_s0  }
 0x152   : > { %529 = vrot.lane.b32.xlu0 %v1180_v7, %s1104_s3  ;;  %525 = vrot.lane.b32.xlu1 %v1170_v5, %s1104_s3  ;;  %s1286_s29 = sshll.u32 %s1099_s0, 2  ;;  %s444_s0 = sadd.s32 1, %s1099_s0  }
 0x153   : > { %997 = vmatprep.subr.mxu0 %v1105_v10  ;;  %1005 = vmatprep.mubr.msk.f32.mxu0 %vm1106_vm2, %v1105_v10  ;;  %s691_s30 = scalar_lea.vmem [#allocation2], %s1286_s29  ;;  %s700_s8 = scalar_lea.vmem [#allocation3], %s1286_s29 }
 0x154   : > { %998 = vmatpush3.msra.mxu0 %v1180_v7  ;;  %1008 = vmatprep.subr.mxu1 %v1105_v10  ;;  %v692_v23 = vld [vmem:[%s691_s30] sm:$0xf]  ;;  %s709_s9 = scalar_lea.vmem [#allocation4], %s1286_s29  ;;  %s719_s10 = scalar_lea.vmem [#allocation6], %s1286_s29 }
 0x155   : > { %999 = vmatprep.subr.mxu0 %v1105_v10  ;;  %1016 = vmatprep.mubr.msk.f32.mxu1 %vm1106_vm2, %v1105_v10  ;;  %v701_v28 = vld [vmem:[%s700_s8] sm:$0xf]  ;;  %p441_p0 = scmp.ge.s32.totalorder %s444_s0, 8  }
 0x156   : > { %527 = vrot.lane.b32.xlu0 %v1175_v6, %s1104_s3  ;;  %523 = vrot.lane.b32.xlu1 %v1165_v4, %s1104_s3  ;;  %v732_v49 = vld [vmem:[%s1351_s5 + $0x18] sm:$0xff] (%p441_p0)  ;;  %v731_v50 = vld [vmem:[%s1351_s5 + $0x10] sm:$0xff] (%p441_p0)  ;;  %vm857_vm3 = vcmask (%p441_p0), 27648  }
 0x157   : > { %1000 = vmatpush3.msra.mxu0 %v1175_v6  ;;  %v710_v39 = vld [vmem:[%s709_s9] sm:$0xf]  ;;  %v730_v51 = vld [vmem:[%s1351_s5 + $0x8] sm:$0xff] (%p441_p0) }
 0x158   : > { %1001 = vmatprep.subr.mxu0 %v1105_v10  ;;  %v903_v52 = vld [vmem:[%s1352_s6] ss:$0 sm:$0xff] (%p441_p0) }
 0x159   : > { %1002 = vmatpush3.msra.mxu0 %v1170_v5 }
 0x15a   : > { %611 = vrot.lane.b32.xlu0 %v1180_v7, %s1107_s4  ;;  %609 = vrot.lane.b32.xlu1 %v1175_v6, %s1107_s4 }
 0x15b   : > { %1003 = vmatprep.subr.mxu0 %v1105_v10 }
 0x15c   : > { %1004 = vmatpush3.msra.mxu0 %v1165_v4 }
 0x15d   : > { %1006 = vmatmul.mubr.msk.f32.vlgmr.msra.gmra.mxu0 %vm62_vm0, %v1272_v11  ;;  %1019 = vmatprep.subr.mxu0 %v1105_v10 }
 0x15e   : > { %607 = vrot.lane.b32.xlu0 %v1170_v5, %s1107_s4  ;;  %605 = vrot.lane.b32.xlu1 %v1165_v4, %s1107_s4  ;;  %v729_v4 = vld [vmem:[%s1351_s5] sm:$0xff] (%p441_p0) }
 0x15f   : > { %1027 = vmatprep.mubr.msk.f32.mxu0 %vm1106_vm2, %v1105_v10 }
 0x162   : > { %617 = vrot.lane.b32.xlu0 %v1208_v13, %s1107_s4 }
 0x1c4   : > { %v530_v12 = vpop.permute.xlu0 %529  ;;  %v526_v14 = vpop.permute.xlu1 %525 }
 0x1c5   : > { %1009 = vmatpush3.msra.mxu1 %v530_v12 }
 0x1c6   : > { %1010 = vmatprep.subr.mxu1 %v1105_v10 }
 0x1c8   : > { %v528_v15 = vpop.permute.xlu0 %527  ;;  %v524_v16 = vpop.permute.xlu1 %523 }
 0x1c9   : > { %1011 = vmatpush3.msra.mxu1 %v528_v15 }
 0x1ca   : > { %1012 = vmatprep.subr.mxu1 %v1105_v10 }
 0x1cb   : > { %1013 = vmatpush3.msra.mxu1 %v526_v14 }
 0x1cc   : > { %1014 = vmatprep.subr.mxu1 %v1105_v10  ;;  %v612_v17 = vpop.permute.xlu0 %611  ;;  %v610_v18 = vpop.permute.xlu1 %609 }
 0x1cd   : > { %1015 = vmatpush3.msra.mxu1 %v524_v16  ;;  %1020 = vmatpush3.msra.mxu0 %v612_v17 }
 0x1ce   : > { %1017 = vmatmul.mubr.msk.f32.vlgmr.msra.gmra.mxu1 %vm62_vm0, %v1272_v11  ;;  %1021 = vmatprep.subr.mxu0 %v1105_v10 }
 0x1cf   : > { %1022 = vmatpush3.msra.mxu0 %v610_v18  ;;  %1052 = vmatprep.subr.mxu1 (%p441_p0), %v732_v49 }
 0x1d0   : > { %v608_v19 = vpop.permute.xlu0 %607  ;;  %1023 = vmatprep.subr.mxu0 %v1105_v10  ;;  %v606_v20 = vpop.permute.xlu1 %605  ;;  %1056 = vmatpush3.msra.mxu1 (%p441_p0), %v732_v49 }
 0x1d1   : > { %1024 = vmatpush3.msra.mxu0 %v608_v19  ;;  %1053 = vmatprep.subr.mxu1 (%p441_p0), %v731_v50 }
 0x1d2   : > { %1025 = vmatprep.subr.mxu0 %v1105_v10  ;;  %1057 = vmatpush3.msra.mxu1 (%p441_p0), %v731_v50 }
 0x1d3   : > { %1026 = vmatpush3.msra.mxu0 %v606_v20  ;;  %1054 = vmatprep.subr.mxu1 (%p441_p0), %v730_v51 }
 0x1d4   : > { %1028 = vmatmul.mubr.msk.f32.vlgmr.msra.gmra.mxu0 %vm62_vm0, %v1272_v11  ;;  %v618_v33 = vpop.permute.xlu0 %617  ;;  %1030 = vmatprep.subr.mxu0 (%p441_p0), %v732_v49 }
 0x1d5   :  { %1031 = vmatpush3.msra.mxu0 (%p441_p0), %v732_v49  ;;  %1058 = vmatpush3.msra.mxu1 (%p441_p0), %v730_v51 }
 0x1d6   :  { %1032 = vmatprep.subr.mxu0 (%p441_p0), %v731_v50  ;;  %1055 = vmatprep.subr.mxu1 (%p441_p0), %v729_v4 }
 0x1d7   :  { %1033 = vmatpush3.msra.mxu0 (%p441_p0), %v731_v50  ;;  %1059 = vmatpush3.msra.mxu1 (%p441_p0), %v729_v4 }
 0x1d8   :  { %1034 = vmatprep.subr.mxu0 (%p441_p0), %v730_v51 }
 0x1d9   :  { %1035 = vmatpush3.msra.mxu0 (%p441_p0), %v730_v51 }
 0x1da   :  { %1036 = vmatprep.subr.mxu0 (%p441_p0), %v729_v4 }
 0x1db   :  { %1037 = vmatpush3.msra.mxu0 (%p441_p0), %v729_v4 }
 0x21d   : > { %v515_v21 = vpop.f32.mrf.mxu0 }
 0x21e   : > { %v693_v24 = vadd.f32 %v692_v23, %v515_v21 }
 0x21f   : > { %v1007_v22 = vpop.f32.mrf.mxu0 }
 0x220   : > { %v901_v25 = vmul.f32 -1.442695, %v693_v24 }
 0x222   : > { %1079 = vpow2.f32 %v901_v25 }
 0x22f   : > { %v1080_v26 = vpop.eup %1079 }
 0x230   : > { %v697_v27 = vadd.f32 1.0, %v1080_v26 }
 0x232   : > { %1081 = vrcp.f32 %v697_v27 }
 0x23f   : > { %v1082_v37 = vpop.eup %1081 }
 0x28e   : > { %v601_v29 = vpop.f32.mrf.mxu1 }
 0x28f   : > { %v702_v30 = vadd.f32 %v701_v28, %v601_v29 }
 0x290   : > { %v1018_v31 = vpop.f32.mrf.mxu1 }
 0x291   : > { %v902_v32 = vmul.f32 -1.442695, %v702_v30 }
 0x293   : > { %1083 = vpow2.f32 %v902_v32 }
 0x294   : > { %v686_v34 = vpop.f32.mrf.mxu0 }
 0x295   : > { %v687_v35 = vadd.f32 %v686_v34, %v618_v33 }
 0x296   : > { %v1029_v36 = vpop.f32.mrf.mxu0 }
 0x297   : > { %v711_v38 = vmul.f32 %v1082_v37, %v687_v35 }
 0x299   : > { %v712_v40 = vadd.f32 %v711_v38, %v710_v39 }
 0x29b   : > { %1085 = vtanh.f32 %v712_v40 }
 0x2a0   : > { %v1084_v41 = vpop.eup %1083 }
 0x2a1   : > { %v706_v42 = vadd.f32 1.0, %v1084_v41 }
 0x2a3   : > { %1087 = vrcp.f32 %v706_v42 }
 0x2a8   : > { %v1086_v43 = vpop.eup %1085 }
 0x2b0   : > { %v1088_v44 = vpop.eup %1087 }
 0x2b1   : > { %v714_v45 = vsub.f32 1.0, %v1088_v44  ;;  %v716_v46 = vmul.f32 %v1088_v44, %v1272_v11 }
 0x2b3   : > { %v715_v47 = vmul.f32 %v1086_v43, %v714_v45  ;;  %443 = sbr.rel (!%p441_p0) target bundleno = 337 (0x151), region = 59 }
 0x2b5   : > { %v717_v48 = vadd.f32 %v716_v46, %v715_v47 }
 0x2b7   : > { %718 = vst.msk [vmem:[#allocation5] sm:$0xf] %vm178_vm1, %v717_v48  ;;  %720 = vst.msk [vmem:[%s719_s10] sm:$0xf] %vm178_vm1, %v717_v48 }
 0x2be   :  { %v1089_v5 = vld [vmem:[#allocation6] sm:$0xff]   ;;  %v1090_v6 = vld [vmem:[#allocation6 + $0x10] sm:$0xff]   ;;  %v1091_v7 = vld [vmem:[#allocation6 + $0x8] sm:$0xff]  }
 0x2bf   :  { %v1092_v13 = vld [vmem:[#allocation6 + $0x18] sm:$0xff]   ;;  %1038 = vmatprep.mubr.msk.f32.mxu0 %vm62_vm0, %v1089_v5  ;;  %1041 = vmatprep.mubr.msk.f32.mxu1 %vm62_vm0, %v1090_v6 }
 0x2c0   :  { %1039 = vmatmul.mubr.msk.f32.vlgmr.msra.gmra.mxu0 %vm62_vm0, %v1091_v7  ;;  %1042 = vmatmul.mubr.msk.f32.vlgmr.msra.gmra.mxu1 %vm62_vm0, %v1092_v13 }
 0x380   :  { %v1040_v53 = vpop.f32.mrf.mxu0  ;;  %v1043_v54 = vpop.f32.mrf.mxu1 }
 0x381   :  { %v832_v55 = vadd.f32 %v1040_v53, %v903_v52  ;;  %v842_v56 = vadd.f32 %v1043_v54, %v903_v52 }
 0x382   :  { %v826_v57 = vpop.f32.mrf.mxu0  ;;  %v836_v58 = vpop.f32.mrf.mxu1 }
 0x383   :  { %v850_v59 = vcombine.high %v832_v55, %v832_v55  ;;  %860 = vst.msk [vmem:[%s1353_s7 + $0x8] sm:$0xf] %vm857_vm3, %v832_v55  ;;  %v852_v60 = vcombine.high %v842_v56, %v842_v56  ;;  %864 = vst.msk [vmem:[%s1353_s7 + $0x18] sm:$0xf] %vm857_vm3, %v842_v56  ;;  %v827_v61 = vadd.f32 %v903_v52, %v826_v57 }
 0x384   :  { %v837_v62 = vadd.f32 %v903_v52, %v836_v58 }
 0x385   :  { %861 = vst.msk [vmem:[%s1353_s7 + $0xc] sm:$0xf] %vm857_vm3, %v850_v59  ;;  %865 = vst.msk [vmem:[%s1353_s7 + $0x1c] sm:$0xf] %vm857_vm3, %v852_v60  ;;  %v849_v63 = vcombine.high %v827_v61, %v827_v61 }
 0x386   :  { %858 = vst.msk [vmem:[%s1353_s7] sm:$0xf] %vm857_vm3, %v827_v61  ;;  %v851_v0 = vcombine.high %v837_v62, %v837_v62  ;;  %862 = vst.msk [vmem:[%s1353_s7 + $0x10] sm:$0xf] %vm857_vm3, %v837_v62 }
 0x387   :  { %859 = vst.msk [vmem:[%s1353_s7 + $0x4] sm:$0xf] %vm857_vm3, %v849_v63 }
 0x388   :  { %863 = vst.msk [vmem:[%s1353_s7 + $0x14] sm:$0xf] %vm857_vm3, %v851_v0 }

// kernel: forward.11
= control target key start
LH: loop header
LB: loop body
LE: loop exit
PB: predicated region body
PF: predicated region fallthrough
CT: control target
= control target key end

     0   :  { %v91_v0 = vlaneseq  ;;  %v11132_v4 = vmov 1983009808   ;;  %vm154_vm0 = vcmask 130048   ;;  %v13941_v44 = vmov 0.0   ;;  %s11136_s27 = smov 96   ;;  %s11137_s28 = smov 104   ;;  %s13927_s1 = inlined_call_operand.vmem [shape: f32[16,48], index: 1, kind: input, shape index: {}]   ;;  %s13928_s0 = inlined_call_operand.vmem [shape: f32[16,2,16], index: 0, kind: input, shape index: {}]   ;;  %s13929_s2 = inlined_call_operand.vmem [shape: f32[1,48], index: 2, kind: input, shape index: {}]   ;;  %s13930_s3 = inlined_call_operand.vmem [shape: f32[16,16], index: 3, kind: input, shape index: {}]   ;;  %s13931_s4 = inlined_call_operand.vmem [shape: f32[1,16], index: 4, kind: input, shape index: {}]   ;;  %s13932_s5 = inlined_call_operand.vmem [shape: bf16[16,2048], index: 5, kind: input, shape index: {}]   ;;  %s13933_s9 = inlined_call_operand.vmem [shape: f32[1,16], index: 9, kind: input, shape index: {}]   ;;  %s13934_s10 = inlined_call_operand.vmem [shape: f32[1,16], index: 10, kind: input, shape index: {}]   ;;  %s13935_s7 = inlined_call_operand.vmem [shape: bf16[2048,16], index: 7, kind: input, shape index: {}]   ;;  %s13936_s6 = inlined_call_operand.vmem [shape: f32[1,2048], index: 6, kind: input, shape index: {}]   ;;  %s13937_s8 = inlined_call_operand.vmem [shape: f32[1,16], index: 8, kind: input, shape index: {}]   ;;  %s13938_s11 = inlined_call_operand.vmem [shape: f32[1,16], index: 11, kind: input, shape index: {}]   ;;  %s13939_s12 = inlined_call_operand.vmem [shape: f32[1,16], index: 12, kind: input, shape index: {}]   ;;  %s13940_s13 = inlined_call_operand.vmem [shape: f32[16,2,16], index: 13, kind: output, shape index: {}]  }
   0x1   :  { %v62_v1 = vld [vmem:[%s13927_s1 + $0x8] sm:$0xff]  ;;  %v61_v2 = vld [vmem:[%s13927_s1] sm:$0xff]  ;;  %v89_v5 = vunpack.c.l.s4 %v11132_v4  ;;  %v53_v18 = vld [vmem:[%s13928_s0 + $0x10] sm:$0x3]  ;;  %vm11134_vm1 = vmmov 0   ;;  %s11138_s29 = smov 120  }
   0x2   :  { %v45_v3 = vld [vmem:[%s13928_s0] sm:$0x3]  ;;  %10486 = vmatprep.subr.mxu0 %v62_v1  ;;  %v46_v6 = vld [vmem:[%s13928_s0 + $0x2] sm:$0x3]  ;;  %v47_v7 = vld [vmem:[%s13928_s0 + $0x4] sm:$0x3]  ;;  %10826 = vmatprep.subr.mxu1 %v62_v1 }
   0x3   :  { %v48_v8 = vld [vmem:[%s13928_s0 + $0x6] sm:$0x3]  ;;  %10487 = vmatpush3.msra.mxu0 %v62_v1  ;;  %v86_v9 = vcombine.low %v45_v3, %v46_v6  ;;  %v90_v11 = vunpack.c.0.s8 %v89_v5  ;;  %v11234_v12 = vshrl.u32 %v91_v0, 7  ;;  %v49_v13 = vld [vmem:[%s13928_s0 + $0x8] sm:$0x3]  ;;  %10828 = vmatpush3.msra.mxu1 %v62_v1  ;;  %vm361_vm2 = vcmask 64512  }
   0x4   :  { %v87_v10 = vcombine.low %v47_v7, %v48_v8  ;;  %v50_v14 = vld [vmem:[%s13928_s0 + $0xa] sm:$0x3]  ;;  %10488 = vmatprep.subr.mxu0 %v61_v2  ;;  %v51_v15 = vld [vmem:[%s13928_s0 + $0xc] sm:$0x3]  ;;  %v52_v16 = vld [vmem:[%s13928_s0 + $0xe] sm:$0x3]  ;;  %10827 = vmatprep.subr.mxu1 %v61_v2 }
   0x5   :  { %13967 = vst [vmem:[#allocation2_spill] sm:$0xff] %v11234_v12  ;;  %v103_v17 = vcombine.low %v49_v13, %v50_v14  ;;  %10489 = vmatpush3.msra.mxu0 %v61_v2  ;;  %v11252_v19 = vsub.s32 %v90_v11, %v11234_v12  ;;  %v104_v20 = vcombine.low %v51_v15, %v52_v16  ;;  %v54_v21 = vld [vmem:[%s13928_s0 + $0x12] sm:$0x3]  ;;  %v55_v22 = vld [vmem:[%s13928_s0 + $0x14] sm:$0x3]  ;;  %vm1880_vm3 = vcmask 1041408  }
   0x6   :  { %10829 = vmatpush3.msra.mxu1 %v61_v2  ;;  %v56_v23 = vld [vmem:[%s13928_s0 + $0x16] sm:$0x3]  ;;  %v120_v24 = vcombine.low %v53_v18, %v54_v21  ;;  %v57_v26 = vld [vmem:[%s13928_s0 + $0x18] sm:$0x3]  ;;  %v58_v27 = vld [vmem:[%s13928_s0 + $0x1a] sm:$0x3]  ;;  %10506 = vmatprep.subr.mxu0 %v13941_v44 }
   0x7   :  { %v121_v25 = vcombine.low %v55_v22, %v56_v23  ;;  %v59_v28 = vld [vmem:[%s13928_s0 + $0x1c] sm:$0x3]  ;;  %v94_v29 = vrot.slane %v86_v9, %v11252_v19  ;;  %v101_v30 = vrot.slane %v87_v10, %v11252_v19  ;;  %v111_v31 = vrot.slane %v103_v17, %v11252_v19  ;;  %v60_v33 = vld [vmem:[%s13928_s0 + $0x1e] sm:$0x3]  ;;  %10496 = vmatprep.subr.mxu1 %v13941_v44  ;;  %v9819_v46 = vld [vmem:[%s13929_s2] ss:$0 sm:$0xff] }
   0x8   :  { %v118_v32 = vrot.slane %v104_v20, %v11252_v19  ;;  %v128_v34 = vrot.slane %v120_v24, %v11252_v19  ;;  %v137_v36 = vcombine.low %v57_v26, %v58_v27  ;;  %v138_v37 = vcombine.low %v59_v28, %v60_v33  ;;  %s11135_s2 = smov 112   ;;  %s11139_s30 = smov 88  }
   0x9   :  { %v135_v35 = vrot.slane %v121_v25, %v11252_v19  ;;  %v102_v38 = vcombine.low %v94_v29, %v101_v30  ;;  %vm1697_vm4 = vcmask 9216   ;;  %vm1876_vm5 = vcmask 15360   ;;  %s11140_s14 = smov 8  }
   0xa   :  { %v119_v39 = vcombine.low %v111_v31, %v118_v32  ;;  %v145_v41 = vrot.slane %v137_v36, %v11252_v19  ;;  %v152_v42 = vrot.slane %v138_v37, %v11252_v19  ;;  %vm9798_vm6 = vcmask 123904  }
   0xb   :  { %v136_v40 = vcombine.low %v128_v34, %v135_v35  ;;  %10490 = vmatprep.mubr.msk.f32.mxu0 %vm154_vm0, %v102_v38 }
   0xc   :  { %10491 = vmatmul.mubr.msk.f32.vlgmr.msra.gmra.mxu0 %vm154_vm0, %v119_v39  ;;  %v153_v43 = vcombine.low %v145_v41, %v152_v42 }
   0xd   :  { %10493 = vmatprep.mubr.msk.f32.mxu1 %vm154_vm0, %v136_v40  ;;  %10508 = vmatprep.mubr.msk.f32.mxu0 %vm11134_vm1, %v13941_v44 }
   0xe   :  { %10494 = vmatmul.mubr.msk.f32.vlgmr.msra.gmra.mxu1 %vm154_vm0, %v153_v43 }
   0xf   :  { %10498 = vmatprep.mubr.msk.f32.mxu1 %vm11134_vm1, %v13941_v44 }
  0xcc   :  { %v10492_v45 = vpop.f32.mrf.mxu0 }
  0xcd   :  { %v235_v49 = vadd.f32 %v10492_v45, %v9819_v46 }
  0xce   :  { %v229_v47 = vpop.f32.mrf.mxu0  ;;  %v10495_v52 = vpop.f32.mrf.mxu1 }
  0xcf   :  { %v230_v48 = vadd.f32 %v9819_v46, %v229_v47  ;;  %v269_v56 = vcombine.high %v235_v49, %v235_v49  ;;  %v11311_v57 = vrot.slane %v235_v49, %v11252_v19  ;;  %v245_v8 = vadd.f32 %v10495_v52, %v9819_v46 }
  0xd0   :  { %v239_v60 = vpop.f32.mrf.mxu1 }
  0xd1   :  { %v252_v50 = vcombine.high %v230_v48, %v230_v48  ;;  %v11297_v51 = vrot.slane %v230_v48, %v11252_v19  ;;  %v11330_v62 = vrot.slane %v269_v56, %v11252_v19  ;;  %v11334_v63 = vcombine.high %v11311_v57, %v11311_v57 }
  0xd2   :  { %v240_v1 = vadd.f32 %v9819_v46, %v239_v60  ;;  %v11344_v2 = vrot.slane %v11311_v57, %v11252_v19  ;;  %v303_v14 = vcombine.high %v245_v8, %v245_v8  ;;  %v11387_v15 = vrot.slane %v245_v8, %v11252_v19 }
  0xd3   :  { %v11300_v53 = vrot.slane %v252_v50, %v11252_v19  ;;  %v11304_v54 = vcombine.high %v11297_v51, %v11297_v51  ;;  %v11308_v55 = vrot.slane %v11297_v51, %v11252_v19  ;;  %v11350_v3 = vcombine.high %v11330_v62, %v11330_v62 }
  0xd4   :  { %v286_v4 = vcombine.high %v240_v1, %v240_v1  ;;  %v11353_v5 = vrot.slane %v240_v1, %v11252_v19  ;;  %v11359_v6 = vrot.slane %v11334_v63, %v11252_v19  ;;  %v11365_v7 = vrot.slane %v11330_v62, %v11252_v19 }
  0xd5   :  { %v11315_v58 = vcombine.high %v11300_v53, %v11300_v53  ;;  %359 = vrot.lane.b32.xlu0 %v11308_v55, %s11135_s2  ;;  %v11321_v59 = vrot.slane %v11300_v53, %v11252_v19  ;;  %v11327_v61 = vrot.slane %v11304_v54, %v11252_v19  ;;  %v11378_v11 = vrot.slane %v11350_v3, %v11252_v19 }
  0xd6   :  { %v11368_v9 = vrot.slane %v286_v4, %v11252_v19  ;;  %v11372_v10 = vcombine.high %v11353_v5, %v11353_v5  ;;  %v11382_v13 = vrot.slane %v11353_v5, %v11252_v19  ;;  %v11406_v20 = vrot.slane %v303_v14, %v11252_v19 }
  0xd7   :  { %528 = vrot.lane.b32.xlu1 %v11321_v59, %s11135_s2  ;;  %v11340_v0 = vrot.slane %v11315_v58, %v11252_v19  ;;  %v11410_v21 = vcombine.high %v11387_v15, %v11387_v15  ;;  %v11420_v23 = vrot.slane %v11387_v15, %v11252_v19  ;;  %v336_v28 = vmul.f32 0.35355338, %v11297_v51 }
  0xd8   :  { %v11391_v16 = vcombine.high %v11368_v9, %v11368_v9  ;;  %v11397_v17 = vrot.slane %v11372_v10, %v11252_v19  ;;  %v11403_v18 = vrot.slane %v11368_v9, %v11252_v19  ;;  %v11426_v24 = vcombine.high %v11406_v20, %v11406_v20 }
  0xd9   :  { %444 = vrot.lane.b32.xlu0 %v11327_v61, %s11135_s2  ;;  %v11432_v25 = vrot.slane %v11410_v21, %v11252_v19  ;;  %v11438_v26 = vrot.slane %v11406_v20, %v11252_v19  ;;  %v3114_v29 = vrot.slane %v336_v28, %v11252_v19  ;;  %v337_v30 = vmul.f32 0.35355338, %v11304_v54 }
  0xda   :  { %v11416_v22 = vrot.slane %v11391_v16, %v11252_v19  ;;  %v11444_v27 = vrot.slane %v11426_v24, %v11252_v19  ;;  %v11478_v34 = vmul.f32 0.35355338, %v11300_v53  ;;  %v11494_v38 = vmul.f32 0.35355338, %v11311_v57 }
  0xdb   :  { %612 = vrot.lane.b32.xlu1 %v11340_v0, %s11135_s2  ;;  %v3199_v31 = vrot.slane %v337_v30, %v11252_v19  ;;  %v11497_v39 = vmul.f32 0.35355338, %v11315_v58  ;;  %v11510_v42 = vmul.f32 0.35355338, %v11334_v63  ;;  %v11513_v43 = vmul.f32 0.35355338, %v11330_v62 }
  0xdc   :  { %v11528_v47 = vmul.f32 0.35355338, %v11350_v3  ;;  %v11531_v48 = vmul.f32 0.35355338, %v11353_v5  ;;  %v11546_v51 = vmul.f32 0.35355338, %v11372_v10 }
  0xdd   :  { %696 = vrot.lane.b32.xlu0 %v11344_v2, %s11135_s2  ;;  %v11549_v52 = vmul.f32 0.35355338, %v11368_v9  ;;  %v11564_v56 = vmul.f32 0.35355338, %v11387_v15  ;;  %v11567_v57 = vmul.f32 0.35355338, %v11391_v16 }
  0xde   :  { %v11582_v62 = vmul.f32 0.35355338, %v11410_v21  ;;  %v11585_v63 = vmul.f32 0.35355338, %v11406_v20  ;;  %v11601_v3 = vmul.f32 0.35355338, %v11426_v24 }
  0xdf   :  { %780 = vrot.lane.b32.xlu1 %v11359_v6, %s11135_s2 }
  0xe1   :  { %864 = vrot.lane.b32.xlu0 %v11365_v7, %s11135_s2 }
  0xe3   :  { %948 = vrot.lane.b32.xlu1 %v11378_v11, %s11135_s2 }
  0xe5   :  { %1032 = vrot.lane.b32.xlu0 %v11382_v13, %s11135_s2 }
  0xe7   :  { %1116 = vrot.lane.b32.xlu1 %v11397_v17, %s11135_s2 }
  0xe9   :  { %1200 = vrot.lane.b32.xlu0 %v11403_v18, %s11135_s2 }
  0xeb   :  { %1284 = vrot.lane.b32.xlu1 %v11416_v22, %s11135_s2 }
  0xed   :  { %1368 = vrot.lane.b32.xlu0 %v11420_v23, %s11135_s2 }
  0xef   :  { %1452 = vrot.lane.b32.xlu1 %v11432_v25, %s11135_s2 }
  0xf1   :  { %1536 = vrot.lane.b32.xlu0 %v11438_v26, %s11135_s2 }
  0xf3   :  { %1620 = vrot.lane.b32.xlu1 %v11444_v27, %s11135_s2 }
  0xf5   :  { %1953 = vrot.lane.b32.xlu0 %v11327_v61, %s11136_s27 }
  0xf7   :  { %1874 = vrot.lane.b32.xlu1 %v11308_v55, %s11136_s27 }
  0xf9   :  { %2338 = vrot.lane.b32.xlu0 %v11365_v7, %s11136_s27 }
  0xfb   :  { %2030 = vrot.lane.b32.xlu1 %v11321_v59, %s11136_s27 }
  0xfd   :  { %2492 = vrot.lane.b32.xlu0 %v11382_v13, %s11136_s27 }
  0xff   :  { %2184 = vrot.lane.b32.xlu1 %v11344_v2, %s11136_s27 }
 0x101   :  { %2646 = vrot.lane.b32.xlu0 %v11403_v18, %s11136_s27 }
 0x103   :  { %2261 = vrot.lane.b32.xlu1 %v11359_v6, %s11136_s27 }
 0x105   :  { %2800 = vrot.lane.b32.xlu0 %v11420_v23, %s11136_s27 }
 0x107   :  { %2415 = vrot.lane.b32.xlu1 %v11378_v11, %s11136_s27 }
 0x109   :  { %2954 = vrot.lane.b32.xlu0 %v11438_v26, %s11136_s27 }
 0x10b   :  { %2569 = vrot.lane.b32.xlu1 %v11397_v17, %s11136_s27 }
 0x10d   :  { %3117 = vrot.lane.b32.xlu0 %v11308_v55, %s11137_s28 }
 0x10f   :  { %2877 = vrot.lane.b32.xlu1 %v11432_v25, %s11136_s27 }
 0x111   :  { %3115 = vrot.lane.b32.xlu0 %v3114_v29, %s11138_s29 }
 0x113   :  { %3031 = vrot.lane.b32.xlu1 %v11444_v27, %s11136_s27 }
 0x115   :  { %2107 = vrot.lane.b32.xlu0 %v11340_v0, %s11136_s27 }
 0x117   :  { %3202 = vrot.lane.b32.xlu1 %v11327_v61, %s11137_s28 }
 0x11b   :  { %2723 = vrot.lane.b32.xlu1 %v11416_v22, %s11136_s27 }
 0x11f   :  { %3200 = vrot.lane.b32.xlu1 %v3199_v31, %s11138_s29 }
 0x147   :  { %v360_v32 = vpop.permute.xlu0 %359 }
 0x148   :  { %10497 = vmatpush3.xpose.msk.msra.mxu1 %vm361_vm2, %v360_v32 }
 0x149   :  { %v529_v33 = vpop.permute.xlu1 %528  ;;  %10501 = vmatprep.subr.mxu1 %v13941_v44 }
 0x14a   :  { %10507 = vmatpush3.xpose.msk.msra.mxu0 %vm361_vm2, %v529_v33 }
 0x14b   :  { %10499 = vmatmul.mubr.msk.f32.vlgmr.msra.gmra.mxu1 %vm361_vm2, %v336_v28  ;;  %v445_v35 = vpop.permute.xlu0 %444  ;;  %10516 = vmatprep.subr.mxu0 %v13941_v44 }
 0x14c   :  { %10502 = vmatpush3.xpose.msk.msra.mxu1 %vm361_vm2, %v445_v35  ;;  %10503 = vmatprep.mubr.msk.f32.mxu1 %vm11134_vm1, %v13941_v44 }
 0x14d   :  { %10509 = vmatmul.mubr.msk.f32.vlgmr.msra.gmra.mxu0 %vm361_vm2, %v11478_v34  ;;  %v613_v36 = vpop.permute.xlu1 %612  ;;  %10511 = vmatprep.subr.mxu1 %v13941_v44 }
 0x14e   :  { %10518 = vmatprep.mubr.msk.f32.mxu0 %vm11134_vm1, %v13941_v44 }
 0x14f   :  { %v697_v37 = vpop.permute.xlu0 %696  ;;  %10504 = vmatmul.mubr.msk.f32.vlgmr.msra.gmra.mxu1 %vm361_vm2, %v337_v30 }
 0x150   :  { %10512 = vmatpush3.xpose.msk.msra.mxu1 %vm361_vm2, %v613_v36  ;;  %10517 = vmatpush3.xpose.msk.msra.mxu0 %vm361_vm2, %v697_v37 }
 0x151   :  { %v781_v40 = vpop.permute.xlu1 %780  ;;  %10513 = vmatprep.mubr.msk.f32.mxu1 %vm11134_vm1, %v13941_v44  ;;  %10521 = vmatprep.subr.mxu1 %v13941_v44 }
 0x152   :  { %10526 = vmatprep.subr.mxu0 %v13941_v44 }
 0x153   :  { %v865_v41 = vpop.permute.xlu0 %864  ;;  %10514 = vmatmul.mubr.msk.f32.vlgmr.msra.gmra.mxu1 %vm361_vm2, %v11497_v39  ;;  %10519 = vmatmul.mubr.msk.f32.vlgmr.msra.gmra.mxu0 %vm361_vm2, %v11494_v38 }
 0x154   :  { %10522 = vmatpush3.xpose.msk.msra.mxu1 %vm361_vm2, %v781_v40  ;;  %10527 = vmatpush3.xpose.msk.msra.mxu0 %vm361_vm2, %v865_v41 }
 0x155   :  { %v949_v45 = vpop.permute.xlu1 %948  ;;  %10523 = vmatprep.mubr.msk.f32.mxu1 %vm11134_vm1, %v13941_v44  ;;  %10528 = vmatprep.mubr.msk.f32.mxu0 %vm11134_vm1, %v13941_v44 }
 0x156   :  { %10531 = vmatprep.subr.mxu1 %v13941_v44  ;;  %10536 = vmatprep.subr.mxu0 %v13941_v44 }
 0x157   :  { %v1033_v46 = vpop.permute.xlu0 %1032  ;;  %10524 = vmatmul.mubr.msk.f32.vlgmr.msra.gmra.mxu1 %vm361_vm2, %v11510_v42  ;;  %10529 = vmatmul.mubr.msk.f32.vlgmr.msra.gmra.mxu0 %vm361_vm2, %v11513_v43 }
 0x158   :  { %10532 = vmatpush3.xpose.msk.msra.mxu1 %vm361_vm2, %v949_v45  ;;  %10537 = vmatpush3.xpose.msk.msra.mxu0 %vm361_vm2, %v1033_v46 }
 0x159   :  { %v1117_v49 = vpop.permute.xlu1 %1116  ;;  %10533 = vmatprep.mubr.msk.f32.mxu1 %vm11134_vm1, %v13941_v44  ;;  %10538 = vmatprep.mubr.msk.f32.mxu0 %vm11134_vm1, %v13941_v44 }
 0x15a   :  { %10541 = vmatprep.subr.mxu1 %v13941_v44  ;;  %10546 = vmatprep.subr.mxu0 %v13941_v44 }
 0x15b   :  { %v1201_v50 = vpop.permute.xlu0 %1200  ;;  %10534 = vmatmul.mubr.msk.f32.vlgmr.msra.gmra.mxu1 %vm361_vm2, %v11528_v47  ;;  %10539 = vmatmul.mubr.msk.f32.vlgmr.msra.gmra.mxu0 %vm361_vm2, %v11531_v48 }
 0x15c   :  { %10542 = vmatpush3.xpose.msk.msra.mxu1 %vm361_vm2, %v1117_v49  ;;  %10547 = vmatpush3.xpose.msk.msra.mxu0 %vm361_vm2, %v1201_v50 }
 0x15d   :  { %v1285_v53 = vpop.permute.xlu1 %1284  ;;  %10543 = vmatprep.mubr.msk.f32.mxu1 %vm11134_vm1, %v13941_v44  ;;  %10548 = vmatprep.mubr.msk.f32.mxu0 %vm11134_vm1, %v13941_v44 }
 0x15e   :  { %10551 = vmatprep.subr.mxu1 %v13941_v44  ;;  %10556 = vmatprep.subr.mxu0 %v13941_v44 }
 0x15f   :  { %v1369_v54 = vpop.permute.xlu0 %1368  ;;  %10544 = vmatmul.mubr.msk.f32.vlgmr.msra.gmra.mxu1 %vm361_vm2, %v11546_v51  ;;  %10549 = vmatmul.mubr.msk.f32.vlgmr.msra.gmra.mxu0 %vm361_vm2, %v11549_v52 }
 0x160   :  { %10552 = vmatpush3.xpose.msk.msra.mxu1 %vm361_vm2, %v1285_v53  ;;  %10557 = vmatpush3.xpose.msk.msra.mxu0 %vm361_vm2, %v1369_v54 }
 0x161   :  { %v1453_v58 = vpop.permute.xlu1 %1452  ;;  %10553 = vmatprep.mubr.msk.f32.mxu1 %vm11134_vm1, %v13941_v44  ;;  %10558 = vmatprep.mubr.msk.f32.mxu0 %vm11134_vm1, %v13941_v44 }
 0x162   :  { %10561 = vmatprep.subr.mxu1 %v13941_v44  ;;  %10566 = vmatprep.subr.mxu0 %v13941_v44 }
 0x163   :  { %v1537_v60 = vpop.permute.xlu0 %1536  ;;  %10554 = vmatmul.mubr.msk.f32.vlgmr.msra.gmra.mxu1 %vm361_vm2, %v11567_v57  ;;  %10559 = vmatmul.mubr.msk.f32.vlgmr.msra.gmra.mxu0 %vm361_vm2, %v11564_v56 }
 0x164   :  { %10562 = vmatpush3.xpose.msk.msra.mxu1 %vm361_vm2, %v1453_v58  ;;  %10567 = vmatpush3.xpose.msk.msra.mxu0 %vm361_vm2, %v1537_v60 }
 0x165   :  { %v1621_v1 = vpop.permute.xlu1 %1620  ;;  %10563 = vmatprep.mubr.msk.f32.mxu1 %vm11134_vm1, %v13941_v44  ;;  %10568 = vmatprep.mubr.msk.f32.mxu0 %vm11134_vm1, %v13941_v44 }
 0x166   :  { %10571 = vmatprep.subr.mxu1 %v13941_v44  ;;  %10576 = vmatprep.subr.mxu0 %v13941_v44 }
 0x167   :  { %10564 = vmatmul.mubr.msk.f32.vlgmr.msra.gmra.mxu1 %vm361_vm2, %v11582_v62  ;;  %10569 = vmatmul.mubr.msk.f32.vlgmr.msra.gmra.mxu0 %vm361_vm2, %v11585_v63  ;;  %v1954_v5 = vpop.permute.xlu0 %1953 }
 0x168   :  { %10572 = vmatpush3.xpose.msk.msra.mxu1 %vm361_vm2, %v1621_v1  ;;  %10573 = vmatprep.mubr.msk.f32.mxu1 %vm11134_vm1, %v13941_v44 }
 0x169   :  { %v1875_v4 = vpop.permute.xlu1 %1874  ;;  %10581 = vmatprep.subr.mxu1 %v13941_v44  ;;  %10578 = vmatprep.mubr.msk.f32.mxu0 %vm11134_vm1, %v13941_v44 }
 0x16a   :  { %10577 = vmatpush3.msk.msra.mxu0 %vm1880_vm3, %v1875_v4 }
 0x16b   :  { %10574 = vmatmul.mubr.msk.f32.vlgmr.msra.gmra.mxu1 %vm361_vm2, %v11601_v3  ;;  %10586 = vmatprep.subr.mxu0 %v13941_v44 }
 0x16c   :  { %10582 = vmatpush3.msk.msra.mxu1 %vm1880_vm3, %v1954_v5  ;;  %10583 = vmatprep.mubr.msk.f32.mxu1 %vm11134_vm1, %v13941_v44 }
 0x16d   :  { %10591 = vmatprep.subr.mxu1 %v13941_v44 }
 0x20b   :  { %v11614_v8 = vpop.f32.mrf.mxu1 }
 0x20c   :  { %v1698_v9 = vsel %vm1697_vm4, %v11614_v8, -inf }
 0x20d   :  { %v10500_v10 = vpop.f32.mrf.mxu1  ;;  %v11618_v14 = vpop.f32.mrf.mxu0  ;;  %1699 = vmax.xlane.f32.xlu0 %v1698_v9 }
 0x20e   :  { %v1704_v20 = vsel %vm1697_vm4, %v11618_v14, -inf }
 0x20f   :  { %v11620_v15 = vpop.f32.mrf.mxu1  ;;  %v10510_v16 = vpop.f32.mrf.mxu0 }
 0x210   :  { %v1701_v21 = vsel %vm1697_vm4, %v11620_v15, -inf }
 0x211   :  { %v10505_v24 = vpop.f32.mrf.mxu1  ;;  %1705 = vmax.xlane.f32.xlu0 %v1704_v20  ;;  %1702 = vmax.xlane.f32.xlu1 %v1701_v21 }
 0x213   :  { %v11626_v28 = vpop.f32.mrf.mxu1  ;;  %v11628_v29 = vpop.f32.mrf.mxu0 }
 0x214   :  { %v1710_v30 = vsel %vm1697_vm4, %v11628_v29, -inf  ;;  %v1707_v31 = vsel %vm1697_vm4, %v11626_v28, -inf }
 0x215   :  { %v10520_v32 = vpop.f32.mrf.mxu0  ;;  %1711 = vmax.xlane.f32.xlu1 %v1710_v30  ;;  %1708 = vmax.xlane.f32.xlu0 %v1707_v31  ;;  %v10515_v33 = vpop.f32.mrf.mxu1 }
 0x217   :  { %v11634_v35 = vpop.f32.mrf.mxu1  ;;  %v11636_v36 = vpop.f32.mrf.mxu0 }
 0x218   :  { %v1716_v37 = vsel %vm1697_vm4, %v11636_v36, -inf  ;;  %v1713_v40 = vsel %vm1697_vm4, %v11634_v35, -inf }
 0x219   :  { %v10530_v41 = vpop.f32.mrf.mxu0  ;;  %1717 = vmax.xlane.f32.xlu1 %v1716_v37  ;;  %1714 = vmax.xlane.f32.xlu0 %v1713_v40  ;;  %v10525_v45 = vpop.f32.mrf.mxu1 }
 0x21b   :  { %v11642_v46 = vpop.f32.mrf.mxu1  ;;  %v11644_v49 = vpop.f32.mrf.mxu0 }
 0x21c   :  { %v1722_v50 = vsel %vm1697_vm4, %v11644_v49, -inf  ;;  %v1719_v53 = vsel %vm1697_vm4, %v11642_v46, -inf }
 0x21d   :  { %v10540_v54 = vpop.f32.mrf.mxu0  ;;  %1723 = vmax.xlane.f32.xlu1 %v1722_v50  ;;  %1720 = vmax.xlane.f32.xlu0 %v1719_v53  ;;  %v10535_v58 = vpop.f32.mrf.mxu1 }
 0x21e   :  { %v3369_v58 = vrot.slane %v11497_v39, %v11252_v19  ;;  %v11696_v39 = vpop.permute.xlu0 %2338 }
 0x21f   :  { %v11650_v60 = vpop.f32.mrf.mxu1  ;;  %v11652_v1 = vpop.f32.mrf.mxu0 }
 0x220   :  { %v1728_v4 = vsel %vm1697_vm4, %v11652_v1, -inf  ;;  %v1725_v5 = vsel %vm1697_vm4, %v11650_v60, -inf }
 0x221   :  { %v10550_v9 = vpop.f32.mrf.mxu0  ;;  %1729 = vmax.xlane.f32.xlu1 %v1728_v4  ;;  %1726 = vmax.xlane.f32.xlu0 %v1725_v5  ;;  %v10545_v10 = vpop.f32.mrf.mxu1  ;;  %v3284_v4 = vrot.slane %v11478_v34, %v11252_v19 }
 0x222   :  { %v11692_v5 = vpop.permute.xlu1 %2030 }
 0x223   :  { %v11658_v16 = vpop.f32.mrf.mxu1  ;;  %v11660_v20 = vpop.f32.mrf.mxu0 }
 0x224   :  { %v1734_v21 = vsel %vm1697_vm4, %v11660_v20, -inf  ;;  %v1731_v24 = vsel %vm1697_vm4, %v11658_v16, -inf }
 0x225   :  { %v10560_v30 = vpop.f32.mrf.mxu0  ;;  %1735 = vmax.xlane.f32.xlu1 %v1734_v21  ;;  %1732 = vmax.xlane.f32.xlu0 %v1731_v24  ;;  %v10555_v31 = vpop.f32.mrf.mxu1 }
 0x226   :  { %v11694_v9 = vpop.permute.xlu1 %2184  ;;  %v11700_v21 = vpop.permute.xlu0 %2492 }
 0x227   :  { %v11666_v32 = vpop.f32.mrf.mxu1  ;;  %v11668_v33 = vpop.f32.mrf.mxu0  ;;  %13968 = vst [vmem:[#allocation3_spill] sm:$0xff] %v11700_v21 }
 0x228   :  { %v1740_v37 = vsel %vm1697_vm4, %v11668_v33, -inf  ;;  %v1737_v40 = vsel %vm1697_vm4, %v11666_v32, -inf }
 0x229   :  { %v10570_v41 = vpop.f32.mrf.mxu0  ;;  %1741 = vmax.xlane.f32.xlu1 %v1740_v37  ;;  %1738 = vmax.xlane.f32.xlu0 %v1737_v40  ;;  %v10565_v45 = vpop.f32.mrf.mxu1 }
 0x22a   :  { %v11698_v10 = vpop.permute.xlu1 %2261  ;;  %v11704_v30 = vpop.permute.xlu0 %2646 }
 0x22b   :  { %v11674_v50 = vpop.f32.mrf.mxu1  ;;  %13970 = vst [vmem:[#allocation5_spill] sm:$0xff] %v11704_v30 }
 0x22c   :  { %v1743_v53 = vsel %vm1697_vm4, %v11674_v50, -inf }
 0x22d   :  { %1744 = vmax.xlane.f32.xlu0 %v1743_v53  ;;  %v10575_v54 = vpop.f32.mrf.mxu1 }
 0x22e   :  { %v11702_v24 = vpop.permute.xlu1 %2415  ;;  %v11708_v31 = vpop.permute.xlu0 %2800 }
 0x22f   :  { %13969 = vst [vmem:[#allocation4_spill] sm:$0xff] %v11702_v24  ;;  %13972 = vst [vmem:[#allocation7_spill] sm:$0xff] %v11708_v31 }
 0x232   :  { %v11706_v34 = vpop.permute.xlu1 %2569  ;;  %v11712_v40 = vpop.permute.xlu0 %2954 }
 0x233   :  { %13971 = vst [vmem:[#allocation6_spill] sm:$0xff] %v11706_v34  ;;  %13974 = vst [vmem:[#allocation9_spill] sm:$0xff] %v11712_v40 }
 0x236   :  { %v11710_v37 = vpop.permute.xlu1 %2877  ;;  %v11716_v45 = vpop.permute.xlu0 %3117 }
 0x237   :  { %13973 = vst [vmem:[#allocation8_spill] sm:$0xff] %v11710_v37  ;;  %13976 = vst [vmem:[#allocation11_spill] sm:$0xff] %v11716_v45 }
 0x23a   :  { %3372 = vrot.lane.b32.xlu1 %v11340_v0, %s11137_s28  ;;  %v11714_v41 = vpop.permute.xlu1 %3031  ;;  %v11720_v54 = vpop.permute.xlu0 %3115 }
 0x23b   :  { %13975 = vst [vmem:[#allocation10_spill] sm:$0xff] %v11714_v41  ;;  %13978 = vst [vmem:[#allocation13_spill] sm:$0xff] %v11720_v54 }
 0x23e   :  { %3370 = vrot.lane.b32.xlu1 %v3369_v58, %s11138_s29  ;;  %v11718_v53 = vpop.permute.xlu1 %3202 }
 0x23f   :  { %13977 = vst [vmem:[#allocation12_spill] sm:$0xff] %v11718_v53 }
 0x242   :  { %3542 = vrot.lane.b32.xlu1 %v11359_v6, %s11137_s28  ;;  %v11722_v58 = vpop.permute.xlu1 %2723 }
 0x243   :  { %3287 = vrot.lane.b32.xlu0 %v11321_v59, %s11137_s28  ;;  %13979 = vst [vmem:[#allocation14_spill] sm:$0xff] %v11722_v58 }
 0x246   :  { %v11726_v44 = vpop.permute.xlu1 %3200 }
 0x247   :  { %3285 = vrot.lane.b32.xlu0 %v3284_v4, %s11138_s29  ;;  %v11724_v4 = vpop.permute.xlu0 %2107  ;;  %13980 = vst [vmem:[#allocation15_spill] sm:$0xff] %v11726_v44 }
 0x24b   :  { %3457 = vrot.lane.b32.xlu0 %v11344_v2, %s11137_s28 }
 0x296   :  { %v1700_v12 = vpop.xlane.xlu0 %1699 }
 0x297   :  { %v1746_v31 = vsub.f32 %v11614_v8, %v1700_v12 }
 0x299   :  { %v1762_v37 = vmul.f32 1.442695, %v1746_v31 }
 0x29a   :  { %v1706_v34 = vpop.xlane.xlu0 %1705  ;;  %v1703_v40 = vpop.xlane.xlu1 %1702 }
 0x29b   :  { %10972 = vpow2.f32 %v1762_v37  ;;  %v1748_v41 = vsub.f32 %v11618_v14, %v1706_v34  ;;  %v1747_v45 = vsub.f32 %v11620_v15, %v1703_v40 }
 0x29d   :  { %v1766_v53 = vmul.f32 1.442695, %v1748_v41  ;;  %v1764_v30 = vmul.f32 1.442695, %v1747_v45 }
 0x29e   :  { %v1712_v54 = vpop.xlane.xlu1 %1711  ;;  %v1709_v24 = vpop.xlane.xlu0 %1708 }
 0x29f   :  { %10974 = vpow2.f32 %v1766_v53  ;;  %v1750_v58 = vsub.f32 %v11628_v29, %v1712_v54  ;;  %v1749_v44 = vsub.f32 %v11626_v28, %v1709_v24 }
 0x2a0   :  { %10976 = vpow2.f32 %v1764_v30 }
 0x2a1   :  { %v1770_v21 = vmul.f32 1.442695, %v1750_v58  ;;  %v1768_v12 = vmul.f32 1.442695, %v1749_v44 }
 0x2a2   :  { %v1718_v8 = vpop.xlane.xlu1 %1717  ;;  %v1715_v31 = vpop.xlane.xlu0 %1714 }
 0x2a3   :  { %10978 = vpow2.f32 %v1770_v21  ;;  %v1752_v37 = vsub.f32 %v11636_v36, %v1718_v8  ;;  %v1751_v14 = vsub.f32 %v11634_v35, %v1715_v31 }
 0x2a4   :  { %10980 = vpow2.f32 %v1768_v12 }
 0x2a5   :  { %v1774_v15 = vmul.f32 1.442695, %v1752_v37  ;;  %v1772_v34 = vmul.f32 1.442695, %v1751_v14 }
 0x2a6   :  { %v1724_v40 = vpop.xlane.xlu1 %1723  ;;  %v1721_v41 = vpop.xlane.xlu0 %1720 }
 0x2a7   :  { %10982 = vpow2.f32 %v1774_v15  ;;  %v1754_v29 = vsub.f32 %v11644_v49, %v1724_v40  ;;  %v1753_v28 = vsub.f32 %v11642_v46, %v1721_v41 }
 0x2a8   :  { %v11737_v24 = vpop.eup %10972  ;;  %10984 = vpow2.f32 %v1772_v34 }
 0x2a9   :  { %v1778_v44 = vmul.f32 1.442695, %v1754_v29  ;;  %v1776_v30 = vmul.f32 1.442695, %v1753_v28  ;;  %v1794_v36 = vsel %vm1697_vm4, %v11737_v24, 0.0 }
 0x2aa   :  { %v1730_v21 = vpop.xlane.xlu1 %1729  ;;  %1795 = vadd.xlane.f32.xlu1 %v1794_v36  ;;  %v1727_v35 = vpop.xlane.xlu0 %1726 }
 0x2ab   :  { %10986 = vpow2.f32 %v1778_v44  ;;  %v1756_v45 = vsub.f32 %v11652_v1, %v1730_v21  ;;  %v1755_v53 = vsub.f32 %v11650_v60, %v1727_v35 }
 0x2ac   :  { %v11743_v54 = vpop.eup %10974  ;;  %10988 = vpow2.f32 %v1776_v30 }
 0x2ad   :  { %v11745_v46 = vpop.eup %10976  ;;  %v1782_v49 = vmul.f32 1.442695, %v1756_v45  ;;  %v1780_v58 = vmul.f32 1.442695, %v1755_v53  ;;  %v1800_v12 = vsel %vm1697_vm4, %v11743_v54, 0.0 }
 0x2ae   :  { %v1736_v8 = vpop.xlane.xlu1 %1735  ;;  %1801 = vadd.xlane.f32.xlu1 %v1800_v12  ;;  %v1733_v31 = vpop.xlane.xlu0 %1732  ;;  %v1797_v37 = vsel %vm1697_vm4, %v11745_v46, 0.0 }
 0x2af   :  { %10990 = vpow2.f32 %v1782_v49  ;;  %v1758_v1 = vsub.f32 %v11660_v20, %v1736_v8  ;;  %v1757_v60 = vsub.f32 %v11658_v16, %v1733_v31  ;;  %1798 = vadd.xlane.f32.xlu0 %v1797_v37 }
 0x2b0   :  { %v11753_v14 = vpop.eup %10978  ;;  %10992 = vpow2.f32 %v1780_v58 }
 0x2b1   :  { %v11755_v15 = vpop.eup %10980  ;;  %v1786_v34 = vmul.f32 1.442695, %v1758_v1  ;;  %v1784_v40 = vmul.f32 1.442695, %v1757_v60  ;;  %v1806_v41 = vsel %vm1697_vm4, %v11753_v14, 0.0 }
 0x2b2   :  { %v1742_v29 = vpop.xlane.xlu1 %1741  ;;  %1807 = vadd.xlane.f32.xlu1 %v1806_v41  ;;  %v1739_v28 = vpop.xlane.xlu0 %1738  ;;  %v1803_v44 = vsel %vm1697_vm4, %v11755_v15, 0.0 }
 0x2b3   :  { %10994 = vpow2.f32 %v1786_v34  ;;  %v1760_v16 = vsub.f32 %v11668_v33, %v1742_v29  ;;  %v1759_v20 = vsub.f32 %v11666_v32, %v1739_v28  ;;  %1804 = vadd.xlane.f32.xlu0 %v1803_v44 }
 0x2b4   :  { %v11763_v30 = vpop.eup %10982  ;;  %10996 = vpow2.f32 %v1784_v40 }
 0x2b5   :  { %v11765_v36 = vpop.eup %10984  ;;  %v1790_v21 = vmul.f32 1.442695, %v1760_v16  ;;  %v1788_v35 = vmul.f32 1.442695, %v1759_v20  ;;  %v1812_v45 = vsel %vm1697_vm4, %v11763_v30, 0.0 }
 0x2b6   :  { %1813 = vadd.xlane.f32.xlu1 %v1812_v45  ;;  %v1809_v53 = vsel %vm1697_vm4, %v11765_v36, 0.0  ;;  %v1745_v49 = vpop.xlane.xlu0 %1744  ;;  %v3539_v45 = vrot.slane %v11510_v42, %v11252_v19  ;;  %v3879_v42 = vrot.slane %v11546_v51, %v11252_v19  ;;  %v3794_v51 = vrot.slane %v11531_v48, %v11252_v19 }
 0x2b7   :  { %10998 = vpow2.f32 %v1790_v21  ;;  %1810 = vadd.xlane.f32.xlu0 %v1809_v53  ;;  %v1761_v32 = vsub.f32 %v11674_v50, %v1745_v49  ;;  %v3709_v53 = vrot.slane %v11528_v47, %v11252_v19  ;;  %v3454_v49 = vrot.slane %v11494_v38, %v11252_v19 }
 0x2b8   :  { %v11772_v33 = vpop.eup %10986  ;;  %11000 = vpow2.f32 %v1788_v35  ;;  %v3624_v47 = vrot.slane %v11513_v43, %v11252_v19  ;;  %v4049_v38 = vrot.slane %v11567_v57, %v11252_v19  ;;  %v4219_v43 = vrot.slane %v11582_v62, %v11252_v19 }
 0x2b9   :  { %v11774_v58 = vpop.eup %10988  ;;  %v1792_v12 = vmul.f32 1.442695, %v1761_v32  ;;  %v1818_v8 = vsel %vm1697_vm4, %v11772_v33, 0.0  ;;  %v3964_v57 = vrot.slane %v11549_v52, %v11252_v19  ;;  %v4389_v48 = vrot.slane %v11601_v3, %v11252_v19 }
 0x2ba   :  { %1819 = vadd.xlane.f32.xlu1 %v1818_v8  ;;  %v1815_v31 = vsel %vm1697_vm4, %v11774_v58, 0.0  ;;  %v4134_v62 = vrot.slane %v11564_v56, %v11252_v19  ;;  %v4304_v52 = vrot.slane %v11585_v63, %v11252_v19 }
 0x2bb   :  { %11002 = vpow2.f32 %v1792_v12  ;;  %1816 = vadd.xlane.f32.xlu0 %v1815_v31 }
 0x2bc   :  { %v11780_v37 = vpop.eup %10990 }
 0x2bd   :  { %v11782_v1 = vpop.eup %10992  ;;  %v1824_v50 = vsel %vm1697_vm4, %v11780_v37, 0.0 }
 0x2be   :  { %1825 = vadd.xlane.f32.xlu1 %v1824_v50  ;;  %v1821_v60 = vsel %vm1697_vm4, %v11782_v1, 0.0 }
 0x2bf   :  { %1822 = vadd.xlane.f32.xlu0 %v1821_v60  ;;  %v13981_v60 = vmov 0.0  }
 0x2c0   :  { %v11788_v34 = vpop.eup %10994 }
 0x2c1   :  { %v11790_v40 = vpop.eup %10996  ;;  %v1830_v41 = vsel %vm1697_vm4, %v11788_v34, 0.0 }
 0x2c2   :  { %1831 = vadd.xlane.f32.xlu1 %v1830_v41  ;;  %v1827_v29 = vsel %vm1697_vm4, %v11790_v40, 0.0 }
 0x2c3   :  { %1828 = vadd.xlane.f32.xlu0 %v1827_v29 }
 0x2c4   :  { %v11796_v28 = vpop.eup %10998 }
 0x2c5   :  { %v11798_v44 = vpop.eup %11000  ;;  %v1836_v16 = vsel %vm1697_vm4, %v11796_v28, 0.0 }
 0x2c6   :  { %1837 = vadd.xlane.f32.xlu1 %v1836_v16  ;;  %v1833_v20 = vsel %vm1697_vm4, %v11798_v44, 0.0 }
 0x2c7   :  { %1834 = vadd.xlane.f32.xlu0 %v1833_v20 }
 0x2c8   :  { %v11804_v21 = vpop.eup %11002 }
 0x2c9   :  { %v1839_v35 = vsel %vm1697_vm4, %v11804_v21, 0.0 }
 0x2cb   :  { %1840 = vadd.xlane.f32.xlu0 %v1839_v35 }
 0x2d7   :  { %3540 = vrot.lane.b32.xlu1 %v3539_v45, %s11138_s29 }
 0x2db   :  { %3712 = vrot.lane.b32.xlu1 %v11378_v11, %s11137_s28 }
 0x2df   :  { %3710 = vrot.lane.b32.xlu1 %v3709_v53, %s11138_s29 }
 0x2e1   :  { %3455 = vrot.lane.b32.xlu0 %v3454_v49, %s11138_s29 }
 0x2e3   :  { %3882 = vrot.lane.b32.xlu1 %v11397_v17, %s11137_s28 }
 0x2e5   :  { %3627 = vrot.lane.b32.xlu0 %v11365_v7, %s11137_s28 }
 0x2e7   :  { %3880 = vrot.lane.b32.xlu1 %v3879_v42, %s11138_s29  ;;  %v13982_v42 = vld [vmem:[#allocation3_spill] sm:$0xff] }
 0x2e9   :  { %3625 = vrot.lane.b32.xlu0 %v3624_v47, %s11138_s29  ;;  %v13983_v47 = vld [vmem:[#allocation4_spill] sm:$0xff] }
 0x2eb   :  { %4052 = vrot.lane.b32.xlu1 %v11416_v22, %s11137_s28 }
 0x2ed   :  { %3797 = vrot.lane.b32.xlu0 %v11382_v13, %s11137_s28 }
 0x2ef   :  { %4050 = vrot.lane.b32.xlu1 %v4049_v38, %s11138_s29 }
 0x2f1   :  { %3795 = vrot.lane.b32.xlu0 %v3794_v51, %s11138_s29 }
 0x2f3   :  { %4222 = vrot.lane.b32.xlu1 %v11432_v25, %s11137_s28 }
 0x2f5   :  { %3967 = vrot.lane.b32.xlu0 %v11403_v18, %s11137_s28 }
 0x2f7   :  { %4220 = vrot.lane.b32.xlu1 %v4219_v43, %s11138_s29 }
 0x2f9   :  { %3965 = vrot.lane.b32.xlu0 %v3964_v57, %s11138_s29 }
 0x2fb   :  { %4392 = vrot.lane.b32.xlu1 %v11444_v27, %s11137_s28 }
 0x2fd   :  { %4137 = vrot.lane.b32.xlu0 %v11420_v23, %s11137_s28 }
 0x2ff   :  { %4390 = vrot.lane.b32.xlu1 %v4389_v48, %s11138_s29  ;;  %v13984_v48 = vld [vmem:[#allocation5_spill] sm:$0xff] }
 0x301   :  { %4135 = vrot.lane.b32.xlu0 %v4134_v62, %s11138_s29  ;;  %v13985_v62 = vld [vmem:[#allocation6_spill] sm:$0xff] }
 0x303   :  { %4644 = vrot.lane.b32.xlu1 %v11308_v55, %s11139_s30  ;;  %v11884_v55 = vpop.permute.xlu1 %3372 }
 0x305   :  { %4307 = vrot.lane.b32.xlu0 %v11438_v26, %s11137_s28 }
 0x307   :  { %4798 = vrot.lane.b32.xlu1 %v11321_v59, %s11139_s30  ;;  %v11886_v59 = vpop.permute.xlu0 %3287 }
 0x309   :  { %4305 = vrot.lane.b32.xlu0 %v4304_v52, %s11138_s29 }
 0x30b   :  { %4952 = vrot.lane.b32.xlu1 %v11344_v2, %s11139_s30  ;;  %v11890_v2 = vpop.permute.xlu0 %3285 }
 0x30d   :  { %4721 = vrot.lane.b32.xlu0 %v11327_v61, %s11139_s30  ;;  %v11888_v61 = vpop.permute.xlu1 %3370 }
 0x30f   :  { %5106 = vrot.lane.b32.xlu1 %v11365_v7, %s11139_s30 }
 0x311   :  { %4875 = vrot.lane.b32.xlu0 %v11340_v0, %s11139_s30  ;;  %v11892_v0 = vpop.permute.xlu1 %3542 }
 0x313   :  { %5260 = vrot.lane.b32.xlu1 %v11382_v13, %s11139_s30  ;;  %v11894_v13 = vpop.permute.xlu0 %3457 }
 0x315   :  { %5029 = vrot.lane.b32.xlu0 %v11359_v6, %s11139_s30 }
 0x317   :  { %5337 = vrot.lane.b32.xlu1 %v11397_v17, %s11139_s30 }
 0x319   :  { %5183 = vrot.lane.b32.xlu0 %v11378_v11, %s11139_s30 }
 0x333   :  { %v1796_v7 = vpop.xlane.xlu1 %1795 }
 0x334   :  { %11004 = vrcp.f32 %v1796_v7 }
 0x337   :  { %v1802_v6 = vpop.xlane.xlu1 %1801 }
 0x338   :  { %11006 = vrcp.f32 %v1802_v6  ;;  %v1799_v17 = vpop.xlane.xlu0 %1798 }
 0x339   :  { %11008 = vrcp.f32 %v1799_v17 }
 0x33b   :  { %v1808_v56 = vpop.xlane.xlu1 %1807 }
 0x33c   :  { %11010 = vrcp.f32 %v1808_v56  ;;  %v1805_v11 = vpop.xlane.xlu0 %1804  ;;  %v13986_v56 = vld [vmem:[#allocation7_spill] sm:$0xff] }
 0x33d   :  { %11012 = vrcp.f32 %v1805_v11  ;;  %v13987_v11 = vld [vmem:[#allocation14_spill] sm:$0xff] }
 0x33f   :  { %v1814_v63 = vpop.xlane.xlu1 %1813 }
 0x340   :  { %11014 = vrcp.f32 %v1814_v63  ;;  %v1811_v3 = vpop.xlane.xlu0 %1810 }
 0x341   :  { %v11005_v32 = vpop.eup %11004  ;;  %11016 = vrcp.f32 %v1811_v3 }
 0x342   :  { %v1858_v12 = vmul.f32 %v11005_v32, %v11737_v24 }
 0x343   :  { %v1820_v8 = vpop.xlane.xlu1 %1819 }
 0x344   :  { %11018 = vrcp.f32 %v1820_v8  ;;  %v1817_v31 = vpop.xlane.xlu0 %1816  ;;  %10579 = vmatmul.mubr.msk.f32.vlgmr.msra.gmra.mxu0 %vm1876_vm5, %v1858_v12  ;;  %v13988_v8 = vld [vmem:[#allocation9_spill] sm:$0xff] }
 0x345   :  { %v11007_v50 = vpop.eup %11006  ;;  %11020 = vrcp.f32 %v1817_v31  ;;  %10587 = vmatpush3.msk.msra.mxu0 %vm1880_vm3, %v11692_v5  ;;  %10588 = vmatprep.mubr.msk.f32.mxu0 %vm11134_vm1, %v13981_v60  ;;  %v13989_v31 = vld [vmem:[#allocation8_spill] sm:$0xff] }
 0x346   :  { %v11009_v41 = vpop.eup %11008  ;;  %10596 = vmatprep.subr.mxu0 %v13981_v60  ;;  %v1860_v29 = vmul.f32 %v11007_v50, %v11743_v54 }
 0x347   :  { %v1826_v16 = vpop.xlane.xlu1 %1825  ;;  %v1859_v24 = vmul.f32 %v11009_v41, %v11745_v46 }
 0x348   :  { %11022 = vrcp.f32 %v1826_v16  ;;  %v1823_v20 = vpop.xlane.xlu0 %1822  ;;  %10589 = vmatmul.mubr.msk.f32.vlgmr.msra.gmra.mxu0 %vm1876_vm5, %v1860_v29  ;;  %v13990_v16 = vld [vmem:[#allocation11_spill] sm:$0xff] }
 0x349   :  { %v11011_v35 = vpop.eup %11010  ;;  %11024 = vrcp.f32 %v1823_v20  ;;  %10584 = vmatmul.mubr.msk.f32.vlgmr.msra.gmra.mxu1 %vm1876_vm5, %v1859_v24  ;;  %10597 = vmatpush3.msk.msra.mxu0 %vm1880_vm3, %v11694_v9 }
 0x34a   :  { %v11013_v5 = vpop.eup %11012  ;;  %10592 = vmatpush3.msk.msra.mxu1 %vm1880_vm3, %v11724_v4  ;;  %10598 = vmatprep.mubr.msk.f32.mxu0 %vm11134_vm1, %v13981_v60  ;;  %v1862_v54 = vmul.f32 %v11011_v35, %v11753_v14 }
 0x34b   :  { %10606 = vmatprep.subr.mxu0 %v13981_v60  ;;  %v1832_v46 = vpop.xlane.xlu1 %1831  ;;  %10593 = vmatprep.mubr.msk.f32.mxu1 %vm11134_vm1, %v13981_v60  ;;  %v1861_v45 = vmul.f32 %v11013_v5, %v11755_v15  ;;  %v13992_v5 = vld [vmem:[#allocation13_spill] sm:$0xff] }
 0x34c   :  { %11026 = vrcp.f32 %v1832_v46  ;;  %10601 = vmatprep.subr.mxu1 %v13981_v60  ;;  %v1829_v9 = vpop.xlane.xlu0 %1828  ;;  %10599 = vmatmul.mubr.msk.f32.vlgmr.msra.gmra.mxu0 %vm1876_vm5, %v1862_v54  ;;  %v13993_v54 = vld [vmem:[#allocation12_spill] sm:$0xff] }
 0x34d   :  { %v11015_v4 = vpop.eup %11014  ;;  %11028 = vrcp.f32 %v1829_v9  ;;  %10594 = vmatmul.mubr.msk.f32.vlgmr.msra.gmra.mxu1 %vm1876_vm5, %v1861_v45  ;;  %10607 = vmatpush3.msk.msra.mxu0 %vm1880_vm3, %v11696_v39  ;;  %v13994_v45 = vld [vmem:[#allocation15_spill] sm:$0xff] }
 0x34e   :  { %v11017_v14 = vpop.eup %11016  ;;  %10602 = vmatpush3.msk.msra.mxu1 %vm1880_vm3, %v11698_v10  ;;  %10608 = vmatprep.mubr.msk.f32.mxu0 %vm11134_vm1, %v13981_v60  ;;  %v1864_v15 = vmul.f32 %v11015_v4, %v11763_v30 }
 0x34f   :  { %10616 = vmatprep.subr.mxu0 %v13981_v60  ;;  %v1838_v53 = vpop.xlane.xlu1 %1837  ;;  %10603 = vmatprep.mubr.msk.f32.mxu1 %vm11134_vm1, %v13981_v60  ;;  %v1863_v49 = vmul.f32 %v11017_v14, %v11765_v36 }
 0x350   :  { %11030 = vrcp.f32 %v1838_v53  ;;  %10611 = vmatprep.subr.mxu1 %v13981_v60  ;;  %v1835_v39 = vpop.xlane.xlu0 %1834  ;;  %10609 = vmatmul.mubr.msk.f32.vlgmr.msra.gmra.mxu0 %vm1876_vm5, %v1864_v15 }
 0x351   :  { %v11019_v10 = vpop.eup %11018  ;;  %11032 = vrcp.f32 %v1835_v39  ;;  %10604 = vmatmul.mubr.msk.f32.vlgmr.msra.gmra.mxu1 %vm1876_vm5, %v1863_v49  ;;  %10617 = vmatpush3.msk.msra.mxu0 %vm1880_vm3, %v13982_v42 }
 0x352   :  { %v11021_v30 = vpop.eup %11020  ;;  %10612 = vmatpush3.msk.msra.mxu1 %vm1880_vm3, %v13983_v47  ;;  %10618 = vmatprep.mubr.msk.f32.mxu0 %vm11134_vm1, %v13981_v60  ;;  %v1866_v36 = vmul.f32 %v11019_v10, %v11772_v33 }
 0x353   :  { %10626 = vmatprep.subr.mxu0 %v13981_v60  ;;  %v11943_v38 = vpop.permute.xlu1 %3540  ;;  %10613 = vmatprep.mubr.msk.f32.mxu1 %vm11134_vm1, %v13981_v60  ;;  %v1865_v51 = vmul.f32 %v11021_v30, %v11774_v58 }
 0x354   :  { %10621 = vmatprep.subr.mxu1 %v13981_v60  ;;  %v1841_v43 = vpop.xlane.xlu0 %1840  ;;  %10619 = vmatmul.mubr.msk.f32.vlgmr.msra.gmra.mxu0 %vm1876_vm5, %v1866_v36 }
 0x355   :  { %v11023_v57 = vpop.eup %11022  ;;  %11034 = vrcp.f32 %v1841_v43  ;;  %10614 = vmatmul.mubr.msk.f32.vlgmr.msra.gmra.mxu1 %vm1876_vm5, %v1865_v51  ;;  %10627 = vmatpush3.msk.msra.mxu0 %vm1880_vm3, %v13984_v48 }
 0x356   :  { %v11025_v33 = vpop.eup %11024  ;;  %10622 = vmatpush3.msk.msra.mxu1 %vm1880_vm3, %v13985_v62  ;;  %10628 = vmatprep.mubr.msk.f32.mxu0 %vm11134_vm1, %v13981_v60  ;;  %v1868_v58 = vmul.f32 %v11023_v57, %v11780_v37 }
 0x357   :  { %10636 = vmatprep.subr.mxu0 %v13981_v60  ;;  %v11959_v52 = vpop.permute.xlu1 %3712  ;;  %10623 = vmatprep.mubr.msk.f32.mxu1 %vm11134_vm1, %v13981_v60  ;;  %v1867_v7 = vmul.f32 %v11025_v33, %v11782_v1 }
 0x358   :  { %10631 = vmatprep.subr.mxu1 %v13981_v60  ;;  %v3456_v6 = vpop.permute.xlu0 %3455  ;;  %10629 = vmatmul.mubr.msk.f32.vlgmr.msra.gmra.mxu0 %vm1876_vm5, %v1868_v58 }
 0x359   :  { %v11027_v17 = vpop.eup %11026  ;;  %10624 = vmatmul.mubr.msk.f32.vlgmr.msra.gmra.mxu1 %vm1876_vm5, %v1867_v7  ;;  %10637 = vmatpush3.msk.msra.mxu0 %vm1880_vm3, %v13986_v56 }
 0x35a   :  { %v11029_v37 = vpop.eup %11028  ;;  %10632 = vmatpush3.msk.msra.mxu1 %vm1880_vm3, %v13987_v11  ;;  %10638 = vmatprep.mubr.msk.f32.mxu0 %vm11134_vm1, %v13981_v60  ;;  %v1870_v1 = vmul.f32 %v11027_v17, %v11788_v34 }
 0x35b   :  { %10646 = vmatprep.subr.mxu0 %v13981_v60  ;;  %v11975_v63 = vpop.permute.xlu1 %3710  ;;  %10633 = vmatprep.mubr.msk.f32.mxu1 %vm11134_vm1, %v13981_v60  ;;  %v1869_v3 = vmul.f32 %v11029_v37, %v11790_v40 }
 0x35c   :  { %10641 = vmatprep.subr.mxu1 %v13981_v60  ;;  %v3628_v32 = vpop.permute.xlu0 %3627  ;;  %10639 = vmatmul.mubr.msk.f32.vlgmr.msra.gmra.mxu0 %vm1876_vm5, %v1870_v1 }
 0x35d   :  { %v11031_v12 = vpop.eup %11030  ;;  %10634 = vmatmul.mubr.msk.f32.vlgmr.msra.gmra.mxu1 %vm1876_vm5, %v1869_v3  ;;  %10647 = vmatpush3.msk.msra.mxu0 %vm1880_vm3, %v13988_v8 }
 0x35e   :  { %v11033_v34 = vpop.eup %11032  ;;  %10642 = vmatpush3.msk.msra.mxu1 %vm1880_vm3, %v13989_v31  ;;  %10648 = vmatprep.mubr.msk.f32.mxu0 %vm11134_vm1, %v13981_v60  ;;  %v1872_v40 = vmul.f32 %v11031_v12, %v11796_v28  ;;  %v13991_v28 = vld [vmem:[#allocation10_spill] sm:$0xff] }
 0x35f   :  { %10656 = vmatprep.subr.mxu0 %v13981_v60  ;;  %v3883_v50 = vpop.permute.xlu1 %3882  ;;  %10643 = vmatprep.mubr.msk.f32.mxu1 %vm11134_vm1, %v13981_v60  ;;  %v1871_v41 = vmul.f32 %v11033_v34, %v11798_v44 }
 0x360   :  { %10651 = vmatprep.subr.mxu1 %v13981_v60  ;;  %v3626_v29 = vpop.permute.xlu0 %3625  ;;  %10649 = vmatmul.mubr.msk.f32.vlgmr.msra.gmra.mxu0 %vm1876_vm5, %v1872_v40 }
 0x361   :  { %10644 = vmatmul.mubr.msk.f32.vlgmr.msra.gmra.mxu1 %vm1876_vm5, %v1871_v41  ;;  %10657 = vmatpush3.xpose.msk.msra.mxu0 %vm361_vm2, %v13990_v16 }
 0x362   :  { %v11035_v24 = vpop.eup %11034  ;;  %10652 = vmatpush3.msk.msra.mxu1 %vm1880_vm3, %v13991_v28  ;;  %10658 = vmatprep.mubr.msk.f32.mxu0 %vm11134_vm1, %v13981_v60 }
 0x363   :  { %10666 = vmatprep.subr.mxu0 %v13981_v60  ;;  %v3881_v44 = vpop.permute.xlu1 %3880  ;;  %10653 = vmatprep.mubr.msk.f32.mxu1 %vm11134_vm1, %v13981_v60  ;;  %v1873_v20 = vmul.f32 %v11035_v24, %v11804_v21 }
 0x364   :  { %10661 = vmatprep.subr.mxu1 %v13981_v60  ;;  %v3798_v35 = vpop.permute.xlu0 %3797  ;;  %10659 = vmatmul.mubr.msk.f32.vlgmr.msra.gmra.mxu0 %vm361_vm2, %v13992_v5 }
 0x365   :  { %10654 = vmatmul.mubr.msk.f32.vlgmr.msra.gmra.mxu1 %vm1876_vm5, %v1873_v20  ;;  %10667 = vmatpush3.xpose.msk.msra.mxu0 %vm361_vm2, %v11886_v59 }
 0x366   :  { %10662 = vmatpush3.xpose.msk.msra.mxu1 %vm361_vm2, %v13993_v54  ;;  %10668 = vmatprep.mubr.msk.f32.mxu0 %vm11134_vm1, %v13981_v60 }
 0x367   :  { %v4053_v46 = vpop.permute.xlu1 %4052  ;;  %10663 = vmatprep.mubr.msk.f32.mxu1 %vm11134_vm1, %v13981_v60  ;;  %10671 = vmatprep.subr.mxu1 %v13981_v60 }
 0x368   :  { %10676 = vmatprep.subr.mxu0 %v13981_v60  ;;  %v3796_v21 = vpop.permute.xlu0 %3795  ;;  %10669 = vmatmul.mubr.msk.f32.vlgmr.msra.gmra.mxu0 %vm361_vm2, %v11890_v2 }
 0x369   :  { %10664 = vmatmul.mubr.msk.f32.vlgmr.msra.gmra.mxu1 %vm361_vm2, %v13994_v45  ;;  %10677 = vmatpush3.xpose.msk.msra.mxu0 %vm361_vm2, %v11894_v13 }
 0x36a   :  { %10672 = vmatpush3.xpose.msk.msra.mxu1 %vm361_vm2, %v11884_v55  ;;  %10673 = vmatprep.mubr.msk.f32.mxu1 %vm11134_vm1, %v13981_v60 }
 0x36b   :  { %v4051_v59 = vpop.permute.xlu1 %4050  ;;  %10678 = vmatprep.mubr.msk.f32.mxu0 %vm11134_vm1, %v13981_v60  ;;  %10681 = vmatprep.subr.mxu1 %v13981_v60 }
 0x36c   :  { %10686 = vmatprep.subr.mxu0 %v13981_v60  ;;  %v3968_v2 = vpop.permute.xlu0 %3967  ;;  %10679 = vmatmul.mubr.msk.f32.vlgmr.msra.gmra.mxu0 %vm361_vm2, %v3456_v6 }
 0x36d   :  { %10674 = vmatmul.mubr.msk.f32.vlgmr.msra.gmra.mxu1 %vm361_vm2, %v11888_v61  ;;  %10687 = vmatpush3.xpose.msk.msra.mxu0 %vm361_vm2, %v3628_v32 }
 0x36e   :  { %10682 = vmatpush3.xpose.msk.msra.mxu1 %vm361_vm2, %v11892_v0  ;;  %10683 = vmatprep.mubr.msk.f32.mxu1 %vm11134_vm1, %v13981_v60 }
 0x36f   :  { %v4223_v55 = vpop.permute.xlu1 %4222  ;;  %10688 = vmatprep.mubr.msk.f32.mxu0 %vm11134_vm1, %v13981_v60  ;;  %10691 = vmatprep.subr.mxu1 %v13981_v60 }
 0x370   :  { %10696 = vmatprep.subr.mxu0 %v13981_v60  ;;  %v3966_v13 = vpop.permute.xlu0 %3965  ;;  %10689 = vmatmul.mubr.msk.f32.vlgmr.msra.gmra.mxu0 %vm361_vm2, %v3626_v29 }
 0x371   :  { %10684 = vmatmul.mubr.msk.f32.vlgmr.msra.gmra.mxu1 %vm361_vm2, %v11943_v38  ;;  %10697 = vmatpush3.xpose.msk.msra.mxu0 %vm361_vm2, %v3798_v35 }
 0x372   :  { %10692 = vmatpush3.xpose.msk.msra.mxu1 %vm361_vm2, %v11959_v52  ;;  %10693 = vmatprep.mubr.msk.f32.mxu1 %vm11134_vm1, %v13981_v60 }
 0x373   :  { %v4221_v61 = vpop.permute.xlu1 %4220  ;;  %10698 = vmatprep.mubr.msk.f32.mxu0 %vm11134_vm1, %v13981_v60  ;;  %10701 = vmatprep.subr.mxu1 %v13981_v60 }
 0x374   :  { %10706 = vmatprep.subr.mxu0 %v13981_v60  ;;  %v4138_v0 = vpop.permute.xlu0 %4137  ;;  %10699 = vmatmul.mubr.msk.f32.vlgmr.msra.gmra.mxu0 %vm361_vm2, %v3796_v21 }
 0x375   :  { %10694 = vmatmul.mubr.msk.f32.vlgmr.msra.gmra.mxu1 %vm361_vm2, %v11975_v63  ;;  %10707 = vmatpush3.xpose.msk.msra.mxu0 %vm361_vm2, %v3968_v2 }
 0x376   :  { %10702 = vmatpush3.xpose.msk.msra.mxu1 %vm361_vm2, %v3883_v50  ;;  %10703 = vmatprep.mubr.msk.f32.mxu1 %vm11134_vm1, %v13981_v60 }
 0x377   :  { %v4393_v9 = vpop.permute.xlu1 %4392  ;;  %10708 = vmatprep.mubr.msk.f32.mxu0 %vm11134_vm1, %v13981_v60  ;;  %10711 = vmatprep.subr.mxu1 %v13981_v60 }
 0x378   :  { %10716 = vmatprep.subr.mxu0 %v13981_v60  ;;  %v4136_v4 = vpop.permute.xlu0 %4135  ;;  %10709 = vmatmul.mubr.msk.f32.vlgmr.msra.gmra.mxu0 %vm361_vm2, %v3966_v13 }
 0x379   :  { %10704 = vmatmul.mubr.msk.f32.vlgmr.msra.gmra.mxu1 %vm361_vm2, %v3881_v44  ;;  %10717 = vmatpush3.xpose.msk.msra.mxu0 %vm361_vm2, %v4138_v0 }
 0x37a   :  { %10712 = vmatpush3.xpose.msk.msra.mxu1 %vm361_vm2, %v4053_v46  ;;  %10713 = vmatprep.mubr.msk.f32.mxu1 %vm11134_vm1, %v13981_v60 }
 0x37b   :  { %v4391_v14 = vpop.permute.xlu1 %4390  ;;  %10718 = vmatprep.mubr.msk.f32.mxu0 %vm11134_vm1, %v13981_v60  ;;  %10721 = vmatprep.subr.mxu1 %v13981_v60 }
 0x37c   :  { %10726 = vmatprep.subr.mxu0 %v13981_v60  ;;  %v4308_v15 = vpop.permute.xlu0 %4307  ;;  %10719 = vmatmul.mubr.msk.f32.vlgmr.msra.gmra.mxu0 %vm361_vm2, %v4136_v4 }
 0x37d   :  { %10714 = vmatmul.mubr.msk.f32.vlgmr.msra.gmra.mxu1 %vm361_vm2, %v4051_v59  ;;  %10727 = vmatpush3.xpose.msk.msra.mxu0 %vm361_vm2, %v4308_v15 }
 0x37e   :  { %10722 = vmatpush3.xpose.msk.msra.mxu1 %vm361_vm2, %v4223_v55  ;;  %10723 = vmatprep.mubr.msk.f32.mxu1 %vm11134_vm1, %v13981_v60 }
 0x37f   :  { %v4645_v53 = vpop.permute.xlu1 %4644  ;;  %10728 = vmatprep.mubr.msk.f32.mxu0 %vm11134_vm1, %v13981_v60  ;;  %10731 = vmatprep.subr.mxu1 %v13981_v60 }
 0x380   :  { %10736 = vmatprep.subr.mxu0 %v13981_v60  ;;  %v4306_v49 = vpop.permute.xlu0 %4305 }
 0x381   :  { %10724 = vmatmul.mubr.msk.f32.vlgmr.msra.gmra.mxu1 %vm361_vm2, %v4221_v61  ;;  %10729 = vmatmul.mubr.msk.f32.vlgmr.msra.gmra.mxu0 %vm361_vm2, %v4306_v49 }
 0x382   :  { %10732 = vmatpush3.xpose.msk.msra.mxu1 %vm361_vm2, %v4393_v9  ;;  %10737 = vmatpush3.msk.msra.mxu0 %vm1880_vm3, %v4645_v53 }
 0x383   :  { %10733 = vmatprep.mubr.msk.f32.mxu1 %vm11134_vm1, %v13981_v60  ;;  %10741 = vmatprep.subr.mxu1 %v13981_v60 }
 0x384   :  { %v4722_v39 = vpop.permute.xlu0 %4721  ;;  %10738 = vmatprep.mubr.msk.f32.mxu0 %vm11134_vm1, %v13981_v60  ;;  %10746 = vmatprep.subr.mxu0 %v13981_v60 }
 0x385   :  { %10734 = vmatmul.mubr.msk.f32.vlgmr.msra.gmra.mxu1 %vm361_vm2, %v4391_v14 }
 0x386   :  { %10742 = vmatpush3.msk.msra.mxu1 %vm1880_vm3, %v4722_v39  ;;  %10743 = vmatprep.mubr.msk.f32.mxu1 %vm11134_vm1, %v13981_v60 }
 0x387   :  { %10751 = vmatprep.subr.mxu1 %v13981_v60 }
 0x404   :  { %v12105_v10 = vpop.f32.mrf.mxu0 }
 0x406   :  { %v10580_v42 = vpop.f32.mrf.mxu0 }
 0x408   :  { %v12107_v30 = vpop.f32.mrf.mxu0 }
 0x409   :  { %v12109_v47 = vpop.f32.mrf.mxu1 }
 0x40a   :  { %v10590_v36 = vpop.f32.mrf.mxu0 }
 0x40b   :  { %v10585_v38 = vpop.f32.mrf.mxu1 }
 0x40c   :  { %v12111_v51 = vpop.f32.mrf.mxu0 }
 0x40d   :  { %v12113_v43 = vpop.f32.mrf.mxu1 }
 0x40e   :  { %v10600_v57 = vpop.f32.mrf.mxu0 }
 0x40f   :  { %v10595_v48 = vpop.f32.mrf.mxu1 }
 0x410   :  { %v12115_v33 = vpop.f32.mrf.mxu0 }
 0x411   :  { %v12117_v62 = vpop.f32.mrf.mxu1 }
 0x412   :  { %v10610_v58 = vpop.f32.mrf.mxu0 }
 0x413   :  { %v10605_v52 = vpop.f32.mrf.mxu1 }
 0x414   :  { %v12119_v7 = vpop.f32.mrf.mxu0 }
 0x415   :  { %v12121_v6 = vpop.f32.mrf.mxu1 }
 0x416   :  { %v10620_v17 = vpop.f32.mrf.mxu0 }
 0x417   :  { %v10615_v56 = vpop.f32.mrf.mxu1 }
 0x418   :  { %v12123_v37 = vpop.f32.mrf.mxu0 }
 0x419   :  { %v12125_v11 = vpop.f32.mrf.mxu1 }
 0x41a   :  { %v10630_v1 = vpop.f32.mrf.mxu0 }
 0x41b   :  { %v10625_v63 = vpop.f32.mrf.mxu1 }
 0x41c   :  { %v12127_v3 = vpop.f32.mrf.mxu0 }
 0x41d   :  { %v12129_v32 = vpop.f32.mrf.mxu1 }
 0x41e   :  { %v10640_v12 = vpop.f32.mrf.mxu0 }
 0x41f   :  { %v10635_v8 = vpop.f32.mrf.mxu1 }
 0x420   :  { %v12131_v34 = vpop.f32.mrf.mxu0 }
 0x421   :  { %v12133_v31 = vpop.f32.mrf.mxu1 }
 0x422   :  { %v10650_v40 = vpop.f32.mrf.mxu0 }
 0x423   :  { %v10645_v50 = vpop.f32.mrf.mxu1 }
 0x424   :  { %v12135_v41 = vpop.f32.mrf.mxu0 }
 0x425   :  { %v12137_v29 = vpop.f32.mrf.mxu1  ;;  %v4468_v16 = vsel %vm1697_vm4, %v12135_v41, -inf }
 0x426   :  { %v10660_v24 = vpop.f32.mrf.mxu0  ;;  %4469 = vmax.xlane.f32.xlu0 %v4468_v16 }
 0x427   :  { %v10655_v28 = vpop.f32.mrf.mxu1 }
 0x428   :  { %v12141_v44 = vpop.f32.mrf.mxu0 }
 0x429   :  { %v12143_v20 = vpop.f32.mrf.mxu1  ;;  %v4474_v35 = vsel %vm1697_vm4, %v12141_v44, -inf }
 0x42a   :  { %4475 = vmax.xlane.f32.xlu0 %v4474_v35  ;;  %v10670_v5 = vpop.f32.mrf.mxu0  ;;  %v4471_v54 = vsel %vm1697_vm4, %v12143_v20, -inf }
 0x42b   :  { %4472 = vmax.xlane.f32.xlu1 %v4471_v54  ;;  %v10665_v46 = vpop.f32.mrf.mxu1 }
 0x42c   :  { %v12149_v21 = vpop.f32.mrf.mxu0 }
 0x42d   :  { %v12151_v45 = vpop.f32.mrf.mxu1  ;;  %v4480_v59 = vsel %vm1697_vm4, %v12149_v21, -inf }
 0x42e   :  { %v10680_v2 = vpop.f32.mrf.mxu0  ;;  %v4477_v55 = vsel %vm1697_vm4, %v12151_v45, -inf }
 0x42f   :  { %4481 = vmax.xlane.f32.xlu1 %v4480_v59  ;;  %4478 = vmax.xlane.f32.xlu0 %v4477_v55  ;;  %v10675_v13 = vpop.f32.mrf.mxu1  ;;  %v12205_v55 = vpop.permute.xlu1 %4798 }
 0x430   :  { %v12157_v61 = vpop.f32.mrf.mxu0 }
 0x431   :  { %v12159_v0 = vpop.f32.mrf.mxu1  ;;  %v4486_v9 = vsel %vm1697_vm4, %v12157_v61, -inf }
 0x432   :  { %v10690_v4 = vpop.f32.mrf.mxu0  ;;  %v4483_v14 = vsel %vm1697_vm4, %v12159_v0, -inf }
 0x433   :  { %4487 = vmax.xlane.f32.xlu1 %v4486_v9  ;;  %4484 = vmax.xlane.f32.xlu0 %v4483_v14  ;;  %v10685_v15 = vpop.f32.mrf.mxu1  ;;  %v12207_v13 = vpop.permute.xlu1 %4952 }
 0x434   :  { %v12165_v53 = vpop.f32.mrf.mxu0  ;;  %v12209_v9 = vpop.permute.xlu0 %4875 }
 0x435   :  { %v12167_v49 = vpop.f32.mrf.mxu1  ;;  %v4492_v39 = vsel %vm1697_vm4, %v12165_v53, -inf }
 0x436   :  { %v10700_v42 = vpop.f32.mrf.mxu0  ;;  %v4489_v36 = vsel %vm1697_vm4, %v12167_v49, -inf }
 0x437   :  { %4493 = vmax.xlane.f32.xlu1 %v4492_v39  ;;  %4490 = vmax.xlane.f32.xlu0 %v4489_v36  ;;  %v10695_v38 = vpop.f32.mrf.mxu1  ;;  %v12211_v4 = vpop.permute.xlu1 %5106 }
 0x438   :  { %v12173_v57 = vpop.f32.mrf.mxu0  ;;  %v12213_v14 = vpop.permute.xlu0 %5029 }
 0x439   :  { %v12175_v48 = vpop.f32.mrf.mxu1  ;;  %v4498_v58 = vsel %vm1697_vm4, %v12173_v57, -inf }
 0x43a   :  { %v10710_v52 = vpop.f32.mrf.mxu0  ;;  %v4495_v17 = vsel %vm1697_vm4, %v12175_v48, -inf }
 0x43b   :  { %4499 = vmax.xlane.f32.xlu1 %v4498_v58  ;;  %4496 = vmax.xlane.f32.xlu0 %v4495_v17  ;;  %v10705_v56 = vpop.f32.mrf.mxu1  ;;  %v12215_v15 = vpop.permute.xlu1 %5260 }
 0x43c   :  { %v12181_v1 = vpop.f32.mrf.mxu0  ;;  %v12217_v39 = vpop.permute.xlu0 %5183 }
 0x43d   :  { %v12183_v63 = vpop.f32.mrf.mxu1  ;;  %v4504_v12 = vsel %vm1697_vm4, %v12181_v1, -inf }
 0x43e   :  { %v10720_v8 = vpop.f32.mrf.mxu0  ;;  %v4501_v40 = vsel %vm1697_vm4, %v12183_v63, -inf }
 0x43f   :  { %4505 = vmax.xlane.f32.xlu1 %v4504_v12  ;;  %4502 = vmax.xlane.f32.xlu0 %v4501_v40  ;;  %v10715_v50 = vpop.f32.mrf.mxu1  ;;  %v12219_v36 = vpop.permute.xlu1 %5337 }
 0x441   :  { %v12189_v16 = vpop.f32.mrf.mxu1  ;;  %v12191_v24 = vpop.f32.mrf.mxu0 }
 0x442   :  { %v4510_v28 = vsel %vm1697_vm4, %v12191_v24, -inf  ;;  %v4507_v35 = vsel %vm1697_vm4, %v12189_v16, -inf }
 0x443   :  { %v10730_v5 = vpop.f32.mrf.mxu0  ;;  %4511 = vmax.xlane.f32.xlu1 %v4510_v28  ;;  %4508 = vmax.xlane.f32.xlu0 %v4507_v35  ;;  %v10725_v54 = vpop.f32.mrf.mxu1 }
 0x445   :  { %v12197_v46 = vpop.f32.mrf.mxu1 }
 0x446   :  { %v4513_v59 = vsel %vm1697_vm4, %v12197_v46, -inf }
 0x447   :  { %4514 = vmax.xlane.f32.xlu0 %v4513_v59  ;;  %v10735_v2 = vpop.f32.mrf.mxu1 }
 0x454   :  { %5491 = vrot.lane.b32.xlu1 %v11416_v22, %s11139_s30 }
 0x45d   :  { %5414 = vrot.lane.b32.xlu0 %v11403_v18, %s11139_s30 }
 0x4af   :  { %v4470_v42 = vpop.xlane.xlu0 %4469 }
 0x4b0   :  { %v4516_v22 = vsub.f32 %v12135_v41, %v4470_v42 }
 0x4b2   :  { %v4532_v18 = vmul.f32 1.442695, %v4516_v22 }
 0x4b3   :  { %v4476_v38 = vpop.xlane.xlu0 %4475 }
 0x4b4   :  { %11036 = vpow2.f32 %v4532_v18  ;;  %v4518_v58 = vsub.f32 %v12141_v44, %v4476_v38  ;;  %v4473_v52 = vpop.xlane.xlu1 %4472 }
 0x4b5   :  { %v4517_v17 = vsub.f32 %v12143_v20, %v4473_v52 }
 0x4b6   :  { %v4536_v56 = vmul.f32 1.442695, %v4518_v58 }
 0x4b7   :  { %v4534_v12 = vmul.f32 1.442695, %v4517_v17 }
 0x4b8   :  { %11038 = vpow2.f32 %v4536_v56  ;;  %v4482_v8 = vpop.xlane.xlu1 %4481  ;;  %v4479_v40 = vpop.xlane.xlu0 %4478 }
 0x4b9   :  { %11040 = vpow2.f32 %v4534_v12  ;;  %v4520_v50 = vsub.f32 %v12149_v21, %v4482_v8  ;;  %v4519_v28 = vsub.f32 %v12151_v45, %v4479_v40 }
 0x4bb   :  { %v4540_v35 = vmul.f32 1.442695, %v4520_v50  ;;  %v4538_v41 = vmul.f32 1.442695, %v4519_v28 }
 0x4bc   :  { %v4488_v5 = vpop.xlane.xlu1 %4487  ;;  %v4485_v54 = vpop.xlane.xlu0 %4484 }
 0x4bd   :  { %11042 = vpow2.f32 %v4540_v35  ;;  %v4522_v44 = vsub.f32 %v12157_v61, %v4488_v5  ;;  %v4521_v59 = vsub.f32 %v12159_v0, %v4485_v54 }
 0x4be   :  { %11044 = vpow2.f32 %v4538_v41 }
 0x4bf   :  { %v4544_v20 = vmul.f32 1.442695, %v4522_v44  ;;  %v4542_v2 = vmul.f32 1.442695, %v4521_v59 }
 0x4c0   :  { %v4491_v42 = vpop.xlane.xlu0 %4490  ;;  %v4494_v41 = vpop.xlane.xlu1 %4493 }
 0x4c1   :  { %v12228_v22 = vpop.eup %11036  ;;  %11046 = vpow2.f32 %v4544_v20  ;;  %v4523_v21 = vsub.f32 %v12167_v49, %v4491_v42  ;;  %v4524_v44 = vsub.f32 %v12165_v53, %v4494_v41 }
 0x4c2   :  { %11048 = vpow2.f32 %v4542_v2  ;;  %v4564_v45 = vsel %vm1697_vm4, %v12228_v22, 0.0 }
 0x4c3   :  { %v4546_v18 = vmul.f32 1.442695, %v4523_v21  ;;  %4565 = vadd.xlane.f32.xlu1 %v4564_v45  ;;  %v4548_v2 = vmul.f32 1.442695, %v4524_v44 }
 0x4c4   :  { %v4497_v5 = vpop.xlane.xlu0 %4496  ;;  %v4500_v54 = vpop.xlane.xlu1 %4499 }
 0x4c5   :  { %v12233_v38 = vpop.eup %11038  ;;  %11050 = vpow2.f32 %v4546_v18  ;;  %v4526_v42 = vsub.f32 %v12173_v57, %v4500_v54  ;;  %v4525_v21 = vsub.f32 %v12175_v48, %v4497_v5 }
 0x4c6   :  { %v12235_v61 = vpop.eup %11040  ;;  %v4570_v0 = vsel %vm1697_vm4, %v12233_v38, 0.0  ;;  %11052 = vpow2.f32 %v4548_v2 }
 0x4c7   :  { %4571 = vadd.xlane.f32.xlu1 %v4570_v0  ;;  %v4567_v58 = vsel %vm1697_vm4, %v12235_v61, 0.0  ;;  %v4552_v45 = vmul.f32 1.442695, %v4526_v42  ;;  %v4550_v0 = vmul.f32 1.442695, %v4525_v21 }
 0x4c8   :  { %4568 = vadd.xlane.f32.xlu0 %v4567_v58  ;;  %v4503_v59 = vpop.xlane.xlu0 %4502  ;;  %v4506_v20 = vpop.xlane.xlu1 %4505 }
 0x4c9   :  { %v4528_v18 = vsub.f32 %v12181_v1, %v4506_v20  ;;  %v4527_v58 = vsub.f32 %v12183_v63, %v4503_v59  ;;  %11054 = vpow2.f32 %v4552_v45 }
 0x4ca   :  { %v12241_v49 = vpop.eup %11042  ;;  %11056 = vpow2.f32 %v4550_v0 }
 0x4cb   :  { %v12243_v52 = vpop.eup %11044  ;;  %v4576_v17 = vsel %vm1697_vm4, %v12241_v49, 0.0 }
 0x4cc   :  { %4577 = vadd.xlane.f32.xlu1 %v4576_v17  ;;  %v4573_v56 = vsel %vm1697_vm4, %v12243_v52, 0.0  ;;  %v4512_v17 = vpop.xlane.xlu1 %4511 }
 0x4cd   :  { %4574 = vadd.xlane.f32.xlu0 %v4573_v56  ;;  %v4530_v53 = vsub.f32 %v12191_v24, %v4512_v17  ;;  %v4554_v56 = vmul.f32 1.442695, %v4527_v58 }
 0x4ce   :  { %v12249_v12 = vpop.eup %11046 }
 0x4cf   :  { %v12251_v8 = vpop.eup %11048  ;;  %v4582_v40 = vsel %vm1697_vm4, %v12249_v12, 0.0  ;;  %v4560_v48 = vmul.f32 1.442695, %v4530_v53 }
 0x4d0   :  { %4583 = vadd.xlane.f32.xlu1 %v4582_v40  ;;  %v4579_v50 = vsel %vm1697_vm4, %v12251_v8, 0.0  ;;  %v12309_v0 = vpop.permute.xlu1 %5491 }
 0x4d1   :  { %4580 = vadd.xlane.f32.xlu0 %v4579_v50 }
 0x4d2   :  { %v12257_v28 = vpop.eup %11050 }
 0x4d3   :  { %v4585_v35 = vsel %vm1697_vm4, %v12257_v28, 0.0 }
 0x4d5   :  { %4586 = vadd.xlane.f32.xlu0 %v4585_v35  ;;  %v12273_v35 = vpop.eup %11052 }
 0x4d6   :  { %v4588_v41 = vsel %vm1697_vm4, %v12273_v35, 0.0  ;;  %v12277_v24 = vpop.eup %11054 }
 0x4d7   :  { %v4594_v5 = vsel %vm1697_vm4, %v12277_v24, 0.0 }
 0x4e1   :  { %5645 = vrot.lane.b32.xlu1 %v11432_v25, %s11139_s30  ;;  %v4509_v25 = vpop.xlane.xlu0 %4508 }
 0x4e2   :  { %v4529_v40 = vsub.f32 %v12189_v16, %v4509_v25  ;;  %v12279_v16 = vpop.eup %11056 }
 0x4e4   :  { %v4558_v50 = vmul.f32 1.442695, %v4529_v40 }
 0x4e5   :  { %v4515_v57 = vpop.xlane.xlu0 %4514 }
 0x4e6   :  { %v4531_v1 = vsub.f32 %v12197_v46, %v4515_v57  ;;  %v4591_v46 = vsel %vm1697_vm4, %v12279_v16, 0.0 }
 0x4e8   :  { %v4562_v63 = vmul.f32 1.442695, %v4531_v1 }
 0x4e9   :  { %v12311_v17 = vpop.permute.xlu0 %5414 }
 0x4eb   :  { %5568 = vrot.lane.b32.xlu0 %v11420_v23, %s11139_s30  ;;  %v4556_v23 = vmul.f32 1.442695, %v4528_v18 }
 0x4ed   :  { %11058 = vpow2.f32 %v4556_v23 }
 0x4ee   :  { %11060 = vpow2.f32 %v4554_v56 }
 0x4ef   :  { %11062 = vpow2.f32 %v4560_v48 }
 0x4f0   :  { %11064 = vpow2.f32 %v4558_v50 }
 0x4f1   :  { %11066 = vpow2.f32 %v4562_v63 }
 0x4fa   :  { %v12283_v54 = vpop.eup %11058 }
 0x4fb   :  { %v12287_v44 = vpop.eup %11060  ;;  %v4600_v59 = vsel %vm1697_vm4, %v12283_v54, 0.0 }
 0x4fc   :  { %v12291_v20 = vpop.eup %11062  ;;  %v4597_v2 = vsel %vm1697_vm4, %v12287_v44, 0.0 }
 0x4fd   :  { %v12295_v42 = vpop.eup %11064  ;;  %v4606_v21 = vsel %vm1697_vm4, %v12291_v20, 0.0 }
 0x4fe   :  { %v4603_v45 = vsel %vm1697_vm4, %v12295_v42, 0.0  ;;  %v12301_v18 = vpop.eup %11066 }
 0x4ff   :  { %v4609_v25 = vsel %vm1697_vm4, %v12301_v18, 0.0 }
 0x505   :  { %4589 = vadd.xlane.f32.xlu1 %v4588_v41 }
 0x509   :  { %4595 = vadd.xlane.f32.xlu1 %v4594_v5 }
 0x50a   :  { %4592 = vadd.xlane.f32.xlu0 %v4591_v46 }
 0x50d   :  { %4601 = vadd.xlane.f32.xlu1 %v4600_v59 }
 0x50e   :  { %4598 = vadd.xlane.f32.xlu0 %v4597_v2 }
 0x511   :  { %4607 = vadd.xlane.f32.xlu1 %v4606_v21 }
 0x512   :  { %4604 = vadd.xlane.f32.xlu0 %v4603_v45 }
 0x516   :  { %4610 = vadd.xlane.f32.xlu0 %v4609_v25 }
 0x522   :  { %5799 = vrot.lane.b32.xlu1 %v11444_v27, %s11139_s30 }
 0x52c   :  { %5722 = vrot.lane.b32.xlu0 %v11438_v26, %s11139_s30 }
 0x54c   :  { %v4566_v58 = vpop.xlane.xlu1 %4565 }
 0x54d   :  { %11068 = vrcp.f32 %v4566_v58 }
 0x550   :  { %v4572_v23 = vpop.xlane.xlu1 %4571 }
 0x551   :  { %11070 = vrcp.f32 %v4572_v23  ;;  %v4569_v53 = vpop.xlane.xlu0 %4568 }
 0x552   :  { %11072 = vrcp.f32 %v4569_v53 }
 0x555   :  { %v4578_v56 = vpop.xlane.xlu1 %4577 }
 0x556   :  { %11074 = vrcp.f32 %v4578_v56  ;;  %v4575_v40 = vpop.xlane.xlu0 %4574 }
 0x557   :  { %11076 = vrcp.f32 %v4575_v40 }
 0x559   :  { %v4584_v57 = vpop.xlane.xlu1 %4583 }
 0x55a   :  { %v11069_v48 = vpop.eup %11068  ;;  %11078 = vrcp.f32 %v4584_v57  ;;  %v4581_v27 = vpop.xlane.xlu0 %4580 }
 0x55b   :  { %11080 = vrcp.f32 %v4581_v27  ;;  %v4628_v26 = vmul.f32 %v11069_v48, %v12228_v22 }
 0x55d   :  { %10739 = vmatmul.mubr.msk.f32.vlgmr.msra.gmra.mxu0 %vm1876_vm5, %v4628_v26 }
 0x55e   :  { %v11071_v50 = vpop.eup %11070  ;;  %v4587_v1 = vpop.xlane.xlu0 %4586  ;;  %10747 = vmatpush3.msk.msra.mxu0 %vm1880_vm3, %v12205_v55  ;;  %10748 = vmatprep.mubr.msk.f32.mxu0 %vm11134_vm1, %v13981_v60 }
 0x55f   :  { %v11073_v63 = vpop.eup %11072  ;;  %11082 = vrcp.f32 %v4587_v1  ;;  %10756 = vmatprep.subr.mxu0 %v13981_v60  ;;  %v4630_v41 = vmul.f32 %v11071_v50, %v12233_v38 }
 0x560   :  { %v4629_v5 = vmul.f32 %v11073_v63, %v12235_v61 }
 0x561   :  { %10749 = vmatmul.mubr.msk.f32.vlgmr.msra.gmra.mxu0 %vm1876_vm5, %v4630_v41 }
 0x562   :  { %10744 = vmatmul.mubr.msk.f32.vlgmr.msra.gmra.mxu1 %vm1876_vm5, %v4629_v5  ;;  %10757 = vmatpush3.msk.msra.mxu0 %vm1880_vm3, %v12207_v13 }
 0x563   :  { %v11075_v22 = vpop.eup %11074  ;;  %10752 = vmatpush3.msk.msra.mxu1 %vm1880_vm3, %v12209_v9  ;;  %10753 = vmatprep.mubr.msk.f32.mxu1 %vm11134_vm1, %v13981_v60 }
 0x564   :  { %v11077_v55 = vpop.eup %11076  ;;  %10758 = vmatprep.mubr.msk.f32.mxu0 %vm11134_vm1, %v13981_v60  ;;  %10761 = vmatprep.subr.mxu1 %v13981_v60  ;;  %v4632_v38 = vmul.f32 %v11075_v22, %v12241_v49 }
 0x565   :  { %10766 = vmatprep.subr.mxu0 %v13981_v60  ;;  %v4631_v61 = vmul.f32 %v11077_v55, %v12243_v52  ;;  %v5957_v55 = vld [vmem:[%s13930_s3 + $0x8] sm:$0xff] }
 0x566   :  { %10759 = vmatmul.mubr.msk.f32.vlgmr.msra.gmra.mxu0 %vm1876_vm5, %v4632_v38  ;;  %v5956_v38 = vld [vmem:[%s13930_s3] sm:$0xff] }
 0x567   :  { %v11079_v13 = vpop.eup %11078  ;;  %10754 = vmatmul.mubr.msk.f32.vlgmr.msra.gmra.mxu1 %vm1876_vm5, %v4631_v61  ;;  %10767 = vmatpush3.msk.msra.mxu0 %vm1880_vm3, %v12211_v4 }
 0x568   :  { %v11081_v9 = vpop.eup %11080  ;;  %10762 = vmatpush3.msk.msra.mxu1 %vm1880_vm3, %v12213_v14  ;;  %10763 = vmatprep.mubr.msk.f32.mxu1 %vm11134_vm1, %v13981_v60  ;;  %v4634_v49 = vmul.f32 %v11079_v13, %v12249_v12  ;;  %v5569_v12 = vpop.permute.xlu0 %5568 }
 0x569   :  { %10768 = vmatprep.mubr.msk.f32.mxu0 %vm11134_vm1, %v13981_v60  ;;  %10771 = vmatprep.subr.mxu1 %v13981_v60  ;;  %v4633_v52 = vmul.f32 %v11081_v9, %v12251_v8 }
 0x56a   :  { %10776 = vmatprep.subr.mxu0 %v13981_v60  ;;  %10769 = vmatmul.mubr.msk.f32.vlgmr.msra.gmra.mxu0 %vm1876_vm5, %v4634_v49 }
 0x56b   :  { %10764 = vmatmul.mubr.msk.f32.vlgmr.msra.gmra.mxu1 %vm1876_vm5, %v4633_v52  ;;  %10777 = vmatpush3.msk.msra.mxu0 %vm1880_vm3, %v12215_v15  ;;  %v5646_v15 = vpop.permute.xlu1 %5645 }
 0x56c   :  { %v11083_v4 = vpop.eup %11082  ;;  %10772 = vmatpush3.msk.msra.mxu1 %vm1880_vm3, %v12217_v39  ;;  %10773 = vmatprep.mubr.msk.f32.mxu1 %vm11134_vm1, %v13981_v60 }
 0x56d   :  { %10781 = vmatprep.subr.mxu1 %v13981_v60  ;;  %v4635_v14 = vmul.f32 %v11083_v4, %v12257_v28  ;;  %10778 = vmatprep.mubr.msk.f32.mxu0 %vm11134_vm1, %v13981_v60 }
 0x56e   :  { %10786 = vmatprep.subr.mxu0 %v13981_v60 }
 0x56f   :  { %10774 = vmatmul.mubr.msk.f32.vlgmr.msra.gmra.mxu1 %vm1876_vm5, %v4635_v14 }
 0x570   :  { %10782 = vmatpush3.msk.msra.mxu1 %vm1880_vm3, %v12219_v36  ;;  %10783 = vmatprep.mubr.msk.f32.mxu1 %vm11134_vm1, %v13981_v60 }
 0x571   :  { %10791 = vmatprep.subr.mxu1 %v13981_v60 }
 0x58e   :  { %v4590_v39 = vpop.xlane.xlu1 %4589 }
 0x58f   :  { %11084 = vrcp.f32 %v4590_v39 }
 0x592   :  { %v4596_v8 = vpop.xlane.xlu1 %4595 }
 0x593   :  { %11086 = vrcp.f32 %v4596_v8  ;;  %v4593_v28 = vpop.xlane.xlu0 %4592 }
 0x594   :  { %11088 = vrcp.f32 %v4593_v28 }
 0x596   :  { %v4602_v46 = vpop.xlane.xlu1 %4601 }
 0x597   :  { %11090 = vrcp.f32 %v4602_v46  ;;  %v4599_v59 = vpop.xlane.xlu0 %4598 }
 0x598   :  { %11092 = vrcp.f32 %v4599_v59 }
 0x59a   :  { %v4608_v2 = vpop.xlane.xlu1 %4607 }
 0x59b   :  { %11094 = vrcp.f32 %v4608_v2  ;;  %v4605_v36 = vpop.xlane.xlu0 %4604 }
 0x59c   :  { %v11085_v21 = vpop.eup %11084  ;;  %11096 = vrcp.f32 %v4605_v36 }
 0x59d   :  { %v4636_v45 = vmul.f32 %v11085_v21, %v12273_v35 }
 0x59e   :  { %v5800_v48 = vpop.permute.xlu1 %5799 }
 0x59f   :  { %v4611_v25 = vpop.xlane.xlu0 %4610  ;;  %10779 = vmatmul.mubr.msk.f32.vlgmr.msra.gmra.mxu0 %vm1876_vm5, %v4636_v45 }
 0x5a0   :  { %v11087_v58 = vpop.eup %11086  ;;  %11098 = vrcp.f32 %v4611_v25  ;;  %10787 = vmatpush3.msk.msra.mxu0 %vm1880_vm3, %v12311_v17  ;;  %10788 = vmatprep.mubr.msk.f32.mxu0 %vm11134_vm1, %v13981_v60 }
 0x5a1   :  { %v11089_v23 = vpop.eup %11088  ;;  %10796 = vmatprep.subr.mxu0 %v13981_v60  ;;  %v4638_v53 = vmul.f32 %v11087_v58, %v12277_v24 }
 0x5a2   :  { %v4637_v56 = vmul.f32 %v11089_v23, %v12279_v16 }
 0x5a3   :  { %10789 = vmatmul.mubr.msk.f32.vlgmr.msra.gmra.mxu0 %vm1876_vm5, %v4638_v53  ;;  %v5723_v16 = vpop.permute.xlu0 %5722 }
 0x5a4   :  { %v11091_v35 = vpop.eup %11090  ;;  %10784 = vmatmul.mubr.msk.f32.vlgmr.msra.gmra.mxu1 %vm1876_vm5, %v4637_v56  ;;  %10797 = vmatpush3.msk.msra.mxu0 %vm1880_vm3, %v5569_v12 }
 0x5a5   :  { %v11093_v40 = vpop.eup %11092  ;;  %10792 = vmatpush3.msk.msra.mxu1 %vm1880_vm3, %v12309_v0  ;;  %10793 = vmatprep.mubr.msk.f32.mxu1 %vm11134_vm1, %v13981_v60  ;;  %v4640_v17 = vmul.f32 %v11091_v35, %v12283_v54 }
 0x5a6   :  { %10798 = vmatprep.mubr.msk.f32.mxu0 %vm11134_vm1, %v13981_v60  ;;  %10801 = vmatprep.subr.mxu1 %v13981_v60  ;;  %v4639_v24 = vmul.f32 %v11093_v40, %v12287_v44 }
 0x5a7   :  { %10806 = vmatprep.subr.mxu0 %v13981_v60  ;;  %10799 = vmatmul.mubr.msk.f32.vlgmr.msra.gmra.mxu0 %vm1876_vm5, %v4640_v17 }
 0x5a8   :  { %v11095_v57 = vpop.eup %11094  ;;  %10794 = vmatmul.mubr.msk.f32.vlgmr.msra.gmra.mxu1 %vm1876_vm5, %v4639_v24  ;;  %10807 = vmatpush3.msk.msra.mxu0 %vm1880_vm3, %v5723_v16 }
 0x5a9   :  { %v11097_v0 = vpop.eup %11096  ;;  %10802 = vmatpush3.msk.msra.mxu1 %vm1880_vm3, %v5646_v15  ;;  %10803 = vmatprep.mubr.msk.f32.mxu1 %vm11134_vm1, %v13981_v60  ;;  %v4642_v54 = vmul.f32 %v11095_v57, %v12291_v20 }
 0x5aa   :  { %10808 = vmatprep.mubr.msk.f32.mxu0 %vm11134_vm1, %v13981_v60  ;;  %10811 = vmatprep.subr.mxu1 %v13981_v60  ;;  %v4641_v44 = vmul.f32 %v11097_v0, %v12295_v42 }
 0x5ab   :  { %10809 = vmatmul.mubr.msk.f32.vlgmr.msra.gmra.mxu0 %vm1876_vm5, %v4642_v54  ;;  %10816 = vmatprep.subr.mxu0 %v5957_v55 }
 0x5ac   :  { %10804 = vmatmul.mubr.msk.f32.vlgmr.msra.gmra.mxu1 %vm1876_vm5, %v4641_v44  ;;  %10817 = vmatpush3.msra.mxu0 %v5957_v55 }
 0x5ad   :  { %v11099_v27 = vpop.eup %11098  ;;  %10812 = vmatpush3.msk.msra.mxu1 %vm1880_vm3, %v5800_v48  ;;  %10813 = vmatprep.mubr.msk.f32.mxu1 %vm11134_vm1, %v13981_v60 }
 0x5ae   :  { %v4643_v20 = vmul.f32 %v11099_v27, %v12301_v18  ;;  %10818 = vmatprep.subr.mxu0 %v5956_v38 }
 0x5af   :  { %10819 = vmatpush3.msra.mxu0 %v5956_v38 }
 0x5b0   :  { %10814 = vmatmul.mubr.msk.f32.vlgmr.msra.gmra.mxu1 %vm1876_vm5, %v4643_v20 }
 0x61d   :  { %v4717_v26 = vpop.f32.mrf.mxu0 }
 0x61e   :  { %5892 = vrot.lane.b32.xlu0 %v4717_v26, %s11140_s14 }
 0x61f   :  { %v10740_v42 = vpop.f32.mrf.mxu0 }
 0x621   :  { %v4871_v50 = vpop.f32.mrf.mxu0 }
 0x622   :  { %v4794_v1 = vpop.f32.mrf.mxu1  ;;  %5896 = vrot.lane.b32.xlu0 %v4871_v50, %s11140_s14 }
 0x623   :  { %5894 = vrot.lane.b32.xlu1 %v4794_v1, %s11140_s14  ;;  %v10750_v63 = vpop.f32.mrf.mxu0 }
 0x624   :  { %v10745_v41 = vpop.f32.mrf.mxu1 }
 0x626   :  { %v5025_v5 = vpop.f32.mrf.mxu0 }
 0x627   :  { %v4948_v22 = vpop.f32.mrf.mxu1  ;;  %5900 = vrot.lane.b32.xlu0 %v5025_v5, %s11140_s14 }
 0x628   :  { %5898 = vrot.lane.b32.xlu1 %v4948_v22, %s11140_s14  ;;  %v10760_v60 = vpop.f32.mrf.mxu0 }
 0x629   :  { %v10755_v18 = vpop.f32.mrf.mxu1 }
 0x62a   :  { %v5179_v61 = vpop.f32.mrf.mxu0 }
 0x62b   :  { %v5102_v13 = vpop.f32.mrf.mxu1  ;;  %5904 = vrot.lane.b32.xlu0 %v5179_v61, %s11140_s14 }
 0x62c   :  { %5902 = vrot.lane.b32.xlu1 %v5102_v13, %s11140_s14  ;;  %v10770_v9 = vpop.f32.mrf.mxu0 }
 0x62d   :  { %v10765_v49 = vpop.f32.mrf.mxu1 }
 0x62f   :  { %v5256_v52 = vpop.f32.mrf.mxu1 }
 0x630   :  { %5906 = vrot.lane.b32.xlu1 %v5256_v52, %s11140_s14 }
 0x631   :  { %v10775_v4 = vpop.f32.mrf.mxu1 }
 0x65f   :  { %v5333_v14 = vpop.f32.mrf.mxu0 }
 0x660   :  { %5908 = vrot.lane.b32.xlu0 %v5333_v14, %s11140_s14 }
 0x661   :  { %v10780_v15 = vpop.f32.mrf.mxu0 }
 0x663   :  { %v5487_v39 = vpop.f32.mrf.mxu0 }
 0x664   :  { %v5410_v12 = vpop.f32.mrf.mxu1  ;;  %5912 = vrot.lane.b32.xlu0 %v5487_v39, %s11140_s14 }
 0x665   :  { %5910 = vrot.lane.b32.xlu1 %v5410_v12, %s11140_s14  ;;  %v10790_v8 = vpop.f32.mrf.mxu0 }
 0x666   :  { %v10785_v28 = vpop.f32.mrf.mxu1 }
 0x667   :  { %v5641_v46 = vpop.f32.mrf.mxu0 }
 0x668   :  { %v5564_v59 = vpop.f32.mrf.mxu1  ;;  %5916 = vrot.lane.b32.xlu0 %v5641_v46, %s11140_s14 }
 0x669   :  { %5914 = vrot.lane.b32.xlu1 %v5564_v59, %s11140_s14  ;;  %v10800_v2 = vpop.f32.mrf.mxu0 }
 0x66a   :  { %v10795_v36 = vpop.f32.mrf.mxu1 }
 0x66b   :  { %v5795_v21 = vpop.f32.mrf.mxu0 }
 0x66c   :  { %v5718_v45 = vpop.f32.mrf.mxu1  ;;  %5920 = vrot.lane.b32.xlu0 %v5795_v21, %s11140_s14 }
 0x66d   :  { %5918 = vrot.lane.b32.xlu1 %v5718_v45, %s11140_s14  ;;  %v10810_v25 = vpop.f32.mrf.mxu0 }
 0x66e   :  { %v10805_v58 = vpop.f32.mrf.mxu1 }
 0x670   :  { %v5872_v23 = vpop.f32.mrf.mxu1 }
 0x671   :  { %5922 = vrot.lane.b32.xlu1 %v5872_v23, %s11140_s14 }
 0x672   :  { %v10815_v53 = vpop.f32.mrf.mxu1 }
 0x690   :  { %v5893_v56 = vpop.permute.xlu0 %5892 }
 0x691   :  { %v5940_v24 = vsel %vm361_vm2, %v12105_v10, %v5893_v56 }
 0x694   :  { %v5897_v35 = vpop.permute.xlu0 %5896 }
 0x695   :  { %v5895_v40 = vpop.permute.xlu1 %5894  ;;  %v5942_v54 = vsel %vm361_vm2, %v12107_v30, %v5897_v35  ;;  %v11116_v35 = vld [vmem:[%s13928_s0 + $0x8] sm:$0x3] }
 0x696   :  { %v5941_v17 = vsel %vm361_vm2, %v12109_v47, %v5895_v40 }
 0x697   :  { %v5981_v16 = vcombine.low %v5940_v24, %v5941_v17  ;;  %v11117_v17 = vld [vmem:[%s13928_s0 + $0xa] sm:$0x3] }
 0x699   :  { %v5901_v57 = vpop.permute.xlu0 %5900  ;;  %v5989_v27 = vrot.slane %v5981_v16, %v11252_v19 }
 0x69a   :  { %v5899_v0 = vpop.permute.xlu1 %5898  ;;  %v5944_v50 = vsel %vm361_vm2, %v12111_v51, %v5901_v57 }
 0x69b   :  { %v5943_v44 = vsel %vm361_vm2, %v12113_v43, %v5899_v0  ;;  %v11118_v0 = vld [vmem:[%s13928_s0 + $0xc] sm:$0x3] }
 0x69c   :  { %v5982_v48 = vcombine.low %v5942_v54, %v5943_v44  ;;  %v11119_v44 = vld [vmem:[%s13928_s0 + $0xe] sm:$0x3] }
 0x69d   :  { %v5905_v10 = vpop.permute.xlu0 %5904 }
 0x69e   :  { %v5996_v20 = vrot.slane %v5982_v48, %v11252_v19  ;;  %v5903_v26 = vpop.permute.xlu1 %5902  ;;  %v5946_v43 = vsel %vm361_vm2, %v12115_v33, %v5905_v10 }
 0x69f   :  { %v5945_v47 = vsel %vm361_vm2, %v12117_v62, %v5903_v26  ;;  %v11120_v26 = vld [vmem:[%s13928_s0] sm:$0x3] }
 0x6a0   :  { %v5997_v42 = vcombine.low %v5989_v27, %v5996_v20  ;;  %v5998_v1 = vcombine.low %v5944_v50, %v5945_v47  ;;  %v11122_v50 = vld [vmem:[%s13928_s0 + $0x4] sm:$0x3] }
 0x6a2   :  { %10820 = vmatprep.mubr.msk.f32.mxu0 %vm154_vm0, %v5997_v42  ;;  %v5907_v30 = vpop.permute.xlu1 %5906  ;;  %v6006_v5 = vrot.slane %v5998_v1, %v11252_v19  ;;  %v11121_v42 = vld [vmem:[%s13928_s0 + $0x2] sm:$0x3] }
 0x6a3   :  { %v5947_v63 = vsel %vm361_vm2, %v12121_v6, %v5907_v30  ;;  %v11123_v30 = vld [vmem:[%s13928_s0 + $0x6] sm:$0x3] }
 0x6a4   :  { %v5999_v41 = vcombine.low %v5946_v43, %v5947_v63 }
 0x6a6   :  { %v6013_v62 = vrot.slane %v5999_v41, %v11252_v19 }
 0x6a8   :  { %v6014_v22 = vcombine.low %v6006_v5, %v6013_v62 }
 0x6aa   :  { %10821 = vmatmul.mubr.msk.f32.vlgmr.msra.gmra.mxu0 %vm154_vm0, %v6014_v22 }
 0x6d2   :  { %v5909_v60 = vpop.permute.xlu0 %5908 }
 0x6d3   :  { %v5948_v33 = vsel %vm361_vm2, %v12119_v7, %v5909_v60 }
 0x6d6   :  { %v5913_v51 = vpop.permute.xlu0 %5912 }
 0x6d7   :  { %v5911_v18 = vpop.permute.xlu1 %5910  ;;  %v5950_v13 = vsel %vm361_vm2, %v12123_v37, %v5913_v51 }
 0x6d8   :  { %v5949_v55 = vsel %vm361_vm2, %v12125_v11, %v5911_v18 }
 0x6d9   :  { %v6015_v38 = vcombine.low %v5948_v33, %v5949_v55 }
 0x6da   :  { %v5917_v61 = vpop.permute.xlu0 %5916 }
 0x6db   :  { %v5915_v6 = vpop.permute.xlu1 %5914  ;;  %v6023_v52 = vrot.slane %v6015_v38, %v11252_v19  ;;  %v5952_v39 = vsel %vm361_vm2, %v12127_v3, %v5917_v61  ;;  %v9952_v3 = vld [vmem:[%s13931_s4] ss:$0 sm:$0xff] }
 0x6dc   :  { %v5951_v9 = vsel %vm361_vm2, %v12129_v32, %v5915_v6 }
 0x6dd   :  { %v6016_v49 = vcombine.low %v5950_v13, %v5951_v9 }
 0x6de   :  { %v5921_v7 = vpop.permute.xlu0 %5920 }
 0x6df   :  { %v6030_v4 = vrot.slane %v6016_v49, %v11252_v19  ;;  %v5919_v14 = vpop.permute.xlu1 %5918  ;;  %v5954_v32 = vsel %vm361_vm2, %v12131_v34, %v5921_v7 }
 0x6e0   :  { %v5953_v11 = vsel %vm361_vm2, %v12133_v31, %v5919_v14 }
 0x6e1   :  { %v6031_v15 = vcombine.low %v6023_v52, %v6030_v4  ;;  %v6032_v12 = vcombine.low %v5952_v39, %v5953_v11 }
 0x6e3   :  { %10823 = vmatprep.mubr.msk.f32.mxu0 %vm154_vm0, %v6031_v15  ;;  %v5923_v37 = vpop.permute.xlu1 %5922  ;;  %v6040_v46 = vrot.slane %v6032_v12, %v11252_v19 }
 0x6e4   :  { %v5955_v8 = vsel %vm361_vm2, %v12137_v29, %v5923_v37  ;;  %v11124_v37 = vld [vmem:[%s13928_s0 + $0x1a] sm:$0x3] }
 0x6e5   :  { %v6033_v28 = vcombine.low %v5954_v32, %v5955_v8  ;;  %v11125_v8 = vld [vmem:[%s13928_s0 + $0x1c] sm:$0x3] }
 0x6e7   :  { %v6047_v31 = vrot.slane %v6033_v28, %v11252_v19 }
 0x6e9   :  { %v6048_v59 = vcombine.low %v6040_v46, %v6047_v31  ;;  %v11126_v46 = vld [vmem:[%s13928_s0 + $0x1e] sm:$0x3] }
 0x6eb   :  { %10824 = vmatmul.mubr.msk.f32.gmra.mxu0 %vm154_vm0, %v6048_v59 }
 0x76a   :  { %v10822_v2 = vpop.f32.mrf.mxu0 }
 0x76b   :  { %v6129_v36 = vadd.f32 %v10822_v2, %v9952_v3 }
 0x76c   :  { %v6123_v21 = vpop.f32.mrf.mxu0 }
 0x76d   :  { %v6163_v45 = vcombine.high %v6129_v36, %v6129_v36  ;;  %v6170_v34 = vrot.slane %v6129_v36, %v11252_v19  ;;  %v6124_v25 = vadd.f32 %v9952_v3, %v6123_v21  ;;  %v11128_v36 = vld [vmem:[%s13928_s0 + $0x12] sm:$0x3] }
 0x76f   :  { %v6177_v29 = vrot.slane %v6163_v45, %v11252_v19  ;;  %v6178_v58 = vcombine.high %v6170_v34, %v6170_v34  ;;  %v6146_v23 = vcombine.high %v6124_v25, %v6124_v25  ;;  %v6153_v53 = vrot.slane %v6124_v25, %v11252_v19  ;;  %v11129_v45 = vld [vmem:[%s13928_s0 + $0x18] sm:$0x3]  ;;  %v11130_v25 = vld [vmem:[%s13928_s0 + $0x14] sm:$0x3] }
 0x770   :  { %v12484_v40 = vadd.f32 %v11116_v35, %v6170_v34 }
 0x771   :  { %v6179_v56 = vcombine.high %v6177_v29, %v6177_v29  ;;  %v12489_v24 = vadd.f32 %v11117_v17, %v6178_v58  ;;  %v6160_v16 = vrot.slane %v6146_v23, %v11252_v19  ;;  %v6161_v57 = vcombine.high %v6153_v53, %v6153_v53  ;;  %v11131_v58 = vld [vmem:[%s13928_s0 + $0x16] sm:$0x3] }
 0x772   :  { %v12495_v54 = vadd.f32 %v11118_v0, %v6177_v29  ;;  %v12507_v47 = vadd.f32 %v11120_v26, %v6153_v53 }
 0x773   :  { %v12500_v48 = vadd.f32 %v11119_v44, %v6179_v56  ;;  %v6281_v27 = vcombine.low %v12484_v40, %v12489_v24  ;;  %v6162_v20 = vcombine.high %v6160_v16, %v6160_v16  ;;  %v12512_v10 = vadd.f32 %v11121_v42, %v6161_v57 }
 0x774   :  { %v12517_v1 = vadd.f32 %v11122_v50, %v6160_v16  ;;  %v11141_v50 = vmov 269488144  }
 0x775   :  { %v12522_v43 = vadd.f32 %v11123_v30, %v6162_v20  ;;  %v6282_v63 = vcombine.low %v12495_v54, %v12500_v48  ;;  %v6264_v41 = vcombine.low %v12507_v47, %v12512_v10  ;;  %v6289_v5 = vrot.slane %v6281_v27, %v11252_v19 }
 0x776   :  { %v6358_v30 = vunpack.c.l.s4 %v11141_v50 }
 0x777   :  { %v6296_v62 = vrot.slane %v6282_v63, %v11252_v19  ;;  %v6265_v22 = vcombine.low %v12517_v1, %v12522_v43  ;;  %v6272_v51 = vrot.slane %v6264_v41, %v11252_v19  ;;  %v11142_v63 = vmov 842150450  }
 0x778   :  { %v6365_v41 = vunpack.c.l.s4 %v11142_v63  ;;  %v6951_v63 = vld [vmem:[%s13932_s5] sm:$0xff] }
 0x779   :  { %v6297_v60 = vcombine.low %v6289_v5, %v6296_v62  ;;  %v6279_v18 = vrot.slane %v6265_v22, %v11252_v19  ;;  %v11143_v5 = vmov 1414812756   ;;  %v11144_v22 = vmov 1987475062  }
 0x77a   :  { %v6372_v62 = vunpack.c.l.s4 %v11143_v5  ;;  %v6952_v5 = vld [vmem:[%s13932_s5 + $0x8] sm:$0xff] }
 0x77b   :  { %v6339_v55 = vsel %vm154_vm0, %v6297_v60, 0.0  ;;  %v6280_v33 = vcombine.low %v6272_v51, %v6279_v18  ;;  %v6379_v60 = vunpack.c.l.s4 %v11144_v22  ;;  %v6359_v51 = vunpack.c.0.s8 %v6358_v30 }
 0x77c   :  { %6340 = vadd.xlane.f32.xlu1 %v6339_v55  ;;  %v6366_v18 = vunpack.c.0.s8 %v6365_v41  ;;  %v6373_v55 = vunpack.c.0.s8 %v6372_v62  ;;  %v6959_v41 = vld [vmem:[%s13932_s5 + $0x40] sm:$0xff]  ;;  %v11145_v62 = vmov 0  }
 0x77d   :  { %v6336_v38 = vsel %vm154_vm0, %v6280_v33, 0.0  ;;  %v6380_v33 = vunpack.c.0.s8 %v6379_v60  ;;  %7169 = vmatprep.mubr.bf16.mxu1 %v11145_v62  ;;  %7222 = vmatprep.mubr.bf16.mxu0 %v11145_v62  ;;  %v9959_v22 = vcombine.low %v6951_v63, %v6959_v41  ;;  %v9960_v60 = vcombine.high %v6951_v63, %v6959_v41  ;;  %v12736_v63 = vld [vmem:[%s13932_s5 + $0x50] sm:$0xff]  ;;  %v12741_v41 = vld [vmem:[%s13932_s5 + $0x18] sm:$0xff] }
 0x77e   :  { %6337 = vadd.xlane.f32.xlu0 %v6336_v38  ;;  %v13995_v38 = vld [vmem:[#allocation2_spill] sm:$0xff] }
 0x77f   :  { %7151 = vmatprep.subr.bf16.mxu1 %v9960_v60  ;;  %v12750_v60 = vld [vmem:[%s13932_s5 + $0x58] sm:$0xff] }
 0x780   :  { %7152 = vmatpush1.bf16.msra.mxu1 %v9959_v22 }
 0x7ab   :  { %v10825_v61 = vpop.f32.mrf.mxu0 }
 0x7ac   :  { %v6139_v6 = vadd.f32 %v10825_v61, %v9952_v3  ;;  %v12595_v61 = vsub.s32 %v6359_v51, %v13995_v38  ;;  %v6960_v51 = vld [vmem:[%s13932_s5 + $0x48] sm:$0xff] }
 0x7ad   :  { %v6133_v13 = vpop.f32.mrf.mxu0 }
 0x7ae   :  { %v6197_v9 = vcombine.high %v6139_v6, %v6139_v6  ;;  %v6204_v49 = vrot.slane %v6139_v6, %v11252_v19  ;;  %v6134_v52 = vadd.f32 %v9952_v3, %v6133_v13  ;;  %v11127_v3 = vld [vmem:[%s13928_s0 + $0x10] sm:$0x3]  ;;  %13996 = vst [vmem:[#allocation3_spill] sm:$0xff] %v12595_v61  ;;  %v12598_v6 = vsub.s32 %v6366_v18, %v13995_v38 }
 0x7af   :  { %v12601_v13 = vsub.s32 %v6373_v55, %v13995_v38  ;;  %v9961_v18 = vcombine.low %v6952_v5, %v6960_v51  ;;  %v9962_v55 = vcombine.high %v6952_v5, %v6960_v51  ;;  %v9965_v51 = vcombine.low %v12741_v41, %v12750_v60 }
 0x7b0   :  { %v6211_v4 = vrot.slane %v6197_v9, %v11252_v19  ;;  %v6212_v14 = vcombine.high %v6204_v49, %v6204_v49  ;;  %v6180_v11 = vcombine.high %v6134_v52, %v6134_v52  ;;  %v6187_v15 = vrot.slane %v6134_v52, %v11252_v19  ;;  %13997 = vst [vmem:[#allocation4_spill] sm:$0xff] %v12598_v6 }
 0x7b1   :  { %v12568_v34 = vadd.f32 %v11129_v45, %v6204_v49  ;;  %13998 = vst [vmem:[#allocation5_spill] sm:$0xff] %v12601_v13  ;;  %v12604_v9 = vsub.s32 %v6380_v33, %v13995_v38  ;;  %7204 = vmatprep.subr.bf16.mxu0 %v9962_v55  ;;  %v12759_v55 = vld [vmem:[%s13932_s5 + $0x20] sm:$0xff] }
 0x7b2   :  { %v6213_v7 = vcombine.high %v6211_v4, %v6211_v4  ;;  %v6194_v39 = vrot.slane %v6180_v11, %v11252_v19  ;;  %v6195_v12 = vcombine.high %v6187_v15, %v6187_v15  ;;  %v12543_v32 = vadd.f32 %v11124_v37, %v6212_v14  ;;  %7205 = vmatpush1.bf16.msra.mxu0 %v9961_v18 }
 0x7b3   :  { %v12548_v28 = vadd.f32 %v11125_v8, %v6211_v4  ;;  %v12558_v2 = vadd.f32 %v11127_v3, %v6187_v15  ;;  %13999 = vst [vmem:[#allocation6_spill] sm:$0xff] %v12604_v9  ;;  %v9966_v18 = vcombine.high %v12741_v41, %v12750_v60 }
 0x7b4   :  { %v12553_v31 = vadd.f32 %v11126_v46, %v6213_v7  ;;  %v6196_v59 = vcombine.high %v6194_v39, %v6194_v39  ;;  %v12563_v21 = vadd.f32 %v11128_v36, %v6195_v12  ;;  %v12573_v29 = vadd.f32 %v11130_v25, %v6194_v39 }
 0x7b5   :  { %v6315_v35 = vcombine.low %v12568_v34, %v12543_v32  ;;  %7310 = vmatprep.subr.bf16.mxu0 %v9966_v18 }
 0x7b6   :  { %v12578_v23 = vadd.f32 %v11131_v58, %v6196_v59  ;;  %v6316_v53 = vcombine.low %v12548_v28, %v12553_v31  ;;  %v6298_v56 = vcombine.low %v12558_v2, %v12563_v21 }
 0x7b7   :  { %v6323_v27 = vrot.slane %v6315_v35, %v11252_v19 }
 0x7b8   :  { %v6299_v17 = vcombine.low %v12573_v29, %v12578_v23  ;;  %v6306_v16 = vrot.slane %v6298_v56, %v11252_v19  ;;  %v6330_v0 = vrot.slane %v6316_v53, %v11252_v19 }
 0x7ba   :  { %v6313_v57 = vrot.slane %v6299_v17, %v11252_v19  ;;  %v6331_v26 = vcombine.low %v6323_v27, %v6330_v0 }
 0x7bc   :  { %v6314_v44 = vcombine.low %v6306_v16, %v6313_v57  ;;  %v6345_v42 = vsel %vm154_vm0, %v6331_v26, 0.0 }
 0x7be   :  { %v6342_v20 = vsel %vm154_vm0, %v6314_v44, 0.0 }
 0x7bf   :  { %6343 = vadd.xlane.f32.xlu0 %v6342_v20 }
 0x7c3   :  { %6346 = vadd.xlane.f32.xlu0 %v6345_v42 }
 0x805   :  { %v6341_v49 = vpop.xlane.xlu1 %6340 }
 0x806   :  { %v6350_v52 = vmul.f32 0.0625, %v6341_v49 }
 0x807   :  { %v6338_v4 = vpop.xlane.xlu0 %6337 }
 0x808   :  { %v6391_v14 = vrot.slane %v6350_v52, %v12595_v61  ;;  %v6398_v11 = vrot.slane %v6350_v52, %v12598_v6  ;;  %v6405_v15 = vrot.slane %v6350_v52, %v12601_v13  ;;  %v6412_v7 = vrot.slane %v6350_v52, %v12604_v9 }
 0x809   :  { %v6349_v39 = vmul.f32 0.0625, %v6338_v4 }
 0x80a   :  { %v12611_v12 = vsub.f32 %v12484_v40, %v6391_v14  ;;  %v12614_v37 = vsub.f32 %v12489_v24, %v6398_v11  ;;  %v12617_v8 = vsub.f32 %v12495_v54, %v6405_v15  ;;  %v12620_v46 = vsub.f32 %v12500_v48, %v6412_v7 }
 0x80b   :  { %v6363_v59 = vrot.slane %v6349_v39, %v12595_v61  ;;  %v6370_v3 = vrot.slane %v6349_v39, %v12598_v6  ;;  %v6377_v36 = vrot.slane %v6349_v39, %v12601_v13  ;;  %v6384_v45 = vrot.slane %v6349_v39, %v12604_v9 }
 0x80c   :  { %v6505_v40 = vmul.f32 %v12611_v12, %v12611_v12  ;;  %v6506_v24 = vmul.f32 %v12614_v37, %v12614_v37  ;;  %v6507_v54 = vmul.f32 %v12617_v8, %v12617_v8  ;;  %v6508_v48 = vmul.f32 %v12620_v46, %v12620_v46 }
 0x80d   :  { %v12635_v25 = vsub.f32 %v12507_v47, %v6363_v59  ;;  %v12638_v58 = vsub.f32 %v12512_v10, %v6370_v3  ;;  %v12641_v53 = vsub.f32 %v12517_v1, %v6377_v36  ;;  %v12644_v56 = vsub.f32 %v12522_v43, %v6384_v45 }
 0x80e   :  { %v6550_v35 = vcombine.low %v6505_v40, %v6506_v24  ;;  %v6551_v17 = vcombine.low %v6507_v54, %v6508_v48 }
 0x80f   :  { %v6501_v16 = vmul.f32 %v12635_v25, %v12635_v25  ;;  %v6502_v57 = vmul.f32 %v12638_v58, %v12638_v58  ;;  %v6503_v47 = vmul.f32 %v12641_v53, %v12641_v53  ;;  %v6504_v10 = vmul.f32 %v12644_v56, %v12644_v56 }
 0x810   :  { %v6558_v1 = vrot.slane %v6550_v35, %v11252_v19  ;;  %v6565_v0 = vrot.slane %v6551_v17, %v11252_v19 }
 0x811   :  { %v6533_v43 = vcombine.low %v6501_v16, %v6502_v57  ;;  %v6534_v44 = vcombine.low %v6503_v47, %v6504_v10 }
 0x812   :  { %v6566_v27 = vcombine.low %v6558_v1, %v6565_v0 }
 0x813   :  { %v6541_v20 = vrot.slane %v6533_v43, %v11252_v19  ;;  %v6548_v26 = vrot.slane %v6534_v44, %v11252_v19 }
 0x814   :  { %v6608_v42 = vsel %vm154_vm0, %v6566_v27, 0.0 }
 0x815   :  { %6609 = vadd.xlane.f32.xlu0 %v6608_v42  ;;  %v6549_v50 = vcombine.low %v6541_v20, %v6548_v26 }
 0x817   :  { %v6605_v30 = vsel %vm154_vm0, %v6549_v50, 0.0 }
 0x818   :  { %6606 = vadd.xlane.f32.xlu1 %v6605_v30  ;;  %v12731_v30 = vld [vmem:[%s13932_s5 + $0x10] sm:$0xff] }
 0x819   :  { %v9963_v5 = vcombine.low %v12731_v30, %v12736_v63  ;;  %v9964_v22 = vcombine.high %v12731_v30, %v12736_v63 }
 0x81b   :  { %7257 = vmatprep.subr.bf16.mxu1 %v9964_v22 }
 0x848   :  { %v6344_v33 = vpop.xlane.xlu0 %6343 }
 0x849   :  { %v6351_v49 = vmul.f32 0.0625, %v6344_v33  ;;  %v12764_v33 = vld [vmem:[%s13932_s5 + $0x60] sm:$0xff] }
 0x84b   :  { %v6419_v52 = vrot.slane %v6351_v49, %v12595_v61  ;;  %v6426_v4 = vrot.slane %v6351_v49, %v12598_v6  ;;  %v6433_v14 = vrot.slane %v6351_v49, %v12601_v13  ;;  %v6440_v11 = vrot.slane %v6351_v49, %v12604_v9  ;;  %v12769_v49 = vld [vmem:[%s13932_s5 + $0x28] sm:$0xff] }
 0x84c   :  { %v6347_v15 = vpop.xlane.xlu0 %6346 }
 0x84d   :  { %v12679_v7 = vsub.f32 %v12558_v2, %v6419_v52  ;;  %v12682_v39 = vsub.f32 %v12563_v21, %v6426_v4  ;;  %v12685_v59 = vsub.f32 %v12573_v29, %v6433_v14  ;;  %v12688_v3 = vsub.f32 %v12578_v23, %v6440_v11  ;;  %v12776_v4 = vld [vmem:[%s13932_s5 + $0x68] sm:$0xff] }
 0x84e   :  { %v6352_v36 = vmul.f32 0.0625, %v6347_v15  ;;  %v9967_v52 = vcombine.low %v12759_v55, %v12764_v33  ;;  %v9969_v14 = vcombine.low %v12769_v49, %v12776_v4 }
 0x84f   :  { %v6509_v45 = vmul.f32 %v12679_v7, %v12679_v7  ;;  %v6510_v40 = vmul.f32 %v12682_v39, %v12682_v39  ;;  %v6511_v2 = vmul.f32 %v12685_v59, %v12685_v59  ;;  %v6512_v21 = vmul.f32 %v12688_v3, %v12688_v3 }
 0x850   :  { %v6447_v24 = vrot.slane %v6352_v36, %v12595_v61  ;;  %v6454_v29 = vrot.slane %v6352_v36, %v12598_v6  ;;  %v6461_v23 = vrot.slane %v6352_v36, %v12601_v13  ;;  %v6468_v54 = vrot.slane %v6352_v36, %v12604_v9 }
 0x851   :  { %v6567_v48 = vcombine.low %v6509_v45, %v6510_v40  ;;  %v6568_v35 = vcombine.low %v6511_v2, %v6512_v21  ;;  %v9957_v21 = vld [vmem:[%s13933_s9] ss:$0 sm:$0xff] }
 0x852   :  { %v12703_v17 = vsub.f32 %v12568_v34, %v6447_v24  ;;  %v12706_v16 = vsub.f32 %v12543_v32, %v6454_v29  ;;  %v12709_v57 = vsub.f32 %v12548_v28, %v6461_v23  ;;  %v12712_v47 = vsub.f32 %v12553_v31, %v6468_v54  ;;  %v9958_v24 = vld [vmem:[%s13934_s10] ss:$0 sm:$0xff] }
 0x853   :  { %v6575_v10 = vrot.slane %v6567_v48, %v11252_v19  ;;  %v6582_v1 = vrot.slane %v6568_v35, %v11252_v19  ;;  %v6782_v29 = vcombine.high %v9957_v21, %v9957_v21  ;;  %v6824_v23 = vcombine.high %v9958_v24, %v9958_v24 }
 0x854   :  { %v6513_v0 = vmul.f32 %v12703_v17, %v12703_v17  ;;  %v6514_v34 = vmul.f32 %v12706_v16, %v12706_v16  ;;  %v6515_v32 = vmul.f32 %v12709_v57, %v12709_v57  ;;  %v6516_v28 = vmul.f32 %v12712_v47, %v12712_v47 }
 0x855   :  { %v6583_v43 = vcombine.low %v6575_v10, %v6582_v1  ;;  %v12787_v54 = vrot.slane %v9957_v21, %v11252_v19  ;;  %v12790_v48 = vrot.slane %v6782_v29, %v11252_v19  ;;  %v12793_v35 = vrot.slane %v9958_v24, %v11252_v19 }
 0x856   :  { %v6584_v44 = vcombine.low %v6513_v0, %v6514_v34  ;;  %v6585_v31 = vcombine.low %v6515_v32, %v6516_v28  ;;  %v12796_v10 = vrot.slane %v6824_v23, %v11252_v19 }
 0x857   :  { %v6611_v27 = vsel %vm154_vm0, %v6583_v43, 0.0  ;;  %v12800_v0 = vcombine.high %v12787_v54, %v12787_v54  ;;  %v12804_v34 = vcombine.high %v12790_v48, %v12790_v48 }
 0x858   :  { %6612 = vadd.xlane.f32.xlu1 %v6611_v27  ;;  %v6592_v20 = vrot.slane %v6584_v44, %v11252_v19  ;;  %v6599_v26 = vrot.slane %v6585_v31, %v11252_v19  ;;  %v12812_v31 = vcombine.high %v12793_v35, %v12793_v35  ;;  %v12816_v27 = vcombine.high %v12796_v10, %v12796_v10 }
 0x85a   :  { %v6600_v42 = vcombine.low %v6592_v20, %v6599_v26 }
 0x85c   :  { %v6614_v50 = vsel %vm154_vm0, %v6600_v42, 0.0 }
 0x85d   :  { %6615 = vadd.xlane.f32.xlu0 %v6614_v50 }
 0x89e   :  { %v6610_v11 = vpop.xlane.xlu0 %6609 }
 0x89f   :  { %v6618_v15 = vmul.f32 0.0625, %v6610_v11 }
 0x8a1   :  { %v6622_v36 = vadd.f32 1e-05, %v6618_v15  ;;  %v6607_v45 = vpop.xlane.xlu1 %6606 }
 0x8a2   :  { %v6617_v40 = vmul.f32 0.0625, %v6607_v45 }
 0x8a3   :  { %11100 = vrsqrt.f32 %v6622_v36 }
 0x8a4   :  { %v6621_v2 = vadd.f32 1e-05, %v6617_v40 }
 0x8a6   :  { %11102 = vrsqrt.f32 %v6621_v2 }
 0x8b0   :  { %v11101_v1 = vpop.eup %11100 }
 0x8b1   :  { %v6667_v32 = vrot.slane %v11101_v1, %v12595_v61  ;;  %v6674_v28 = vrot.slane %v11101_v1, %v12598_v6  ;;  %v6681_v43 = vrot.slane %v11101_v1, %v12601_v13  ;;  %v6688_v44 = vrot.slane %v11101_v1, %v12604_v9 }
 0x8b3   :  { %v11103_v20 = vpop.eup %11102  ;;  %v6765_v26 = vmul.f32 %v6667_v32, %v12611_v12  ;;  %v6766_v42 = vmul.f32 %v6674_v28, %v12614_v37  ;;  %v6767_v50 = vmul.f32 %v6681_v43, %v12617_v8  ;;  %v6768_v22 = vmul.f32 %v6688_v44, %v12620_v46 }
 0x8b4   :  { %v6639_v18 = vrot.slane %v11103_v20, %v12595_v61  ;;  %v6646_v11 = vrot.slane %v11103_v20, %v12598_v6  ;;  %v6653_v15 = vrot.slane %v11103_v20, %v12601_v13  ;;  %v6660_v36 = vrot.slane %v11103_v20, %v12604_v9 }
 0x8b5   :  { %v6807_v45 = vmul.f32 %v12787_v54, %v6765_v26  ;;  %v6808_v40 = vmul.f32 %v12800_v0, %v6766_v42  ;;  %v6809_v12 = vmul.f32 %v12790_v48, %v6767_v50  ;;  %v6810_v37 = vmul.f32 %v12804_v34, %v6768_v22 }
 0x8b6   :  { %v6761_v8 = vmul.f32 %v6639_v18, %v12635_v25  ;;  %v6762_v46 = vmul.f32 %v6646_v11, %v12638_v58  ;;  %v6763_v2 = vmul.f32 %v6653_v15, %v12641_v53  ;;  %v6764_v21 = vmul.f32 %v6660_v36, %v12644_v56 }
 0x8b7   :  { %v12835_v24 = vadd.f32 %v12793_v35, %v6807_v45  ;;  %v12838_v29 = vadd.f32 %v12812_v31, %v6808_v40  ;;  %v12841_v23 = vadd.f32 %v12796_v10, %v6809_v12  ;;  %v12844_v1 = vadd.f32 %v12816_v27, %v6810_v37 }
 0x8b8   :  { %v6803_v25 = vmul.f32 %v12787_v54, %v6761_v8  ;;  %v6804_v58 = vmul.f32 %v12800_v0, %v6762_v46  ;;  %v6805_v53 = vmul.f32 %v12790_v48, %v6763_v2  ;;  %v6806_v56 = vmul.f32 %v12804_v34, %v6764_v21 }
 0x8b9   :  { %14000 = vst [vmem:[#allocation7_spill] sm:$0xff] %v12835_v24  ;;  %14001 = vst [vmem:[#allocation14_spill] sm:$0xff] %v12838_v29  ;;  %v6894_v32 = vcombine.low %v12835_v24, %v12838_v29  ;;  %v6895_v28 = vcombine.low %v12841_v23, %v12844_v1  ;;  %v9968_v12 = vcombine.high %v12759_v55, %v12764_v33  ;;  %v10844_v55 = vld [vmem:[%s13935_s7 + $0x78] sm:$0xff]  }
 0x8ba   :  { %14002 = vst [vmem:[#allocation9_spill] sm:$0xff] %v12841_v23  ;;  %14003 = vst [vmem:[#allocation8_spill] sm:$0xff] %v12844_v1  ;;  %v12855_v43 = vadd.f32 %v12793_v35, %v6803_v25  ;;  %v12858_v44 = vadd.f32 %v12812_v31, %v6804_v58  ;;  %v12861_v20 = vadd.f32 %v12796_v10, %v6805_v53  ;;  %v10845_v33 = vld [vmem:[%s13935_s7 + $0xf8] sm:$0xff]  }
 0x8bb   :  { %v12864_v26 = vadd.f32 %v12816_v27, %v6806_v56  ;;  %v6902_v22 = vrot.slane %v6894_v32, %v11252_v19  ;;  %v6909_v18 = vrot.slane %v6895_v28, %v11252_v19  ;;  %v9970_v37 = vcombine.high %v12769_v49, %v12776_v4  ;;  %v10846_v49 = vld [vmem:[%s13935_s7 + $0x38] sm:$0xff]   ;;  %v10848_v4 = vld [vmem:[%s13935_s7 + $0x70] sm:$0xff]  }
 0x8bc   :  { %14004 = vst [vmem:[#allocation11_spill] sm:$0xff] %v12861_v20  ;;  %v6877_v42 = vcombine.low %v12855_v43, %v12858_v44 }
 0x8bd   :  { %14005 = vst [vmem:[#allocation10_spill] sm:$0xff] %v12864_v26  ;;  %v6878_v50 = vcombine.low %v12861_v20, %v12864_v26  ;;  %v6910_v45 = vcombine.low %v6902_v22, %v6909_v18 }
 0x8be   :  { %v6885_v11 = vrot.slane %v6877_v42, %v11252_v19 }
 0x8bf   :  { %v6892_v15 = vrot.slane %v6878_v50, %v11252_v19 }
 0x8c1   :  { %v6893_v36 = vcombine.low %v6885_v11, %v6892_v15 }
 0x8c3   :  { %v12874_v40 = vpack.c.bf16 %v6910_v45, %v6893_v36 }
 0x8c5   :  { %9975 = vmatmul.mubr.msk.bf16.vlgmr.msra.gmra.mxu1 %vm154_vm0, %v12874_v40  ;;  %9977 = vmatmul.mubr.msk.bf16.vlgmr.msra.gmra.mxu0 %vm154_vm0, %v12874_v40 }
 0x8c6   :  { %7258 = vmatpush1.bf16.msra.mxu1 %v9963_v5  ;;  %7311 = vmatpush1.bf16.msra.mxu0 %v9965_v51 }
 0x8c7   :  { %7179 = vmatprep.mubr.bf16.mxu1 %v11145_v62  ;;  %7232 = vmatprep.mubr.bf16.mxu0 %v11145_v62 }
 0x8c8   :  { %7363 = vmatprep.subr.bf16.mxu1 %v9968_v12  ;;  %7416 = vmatprep.subr.bf16.mxu0 %v9970_v37 }
 0x8e1   :  { %v6613_v8 = vpop.xlane.xlu1 %6612 }
 0x8e2   :  { %v6619_v46 = vmul.f32 0.0625, %v6613_v8 }
 0x8e4   :  { %v6623_v2 = vadd.f32 1e-05, %v6619_v46 }
 0x8e6   :  { %11104 = vrsqrt.f32 %v6623_v2  ;;  %v6616_v21 = vpop.xlane.xlu0 %6615 }
 0x8e7   :  { %v6620_v25 = vmul.f32 0.0625, %v6616_v21 }
 0x8e9   :  { %v6624_v58 = vadd.f32 1e-05, %v6620_v25 }
 0x8eb   :  { %11106 = vrsqrt.f32 %v6624_v58 }
 0x8f3   :  { %v11105_v30 = vpop.eup %11104 }
 0x8f4   :  { %v6695_v63 = vrot.slane %v11105_v30, %v12595_v61  ;;  %v6702_v41 = vrot.slane %v11105_v30, %v12598_v6  ;;  %v6709_v5 = vrot.slane %v11105_v30, %v12601_v13  ;;  %v6716_v60 = vrot.slane %v11105_v30, %v12604_v9 }
 0x8f6   :  { %v6769_v51 = vmul.f32 %v6695_v63, %v12679_v7  ;;  %v6770_v53 = vmul.f32 %v6702_v41, %v12682_v39  ;;  %v6771_v56 = vmul.f32 %v6709_v5, %v12685_v59  ;;  %v6772_v32 = vmul.f32 %v6716_v60, %v12688_v3  ;;  %v6965_v60 = vld [vmem:[%s13932_s5 + $0x70] sm:$0xff] }
 0x8f8   :  { %v11107_v28 = vpop.eup %11106  ;;  %v6811_v42 = vmul.f32 %v12787_v54, %v6769_v51  ;;  %v6812_v50 = vmul.f32 %v12800_v0, %v6770_v53  ;;  %v6813_v22 = vmul.f32 %v12790_v48, %v6771_v56  ;;  %v6814_v18 = vmul.f32 %v12804_v34, %v6772_v32  ;;  %v6958_v51 = vld [vmem:[%s13932_s5 + $0x38] sm:$0xff] }
 0x8f9   :  { %v6723_v11 = vrot.slane %v11107_v28, %v12595_v61  ;;  %v6730_v15 = vrot.slane %v11107_v28, %v12598_v6  ;;  %v6737_v7 = vrot.slane %v11107_v28, %v12601_v13  ;;  %v6744_v39 = vrot.slane %v11107_v28, %v12604_v9  ;;  %v6966_v53 = vld [vmem:[%s13932_s5 + $0x78] sm:$0xff] }
 0x8fa   :  { %v12909_v59 = vadd.f32 %v12793_v35, %v6811_v42  ;;  %v12912_v3 = vadd.f32 %v12812_v31, %v6812_v50  ;;  %v12915_v36 = vadd.f32 %v12796_v10, %v6813_v22  ;;  %v12918_v45 = vadd.f32 %v12816_v27, %v6814_v18  ;;  %v10850_v50 = vld [vmem:[%s13935_s7 + $0x30] sm:$0xff]   ;;  %v10854_v18 = vld [vmem:[%s13935_s7 + $0x28] sm:$0xff]  }
 0x8fb   :  { %v6773_v12 = vmul.f32 %v6723_v11, %v12703_v17  ;;  %v6774_v37 = vmul.f32 %v6730_v15, %v12706_v16  ;;  %v6775_v8 = vmul.f32 %v6737_v7, %v12709_v57  ;;  %v6776_v46 = vmul.f32 %v6744_v39, %v12712_v47  ;;  %v10851_v22 = vld [vmem:[%s13935_s7 + $0xb0] sm:$0xff]   ;;  %v10855_v11 = vld [vmem:[%s13935_s7 + $0xa8] sm:$0xff]   ;;  %v10856_v15 = vld [vmem:[%s13935_s7 + $0x60] sm:$0xff]  }
 0x8fc   :  { %14006 = vst [vmem:[#allocation13_spill] sm:$0xff] %v12909_v59  ;;  %14007 = vst [vmem:[#allocation12_spill] sm:$0xff] %v12912_v3  ;;  %v6911_v2 = vcombine.low %v12909_v59, %v12912_v3  ;;  %v6912_v21 = vcombine.low %v12915_v36, %v12918_v45  ;;  %v9974_v32 = vcombine.high %v6958_v51, %v6966_v53  ;;  %v10857_v7 = vld [vmem:[%s13935_s7 + $0xe0] sm:$0xff]  }
 0x8fd   :  { %14008 = vst [vmem:[#allocation15_spill] sm:$0xff] %v12915_v36  ;;  %14009 = vst [vmem:[#allocation2_spill] sm:$0xff] %v12918_v45  ;;  %v6815_v25 = vmul.f32 %v12787_v54, %v6773_v12  ;;  %v6816_v58 = vmul.f32 %v12800_v0, %v6774_v37  ;;  %v6817_v30 = vmul.f32 %v12790_v48, %v6775_v8  ;;  %v10858_v39 = vld [vmem:[%s13935_s7 + $0x20] sm:$0xff]   ;;  %v10860_v37 = vld [vmem:[%s13935_s7 + $0x58] sm:$0xff]  }
 0x8fe   :  { %v6818_v17 = vmul.f32 %v12804_v34, %v6776_v46  ;;  %v6919_v54 = vrot.slane %v6911_v2, %v11252_v19  ;;  %v6926_v0 = vrot.slane %v6912_v21, %v11252_v19  ;;  %v9973_v42 = vcombine.low %v6958_v51, %v6966_v53  ;;  %v10859_v12 = vld [vmem:[%s13935_s7 + $0xa0] sm:$0xff]   ;;  %v10861_v8 = vld [vmem:[%s13935_s7 + $0xd8] sm:$0xff]   ;;  %v10864_v21 = vld [vmem:[%s13935_s7 + $0x50] sm:$0xff]  }
 0x8ff   :  { %v12933_v16 = vadd.f32 %v12793_v35, %v6815_v25  ;;  %v12936_v57 = vadd.f32 %v12812_v31, %v6816_v58  ;;  %v12939_v47 = vadd.f32 %v12796_v10, %v6817_v30  ;;  %v10862_v46 = vld [vmem:[%s13935_s7 + $0x18] sm:$0xff]   ;;  %v10865_v25 = vld [vmem:[%s13935_s7 + $0xd0] sm:$0xff]   ;;  %v6973_v51 = vsub.s32 0, %v13995_v38 }
 0x900   :  { %v12942_v63 = vadd.f32 %v12816_v27, %v6818_v17  ;;  %v6927_v41 = vcombine.low %v6919_v54, %v6926_v0  ;;  %v6957_v27 = vld [vmem:[%s13932_s5 + $0x30] sm:$0xff]  ;;  %v10863_v2 = vld [vmem:[%s13935_s7 + $0x98] sm:$0xff]   ;;  %v10868_v17 = vld [vmem:[%s13935_s7 + $0x48] sm:$0xff]   ;;  %v6981_v53 = vsub.s32 2, %v13995_v38 }
 0x901   :  { %14010 = vst [vmem:[#allocation16_spill] sm:$0xff] %v12933_v16  ;;  %14011 = vst [vmem:[#allocation17_spill] sm:$0xff] %v12936_v57  ;;  %v6928_v48 = vcombine.low %v12933_v16, %v12936_v57  ;;  %v9972_v56 = vcombine.high %v6957_v27, %v6965_v60  ;;  %v9971_v28 = vcombine.low %v6957_v27, %v6965_v60  ;;  %v10866_v58 = vld [vmem:[%s13935_s7 + $0x10] sm:$0xff]   ;;  %v10869_v54 = vld [vmem:[%s13935_s7 + $0xc8] sm:$0xff]   ;;  %v6977_v27 = vsub.s32 1, %v13995_v38 }
 0x902   :  { %14012 = vst [vmem:[#allocation18_spill] sm:$0xff] %v12939_v47  ;;  %14013 = vst [vmem:[#allocation19_spill] sm:$0xff] %v12942_v63  ;;  %v6929_v35 = vcombine.low %v12939_v47, %v12942_v63  ;;  %v10867_v30 = vld [vmem:[%s13935_s7 + $0x90] sm:$0xff]   ;;  %v10870_v0 = vld [vmem:[%s13935_s7 + $0x8] sm:$0xff]   ;;  %v6985_v60 = vsub.s32 3, %v13995_v38 }
 0x903   :  { %v6936_v34 = vrot.slane %v6928_v48, %v11252_v19  ;;  %v10871_v48 = vld [vmem:[%s13935_s7 + $0x88] sm:$0xff]  }
 0x904   :  { %v6943_v31 = vrot.slane %v6929_v35, %v11252_v19  ;;  %v10872_v35 = vld [vmem:[%s13935_s7 + $0x40] sm:$0xff]  }
 0x906   :  { %v6944_v10 = vcombine.low %v6936_v34, %v6943_v31  ;;  %v10873_v34 = vld [vmem:[%s13935_s7 + $0xc0] sm:$0xff]  }
 0x907   :  { %v10874_v31 = vld [vmem:[%s13935_s7] sm:$0xff]  }
 0x908   :  { %v12952_v5 = vpack.c.bf16 %v6944_v10, %v6927_v41  ;;  %v10875_v41 = vld [vmem:[%s13935_s7 + $0x80] sm:$0xff]   ;;  %v10876_v10 = vld [vmem:[%s13935_s7 + $0x178] sm:$0xff]  }
 0x90a   :  { %9976 = vmatmul.mubr.msk.bf16.gmra.mxu1 %vm154_vm0, %v12952_v5  ;;  %9978 = vmatmul.mubr.msk.bf16.gmra.mxu0 %vm154_vm0, %v12952_v5 }
 0x90b   :  { %7275 = vmatprep.mubr.bf16.mxu1 %v11145_v62  ;;  %7328 = vmatprep.mubr.bf16.mxu0 %v11145_v62 }
 0x912   :  { %9979 = vmatmul.mubr.msk.bf16.vlgmr.msra.gmra.mxu1 %vm154_vm0, %v12874_v40  ;;  %9981 = vmatmul.mubr.msk.bf16.vlgmr.msra.gmra.mxu0 %vm154_vm0, %v12874_v40 }
 0x913   :  { %7285 = vmatprep.mubr.bf16.mxu1 %v11145_v62  ;;  %7338 = vmatprep.mubr.bf16.mxu0 %v11145_v62 }
 0x914   :  { %7364 = vmatpush1.bf16.msra.mxu1 %v9967_v52  ;;  %7417 = vmatpush1.bf16.msra.mxu0 %v9969_v14  ;;  %v10847_v52 = vld [vmem:[%s13935_s7 + $0xb8] sm:$0xff]   ;;  %v10849_v14 = vld [vmem:[%s13935_s7 + $0xf0] sm:$0xff]  }
 0x915   :  { %7469 = vmatprep.subr.bf16.mxu1 %v9972_v56  ;;  %7522 = vmatprep.subr.bf16.mxu0 %v9974_v32  ;;  %v13121_v56 = vld [vmem:[%s13936_s6] sm:$0xff] }
 0x91a   :  { %9980 = vmatmul.mubr.msk.bf16.gmra.mxu1 %vm154_vm0, %v12952_v5  ;;  %9982 = vmatmul.mubr.msk.bf16.gmra.mxu0 %vm154_vm0, %v12952_v5 }
 0x91b   :  { %7381 = vmatprep.mubr.bf16.mxu1 %v11145_v62  ;;  %7434 = vmatprep.mubr.bf16.mxu0 %v11145_v62 }
 0x922   :  { %9983 = vmatmul.mubr.msk.bf16.vlgmr.msra.gmra.mxu1 %vm154_vm0, %v12874_v40  ;;  %9985 = vmatmul.mubr.msk.bf16.vlgmr.msra.gmra.mxu0 %vm154_vm0, %v12874_v40 }
 0x923   :  { %7391 = vmatprep.mubr.bf16.mxu1 %v11145_v62  ;;  %7444 = vmatprep.mubr.bf16.mxu0 %v11145_v62 }
 0x924   :  { %7470 = vmatpush1.bf16.msra.mxu1 %v9971_v28  ;;  %7523 = vmatpush1.bf16.msra.mxu0 %v9973_v42  ;;  %v13126_v42 = vrot.slane %v13121_v56, %v6977_v27 }
 0x925   :  { %10262 = vmatprep.subr.bf16.mxu1 %v10844_v55  ;;  %10290 = vmatprep.subr.bf16.mxu0 %v10845_v33  ;;  %v13131_v55 = vrot.slane %v13121_v56, %v6985_v60  ;;  %v13136_v33 = vrot.slane %v13121_v56, %v6973_v51 }
 0x92a   :  { %9984 = vmatmul.mubr.msk.bf16.gmra.mxu1 %vm154_vm0, %v12952_v5  ;;  %9986 = vmatmul.mubr.msk.bf16.gmra.mxu0 %vm154_vm0, %v12952_v5 }
 0x92b   :  { %7487 = vmatprep.mubr.bf16.mxu1 %v11145_v62  ;;  %7540 = vmatprep.mubr.bf16.mxu0 %v11145_v62 }
 0x932   :  { %9987 = vmatmul.mubr.msk.bf16.vlgmr.msra.gmra.mxu1 %vm154_vm0, %v12874_v40  ;;  %9989 = vmatmul.mubr.msk.bf16.vlgmr.msra.gmra.mxu0 %vm154_vm0, %v12874_v40  ;;  %v10852_v40 = vld [vmem:[%s13935_s7 + $0x68] sm:$0xff]  }
 0x933   :  { %7497 = vmatprep.mubr.bf16.mxu1 %v11145_v62  ;;  %7550 = vmatprep.mubr.bf16.mxu0 %v11145_v62  ;;  %v10853_v62 = vld [vmem:[%s13935_s7 + $0xe8] sm:$0xff]  }
 0x934   :  { %10263 = vmatpush3.bf16.msra.mxu1 %v10846_v49  ;;  %10291 = vmatpush3.bf16.msra.mxu0 %v10847_v52  ;;  %v13141_v49 = vrot.slane %v13121_v56, %v6981_v53 }
 0x935   :  { %10264 = vmatprep.subr.bf16.mxu1 %v10848_v4  ;;  %10292 = vmatprep.subr.bf16.mxu0 %v10849_v14 }
 0x938   :  { %10265 = vmatpush3.bf16.msra.mxu1 %v10850_v50  ;;  %10293 = vmatpush3.bf16.msra.mxu0 %v10851_v22 }
 0x939   :  { %10266 = vmatprep.subr.bf16.mxu1 %v10852_v40  ;;  %10294 = vmatprep.subr.bf16.mxu0 %v10853_v62 }
 0x93a   :  { %9988 = vmatmul.mubr.msk.bf16.gmra.mxu1 %vm154_vm0, %v12952_v5  ;;  %9990 = vmatmul.mubr.msk.bf16.gmra.mxu0 %vm154_vm0, %v12952_v5  ;;  %v10877_v5 = vld [vmem:[%s13935_s7 + $0x1f8] sm:$0xff]  }
 0x93c   :  { %10267 = vmatpush3.bf16.msra.mxu1 %v10854_v18  ;;  %10295 = vmatpush3.bf16.msra.mxu0 %v10855_v11 }
 0x93d   :  { %10268 = vmatprep.subr.bf16.mxu1 %v10856_v15  ;;  %10296 = vmatprep.subr.bf16.mxu0 %v10857_v7 }
 0x940   :  { %10269 = vmatpush3.bf16.msra.mxu1 %v10858_v39  ;;  %10297 = vmatpush3.bf16.msra.mxu0 %v10859_v12 }
 0x941   :  { %10270 = vmatprep.subr.bf16.mxu1 %v10860_v37  ;;  %10298 = vmatprep.subr.bf16.mxu0 %v10861_v8 }
 0x944   :  { %10271 = vmatpush3.bf16.msra.mxu1 %v10862_v46  ;;  %10299 = vmatpush3.bf16.msra.mxu0 %v10863_v2 }
 0x945   :  { %10272 = vmatprep.subr.bf16.mxu1 %v10864_v21  ;;  %10300 = vmatprep.subr.bf16.mxu0 %v10865_v25 }
 0x948   :  { %10273 = vmatpush3.bf16.msra.mxu1 %v10866_v58  ;;  %10301 = vmatpush3.bf16.msra.mxu0 %v10867_v30 }
 0x949   :  { %10274 = vmatprep.subr.bf16.mxu1 %v10868_v17  ;;  %10302 = vmatprep.subr.bf16.mxu0 %v10869_v54 }
 0x94c   :  { %10275 = vmatpush3.bf16.msra.mxu1 %v10870_v0  ;;  %10303 = vmatpush3.bf16.msra.mxu0 %v10871_v48  ;;  %v10878_v48 = vld [vmem:[%s13935_s7 + $0x138] sm:$0xff]  }
 0x94d   :  { %10276 = vmatprep.subr.bf16.mxu1 %v10872_v35  ;;  %10304 = vmatprep.subr.bf16.mxu0 %v10873_v34  ;;  %v10879_v35 = vld [vmem:[%s13935_s7 + $0x1b8] sm:$0xff]  }
 0x950   :  { %10277 = vmatpush3.bf16.msra.mxu1 %v10874_v31  ;;  %10305 = vmatpush3.bf16.msra.mxu0 %v10875_v41  ;;  %v10880_v41 = vld [vmem:[%s13935_s7 + $0x170] sm:$0xff]  }
 0x951   :  { %10318 = vmatprep.subr.bf16.mxu1 %v10876_v10  ;;  %10346 = vmatprep.subr.bf16.mxu0 %v10877_v5  ;;  %v10881_v10 = vld [vmem:[%s13935_s7 + $0x1f0] sm:$0xff]  }
 0x952   :  { %v10882_v5 = vld [vmem:[%s13935_s7 + $0x130] sm:$0xff]  }
 0x985   :  { %v7171_v32 = vpop.f32.mrf.mxu1  ;;  %v7224_v28 = vpop.f32.mrf.mxu0 }
 0x986   :  { %v7172_v11 = vadd.f32 %v7171_v32, %v13136_v33  ;;  %v7225_v15 = vadd.f32 %v7224_v28, %v13141_v49  ;;  %v10883_v32 = vld [vmem:[%s13935_s7 + $0x1b0] sm:$0xff]   ;;  %v10884_v28 = vld [vmem:[%s13935_s7 + $0x168] sm:$0xff]  }
 0x987   :  { %v7173_v52 = vpop.f32.mrf.mxu1  ;;  %v7226_v4 = vpop.f32.mrf.mxu0 }
 0x988   :  { %v7174_v22 = vadd.f32 %v7173_v52, %v13126_v42  ;;  %v7227_v40 = vadd.f32 %v7226_v4, %v13131_v55  ;;  %v7561_v30 = vmax.f32 %v7172_v11, 0.0  ;;  %v7563_v17 = vmax.f32 %v7225_v15, 0.0  ;;  %v10885_v52 = vld [vmem:[%s13935_s7 + $0x1e8] sm:$0xff]   ;;  %v10893_v11 = vld [vmem:[%s13935_s7 + $0x1d8] sm:$0xff]  }
 0x989   :  { %v7175_v14 = vpop.f32.mrf.mxu1  ;;  %v7228_v50 = vpop.f32.mrf.mxu0  ;;  %v10886_v4 = vld [vmem:[%s13935_s7 + $0x128] sm:$0xff]   ;;  %v10894_v15 = vld [vmem:[%s13935_s7 + $0x118] sm:$0xff]  }
 0x98a   :  { %v7176_v62 = vadd.f32 %v7175_v14, %v13136_v33  ;;  %v7229_v18 = vadd.f32 %v7228_v50, %v13141_v49  ;;  %v7562_v2 = vmax.f32 %v7174_v22, 0.0  ;;  %v7564_v21 = vmax.f32 %v7227_v40, 0.0  ;;  %v10887_v14 = vld [vmem:[%s13935_s7 + $0x1a8] sm:$0xff]   ;;  %v10888_v50 = vld [vmem:[%s13935_s7 + $0x160] sm:$0xff]  }
 0x98b   :  { %v7177_v7 = vpop.f32.mrf.mxu1  ;;  %v7230_v39 = vpop.f32.mrf.mxu0  ;;  %v10889_v22 = vld [vmem:[%s13935_s7 + $0x1e0] sm:$0xff]  }
 0x98c   :  { %v7178_v12 = vadd.f32 %v7177_v7, %v13126_v42  ;;  %v7231_v37 = vadd.f32 %v7230_v39, %v13131_v55  ;;  %v7577_v8 = vmax.f32 %v7176_v62, 0.0  ;;  %v7579_v46 = vmax.f32 %v7229_v18, 0.0  ;;  %v10890_v40 = vld [vmem:[%s13935_s7 + $0x120] sm:$0xff]   ;;  %v10892_v18 = vld [vmem:[%s13935_s7 + $0x158] sm:$0xff]   ;;  %v10896_v39 = vld [vmem:[%s13935_s7 + $0x150] sm:$0xff]  }
 0x98d   :  { %v10891_v62 = vld [vmem:[%s13935_s7 + $0x1a0] sm:$0xff]   ;;  %v10895_v7 = vld [vmem:[%s13935_s7 + $0x198] sm:$0xff]  }
 0x98e   :  { %v7578_v25 = vmax.f32 %v7178_v12, 0.0  ;;  %v7580_v58 = vmax.f32 %v7231_v37, 0.0  ;;  %v7625_v34 = vpack.c.bf16 %v7577_v8, %v7561_v30  ;;  %v7627_v31 = vpack.c.bf16 %v7579_v46, %v7563_v17  ;;  %v10897_v12 = vld [vmem:[%s13935_s7 + $0x1d0] sm:$0xff]   ;;  %v10900_v46 = vld [vmem:[%s13935_s7 + $0x148] sm:$0xff]   ;;  %v10905_v30 = vld [vmem:[%s13935_s7 + $0x1c0] sm:$0xff]  }
 0x98f   :  { %v10898_v37 = vld [vmem:[%s13935_s7 + $0x110] sm:$0xff]   ;;  %v10906_v17 = vld [vmem:[%s13935_s7 + $0x100] sm:$0xff]  }
 0x990   :  { %v7626_v54 = vpack.c.bf16 %v7578_v25, %v7562_v2  ;;  %v7628_v0 = vpack.c.bf16 %v7580_v58, %v7564_v21  ;;  %v10899_v8 = vld [vmem:[%s13935_s7 + $0x190] sm:$0xff]   ;;  %v10901_v2 = vld [vmem:[%s13935_s7 + $0x1c8] sm:$0xff]   ;;  %v10904_v58 = vld [vmem:[%s13935_s7 + $0x140] sm:$0xff]  }
 0x991   :  { %v10902_v21 = vld [vmem:[%s13935_s7 + $0x108] sm:$0xff]  }
 0x992   :  { %8720 = vmatprep.mubr.bf16.mxu1 %v7626_v54  ;;  %8769 = vmatprep.mubr.bf16.mxu0 %v7628_v0  ;;  %v10903_v25 = vld [vmem:[%s13935_s7 + $0x188] sm:$0xff]   ;;  %v10907_v54 = vld [vmem:[%s13935_s7 + $0x180] sm:$0xff]   ;;  %v10908_v0 = vld [vmem:[%s13935_s7 + $0x278] sm:$0xff]  }
 0x993   :  { %8721 = vmatmul.mubr.bf16.vlgmr.msra.gmra.mxu1 %v7625_v34  ;;  %8770 = vmatmul.mubr.bf16.vlgmr.msra.gmra.mxu0 %v7627_v31 }
 0x994   :  { %10319 = vmatpush3.bf16.msra.mxu1 %v10878_v48  ;;  %10347 = vmatpush3.bf16.msra.mxu0 %v10879_v35  ;;  %v10909_v48 = vld [vmem:[%s13935_s7 + $0x2f8] sm:$0xff]  }
 0x995   :  { %10320 = vmatprep.subr.bf16.mxu1 %v10880_v41  ;;  %10348 = vmatprep.subr.bf16.mxu0 %v10881_v10 }
 0x998   :  { %10321 = vmatpush3.bf16.msra.mxu1 %v10882_v5  ;;  %10349 = vmatpush3.bf16.msra.mxu0 %v10883_v32  ;;  %v6993_v32 = vsub.s32 5, %v13995_v38 }
 0x999   :  { %10322 = vmatprep.subr.bf16.mxu1 %v10884_v28  ;;  %10350 = vmatprep.subr.bf16.mxu0 %v10885_v52  ;;  %v7001_v28 = vsub.s32 7, %v13995_v38 }
 0x99c   :  { %10323 = vmatpush3.bf16.msra.mxu1 %v10886_v4  ;;  %10351 = vmatpush3.bf16.msra.mxu0 %v10887_v14 }
 0x99d   :  { %10324 = vmatprep.subr.bf16.mxu1 %v10888_v50  ;;  %10352 = vmatprep.subr.bf16.mxu0 %v10889_v22 }
 0x9a0   :  { %10325 = vmatpush3.bf16.msra.mxu1 %v10890_v40  ;;  %10353 = vmatpush3.bf16.msra.mxu0 %v10891_v62 }
 0x9a1   :  { %10326 = vmatprep.subr.bf16.mxu1 %v10892_v18  ;;  %10354 = vmatprep.subr.bf16.mxu0 %v10893_v11  ;;  %v6989_v11 = vsub.s32 4, %v13995_v38 }
 0x9a4   :  { %10327 = vmatpush3.bf16.msra.mxu1 %v10894_v15  ;;  %10355 = vmatpush3.bf16.msra.mxu0 %v10895_v7  ;;  %v6997_v15 = vsub.s32 6, %v13995_v38  ;;  %v10968_v38 = vld [vmem:[%s13935_s7 + $0x340] sm:$0xff]  }
 0x9a5   :  { %10328 = vmatprep.subr.bf16.mxu1 %v10896_v39  ;;  %10356 = vmatprep.subr.bf16.mxu0 %v10897_v12 }
 0x9a8   :  { %10329 = vmatpush3.bf16.msra.mxu1 %v10898_v37  ;;  %10357 = vmatpush3.bf16.msra.mxu0 %v10899_v8 }
 0x9a9   :  { %10330 = vmatprep.subr.bf16.mxu1 %v10900_v46  ;;  %10358 = vmatprep.subr.bf16.mxu0 %v10901_v2 }
 0x9ac   :  { %10331 = vmatpush3.bf16.msra.mxu1 %v10902_v21  ;;  %10359 = vmatpush3.bf16.msra.mxu0 %v10903_v25 }
 0x9ad   :  { %10332 = vmatprep.subr.bf16.mxu1 %v10904_v58  ;;  %10360 = vmatprep.subr.bf16.mxu0 %v10905_v30  ;;  %v6990_v30 = vrot.slane %v13121_v56, %v6989_v11 }
 0x9b0   :  { %10333 = vmatpush3.bf16.msra.mxu1 %v10906_v17  ;;  %10361 = vmatpush3.bf16.msra.mxu0 %v10907_v54  ;;  %v6998_v17 = vrot.slane %v13121_v56, %v6997_v15 }
 0x9b1   :  { %10374 = vmatprep.subr.bf16.mxu1 %v10908_v0  ;;  %10402 = vmatprep.subr.bf16.mxu0 %v10909_v48 }
 0x9ca   :  { %v7181_v35 = vpop.f32.mrf.mxu1  ;;  %v7234_v34 = vpop.f32.mrf.mxu0 }
 0x9cb   :  { %v7182_v22 = vadd.f32 %v7181_v35, %v13136_v33  ;;  %v7235_v40 = vadd.f32 %v7234_v34, %v13141_v49 }
 0x9cc   :  { %v7183_v31 = vpop.f32.mrf.mxu1  ;;  %v7236_v41 = vpop.f32.mrf.mxu0 }
 0x9cd   :  { %v7184_v52 = vadd.f32 %v7183_v31, %v13126_v42  ;;  %v7237_v4 = vadd.f32 %v7236_v41, %v13131_v55  ;;  %v7593_v58 = vmax.f32 %v7182_v22, 0.0 }
 0x9ce   :  { %v7185_v10 = vpop.f32.mrf.mxu1  ;;  %v7238_v5 = vpop.f32.mrf.mxu0 }
 0x9cf   :  { %v7186_v14 = vadd.f32 %v7185_v10, %v13136_v33  ;;  %v7239_v50 = vadd.f32 %v7238_v5, %v13141_v49  ;;  %v13262_v33 = vrot.slane %v13121_v56, %v6993_v32  ;;  %v13267_v49 = vrot.slane %v13121_v56, %v7001_v28 }
 0x9d0   :  { %v7187_v62 = vpop.f32.mrf.mxu1  ;;  %v7240_v18 = vpop.f32.mrf.mxu0  ;;  %v7594_v2 = vmax.f32 %v7184_v52, 0.0  ;;  %v7596_v21 = vmax.f32 %v7237_v4, 0.0 }
 0x9d1   :  { %v7188_v7 = vadd.f32 %v7187_v62, %v13126_v42  ;;  %v7241_v39 = vadd.f32 %v7240_v18, %v13131_v55  ;;  %v7609_v12 = vmax.f32 %v7186_v14, 0.0  ;;  %v7611_v37 = vmax.f32 %v7239_v50, 0.0 }
 0x9d2   :  { %v7277_v8 = vpop.f32.mrf.mxu1  ;;  %v7330_v46 = vpop.f32.mrf.mxu0  ;;  %v7595_v55 = vmax.f32 %v7235_v40, 0.0 }
 0x9d3   :  { %v7610_v25 = vmax.f32 %v7188_v7, 0.0  ;;  %v7612_v42 = vmax.f32 %v7241_v39, 0.0  ;;  %v7641_v34 = vpack.c.bf16 %v7609_v12, %v7593_v58  ;;  %v7278_v50 = vadd.f32 %v7277_v8, %v6990_v30 }
 0x9d4   :  { %v7279_v54 = vpop.f32.mrf.mxu1  ;;  %v7332_v0 = vpop.f32.mrf.mxu0  ;;  %v7643_v31 = vpack.c.bf16 %v7611_v37, %v7595_v55  ;;  %v7331_v22 = vadd.f32 %v7330_v46, %v6998_v17 }
 0x9d5   :  { %v7642_v48 = vpack.c.bf16 %v7610_v25, %v7594_v2  ;;  %v7644_v35 = vpack.c.bf16 %v7612_v42, %v7596_v21  ;;  %v7280_v41 = vadd.f32 %v7279_v54, %v13262_v33  ;;  %v7333_v52 = vadd.f32 %v7332_v0, %v13267_v49 }
 0x9d6   :  { %v7281_v10 = vpop.f32.mrf.mxu1  ;;  %v7334_v5 = vpop.f32.mrf.mxu0  ;;  %v7565_v58 = vmax.f32 %v7278_v50, 0.0  ;;  %v7567_v55 = vmax.f32 %v7331_v22, 0.0 }
 0x9d7   :  { %v7282_v4 = vadd.f32 %v7281_v10, %v6990_v30  ;;  %v7335_v14 = vadd.f32 %v7334_v5, %v6998_v17  ;;  %8728 = vmatprep.mubr.bf16.mxu1 %v7642_v48  ;;  %8777 = vmatprep.mubr.bf16.mxu0 %v7644_v35  ;;  %v7566_v2 = vmax.f32 %v7280_v41, 0.0  ;;  %v7568_v21 = vmax.f32 %v7333_v52, 0.0  ;;  %v10910_v48 = vld [vmem:[%s13935_s7 + $0x238] sm:$0xff]   ;;  %v10912_v52 = vld [vmem:[%s13935_s7 + $0x270] sm:$0xff]  }
 0x9d8   :  { %v7283_v40 = vpop.f32.mrf.mxu1  ;;  %v7336_v56 = vpop.f32.mrf.mxu0  ;;  %8729 = vmatmul.mubr.bf16.gmra.mxu1 %v7641_v34  ;;  %8778 = vmatmul.mubr.bf16.gmra.mxu0 %v7643_v31  ;;  %v10911_v35 = vld [vmem:[%s13935_s7 + $0x2b8] sm:$0xff]  }
 0x9d9   :  { %v7284_v62 = vadd.f32 %v7283_v40, %v13262_v33  ;;  %v7337_v18 = vadd.f32 %v7336_v56, %v13267_v49  ;;  %v7581_v7 = vmax.f32 %v7282_v4, 0.0  ;;  %v7583_v39 = vmax.f32 %v7335_v14, 0.0  ;;  %v10913_v4 = vld [vmem:[%s13935_s7 + $0x2f0] sm:$0xff]  }
 0x9da   :  { %v7287_v12 = vpop.f32.mrf.mxu1  ;;  %v7340_v37 = vpop.f32.mrf.mxu0 }
 0x9db   :  { %v7582_v25 = vmax.f32 %v7284_v62, 0.0  ;;  %v7584_v42 = vmax.f32 %v7337_v18, 0.0  ;;  %v7629_v34 = vpack.c.bf16 %v7581_v7, %v7565_v58  ;;  %v7631_v31 = vpack.c.bf16 %v7583_v39, %v7567_v55 }
 0x9dc   :  { %v7289_v8 = vpop.f32.mrf.mxu1  ;;  %v7342_v46 = vpop.f32.mrf.mxu0  ;;  %v7288_v40 = vadd.f32 %v7287_v12, %v6990_v30  ;;  %v7341_v18 = vadd.f32 %v7340_v37, %v6998_v17  ;;  %v10915_v37 = vld [vmem:[%s13935_s7 + $0x2b0] sm:$0xff]  }
 0x9dd   :  { %v7630_v54 = vpack.c.bf16 %v7582_v25, %v7566_v2  ;;  %v7632_v0 = vpack.c.bf16 %v7584_v42, %v7568_v21  ;;  %v7290_v41 = vadd.f32 %v7289_v8, %v13262_v33  ;;  %v7343_v14 = vadd.f32 %v7342_v46, %v13267_v49  ;;  %v13298_v2 = vld [vmem:[%s13936_s6 + $0x8] sm:$0xff] }
 0x9de   :  { %v7291_v10 = vpop.f32.mrf.mxu1  ;;  %v7344_v5 = vpop.f32.mrf.mxu0  ;;  %v10916_v42 = vld [vmem:[%s13935_s7 + $0x268] sm:$0xff]  }
 0x9df   :  { %v7292_v50 = vadd.f32 %v7291_v10, %v6990_v30  ;;  %v7345_v22 = vadd.f32 %v7344_v5, %v6998_v17  ;;  %8818 = vmatprep.mubr.bf16.mxu1 %v7630_v54  ;;  %8867 = vmatprep.mubr.bf16.mxu0 %v7632_v0  ;;  %v10914_v30 = vld [vmem:[%s13935_s7 + $0x230] sm:$0xff]   ;;  %v7598_v12 = vmax.f32 %v7290_v41, 0.0  ;;  %v7600_v58 = vmax.f32 %v7343_v14, 0.0 }
 0x9e0   :  { %v7293_v56 = vpop.f32.mrf.mxu1  ;;  %v7346_v62 = vpop.f32.mrf.mxu0  ;;  %8819 = vmatmul.mubr.bf16.vlgmr.msra.gmra.mxu1 %v7629_v34  ;;  %8868 = vmatmul.mubr.bf16.vlgmr.msra.gmra.mxu0 %v7631_v31  ;;  %v7597_v54 = vmax.f32 %v7288_v40, 0.0  ;;  %v10918_v31 = vld [vmem:[%s13935_s7 + $0x228] sm:$0xff]   ;;  %v10921_v40 = vld [vmem:[%s13935_s7 + $0x2e0] sm:$0xff]  }
 0x9e1   :  { %v7294_v7 = vadd.f32 %v7293_v56, %v13262_v33  ;;  %v7347_v39 = vadd.f32 %v7346_v62, %v13267_v49  ;;  %10375 = vmatpush3.bf16.msra.mxu1 %v10910_v48  ;;  %10403 = vmatpush3.bf16.msra.mxu0 %v10911_v35  ;;  %v7613_v21 = vmax.f32 %v7292_v50, 0.0  ;;  %v13310_v33 = vrot.slane %v13298_v2, %v6977_v27 }
 0x9e2   :  { %v13303_v25 = vpop.f32.mrf.mxu1  ;;  %v13305_v17 = vpop.f32.mrf.mxu0  ;;  %10376 = vmatprep.subr.bf16.mxu1 %v10912_v52  ;;  %10404 = vmatprep.subr.bf16.mxu0 %v10913_v4  ;;  %v13315_v49 = vrot.slane %v13298_v2, %v6985_v60  ;;  %v7615_v55 = vmax.f32 %v7345_v22, 0.0  ;;  %v10917_v60 = vld [vmem:[%s13935_s7 + $0x2e8] sm:$0xff]   ;;  %v7599_v48 = vmax.f32 %v7341_v18, 0.0  ;;  %v10920_v4 = vld [vmem:[%s13935_s7 + $0x260] sm:$0xff]  }
 0x9e3   :  { %v7614_v8 = vmax.f32 %v7294_v7, 0.0  ;;  %v7616_v46 = vmax.f32 %v7347_v39, 0.0  ;;  %v7645_v41 = vpack.c.bf16 %v7613_v21, %v7597_v54  ;;  %v10919_v52 = vld [vmem:[%s13935_s7 + $0x2a8] sm:$0xff]   ;;  %v10922_v39 = vld [vmem:[%s13935_s7 + $0x220] sm:$0xff]  }
 0x9e4   :  { %v7385_v27 = vpop.f32.mrf.mxu1  ;;  %v7438_v0 = vpop.f32.mrf.mxu0  ;;  %v7647_v14 = vpack.c.bf16 %v7615_v55, %v7599_v48  ;;  %v10923_v21 = vld [vmem:[%s13935_s7 + $0x2a0] sm:$0xff]   ;;  %v10926_v48 = vld [vmem:[%s13935_s7 + $0x218] sm:$0xff]  }
 0x9e5   :  { %v7646_v35 = vpack.c.bf16 %v7614_v8, %v7598_v12  ;;  %v7648_v34 = vpack.c.bf16 %v7616_v46, %v7600_v58  ;;  %10377 = vmatpush3.bf16.msra.mxu1 %v10914_v30  ;;  %10405 = vmatpush3.bf16.msra.mxu0 %v10915_v37  ;;  %v7386_v50 = vadd.f32 %v7385_v27, %v13310_v33  ;;  %v10924_v37 = vld [vmem:[%s13935_s7 + $0x258] sm:$0xff]  }
 0x9e6   :  { %v13329_v10 = vpop.f32.mrf.mxu1  ;;  %v13331_v5 = vpop.f32.mrf.mxu0  ;;  %10378 = vmatprep.subr.bf16.mxu1 %v10916_v42  ;;  %v7439_v22 = vadd.f32 %v7438_v0, %v13315_v49  ;;  %10406 = vmatprep.subr.bf16.mxu0 %v10917_v60  ;;  %v10925_v46 = vld [vmem:[%s13935_s7 + $0x2d8] sm:$0xff]  }
 0x9e7   :  { %8826 = vmatprep.mubr.bf16.mxu1 %v7646_v35  ;;  %8875 = vmatprep.mubr.bf16.mxu0 %v7648_v34  ;;  %v7570_v42 = vmax.f32 %v7386_v50, 0.0  ;;  %v10930_v50 = vld [vmem:[%s13935_s7 + $0x210] sm:$0xff]  }
 0x9e8   :  { %v7389_v56 = vpop.f32.mrf.mxu1  ;;  %v7442_v62 = vpop.f32.mrf.mxu0  ;;  %8827 = vmatmul.mubr.bf16.gmra.mxu1 %v7645_v41  ;;  %8876 = vmatmul.mubr.bf16.gmra.mxu0 %v7647_v14  ;;  %v7572_v58 = vmax.f32 %v7439_v22, 0.0  ;;  %v10928_v41 = vld [vmem:[%s13935_s7 + $0x250] sm:$0xff]  }
 0x9e9   :  { %v7390_v18 = vadd.f32 %v7389_v56, %v13310_v33  ;;  %v7443_v7 = vadd.f32 %v7442_v62, %v13315_v49  ;;  %10379 = vmatpush3.bf16.msra.mxu1 %v10918_v31  ;;  %10407 = vmatpush3.bf16.msra.mxu0 %v10919_v52  ;;  %v10927_v31 = vld [vmem:[%s13935_s7 + $0x298] sm:$0xff]   ;;  %v10929_v52 = vld [vmem:[%s13935_s7 + $0x2d0] sm:$0xff]   ;;  %v10932_v62 = vld [vmem:[%s13935_s7 + $0x248] sm:$0xff]  }
 0x9ea   :  { %v13349_v30 = vpop.f32.mrf.mxu1  ;;  %v13351_v12 = vpop.f32.mrf.mxu0  ;;  %10380 = vmatprep.subr.bf16.mxu1 %v10920_v4  ;;  %10408 = vmatprep.subr.bf16.mxu0 %v10921_v40  ;;  %v10931_v56 = vld [vmem:[%s13935_s7 + $0x290] sm:$0xff]  }
 0x9eb   :  { %v7586_v55 = vmax.f32 %v7390_v18, 0.0  ;;  %v7588_v8 = vmax.f32 %v7443_v7, 0.0  ;;  %v10933_v18 = vld [vmem:[%s13935_s7 + $0x2c8] sm:$0xff]   ;;  %v7006_v7 = vrot.slane %v13298_v2, %v6973_v51  ;;  %v10936_v51 = vld [vmem:[%s13935_s7 + $0x240] sm:$0xff]  }
 0x9ec   :  { %v7395_v54 = vpop.f32.mrf.mxu1  ;;  %v7448_v27 = vpop.f32.mrf.mxu0 }
 0x9ed   :  { %v7634_v0 = vpack.c.bf16 %v7586_v55, %v7570_v42  ;;  %v7636_v60 = vpack.c.bf16 %v7588_v8, %v7572_v58  ;;  %10381 = vmatpush3.bf16.msra.mxu1 %v10922_v39  ;;  %10409 = vmatpush3.bf16.msra.mxu0 %v10923_v21  ;;  %v7014_v21 = vrot.slane %v13298_v2, %v6981_v53  ;;  %v10934_v42 = vld [vmem:[%s13935_s7 + $0x208] sm:$0xff]  }
 0x9ee   :  { %v13365_v35 = vpop.f32.mrf.mxu1  ;;  %v13367_v34 = vpop.f32.mrf.mxu0  ;;  %10382 = vmatprep.subr.bf16.mxu1 %v10924_v37  ;;  %10410 = vmatprep.subr.bf16.mxu0 %v10925_v46  ;;  %v7388_v58 = vadd.f32 %v13329_v10, %v7006_v7  ;;  %v10935_v55 = vld [vmem:[%s13935_s7 + $0x288] sm:$0xff]   ;;  %v10937_v46 = vld [vmem:[%s13935_s7 + $0x2c0] sm:$0xff]   ;;  %v7384_v10 = vadd.f32 %v13303_v25, %v7006_v7 }
 0x9ef   :  { %8916 = vmatprep.mubr.bf16.mxu1 %v7634_v0  ;;  %8965 = vmatprep.mubr.bf16.mxu0 %v7636_v60  ;;  %v7441_v53 = vadd.f32 %v13331_v5, %v7014_v21  ;;  %v10938_v5 = vld [vmem:[%s13935_s7 + $0x200] sm:$0xff]  }
 0x9f0   :  { %v7399_v4 = vpop.f32.mrf.mxu1  ;;  %v7452_v14 = vpop.f32.mrf.mxu0  ;;  %v10939_v25 = vld [vmem:[%s13935_s7 + $0x280] sm:$0xff]  }
 0x9f1   :  { %10383 = vmatpush3.bf16.msra.mxu1 %v10926_v48  ;;  %10411 = vmatpush3.bf16.msra.mxu0 %v10927_v31  ;;  %v7400_v8 = vadd.f32 %v7399_v4, %v13310_v33  ;;  %v7453_v0 = vadd.f32 %v7452_v14, %v13315_v49  ;;  %v7437_v48 = vadd.f32 %v13305_v17, %v7014_v21  ;;  %v10940_v17 = vld [vmem:[%s13935_s7 + $0x378] sm:$0xff]  }
 0x9f2   :  { %v13381_v22 = vpop.f32.mrf.mxu1  ;;  %v13383_v40 = vpop.f32.mrf.mxu0  ;;  %10384 = vmatprep.subr.bf16.mxu1 %v10928_v41  ;;  %10412 = vmatprep.subr.bf16.mxu0 %v10929_v52  ;;  %v7396_v31 = vadd.f32 %v7395_v54, %v13310_v33  ;;  %v7585_v52 = vmax.f32 %v7388_v58, 0.0  ;;  %v7449_v4 = vadd.f32 %v7448_v27, %v13315_v49  ;;  %v7587_v33 = vmax.f32 %v7441_v53, 0.0  ;;  %v10941_v14 = vld [vmem:[%s13935_s7 + $0x3f8] sm:$0xff]  }
 0x9f3   :  { %v7618_v54 = vmax.f32 %v7400_v8, 0.0  ;;  %v7571_v27 = vmax.f32 %v7437_v48, 0.0  ;;  %v13445_v53 = vrot.slane %v13298_v2, %v7001_v28  ;;  %v10942_v8 = vld [vmem:[%s13935_s7 + $0x338] sm:$0xff]   ;;  %v10944_v28 = vld [vmem:[%s13935_s7 + $0x370] sm:$0xff]   ;;  %v7394_v48 = vadd.f32 %v13349_v30, %v7006_v7 }
 0x9f4   :  { %v7491_v39 = vpop.f32.mrf.mxu1  ;;  %v7544_v37 = vpop.f32.mrf.mxu0  ;;  %v10946_v30 = vld [vmem:[%s13935_s7 + $0x330] sm:$0xff]  }
 0x9f5   :  { %10385 = vmatpush3.bf16.msra.mxu1 %v10930_v50  ;;  %10413 = vmatpush3.bf16.msra.mxu0 %v10931_v56  ;;  %v7569_v50 = vmax.f32 %v7384_v10, 0.0  ;;  %v7620_v56 = vmax.f32 %v7453_v0, 0.0 }
 0x9f6   :  { %10386 = vmatprep.subr.bf16.mxu1 %v10932_v62  ;;  %10414 = vmatprep.subr.bf16.mxu0 %v10933_v18  ;;  %v13417_v60 = vpop.f32.mrf.mxu1  ;;  %v13421_v41 = vpop.f32.mrf.mxu0  ;;  %v7602_v62 = vmax.f32 %v7396_v31, 0.0  ;;  %v13439_v18 = vrot.slane %v13298_v2, %v6993_v32  ;;  %v7451_v32 = vadd.f32 %v13367_v34, %v7014_v21  ;;  %v10945_v34 = vld [vmem:[%s13935_s7 + $0x3f0] sm:$0xff]  }
 0x9f7   :  { %v7633_v58 = vpack.c.bf16 %v7585_v52, %v7569_v50  ;;  %v7447_v52 = vadd.f32 %v13351_v12, %v7014_v21  ;;  %v10947_v12 = vld [vmem:[%s13935_s7 + $0x3b0] sm:$0xff]   ;;  %v7601_v21 = vmax.f32 %v7394_v48, 0.0 }
 0x9f8   :  { %v7495_v49 = vpop.f32.mrf.mxu1  ;;  %v7650_v10 = vpack.c.bf16 %v7618_v54, %v7602_v62  ;;  %v10949_v54 = vld [vmem:[%s13935_s7 + $0x3e8] sm:$0xff]  }
 0x9f9   :  { %10387 = vmatpush3.bf16.msra.mxu1 %v10934_v42  ;;  %10415 = vmatpush3.bf16.msra.mxu0 %v10935_v55  ;;  %v7548_v42 = vpop.f32.mrf.mxu0  ;;  %v7604_v55 = vmax.f32 %v7449_v4, 0.0  ;;  %v7496_v0 = vadd.f32 %v7495_v49, %v13439_v18  ;;  %v7492_v4 = vadd.f32 %v7491_v39, %v13439_v18  ;;  %v10948_v39 = vld [vmem:[%s13935_s7 + $0x368] sm:$0xff]  }
 0x9fa   :  { %10388 = vmatprep.subr.bf16.mxu1 %v10936_v51  ;;  %10416 = vmatprep.subr.bf16.mxu0 %v10937_v46  ;;  %v7398_v51 = vadd.f32 %v13365_v35, %v7006_v7  ;;  %v7635_v46 = vpack.c.bf16 %v7587_v33, %v7571_v27  ;;  %v10943_v35 = vld [vmem:[%s13935_s7 + $0x3b8] sm:$0xff]   ;;  %v7619_v7 = vmax.f32 %v7451_v32, 0.0  ;;  %v10950_v27 = vld [vmem:[%s13935_s7 + $0x328] sm:$0xff]  }
 0x9fb   :  { %v7652_v31 = vpack.c.bf16 %v7620_v56, %v7604_v55  ;;  %v7590_v33 = vmax.f32 %v7496_v0, 0.0  ;;  %v7574_v50 = vmax.f32 %v7492_v4, 0.0  ;;  %v10952_v55 = vld [vmem:[%s13935_s7 + $0x360] sm:$0xff]   ;;  %v13492_v32 = vpop.f32.mrf.mxu0  ;;  %v10961_v4 = vld [vmem:[%s13935_s7 + $0x3d0] sm:$0xff]  }
 0x9fc   :  { %v10955_v0 = vld [vmem:[%s13935_s7 + $0x3a0] sm:$0xff]  }
 0x9fd   :  { %10389 = vmatpush3.bf16.msra.mxu1 %v10938_v5  ;;  %10417 = vmatpush3.bf16.msra.mxu0 %v10939_v25  ;;  %v7549_v5 = vadd.f32 %v7548_v42, %v13445_v53  ;;  %v7617_v25 = vmax.f32 %v7398_v51, 0.0  ;;  %v7638_v42 = vpack.c.bf16 %v7590_v33, %v7574_v50  ;;  %v10964_v33 = vld [vmem:[%s13935_s7 + $0x348] sm:$0xff]  }
 0x9fe   :  { %10430 = vmatprep.subr.bf16.mxu1 %v10940_v17  ;;  %10458 = vmatprep.subr.bf16.mxu0 %v10941_v14  ;;  %v7545_v17 = vadd.f32 %v7544_v37, %v13445_v53  ;;  %v7603_v14 = vmax.f32 %v7447_v52, 0.0  ;;  %v10960_v52 = vld [vmem:[%s13935_s7 + $0x350] sm:$0xff]  }
 0x9ff   :  { %v7592_v37 = vmax.f32 %v7549_v5, 0.0  ;;  %v7649_v56 = vpack.c.bf16 %v7617_v25, %v7601_v21  ;;  %v10958_v5 = vld [vmem:[%s13935_s7 + $0x318] sm:$0xff]  }
 0xa00   :  { %8917 = vmatmul.mubr.bf16.vlgmr.msra.gmra.mxu1 %v7633_v58  ;;  %8966 = vmatmul.mubr.bf16.vlgmr.msra.gmra.mxu0 %v7635_v46  ;;  %v7576_v49 = vmax.f32 %v7545_v17, 0.0  ;;  %v7651_v62 = vpack.c.bf16 %v7619_v7, %v7603_v14  ;;  %v10951_v58 = vld [vmem:[%s13935_s7 + $0x3a8] sm:$0xff]   ;;  %v13490_v46 = vpop.f32.mrf.mxu1  ;;  %v10963_v7 = vld [vmem:[%s13935_s7 + $0x390] sm:$0xff]  }
 0xa01   :  { %8924 = vmatprep.mubr.bf16.mxu1 %v7650_v10  ;;  %8973 = vmatprep.mubr.bf16.mxu0 %v7652_v31  ;;  %v10954_v10 = vld [vmem:[%s13935_s7 + $0x320] sm:$0xff]   ;;  %v7554_v31 = vpop.f32.mrf.mxu0  ;;  %v10966_v14 = vld [vmem:[%s13935_s7 + $0x308] sm:$0xff]  }
 0xa02   :  { %10431 = vmatpush3.bf16.msra.mxu1 %v10942_v8  ;;  %10459 = vmatpush3.bf16.msra.mxu0 %v10943_v35  ;;  %v7640_v51 = vpack.c.bf16 %v7592_v37, %v7576_v49  ;;  %v10953_v8 = vld [vmem:[%s13935_s7 + $0x3e0] sm:$0xff]   ;;  %v10956_v35 = vld [vmem:[%s13935_s7 + $0x358] sm:$0xff]   ;;  %v7501_v48 = vpop.f32.mrf.mxu1  ;;  %v7030_v37 = vrot.slane %v13298_v2, %v6997_v15 }
 0xa03   :  { %10432 = vmatprep.subr.bf16.mxu1 %v10944_v28  ;;  %10460 = vmatprep.subr.bf16.mxu0 %v10945_v34  ;;  %v10957_v28 = vld [vmem:[%s13935_s7 + $0x3d8] sm:$0xff]   ;;  %v7556_v17 = vpop.f32.mrf.mxu0 }
 0xa04   :  { %v10959_v34 = vld [vmem:[%s13935_s7 + $0x398] sm:$0xff]   ;;  %v7503_v25 = vpop.f32.mrf.mxu1 }
 0xa06   :  { %10433 = vmatpush3.bf16.msra.mxu1 %v10946_v30  ;;  %10461 = vmatpush3.bf16.msra.mxu0 %v10947_v12  ;;  %v10962_v30 = vld [vmem:[%s13935_s7 + $0x310] sm:$0xff]   ;;  %v10965_v12 = vld [vmem:[%s13935_s7 + $0x3c8] sm:$0xff]   ;;  %v7505_v21 = vpop.f32.mrf.mxu1 }
 0xa07   :  { %10434 = vmatprep.subr.bf16.mxu1 %v10948_v39  ;;  %10462 = vmatprep.subr.bf16.mxu0 %v10949_v54  ;;  %v7022_v39 = vrot.slane %v13298_v2, %v6989_v11  ;;  %v7558_v54 = vpop.f32.mrf.mxu0  ;;  %v7547_v11 = vadd.f32 %v13421_v41, %v7030_v37  ;;  %v7506_v15 = vadd.f32 %v7505_v21, %v13439_v18  ;;  %v10969_v2 = vld [vmem:[%s13935_s7 + $0x3c0] sm:$0xff]  }
 0xa08   :  { %8925 = vmatmul.mubr.bf16.gmra.mxu1 %v7649_v56  ;;  %8974 = vmatmul.mubr.bf16.gmra.mxu0 %v7651_v62  ;;  %v10967_v56 = vld [vmem:[%s13935_s7 + $0x388] sm:$0xff]   ;;  %v7559_v49 = vadd.f32 %v7558_v54, %v13445_v53  ;;  %v7502_v62 = vadd.f32 %v7501_v48, %v13439_v18  ;;  %v10970_v41 = vld [vmem:[%s13935_s7 + $0x300] sm:$0xff]  }
 0xa09   :  { %9014 = vmatprep.mubr.bf16.mxu1 %v7638_v42  ;;  %9063 = vmatprep.mubr.bf16.mxu0 %v7640_v51  ;;  %v7494_v50 = vadd.f32 %v13417_v60, %v7022_v39  ;;  %v7490_v60 = vadd.f32 %v13381_v22, %v7022_v39  ;;  %v10971_v22 = vld [vmem:[%s13935_s7 + $0x380] sm:$0xff]   ;;  %v7622_v51 = vmax.f32 %v7506_v15, 0.0 }
 0xa0a   :  { %10435 = vmatpush3.bf16.msra.mxu1 %v10950_v27  ;;  %10463 = vmatpush3.bf16.msra.mxu0 %v10951_v58  ;;  %v7543_v27 = vadd.f32 %v13383_v40, %v7030_v37  ;;  %v7555_v58 = vadd.f32 %v7554_v31, %v13445_v53  ;;  %v7557_v53 = vadd.f32 %v7556_v17, %v7030_v37 }
 0xa0b   :  { %10436 = vmatprep.subr.bf16.mxu1 %v10952_v55  ;;  %10464 = vmatprep.subr.bf16.mxu0 %v10953_v8  ;;  %v7589_v42 = vmax.f32 %v7494_v50, 0.0  ;;  %v7591_v55 = vmax.f32 %v7547_v11, 0.0  ;;  %v7573_v40 = vmax.f32 %v7490_v60, 0.0  ;;  %v7624_v8 = vmax.f32 %v7559_v49, 0.0 }
 0xa0c   :  { %v7575_v18 = vmax.f32 %v7543_v27, 0.0 }
 0xa0e   :  { %10437 = vmatpush3.bf16.msra.mxu1 %v10954_v10  ;;  %10465 = vmatpush3.bf16.msra.mxu0 %v10955_v0  ;;  %v7606_v10 = vmax.f32 %v7502_v62, 0.0  ;;  %v7637_v0 = vpack.c.bf16 %v7589_v42, %v7573_v40  ;;  %v7639_v48 = vpack.c.bf16 %v7591_v55, %v7575_v18 }
 0xa0f   :  { %10438 = vmatprep.subr.bf16.mxu1 %v10956_v35  ;;  %10466 = vmatprep.subr.bf16.mxu0 %v10957_v28  ;;  %v7608_v35 = vmax.f32 %v7555_v58, 0.0  ;;  %v7504_v28 = vadd.f32 %v7503_v25, %v7022_v39 }
 0xa10   :  { %v7654_v31 = vpack.c.bf16 %v7622_v51, %v7606_v10 }
 0xa12   :  { %10439 = vmatpush3.bf16.msra.mxu1 %v10958_v5  ;;  %10467 = vmatpush3.bf16.msra.mxu0 %v10959_v34  ;;  %v7500_v5 = vadd.f32 %v13490_v46, %v7022_v39  ;;  %v7656_v34 = vpack.c.bf16 %v7624_v8, %v7608_v35 }
 0xa13   :  { %10440 = vmatprep.subr.bf16.mxu1 %v10960_v52  ;;  %10468 = vmatprep.subr.bf16.mxu0 %v10961_v4  ;;  %v7553_v52 = vadd.f32 %v13492_v32, %v7030_v37  ;;  %v7621_v4 = vmax.f32 %v7504_v28, 0.0 }
 0xa16   :  { %10441 = vmatpush3.bf16.msra.mxu1 %v10962_v30  ;;  %10469 = vmatpush3.bf16.msra.mxu0 %v10963_v7  ;;  %v7623_v30 = vmax.f32 %v7557_v53, 0.0  ;;  %v7605_v7 = vmax.f32 %v7500_v5, 0.0 }
 0xa17   :  { %10442 = vmatprep.subr.bf16.mxu1 %v10964_v33  ;;  %10470 = vmatprep.subr.bf16.mxu0 %v10965_v12  ;;  %v7607_v33 = vmax.f32 %v7553_v52, 0.0 }
 0xa18   :  { %v7653_v12 = vpack.c.bf16 %v7621_v4, %v7605_v7 }
 0xa19   :  { %v7655_v21 = vpack.c.bf16 %v7623_v30, %v7607_v33 }
 0xa1a   :  { %10443 = vmatpush3.bf16.msra.mxu1 %v10966_v14  ;;  %10471 = vmatpush3.bf16.msra.mxu0 %v10967_v56 }
 0xa1b   :  { %10444 = vmatprep.subr.bf16.mxu1 %v10968_v38  ;;  %10472 = vmatprep.subr.bf16.mxu0 %v10969_v2 }
 0xa1e   :  { %10445 = vmatpush3.bf16.msra.mxu1 %v10970_v41  ;;  %10473 = vmatpush3.bf16.msra.mxu0 %v10971_v22 }
 0xa21   :  { %9015 = vmatmul.mubr.bf16.vlgmr.msra.gmra.mxu1 %v7637_v0  ;;  %9064 = vmatmul.mubr.bf16.vlgmr.msra.gmra.mxu0 %v7639_v48 }
 0xa22   :  { %9022 = vmatprep.mubr.bf16.mxu1 %v7654_v31  ;;  %9071 = vmatprep.mubr.bf16.mxu0 %v7656_v34 }
 0xa29   :  { %9023 = vmatmul.mubr.bf16.gmra.mxu1 %v7653_v12  ;;  %9072 = vmatmul.mubr.bf16.gmra.mxu0 %v7655_v21  ;;  %v9991_v12 = vld [vmem:[%s13937_s8] ss:$0 sm:$0xff] }
 0xa53   :  { %v10278_v25 = vpop.f32.mrf.mxu1  ;;  %v10306_v17 = vpop.f32.mrf.mxu0 }
 0xa55   :  { %v10279_v54 = vpop.f32.mrf.mxu1  ;;  %v10307_v14 = vpop.f32.mrf.mxu0 }
 0xa56   :  { %v10280_v7 = vadd.f32 %v10279_v54, %v10278_v25  ;;  %v10308_v61 = vadd.f32 %v10307_v14, %v10306_v17 }
 0xa57   :  { %v10281_v46 = vpop.f32.mrf.mxu1  ;;  %v10309_v39 = vpop.f32.mrf.mxu0 }
 0xa58   :  { %v8723_v9 = vadd.f32 %v10280_v7, %v9991_v12 }
 0xa59   :  { %v10282_v50 = vpop.f32.mrf.mxu1  ;;  %v10310_v56 = vpop.f32.mrf.mxu0 }
 0xa5a   :  { %v10283_v13 = vadd.f32 %v10282_v50, %v10281_v46  ;;  %v8772_v57 = vadd.f32 %v10308_v61, %v8723_v9  ;;  %v10311_v59 = vadd.f32 %v10310_v56, %v10309_v39 }
 0xa5c   :  { %v8726_v16 = vadd.f32 %v10283_v13, %v9991_v12 }
 0xa5e   :  { %v8775_v23 = vadd.f32 %v10311_v59, %v8726_v16 }
 0xa98   :  { %v10284_v32 = vpop.f32.mrf.mxu1  ;;  %v10312_v37 = vpop.f32.mrf.mxu0 }
 0xa9a   :  { %v10285_v38 = vpop.f32.mrf.mxu1  ;;  %v10313_v11 = vpop.f32.mrf.mxu0 }
 0xa9b   :  { %v10286_v36 = vadd.f32 %v10285_v38, %v10284_v32  ;;  %v10314_v17 = vadd.f32 %v10313_v11, %v10312_v37 }
 0xa9c   :  { %v10287_v15 = vpop.f32.mrf.mxu1  ;;  %v10315_v2 = vpop.f32.mrf.mxu0 }
 0xa9d   :  { %v8731_v7 = vadd.f32 %v10286_v36, %v9991_v12 }
 0xa9e   :  { %v10288_v60 = vpop.f32.mrf.mxu1  ;;  %v10316_v49 = vpop.f32.mrf.mxu0 }
 0xa9f   :  { %v10289_v3 = vadd.f32 %v10288_v60, %v10287_v15  ;;  %v10317_v14 = vadd.f32 %v10316_v49, %v10315_v2 }
 0xaa0   :  { %v10334_v27 = vpop.f32.mrf.mxu1  ;;  %v10362_v62 = vpop.f32.mrf.mxu0 }
 0xaa1   :  { %v8734_v46 = vadd.f32 %v10289_v3, %v9991_v12 }
 0xaa2   :  { %v10335_v41 = vpop.f32.mrf.mxu1  ;;  %v10363_v42 = vpop.f32.mrf.mxu0 }
 0xaa3   :  { %v10336_v63 = vadd.f32 %v10335_v41, %v10334_v27  ;;  %v10364_v29 = vadd.f32 %v10363_v42, %v10362_v62 }
 0xaa4   :  { %v10337_v58 = vpop.f32.mrf.mxu1  ;;  %v10365_v22 = vpop.f32.mrf.mxu0 }
 0xaa5   :  { %v8821_v25 = vadd.f32 %v10336_v63, %v8772_v57  ;;  %v8780_v57 = vadd.f32 %v10314_v17, %v8731_v7  ;;  %v8783_v63 = vadd.f32 %v10317_v14, %v8734_v46 }
 0xaa6   :  { %v10338_v55 = vpop.f32.mrf.mxu1  ;;  %v10366_v51 = vpop.f32.mrf.mxu0 }
 0xaa7   :  { %v10339_v54 = vadd.f32 %v10338_v55, %v10337_v58  ;;  %v8870_v50 = vadd.f32 %v10364_v29, %v8821_v25  ;;  %v10367_v9 = vadd.f32 %v10366_v51, %v10365_v22 }
 0xaa8   :  { %v10340_v40 = vpop.f32.mrf.mxu1  ;;  %v13564_v8 = vpop.f32.mrf.mxu0 }
 0xaa9   :  { %v8824_v20 = vadd.f32 %v10339_v54, %v8775_v23 }
 0xaaa   :  { %v10341_v18 = vpop.f32.mrf.mxu1  ;;  %v10369_v10 = vpop.f32.mrf.mxu0 }
 0xaab   :  { %v10342_v27 = vadd.f32 %v10341_v18, %v10340_v40  ;;  %v8873_v59 = vadd.f32 %v10367_v9, %v8824_v20  ;;  %v10370_v2 = vadd.f32 %v10369_v10, %v13564_v8 }
 0xaac   :  { %v10343_v0 = vpop.f32.mrf.mxu1  ;;  %v10371_v35 = vpop.f32.mrf.mxu0 }
 0xaad   :  { %v8829_v60 = vadd.f32 %v10342_v27, %v8780_v57 }
 0xaae   :  { %v10344_v28 = vpop.f32.mrf.mxu1  ;;  %v10372_v48 = vpop.f32.mrf.mxu0 }
 0xaaf   :  { %v10345_v61 = vadd.f32 %v10344_v28, %v10343_v0  ;;  %v10373_v49 = vadd.f32 %v10372_v48, %v10371_v35  ;;  %v8878_v20 = vadd.f32 %v10370_v2, %v8829_v60 }
 0xab1   :  { %v8832_v36 = vadd.f32 %v10345_v61, %v8783_v63  ;;  %v14015_v63 = vld [vmem:[#allocation10_spill] sm:$0xff] }
 0xab3   :  { %v8881_v51 = vadd.f32 %v10373_v49, %v8832_v36 }
 0xac0   :  { %v10390_v53 = vpop.f32.mrf.mxu1  ;;  %v10418_v31 = vpop.f32.mrf.mxu0 }
 0xac2   :  { %v10391_v5 = vpop.f32.mrf.mxu1  ;;  %v10419_v34 = vpop.f32.mrf.mxu0 }
 0xac3   :  { %v10392_v24 = vadd.f32 %v10391_v5, %v10390_v53  ;;  %v10420_v16 = vadd.f32 %v10419_v34, %v10418_v31 }
 0xac4   :  { %v10393_v52 = vpop.f32.mrf.mxu1  ;;  %v10421_v4 = vpop.f32.mrf.mxu0 }
 0xac5   :  { %v8919_v32 = vadd.f32 %v10392_v24, %v8870_v50 }
 0xac6   :  { %v10394_v30 = vpop.f32.mrf.mxu1  ;;  %v10422_v33 = vpop.f32.mrf.mxu0 }
 0xac7   :  { %v10395_v38 = vadd.f32 %v10394_v30, %v10393_v52  ;;  %v8968_v29 = vadd.f32 %v10420_v16, %v8919_v32  ;;  %v10423_v42 = vadd.f32 %v10422_v33, %v10421_v4 }
 0xac8   :  { %v10396_v21 = vpop.f32.mrf.mxu1  ;;  %v13569_v6 = vpop.f32.mrf.mxu0 }
 0xac9   :  { %v8922_v23 = vadd.f32 %v10395_v38, %v8873_v59  ;;  %v14016_v59 = vld [vmem:[#allocation7_spill] sm:$0xff] }
 0xaca   :  { %v10397_v47 = vpop.f32.mrf.mxu1  ;;  %v10425_v45 = vpop.f32.mrf.mxu0 }
 0xacb   :  { %v10398_v62 = vadd.f32 %v10397_v47, %v10396_v21  ;;  %v8971_v18 = vadd.f32 %v10423_v42, %v8922_v23  ;;  %v10426_v35 = vadd.f32 %v10425_v45, %v13569_v6  ;;  %v14017_v23 = vld [vmem:[#allocation14_spill] sm:$0xff] }
 0xacc   :  { %v10399_v1 = vpop.f32.mrf.mxu1  ;;  %v10427_v26 = vpop.f32.mrf.mxu0 }
 0xacd   :  { %v8927_v31 = vadd.f32 %v10398_v62, %v8878_v20 }
 0xace   :  { %v10400_v13 = vpop.f32.mrf.mxu1  ;;  %v10428_v39 = vpop.f32.mrf.mxu0 }
 0xacf   :  { %v10401_v24 = vadd.f32 %v10400_v13, %v10399_v1  ;;  %v10429_v48 = vadd.f32 %v10428_v39, %v10427_v26  ;;  %v8976_v25 = vadd.f32 %v10426_v35, %v8927_v31  ;;  %v14014_v26 = vld [vmem:[#allocation11_spill] sm:$0xff]  ;;  %v14020_v31 = vld [vmem:[#allocation13_spill] sm:$0xff] }
 0xad1   :  { %v8930_v5 = vadd.f32 %v10401_v24, %v8881_v51 }
 0xad3   :  { %v8979_v54 = vadd.f32 %v10429_v48, %v8930_v5 }
 0xae1   :  { %v10446_v56 = vpop.f32.mrf.mxu1  ;;  %v10474_v15 = vpop.f32.mrf.mxu0 }
 0xae3   :  { %v10447_v3 = vpop.f32.mrf.mxu1  ;;  %v10475_v11 = vpop.f32.mrf.mxu0 }
 0xae4   :  { %v10448_v37 = vadd.f32 %v10447_v3, %v10446_v56  ;;  %v10476_v22 = vadd.f32 %v10475_v11, %v10474_v15  ;;  %v14018_v11 = vld [vmem:[#allocation9_spill] sm:$0xff] }
 0xae5   :  { %v10449_v41 = vpop.f32.mrf.mxu1  ;;  %v10477_v55 = vpop.f32.mrf.mxu0 }
 0xae6   :  { %v9017_v58 = vadd.f32 %v10448_v37, %v8968_v29 }
 0xae7   :  { %v10450_v40 = vpop.f32.mrf.mxu1  ;;  %v10478_v53 = vpop.f32.mrf.mxu0 }
 0xae8   :  { %v9066_v0 = vadd.f32 %v10476_v22, %v9017_v58  ;;  %v10451_v28 = vadd.f32 %v10450_v40, %v10449_v41  ;;  %v10479_v1 = vadd.f32 %v10478_v53, %v10477_v55  ;;  %v14019_v58 = vld [vmem:[#allocation8_spill] sm:$0xff] }
 0xae9   :  { %v10452_v34 = vpop.f32.mrf.mxu1  ;;  %v10480_v10 = vpop.f32.mrf.mxu0 }
 0xaea   :  { %v9084_v52 = vcombine.high %v9066_v0, %v9066_v0  ;;  %v9091_v8 = vrot.slane %v9066_v0, %v11252_v19  ;;  %v9020_v47 = vadd.f32 %v10451_v28, %v8971_v18 }
 0xaeb   :  { %v10453_v4 = vpop.f32.mrf.mxu1  ;;  %v10481_v21 = vpop.f32.mrf.mxu0 }
 0xaec   :  { %v9098_v30 = vrot.slane %v9084_v52, %v11252_v19  ;;  %v9099_v33 = vcombine.high %v9091_v8, %v9091_v8  ;;  %v9069_v12 = vadd.f32 %v10479_v1, %v9020_v47  ;;  %v10454_v7 = vadd.f32 %v10453_v4, %v10452_v34  ;;  %v14021_v34 = vld [vmem:[#allocation12_spill] sm:$0xff] }
 0xaed   :  { %v10455_v46 = vpop.f32.mrf.mxu1  ;;  %v13576_v17 = vadd.f32 %v9091_v8, %v12855_v43  ;;  %v10483_v6 = vpop.f32.mrf.mxu0  ;;  %v10482_v9 = vadd.f32 %v10481_v21, %v10480_v10  ;;  %v14022_v8 = vld [vmem:[#allocation15_spill] sm:$0xff] }
 0xaee   :  { %v9100_v50 = vcombine.high %v9098_v30, %v9098_v30  ;;  %v13579_v14 = vadd.f32 %v9099_v33, %v12858_v44  ;;  %v9101_v27 = vcombine.high %v9069_v12, %v9069_v12  ;;  %v13582_v45 = vadd.f32 %v9098_v30, %v14014_v26  ;;  %v14023_v30 = vld [vmem:[#allocation2_spill] sm:$0xff] }
 0xaef   :  { %v9108_v61 = vrot.slane %v9069_v12, %v11252_v19  ;;  %v9025_v13 = vadd.f32 %v10454_v7, %v8976_v25  ;;  %v10456_v32 = vpop.f32.mrf.mxu1  ;;  %v10484_v57 = vpop.f32.mrf.mxu0  ;;  %v14024_v25 = vld [vmem:[#allocation16_spill] sm:$0xff]  ;;  %v14025_v7 = vld [vmem:[#allocation17_spill] sm:$0xff] }
 0xaf0   :  { %v9115_v38 = vrot.slane %v9101_v27, %v11252_v19  ;;  %v10457_v39 = vadd.f32 %v10456_v32, %v10455_v46  ;;  %v13587_v43 = vadd.f32 %v9100_v50, %v14015_v63  ;;  %v9202_v44 = vcombine.low %v13576_v17, %v13579_v14 }
 0xaf1   :  { %v9116_v56 = vcombine.high %v9108_v61, %v9108_v61  ;;  %v13592_v16 = vadd.f32 %v9108_v61, %v14016_v59  ;;  %v9074_v15 = vadd.f32 %v10482_v9, %v9025_v13  ;;  %v10485_v3 = vadd.f32 %v10484_v57, %v10483_v6  ;;  %v14026_v6 = vld [vmem:[#allocation18_spill] sm:$0xff]  ;;  %v14027_v61 = vld [vmem:[#allocation19_spill] sm:$0xff] }
 0xaf2   :  { %v9117_v60 = vcombine.high %v9115_v38, %v9115_v38  ;;  %v9028_v36 = vadd.f32 %v10457_v39, %v8979_v54  ;;  %v9203_v29 = vcombine.low %v13582_v45, %v13587_v43  ;;  %v13600_v2 = vadd.f32 %v9115_v38, %v14018_v11  ;;  %v14029_v11 = vld [vmem:[#allocation4_spill] sm:$0xff] }
 0xaf3   :  { %v13597_v37 = vadd.f32 %v9116_v56, %v14017_v23  ;;  %v9118_v49 = vcombine.high %v9074_v15, %v9074_v15  ;;  %v9125_v62 = vrot.slane %v9074_v15, %v11252_v19  ;;  %v9210_v41 = vrot.slane %v9202_v44, %v11252_v19 }
 0xaf4   :  { %v9077_v24 = vadd.f32 %v10485_v3, %v9028_v36  ;;  %v9217_v42 = vrot.slane %v9203_v29, %v11252_v19  ;;  %v13606_v22 = vadd.f32 %v9117_v60, %v14019_v58  ;;  %v14028_v29 = vld [vmem:[#allocation3_spill] sm:$0xff] }
 0xaf5   :  { %v9132_v55 = vrot.slane %v9118_v49, %v11252_v19  ;;  %v9133_v20 = vcombine.high %v9125_v62, %v9125_v62  ;;  %v9219_v51 = vcombine.low %v13592_v16, %v13597_v37  ;;  %v13615_v5 = vadd.f32 %v9125_v62, %v14020_v31  ;;  %v14030_v62 = vld [vmem:[#allocation5_spill] sm:$0xff] }
 0xaf6   :  { %v9135_v40 = vcombine.high %v9077_v24, %v9077_v24  ;;  %v9142_v18 = vrot.slane %v9077_v24, %v11252_v19  ;;  %v9218_v0 = vcombine.low %v9210_v41, %v9217_v42  ;;  %v9220_v28 = vcombine.low %v13600_v2, %v13606_v22  ;;  %v14031_v41 = vld [vmem:[#allocation6_spill] sm:$0xff] }
 0xaf7   :  { %v9134_v53 = vcombine.high %v9132_v55, %v9132_v55  ;;  %v13618_v52 = vadd.f32 %v9133_v20, %v14021_v34  ;;  %v13621_v47 = vadd.f32 %v9132_v55, %v14022_v8  ;;  %v9227_v48 = vrot.slane %v9219_v51, %v11252_v19 }
 0xaf8   :  { %v9149_v1 = vrot.slane %v9135_v40, %v11252_v19  ;;  %v9150_v10 = vcombine.high %v9142_v18, %v9142_v18  ;;  %v9274_v35 = vsel %vm154_vm0, %v9218_v0, 0.0  ;;  %v9234_v4 = vrot.slane %v9220_v28, %v11252_v19 }
 0xaf9   :  { %9275 = vadd.xlane.f32.xlu1 %v9274_v35  ;;  %v13628_v33 = vadd.f32 %v9134_v53, %v14023_v30  ;;  %v9236_v12 = vcombine.low %v13615_v5, %v13618_v52  ;;  %v13633_v54 = vadd.f32 %v9142_v18, %v14024_v25 }
 0xafa   :  { %v9151_v21 = vcombine.high %v9149_v1, %v9149_v1  ;;  %v13636_v46 = vadd.f32 %v9150_v10, %v14025_v7  ;;  %v9235_v50 = vcombine.low %v9227_v48, %v9234_v4  ;;  %v13641_v26 = vadd.f32 %v9149_v1, %v14026_v6 }
 0xafb   :  { %v9237_v27 = vcombine.low %v13621_v47, %v13628_v33  ;;  %v9244_v38 = vrot.slane %v9236_v12, %v11252_v19 }
 0xafc   :  { %v13644_v13 = vadd.f32 %v9151_v21, %v14027_v61  ;;  %v9253_v9 = vcombine.low %v13633_v54, %v13636_v46  ;;  %v9277_v32 = vsel %vm154_vm0, %v9235_v50, 0.0 }
 0xafd   :  { %v9251_v39 = vrot.slane %v9237_v27, %v11252_v19  ;;  %9278 = vadd.xlane.f32.xlu0 %v9277_v32 }
 0xafe   :  { %v9254_v57 = vcombine.low %v13641_v26, %v13644_v13  ;;  %v9261_v44 = vrot.slane %v9253_v9, %v11252_v19 }
 0xaff   :  { %v9252_v63 = vcombine.low %v9244_v38, %v9251_v39 }
 0xb00   :  { %v9268_v56 = vrot.slane %v9254_v57, %v11252_v19 }
 0xb01   :  { %v9280_v59 = vsel %vm154_vm0, %v9252_v63, 0.0 }
 0xb02   :  { %9281 = vadd.xlane.f32.xlu1 %v9280_v59  ;;  %v9269_v15 = vcombine.low %v9261_v44, %v9268_v56 }
 0xb04   :  { %v9283_v60 = vsel %vm154_vm0, %v9269_v15, 0.0 }
 0xb05   :  { %9284 = vadd.xlane.f32.xlu0 %v9283_v60 }
 0xb82   :  { %v9276_v36 = vpop.xlane.xlu1 %9275 }
 0xb83   :  { %v9286_v3 = vmul.f32 0.0625, %v9276_v36 }
 0xb85   :  { %v9300_v23 = vrot.slane %v9286_v3, %v14028_v29  ;;  %v9307_v49 = vrot.slane %v9286_v3, %v14029_v11  ;;  %v9314_v24 = vrot.slane %v9286_v3, %v14030_v62  ;;  %v9321_v42 = vrot.slane %v9286_v3, %v14031_v41 }
 0xb86   :  { %v9279_v40 = vpop.xlane.xlu0 %9278 }
 0xb87   :  { %v13662_v58 = vsub.f32 %v13576_v17, %v9300_v23  ;;  %v13665_v55 = vsub.f32 %v13579_v14, %v9307_v49  ;;  %v13668_v20 = vsub.f32 %v13582_v45, %v9314_v24  ;;  %v13671_v51 = vsub.f32 %v13587_v43, %v9321_v42 }
 0xb88   :  { %v9287_v18 = vmul.f32 0.0625, %v9279_v40 }
 0xb89   :  { %v9438_v0 = vmul.f32 %v13662_v58, %v13662_v58  ;;  %v9439_v28 = vmul.f32 %v13665_v55, %v13665_v55  ;;  %v9440_v17 = vmul.f32 %v13668_v20, %v13668_v20  ;;  %v9441_v14 = vmul.f32 %v13671_v51, %v13671_v51 }
 0xb8a   :  { %v9328_v45 = vrot.slane %v9287_v18, %v14028_v29  ;;  %v9335_v53 = vrot.slane %v9287_v18, %v14029_v11  ;;  %v9342_v43 = vrot.slane %v9287_v18, %v14030_v62  ;;  %v9349_v31 = vrot.slane %v9287_v18, %v14031_v41 }
 0xb8b   :  { %v9282_v34 = vpop.xlane.xlu1 %9281  ;;  %v9470_v8 = vcombine.low %v9438_v0, %v9439_v28  ;;  %v9471_v1 = vcombine.low %v9440_v17, %v9441_v14 }
 0xb8c   :  { %v13686_v10 = vsub.f32 %v13592_v16, %v9328_v45  ;;  %v13689_v35 = vsub.f32 %v13597_v37, %v9335_v53  ;;  %v13692_v48 = vsub.f32 %v13600_v2, %v9342_v43  ;;  %v13695_v4 = vsub.f32 %v13606_v22, %v9349_v31 }
 0xb8d   :  { %v9288_v30 = vmul.f32 0.0625, %v9282_v34  ;;  %v9478_v12 = vrot.slane %v9470_v8, %v11252_v19  ;;  %v9485_v21 = vrot.slane %v9471_v1, %v11252_v19 }
 0xb8e   :  { %v9285_v25 = vpop.xlane.xlu0 %9284  ;;  %v9442_v7 = vmul.f32 %v13686_v10, %v13686_v10  ;;  %v9443_v16 = vmul.f32 %v13689_v35, %v13689_v35  ;;  %v9444_v37 = vmul.f32 %v13692_v48, %v13692_v48  ;;  %v9445_v2 = vmul.f32 %v13695_v4, %v13695_v4 }
 0xb8f   :  { %v9356_v22 = vrot.slane %v9288_v30, %v14028_v29  ;;  %v9363_v50 = vrot.slane %v9288_v30, %v14029_v11  ;;  %v9370_v27 = vrot.slane %v9288_v30, %v14030_v62  ;;  %v9377_v6 = vrot.slane %v9288_v30, %v14031_v41 }
 0xb90   :  { %v9289_v61 = vmul.f32 0.0625, %v9285_v25  ;;  %v9486_v9 = vcombine.low %v9478_v12, %v9485_v21  ;;  %v9487_v32 = vcombine.low %v9442_v7, %v9443_v16  ;;  %v9488_v38 = vcombine.low %v9444_v37, %v9445_v2  ;;  %v10120_v2 = vld [vmem:[%s13938_s11] ss:$0 sm:$0xff] }
 0xb91   :  { %v13712_v39 = vsub.f32 %v13615_v5, %v9356_v22  ;;  %v13715_v57 = vsub.f32 %v13618_v52, %v9363_v50  ;;  %v13718_v63 = vsub.f32 %v13621_v47, %v9370_v27  ;;  %v13721_v44 = vsub.f32 %v13628_v33, %v9377_v6  ;;  %v10121_v50 = vld [vmem:[%s13939_s12] ss:$0 sm:$0xff] }
 0xb92   :  { %v9384_v56 = vrot.slane %v9289_v61, %v14028_v29  ;;  %v9391_v59 = vrot.slane %v9289_v61, %v14029_v11  ;;  %v9398_v15 = vrot.slane %v9289_v61, %v14030_v62  ;;  %v9405_v60 = vrot.slane %v9289_v61, %v14031_v41 }
 0xb93   :  { %v9542_v5 = vsel %vm154_vm0, %v9486_v9, 0.0  ;;  %v9495_v36 = vrot.slane %v9487_v32, %v11252_v19  ;;  %v9502_v52 = vrot.slane %v9488_v38, %v11252_v19  ;;  %v9446_v47 = vmul.f32 %v13712_v39, %v13712_v39 }
 0xb94   :  { %v13733_v33 = vsub.f32 %v13633_v54, %v9384_v56  ;;  %v13736_v3 = vsub.f32 %v13636_v46, %v9391_v59  ;;  %v13739_v23 = vsub.f32 %v13641_v26, %v9398_v15  ;;  %v13742_v49 = vsub.f32 %v13644_v13, %v9405_v60  ;;  %9543 = vadd.xlane.f32.xlu1 %v9542_v5 }
 0xb95   :  { %v9503_v24 = vcombine.low %v9495_v36, %v9502_v52  ;;  %v9447_v42 = vmul.f32 %v13715_v57, %v13715_v57  ;;  %v9448_v40 = vmul.f32 %v13718_v63, %v13718_v63  ;;  %v9449_v54 = vmul.f32 %v13721_v44, %v13721_v44 }
 0xb96   :  { %v9450_v46 = vmul.f32 %v13733_v33, %v13733_v33  ;;  %v9451_v26 = vmul.f32 %v13736_v3, %v13736_v3  ;;  %v9452_v13 = vmul.f32 %v13739_v23, %v13739_v23  ;;  %v9453_v18 = vmul.f32 %v13742_v49, %v13742_v49 }
 0xb97   :  { %v9545_v0 = vsel %vm154_vm0, %v9503_v24, 0.0  ;;  %v9504_v28 = vcombine.low %v9446_v47, %v9447_v42  ;;  %v9505_v17 = vcombine.low %v9448_v40, %v9449_v54  ;;  %v9719_v27 = vcombine.high %v10120_v2, %v10120_v2 }
 0xb98   :  { %9546 = vadd.xlane.f32.xlu0 %v9545_v0  ;;  %v9521_v14 = vcombine.low %v9450_v46, %v9451_v26  ;;  %v9522_v45 = vcombine.low %v9452_v13, %v9453_v18  ;;  %v9761_v32 = vcombine.high %v10121_v50, %v10121_v50  ;;  %v13772_v59 = vrot.slane %v10120_v2, %v11252_v19 }
 0xb99   :  { %v9512_v53 = vrot.slane %v9504_v28, %v11252_v19  ;;  %v9519_v43 = vrot.slane %v9505_v17, %v11252_v19  ;;  %v13775_v15 = vrot.slane %v9719_v27, %v11252_v19  ;;  %v13778_v5 = vrot.slane %v10121_v50, %v11252_v19 }
 0xb9a   :  { %v9529_v31 = vrot.slane %v9521_v14, %v11252_v19  ;;  %v9536_v34 = vrot.slane %v9522_v45, %v11252_v19  ;;  %v13781_v36 = vrot.slane %v9761_v32, %v11252_v19  ;;  %v13785_v47 = vcombine.high %v13772_v59, %v13772_v59 }
 0xb9b   :  { %v9520_v8 = vcombine.low %v9512_v53, %v9519_v43  ;;  %v13789_v24 = vcombine.high %v13775_v15, %v13775_v15  ;;  %v13797_v19 = vcombine.high %v13778_v5, %v13778_v5 }
 0xb9c   :  { %v9537_v1 = vcombine.low %v9529_v31, %v9536_v34  ;;  %v13801_v26 = vcombine.high %v13781_v36, %v13781_v36 }
 0xb9d   :  { %v9548_v30 = vsel %vm154_vm0, %v9520_v8, 0.0 }
 0xb9e   :  { %9549 = vadd.xlane.f32.xlu1 %v9548_v30  ;;  %v9551_v12 = vsel %vm154_vm0, %v9537_v1, 0.0 }
 0xb9f   :  { %9552 = vadd.xlane.f32.xlu0 %v9551_v12 }
 0xc1d   :  { %v9544_v21 = vpop.xlane.xlu1 %9543 }
 0xc1e   :  { %v9554_v25 = vmul.f32 0.0625, %v9544_v21 }
 0xc20   :  { %v9558_v7 = vadd.f32 1e-05, %v9554_v25 }
 0xc21   :  { %v9547_v16 = vpop.xlane.xlu0 %9546 }
 0xc22   :  { %11108 = vrsqrt.f32 %v9558_v7  ;;  %v9555_v37 = vmul.f32 0.0625, %v9547_v16 }
 0xc24   :  { %v9559_v22 = vadd.f32 1e-05, %v9555_v37 }
 0xc26   :  { %11110 = vrsqrt.f32 %v9559_v22 }
 0xc27   :  { %v9550_v6 = vpop.xlane.xlu1 %9549 }
 0xc28   :  { %v9556_v61 = vmul.f32 0.0625, %v9550_v6  ;;  %v9553_v9 = vpop.xlane.xlu0 %9552 }
 0xc29   :  { %v9557_v38 = vmul.f32 0.0625, %v9553_v9 }
 0xc2a   :  { %v9560_v56 = vadd.f32 1e-05, %v9556_v61 }
 0xc2b   :  { %v9561_v60 = vadd.f32 1e-05, %v9557_v38 }
 0xc2c   :  { %11112 = vrsqrt.f32 %v9560_v56 }
 0xc2d   :  { %11114 = vrsqrt.f32 %v9561_v60 }
 0xc2f   :  { %v11109_v52 = vpop.eup %11108 }
 0xc30   :  { %v9576_v42 = vrot.slane %v11109_v52, %v14028_v29  ;;  %v9583_v40 = vrot.slane %v11109_v52, %v14029_v11  ;;  %v9590_v54 = vrot.slane %v11109_v52, %v14030_v62  ;;  %v9597_v46 = vrot.slane %v11109_v52, %v14031_v41 }
 0xc32   :  { %v9698_v13 = vmul.f32 %v9576_v42, %v13662_v58  ;;  %v9699_v18 = vmul.f32 %v9583_v40, %v13665_v55  ;;  %v9700_v0 = vmul.f32 %v9590_v54, %v13668_v20  ;;  %v9701_v28 = vmul.f32 %v9597_v46, %v13671_v51 }
 0xc33   :  { %v11111_v17 = vpop.eup %11110 }
 0xc34   :  { %v9740_v14 = vmul.f32 %v13772_v59, %v9698_v13  ;;  %v9741_v45 = vmul.f32 %v13785_v47, %v9699_v18  ;;  %v9742_v53 = vmul.f32 %v13775_v15, %v9700_v0  ;;  %v9743_v43 = vmul.f32 %v13789_v24, %v9701_v28 }
 0xc35   :  { %v9604_v31 = vrot.slane %v11111_v17, %v14028_v29  ;;  %v9611_v58 = vrot.slane %v11111_v17, %v14029_v11  ;;  %v9618_v55 = vrot.slane %v11111_v17, %v14030_v62  ;;  %v9625_v20 = vrot.slane %v11111_v17, %v14031_v41 }
 0xc36   :  { %v9782_v51 = vadd.f32 %v13778_v5, %v9740_v14  ;;  %v9783_v34 = vadd.f32 %v13797_v19, %v9741_v45  ;;  %v9784_v8 = vadd.f32 %v13781_v36, %v9742_v53  ;;  %v9785_v1 = vadd.f32 %v13801_v26, %v9743_v43 }
 0xc37   :  { %v9702_v30 = vmul.f32 %v9604_v31, %v13686_v10  ;;  %v9703_v12 = vmul.f32 %v9611_v58, %v13689_v35  ;;  %v9704_v21 = vmul.f32 %v9618_v55, %v13692_v48  ;;  %v9705_v25 = vmul.f32 %v9625_v20, %v13695_v4 }
 0xc38   :  { %9799 = vst.msk [vmem:[%s13940_s13] sm:$0x3] %vm9798_vm6, %v9782_v51  ;;  %9800 = vst.msk [vmem:[%s13940_s13 + $0x2] sm:$0x3] %vm9798_vm6, %v9783_v34 }
 0xc39   :  { %9801 = vst.msk [vmem:[%s13940_s13 + $0x4] sm:$0x3] %vm9798_vm6, %v9784_v8  ;;  %9802 = vst.msk [vmem:[%s13940_s13 + $0x6] sm:$0x3] %vm9798_vm6, %v9785_v1  ;;  %v11113_v10 = vpop.eup %11112  ;;  %v9744_v35 = vmul.f32 %v13772_v59, %v9702_v30  ;;  %v9745_v48 = vmul.f32 %v13785_v47, %v9703_v12  ;;  %v9746_v4 = vmul.f32 %v13775_v15, %v9704_v21 }
 0xc3a   :  { %v9747_v7 = vmul.f32 %v13789_v24, %v9705_v25  ;;  %v11115_v16 = vpop.eup %11114  ;;  %v9632_v37 = vrot.slane %v11113_v10, %v14028_v29  ;;  %v9639_v2 = vrot.slane %v11113_v10, %v14029_v11  ;;  %v9646_v22 = vrot.slane %v11113_v10, %v14030_v62 }
 0xc3b   :  { %v9653_v50 = vrot.slane %v11113_v10, %v14031_v41  ;;  %v9786_v27 = vadd.f32 %v13778_v5, %v9744_v35  ;;  %v9787_v6 = vadd.f32 %v13797_v19, %v9745_v48  ;;  %v9788_v61 = vadd.f32 %v13781_v36, %v9746_v4 }
 0xc3c   :  { %v9789_v9 = vadd.f32 %v13801_v26, %v9747_v7  ;;  %v9706_v32 = vmul.f32 %v9632_v37, %v13712_v39  ;;  %v9707_v38 = vmul.f32 %v9639_v2, %v13715_v57  ;;  %v9708_v56 = vmul.f32 %v9646_v22, %v13718_v63 }
 0xc3d   :  { %v9709_v60 = vmul.f32 %v9653_v50, %v13721_v44  ;;  %9803 = vst.msk [vmem:[%s13940_s13 + $0x8] sm:$0x3] %vm9798_vm6, %v9786_v27  ;;  %9804 = vst.msk [vmem:[%s13940_s13 + $0xa] sm:$0x3] %vm9798_vm6, %v9787_v6  ;;  %v9660_v39 = vrot.slane %v11115_v16, %v14028_v29  ;;  %v9667_v57 = vrot.slane %v11115_v16, %v14029_v11 }
 0xc3e   :  { %9805 = vst.msk [vmem:[%s13940_s13 + $0xc] sm:$0x3] %vm9798_vm6, %v9788_v61  ;;  %9806 = vst.msk [vmem:[%s13940_s13 + $0xe] sm:$0x3] %vm9798_vm6, %v9789_v9  ;;  %v9674_v63 = vrot.slane %v11115_v16, %v14030_v62  ;;  %v9681_v44 = vrot.slane %v11115_v16, %v14031_v41  ;;  %v9748_v52 = vmul.f32 %v13772_v59, %v9706_v32 }
 0xc3f   :  { %v9749_v42 = vmul.f32 %v13785_v47, %v9707_v38  ;;  %v9750_v40 = vmul.f32 %v13775_v15, %v9708_v56  ;;  %v9751_v54 = vmul.f32 %v13789_v24, %v9709_v60  ;;  %v9710_v46 = vmul.f32 %v9660_v39, %v13733_v33 }
 0xc40   :  { %v9711_v13 = vmul.f32 %v9667_v57, %v13736_v3  ;;  %v9712_v29 = vmul.f32 %v9674_v63, %v13739_v23  ;;  %v9713_v11 = vmul.f32 %v9681_v44, %v13742_v49  ;;  %v9790_v62 = vadd.f32 %v13778_v5, %v9748_v52 }
 0xc41   :  { %v9791_v41 = vadd.f32 %v13797_v19, %v9749_v42  ;;  %v9792_v18 = vadd.f32 %v13781_v36, %v9750_v40  ;;  %v9793_v0 = vadd.f32 %v13801_v26, %v9751_v54  ;;  %v9752_v28 = vmul.f32 %v13772_v59, %v9710_v46 }
 0xc42   :  { %v9753_v17 = vmul.f32 %v13785_v47, %v9711_v13  ;;  %v9754_v33 = vmul.f32 %v13775_v15, %v9712_v29  ;;  %v9755_v3 = vmul.f32 %v13789_v24, %v9713_v11  ;;  %9807 = vst.msk [vmem:[%s13940_s13 + $0x10] sm:$0x3] %vm9798_vm6, %v9790_v62 }
 0xc43   :  { %9808 = vst.msk [vmem:[%s13940_s13 + $0x12] sm:$0x3] %vm9798_vm6, %v9791_v41  ;;  %9809 = vst.msk [vmem:[%s13940_s13 + $0x14] sm:$0x3] %vm9798_vm6, %v9792_v18  ;;  %v9794_v23 = vadd.f32 %v13778_v5, %v9752_v28 }
 0xc44   :  { %9810 = vst.msk [vmem:[%s13940_s13 + $0x16] sm:$0x3] %vm9798_vm6, %v9793_v0  ;;  %v9795_v49 = vadd.f32 %v13797_v19, %v9753_v17  ;;  %v9796_v59 = vadd.f32 %v13781_v36, %v9754_v33  ;;  %v9797_v15 = vadd.f32 %v13801_v26, %v9755_v3 }
 0xc45   :  { %9811 = vst.msk [vmem:[%s13940_s13 + $0x18] sm:$0x3] %vm9798_vm6, %v9794_v23 }
 0xc46   :  { %9812 = vst.msk [vmem:[%s13940_s13 + $0x1a] sm:$0x3] %vm9798_vm6, %v9795_v49  ;;  %9813 = vst.msk [vmem:[%s13940_s13 + $0x1c] sm:$0x3] %vm9798_vm6, %v9796_v59 }
 0xc47   :  { %9814 = vst.msk [vmem:[%s13940_s13 + $0x1e] sm:$0x3] %vm9798_vm6, %v9797_v15 }

// kernel: forward.14
= control target key start
LH: loop header
LB: loop body
LE: loop exit
PB: predicated region body
PF: predicated region fallthrough
CT: control target
= control target key end

     0   :  { %vm163_vm0 = vcmask 1043456   ;;  %v91_v0 = vlaneseq  ;;  %v11182_v4 = vmov 1983009808   ;;  %vm154_vm1 = vcmask 97280   ;;  %s11186_s27 = smov 104   ;;  %s11187_s28 = smov 110   ;;  %s13999_s1 = inlined_call_operand.vmem [shape: f32[12,36], index: 1, kind: input, shape index: {}]   ;;  %s14000_s0 = inlined_call_operand.vmem [shape: f32[16,2,12], index: 0, kind: input, shape index: {}]   ;;  %s14001_s2 = inlined_call_operand.vmem [shape: f32[1,36], index: 2, kind: input, shape index: {}]   ;;  %s14002_s3 = inlined_call_operand.vmem [shape: f32[12,12], index: 3, kind: input, shape index: {}]   ;;  %s14003_s4 = inlined_call_operand.vmem [shape: f32[1,12], index: 4, kind: input, shape index: {}]   ;;  %s14004_s5 = inlined_call_operand.vmem [shape: bf16[12,2048], index: 5, kind: input, shape index: {}]   ;;  %s14005_s9 = inlined_call_operand.vmem [shape: f32[1,12], index: 9, kind: input, shape index: {}]   ;;  %s14006_s10 = inlined_call_operand.vmem [shape: f32[1,12], index: 10, kind: input, shape index: {}]   ;;  %s14007_s7 = inlined_call_operand.vmem [shape: bf16[2048,12], index: 7, kind: input, shape index: {}]   ;;  %s14008_s6 = inlined_call_operand.vmem [shape: f32[1,2048], index: 6, kind: input, shape index: {}]   ;;  %s14009_s8 = inlined_call_operand.vmem [shape: f32[1,12], index: 8, kind: input, shape index: {}]   ;;  %s14010_s11 = inlined_call_operand.vmem [shape: f32[1,12], index: 11, kind: input, shape index: {}]   ;;  %s14011_s12 = inlined_call_operand.vmem [shape: f32[1,12], index: 12, kind: input, shape index: {}]   ;;  %s14012_s13 = inlined_call_operand.vmem [shape: f32[16,2,12], index: 13, kind: output, shape index: {}]  }
   0x1   :  { %v62_v1 = vld [vmem:[%s13999_s1 + $0x8] sm:$0xf]  ;;  %v61_v2 = vld [vmem:[%s13999_s1] sm:$0xff]  ;;  %v89_v5 = vunpack.c.l.s4 %v11182_v4  ;;  %v51_v15 = vld [vmem:[%s14000_s0 + $0xc] sm:$0x3]  ;;  %v14013_v44 = vmov 0.0  }
   0x2   :  { %v45_v3 = vld [vmem:[%s14000_s0] sm:$0x3]  ;;  %10536 = vmatprep.subr.msk.mxu0 %vm163_vm0, %v62_v1  ;;  %v46_v6 = vld [vmem:[%s14000_s0 + $0x2] sm:$0x3]  ;;  %v47_v7 = vld [vmem:[%s14000_s0 + $0x4] sm:$0x3]  ;;  %10876 = vmatprep.subr.msk.mxu1 %vm163_vm0, %v62_v1 }
   0x3   :  { %v48_v8 = vld [vmem:[%s14000_s0 + $0x6] sm:$0x3]  ;;  %10537 = vmatpush3.msk.msra.mxu0 %vm163_vm0, %v62_v1  ;;  %v86_v9 = vcombine.low %v45_v3, %v46_v6  ;;  %v90_v11 = vunpack.c.0.s8 %v89_v5  ;;  %v11287_v12 = vshrl.u32 %v91_v0, 7  ;;  %v49_v13 = vld [vmem:[%s14000_s0 + $0x8] sm:$0x3]  ;;  %10878 = vmatpush3.msk.msra.mxu1 %vm163_vm0, %v62_v1  ;;  %vm11184_vm2 = vmmov 0  }
   0x4   :  { %v87_v10 = vcombine.low %v47_v7, %v48_v8  ;;  %v50_v14 = vld [vmem:[%s14000_s0 + $0xa] sm:$0x3]  ;;  %10538 = vmatprep.subr.mxu0 %v61_v2  ;;  %v52_v16 = vld [vmem:[%s14000_s0 + $0xe] sm:$0x3]  ;;  %10877 = vmatprep.subr.mxu1 %v61_v2  ;;  %v53_v18 = vld [vmem:[%s14000_s0 + $0x10] sm:$0x3] }
   0x5   :  { %14039 = vst [vmem:[#allocation2_spill] sm:$0xff] %v11287_v12  ;;  %v103_v17 = vcombine.low %v49_v13, %v50_v14  ;;  %10539 = vmatpush3.msra.mxu0 %v61_v2  ;;  %v11306_v19 = vsub.s32 %v90_v11, %v11287_v12  ;;  %v104_v20 = vcombine.low %v51_v15, %v52_v16  ;;  %v54_v21 = vld [vmem:[%s14000_s0 + $0x12] sm:$0x3]  ;;  %v55_v22 = vld [vmem:[%s14000_s0 + $0x14] sm:$0x3]  ;;  %s11188_s29 = smov 122  }
   0x6   :  { %10879 = vmatpush3.msra.mxu1 %v61_v2  ;;  %v56_v23 = vld [vmem:[%s14000_s0 + $0x16] sm:$0x3]  ;;  %v120_v24 = vcombine.low %v53_v18, %v54_v21  ;;  %v57_v26 = vld [vmem:[%s14000_s0 + $0x18] sm:$0x3]  ;;  %v58_v27 = vld [vmem:[%s14000_s0 + $0x1a] sm:$0x3]  ;;  %10556 = vmatprep.subr.mxu0 %v14013_v44 }
   0x7   :  { %v121_v25 = vcombine.low %v55_v22, %v56_v23  ;;  %v59_v28 = vld [vmem:[%s14000_s0 + $0x1c] sm:$0x3]  ;;  %v94_v29 = vrot.slane %v86_v9, %v11306_v19  ;;  %v101_v30 = vrot.slane %v87_v10, %v11306_v19  ;;  %v111_v31 = vrot.slane %v103_v17, %v11306_v19  ;;  %v60_v33 = vld [vmem:[%s14000_s0 + $0x1e] sm:$0x3]  ;;  %10546 = vmatprep.subr.mxu1 %v14013_v44  ;;  %v9859_v46 = vld [vmem:[%s14001_s2] ss:$0 sm:$0xff] }
   0x8   :  { %v118_v32 = vrot.slane %v104_v20, %v11306_v19  ;;  %v128_v34 = vrot.slane %v120_v24, %v11306_v19  ;;  %v137_v36 = vcombine.low %v57_v26, %v58_v27  ;;  %v138_v37 = vcombine.low %v59_v28, %v60_v33  ;;  %s11185_s2 = smov 116   ;;  %s11189_s30 = smov 98  }
   0x9   :  { %v135_v35 = vrot.slane %v121_v25, %v11306_v19  ;;  %v102_v38 = vcombine.low %v94_v29, %v101_v30  ;;  %vm365_vm3 = vcmask 48128   ;;  %vm1884_vm4 = vcmask 1041408   ;;  %s11190_s14 = smov 6  }
   0xa   :  { %v119_v39 = vcombine.low %v111_v31, %v118_v32  ;;  %v145_v41 = vrot.slane %v137_v36, %v11306_v19  ;;  %v152_v42 = vrot.slane %v138_v37, %v11306_v19  ;;  %vm1701_vm5 = vcmask 9216  }
   0xb   :  { %v136_v40 = vcombine.low %v128_v34, %v135_v35  ;;  %10540 = vmatprep.mubr.msk.f32.mxu0 %vm154_vm1, %v102_v38  ;;  %vm1880_vm6 = vcmask 15360   ;;  %vm7128_vm7 = vcmask 1045504   ;;  %vm9838_vm8 = vcmask 91136  }
   0xc   :  { %10541 = vmatmul.mubr.msk.f32.vlgmr.msra.gmra.mxu0 %vm154_vm1, %v119_v39  ;;  %v153_v43 = vcombine.low %v145_v41, %v152_v42 }
   0xd   :  { %10543 = vmatprep.mubr.msk.f32.mxu1 %vm154_vm1, %v136_v40  ;;  %10558 = vmatprep.mubr.msk.f32.mxu0 %vm11184_vm2, %v14013_v44 }
   0xe   :  { %10544 = vmatmul.mubr.msk.f32.vlgmr.msra.gmra.mxu1 %vm154_vm1, %v153_v43 }
   0xf   :  { %10548 = vmatprep.mubr.msk.f32.mxu1 %vm11184_vm2, %v14013_v44 }
  0xcc   :  { %v10542_v45 = vpop.f32.mrf.mxu0 }
  0xcd   :  { %v239_v49 = vadd.f32 %v10542_v45, %v9859_v46 }
  0xce   :  { %v233_v47 = vpop.f32.mrf.mxu0  ;;  %v10545_v52 = vpop.f32.mrf.mxu1 }
  0xcf   :  { %v234_v48 = vadd.f32 %v9859_v46, %v233_v47  ;;  %v273_v56 = vcombine.high %v239_v49, %v239_v49  ;;  %v11365_v57 = vrot.slane %v239_v49, %v11306_v19  ;;  %v249_v8 = vadd.f32 %v10545_v52, %v9859_v46 }
  0xd0   :  { %v243_v60 = vpop.f32.mrf.mxu1 }
  0xd1   :  { %v256_v50 = vcombine.high %v234_v48, %v234_v48  ;;  %v11351_v51 = vrot.slane %v234_v48, %v11306_v19  ;;  %v11384_v62 = vrot.slane %v273_v56, %v11306_v19  ;;  %v11388_v63 = vcombine.high %v11365_v57, %v11365_v57 }
  0xd2   :  { %v244_v1 = vadd.f32 %v9859_v46, %v243_v60  ;;  %v11398_v2 = vrot.slane %v11365_v57, %v11306_v19  ;;  %v307_v14 = vcombine.high %v249_v8, %v249_v8  ;;  %v11441_v15 = vrot.slane %v249_v8, %v11306_v19 }
  0xd3   :  { %v11354_v53 = vrot.slane %v256_v50, %v11306_v19  ;;  %v11358_v54 = vcombine.high %v11351_v51, %v11351_v51  ;;  %v11362_v55 = vrot.slane %v11351_v51, %v11306_v19  ;;  %v11404_v3 = vcombine.high %v11384_v62, %v11384_v62 }
  0xd4   :  { %v290_v4 = vcombine.high %v244_v1, %v244_v1  ;;  %v11407_v5 = vrot.slane %v244_v1, %v11306_v19  ;;  %v11413_v6 = vrot.slane %v11388_v63, %v11306_v19  ;;  %v11419_v7 = vrot.slane %v11384_v62, %v11306_v19 }
  0xd5   :  { %v11369_v58 = vcombine.high %v11354_v53, %v11354_v53  ;;  %363 = vrot.lane.b32.xlu0 %v11362_v55, %s11185_s2  ;;  %v11375_v59 = vrot.slane %v11354_v53, %v11306_v19  ;;  %v11381_v61 = vrot.slane %v11358_v54, %v11306_v19  ;;  %v11432_v11 = vrot.slane %v11404_v3, %v11306_v19 }
  0xd6   :  { %v11422_v9 = vrot.slane %v290_v4, %v11306_v19  ;;  %v11426_v10 = vcombine.high %v11407_v5, %v11407_v5  ;;  %v11436_v13 = vrot.slane %v11407_v5, %v11306_v19  ;;  %v11460_v20 = vrot.slane %v307_v14, %v11306_v19 }
  0xd7   :  { %532 = vrot.lane.b32.xlu1 %v11375_v59, %s11185_s2  ;;  %v11394_v0 = vrot.slane %v11369_v58, %v11306_v19  ;;  %v11464_v21 = vcombine.high %v11441_v15, %v11441_v15  ;;  %v11474_v23 = vrot.slane %v11441_v15, %v11306_v19  ;;  %v340_v28 = vmul.f32 0.4082483, %v11351_v51 }
  0xd8   :  { %v11445_v16 = vcombine.high %v11422_v9, %v11422_v9  ;;  %v11451_v17 = vrot.slane %v11426_v10, %v11306_v19  ;;  %v11457_v18 = vrot.slane %v11422_v9, %v11306_v19  ;;  %v11480_v24 = vcombine.high %v11460_v20, %v11460_v20 }
  0xd9   :  { %448 = vrot.lane.b32.xlu0 %v11381_v61, %s11185_s2  ;;  %v11486_v25 = vrot.slane %v11464_v21, %v11306_v19  ;;  %v11492_v26 = vrot.slane %v11460_v20, %v11306_v19  ;;  %v3118_v29 = vrot.slane %v340_v28, %v11306_v19  ;;  %v341_v30 = vmul.f32 0.4082483, %v11358_v54 }
  0xda   :  { %v11470_v22 = vrot.slane %v11445_v16, %v11306_v19  ;;  %v11498_v27 = vrot.slane %v11480_v24, %v11306_v19  ;;  %v11532_v34 = vmul.f32 0.4082483, %v11354_v53  ;;  %v11548_v38 = vmul.f32 0.4082483, %v11365_v57 }
  0xdb   :  { %616 = vrot.lane.b32.xlu1 %v11394_v0, %s11185_s2  ;;  %v3203_v31 = vrot.slane %v341_v30, %v11306_v19  ;;  %v11551_v39 = vmul.f32 0.4082483, %v11369_v58  ;;  %v11564_v42 = vmul.f32 0.4082483, %v11388_v63  ;;  %v11567_v43 = vmul.f32 0.4082483, %v11384_v62 }
  0xdc   :  { %v11582_v47 = vmul.f32 0.4082483, %v11404_v3  ;;  %v11585_v48 = vmul.f32 0.4082483, %v11407_v5  ;;  %v11600_v51 = vmul.f32 0.4082483, %v11426_v10 }
  0xdd   :  { %700 = vrot.lane.b32.xlu0 %v11398_v2, %s11185_s2  ;;  %v11603_v52 = vmul.f32 0.4082483, %v11422_v9  ;;  %v11618_v56 = vmul.f32 0.4082483, %v11441_v15  ;;  %v11621_v57 = vmul.f32 0.4082483, %v11445_v16 }
  0xde   :  { %v11636_v62 = vmul.f32 0.4082483, %v11464_v21  ;;  %v11639_v63 = vmul.f32 0.4082483, %v11460_v20  ;;  %v11655_v3 = vmul.f32 0.4082483, %v11480_v24 }
  0xdf   :  { %784 = vrot.lane.b32.xlu1 %v11413_v6, %s11185_s2 }
  0xe1   :  { %868 = vrot.lane.b32.xlu0 %v11419_v7, %s11185_s2 }
  0xe3   :  { %952 = vrot.lane.b32.xlu1 %v11432_v11, %s11185_s2 }
  0xe5   :  { %1036 = vrot.lane.b32.xlu0 %v11436_v13, %s11185_s2 }
  0xe7   :  { %1120 = vrot.lane.b32.xlu1 %v11451_v17, %s11185_s2 }
  0xe9   :  { %1204 = vrot.lane.b32.xlu0 %v11457_v18, %s11185_s2 }
  0xeb   :  { %1288 = vrot.lane.b32.xlu1 %v11470_v22, %s11185_s2 }
  0xed   :  { %1372 = vrot.lane.b32.xlu0 %v11474_v23, %s11185_s2 }
  0xef   :  { %1456 = vrot.lane.b32.xlu1 %v11486_v25, %s11185_s2 }
  0xf1   :  { %1540 = vrot.lane.b32.xlu0 %v11492_v26, %s11185_s2 }
  0xf3   :  { %1624 = vrot.lane.b32.xlu1 %v11498_v27, %s11185_s2 }
  0xf5   :  { %1957 = vrot.lane.b32.xlu0 %v11381_v61, %s11186_s27 }
  0xf7   :  { %1878 = vrot.lane.b32.xlu1 %v11362_v55, %s11186_s27 }
  0xf9   :  { %2342 = vrot.lane.b32.xlu0 %v11419_v7, %s11186_s27 }
  0xfb   :  { %2034 = vrot.lane.b32.xlu1 %v11375_v59, %s11186_s27 }
  0xfd   :  { %2496 = vrot.lane.b32.xlu0 %v11436_v13, %s11186_s27 }
  0xff   :  { %2188 = vrot.lane.b32.xlu1 %v11398_v2, %s11186_s27 }
 0x101   :  { %2650 = vrot.lane.b32.xlu0 %v11457_v18, %s11186_s27 }
 0x103   :  { %2265 = vrot.lane.b32.xlu1 %v11413_v6, %s11186_s27 }
 0x105   :  { %2804 = vrot.lane.b32.xlu0 %v11474_v23, %s11186_s27 }
 0x107   :  { %2419 = vrot.lane.b32.xlu1 %v11432_v11, %s11186_s27 }
 0x109   :  { %2958 = vrot.lane.b32.xlu0 %v11492_v26, %s11186_s27 }
 0x10b   :  { %2573 = vrot.lane.b32.xlu1 %v11451_v17, %s11186_s27 }
 0x10d   :  { %3121 = vrot.lane.b32.xlu0 %v11362_v55, %s11187_s28 }
 0x10f   :  { %2881 = vrot.lane.b32.xlu1 %v11486_v25, %s11186_s27 }
 0x111   :  { %3119 = vrot.lane.b32.xlu0 %v3118_v29, %s11188_s29 }
 0x113   :  { %3035 = vrot.lane.b32.xlu1 %v11498_v27, %s11186_s27 }
 0x115   :  { %2111 = vrot.lane.b32.xlu0 %v11394_v0, %s11186_s27 }
 0x117   :  { %3206 = vrot.lane.b32.xlu1 %v11381_v61, %s11187_s28 }
 0x11b   :  { %2727 = vrot.lane.b32.xlu1 %v11470_v22, %s11186_s27 }
 0x11f   :  { %3204 = vrot.lane.b32.xlu1 %v3203_v31, %s11188_s29 }
 0x147   :  { %v364_v32 = vpop.permute.xlu0 %363 }
 0x148   :  { %10547 = vmatpush3.xpose.msk.msra.mxu1 %vm365_vm3, %v364_v32 }
 0x149   :  { %v533_v33 = vpop.permute.xlu1 %532  ;;  %10551 = vmatprep.subr.mxu1 %v14013_v44 }
 0x14a   :  { %10557 = vmatpush3.xpose.msk.msra.mxu0 %vm365_vm3, %v533_v33 }
 0x14b   :  { %10549 = vmatmul.mubr.msk.f32.vlgmr.msra.gmra.mxu1 %vm365_vm3, %v340_v28  ;;  %v449_v35 = vpop.permute.xlu0 %448  ;;  %10566 = vmatprep.subr.mxu0 %v14013_v44 }
 0x14c   :  { %10552 = vmatpush3.xpose.msk.msra.mxu1 %vm365_vm3, %v449_v35  ;;  %10553 = vmatprep.mubr.msk.f32.mxu1 %vm11184_vm2, %v14013_v44 }
 0x14d   :  { %10559 = vmatmul.mubr.msk.f32.vlgmr.msra.gmra.mxu0 %vm365_vm3, %v11532_v34  ;;  %v617_v36 = vpop.permute.xlu1 %616  ;;  %10561 = vmatprep.subr.mxu1 %v14013_v44 }
 0x14e   :  { %10568 = vmatprep.mubr.msk.f32.mxu0 %vm11184_vm2, %v14013_v44 }
 0x14f   :  { %v701_v37 = vpop.permute.xlu0 %700  ;;  %10554 = vmatmul.mubr.msk.f32.vlgmr.msra.gmra.mxu1 %vm365_vm3, %v341_v30 }
 0x150   :  { %10562 = vmatpush3.xpose.msk.msra.mxu1 %vm365_vm3, %v617_v36  ;;  %10567 = vmatpush3.xpose.msk.msra.mxu0 %vm365_vm3, %v701_v37 }
 0x151   :  { %v785_v40 = vpop.permute.xlu1 %784  ;;  %10563 = vmatprep.mubr.msk.f32.mxu1 %vm11184_vm2, %v14013_v44  ;;  %10571 = vmatprep.subr.mxu1 %v14013_v44 }
 0x152   :  { %10576 = vmatprep.subr.mxu0 %v14013_v44 }
 0x153   :  { %v869_v41 = vpop.permute.xlu0 %868  ;;  %10564 = vmatmul.mubr.msk.f32.vlgmr.msra.gmra.mxu1 %vm365_vm3, %v11551_v39  ;;  %10569 = vmatmul.mubr.msk.f32.vlgmr.msra.gmra.mxu0 %vm365_vm3, %v11548_v38 }
 0x154   :  { %10572 = vmatpush3.xpose.msk.msra.mxu1 %vm365_vm3, %v785_v40  ;;  %10577 = vmatpush3.xpose.msk.msra.mxu0 %vm365_vm3, %v869_v41 }
 0x155   :  { %v953_v45 = vpop.permute.xlu1 %952  ;;  %10573 = vmatprep.mubr.msk.f32.mxu1 %vm11184_vm2, %v14013_v44  ;;  %10578 = vmatprep.mubr.msk.f32.mxu0 %vm11184_vm2, %v14013_v44 }
 0x156   :  { %10581 = vmatprep.subr.mxu1 %v14013_v44  ;;  %10586 = vmatprep.subr.mxu0 %v14013_v44 }
 0x157   :  { %v1037_v46 = vpop.permute.xlu0 %1036  ;;  %10574 = vmatmul.mubr.msk.f32.vlgmr.msra.gmra.mxu1 %vm365_vm3, %v11564_v42  ;;  %10579 = vmatmul.mubr.msk.f32.vlgmr.msra.gmra.mxu0 %vm365_vm3, %v11567_v43 }
 0x158   :  { %10582 = vmatpush3.xpose.msk.msra.mxu1 %vm365_vm3, %v953_v45  ;;  %10587 = vmatpush3.xpose.msk.msra.mxu0 %vm365_vm3, %v1037_v46 }
 0x159   :  { %v1121_v49 = vpop.permute.xlu1 %1120  ;;  %10583 = vmatprep.mubr.msk.f32.mxu1 %vm11184_vm2, %v14013_v44  ;;  %10588 = vmatprep.mubr.msk.f32.mxu0 %vm11184_vm2, %v14013_v44 }
 0x15a   :  { %10591 = vmatprep.subr.mxu1 %v14013_v44  ;;  %10596 = vmatprep.subr.mxu0 %v14013_v44 }
 0x15b   :  { %v1205_v50 = vpop.permute.xlu0 %1204  ;;  %10584 = vmatmul.mubr.msk.f32.vlgmr.msra.gmra.mxu1 %vm365_vm3, %v11582_v47  ;;  %10589 = vmatmul.mubr.msk.f32.vlgmr.msra.gmra.mxu0 %vm365_vm3, %v11585_v48 }
 0x15c   :  { %10592 = vmatpush3.xpose.msk.msra.mxu1 %vm365_vm3, %v1121_v49  ;;  %10597 = vmatpush3.xpose.msk.msra.mxu0 %vm365_vm3, %v1205_v50 }
 0x15d   :  { %v1289_v53 = vpop.permute.xlu1 %1288  ;;  %10593 = vmatprep.mubr.msk.f32.mxu1 %vm11184_vm2, %v14013_v44  ;;  %10598 = vmatprep.mubr.msk.f32.mxu0 %vm11184_vm2, %v14013_v44 }
 0x15e   :  { %10601 = vmatprep.subr.mxu1 %v14013_v44  ;;  %10606 = vmatprep.subr.mxu0 %v14013_v44 }
 0x15f   :  { %v1373_v54 = vpop.permute.xlu0 %1372  ;;  %10594 = vmatmul.mubr.msk.f32.vlgmr.msra.gmra.mxu1 %vm365_vm3, %v11600_v51  ;;  %10599 = vmatmul.mubr.msk.f32.vlgmr.msra.gmra.mxu0 %vm365_vm3, %v11603_v52 }
 0x160   :  { %10602 = vmatpush3.xpose.msk.msra.mxu1 %vm365_vm3, %v1289_v53  ;;  %10607 = vmatpush3.xpose.msk.msra.mxu0 %vm365_vm3, %v1373_v54 }
 0x161   :  { %v1457_v58 = vpop.permute.xlu1 %1456  ;;  %10603 = vmatprep.mubr.msk.f32.mxu1 %vm11184_vm2, %v14013_v44  ;;  %10608 = vmatprep.mubr.msk.f32.mxu0 %vm11184_vm2, %v14013_v44 }
 0x162   :  { %10611 = vmatprep.subr.mxu1 %v14013_v44  ;;  %10616 = vmatprep.subr.mxu0 %v14013_v44 }
 0x163   :  { %v1541_v60 = vpop.permute.xlu0 %1540  ;;  %10604 = vmatmul.mubr.msk.f32.vlgmr.msra.gmra.mxu1 %vm365_vm3, %v11621_v57  ;;  %10609 = vmatmul.mubr.msk.f32.vlgmr.msra.gmra.mxu0 %vm365_vm3, %v11618_v56 }
 0x164   :  { %10612 = vmatpush3.xpose.msk.msra.mxu1 %vm365_vm3, %v1457_v58  ;;  %10617 = vmatpush3.xpose.msk.msra.mxu0 %vm365_vm3, %v1541_v60 }
 0x165   :  { %v1625_v1 = vpop.permute.xlu1 %1624  ;;  %10613 = vmatprep.mubr.msk.f32.mxu1 %vm11184_vm2, %v14013_v44  ;;  %10618 = vmatprep.mubr.msk.f32.mxu0 %vm11184_vm2, %v14013_v44 }
 0x166   :  { %10621 = vmatprep.subr.mxu1 %v14013_v44  ;;  %10626 = vmatprep.subr.mxu0 %v14013_v44 }
 0x167   :  { %10614 = vmatmul.mubr.msk.f32.vlgmr.msra.gmra.mxu1 %vm365_vm3, %v11636_v62  ;;  %10619 = vmatmul.mubr.msk.f32.vlgmr.msra.gmra.mxu0 %vm365_vm3, %v11639_v63  ;;  %v1958_v5 = vpop.permute.xlu0 %1957 }
 0x168   :  { %10622 = vmatpush3.xpose.msk.msra.mxu1 %vm365_vm3, %v1625_v1  ;;  %10623 = vmatprep.mubr.msk.f32.mxu1 %vm11184_vm2, %v14013_v44 }
 0x169   :  { %v1879_v4 = vpop.permute.xlu1 %1878  ;;  %10631 = vmatprep.subr.mxu1 %v14013_v44  ;;  %10628 = vmatprep.mubr.msk.f32.mxu0 %vm11184_vm2, %v14013_v44 }
 0x16a   :  { %10627 = vmatpush3.msk.msra.mxu0 %vm1884_vm4, %v1879_v4 }
 0x16b   :  { %10624 = vmatmul.mubr.msk.f32.vlgmr.msra.gmra.mxu1 %vm365_vm3, %v11655_v3  ;;  %10636 = vmatprep.subr.mxu0 %v14013_v44 }
 0x16c   :  { %10632 = vmatpush3.msk.msra.mxu1 %vm1884_vm4, %v1958_v5  ;;  %10633 = vmatprep.mubr.msk.f32.mxu1 %vm11184_vm2, %v14013_v44 }
 0x16d   :  { %10641 = vmatprep.subr.mxu1 %v14013_v44 }
 0x20b   :  { %v11668_v8 = vpop.f32.mrf.mxu1 }
 0x20c   :  { %v1702_v9 = vsel %vm1701_vm5, %v11668_v8, -inf }
 0x20d   :  { %v10550_v10 = vpop.f32.mrf.mxu1  ;;  %v11672_v14 = vpop.f32.mrf.mxu0  ;;  %1703 = vmax.xlane.f32.xlu0 %v1702_v9 }
 0x20e   :  { %v1708_v20 = vsel %vm1701_vm5, %v11672_v14, -inf }
 0x20f   :  { %v11674_v15 = vpop.f32.mrf.mxu1  ;;  %v10560_v16 = vpop.f32.mrf.mxu0 }
 0x210   :  { %v1705_v21 = vsel %vm1701_vm5, %v11674_v15, -inf }
 0x211   :  { %v10555_v24 = vpop.f32.mrf.mxu1  ;;  %1709 = vmax.xlane.f32.xlu0 %v1708_v20  ;;  %1706 = vmax.xlane.f32.xlu1 %v1705_v21 }
 0x213   :  { %v11680_v28 = vpop.f32.mrf.mxu1  ;;  %v11682_v29 = vpop.f32.mrf.mxu0 }
 0x214   :  { %v1714_v30 = vsel %vm1701_vm5, %v11682_v29, -inf  ;;  %v1711_v31 = vsel %vm1701_vm5, %v11680_v28, -inf }
 0x215   :  { %v10570_v32 = vpop.f32.mrf.mxu0  ;;  %1715 = vmax.xlane.f32.xlu1 %v1714_v30  ;;  %1712 = vmax.xlane.f32.xlu0 %v1711_v31  ;;  %v10565_v33 = vpop.f32.mrf.mxu1 }
 0x217   :  { %v11688_v35 = vpop.f32.mrf.mxu1  ;;  %v11690_v36 = vpop.f32.mrf.mxu0 }
 0x218   :  { %v1720_v37 = vsel %vm1701_vm5, %v11690_v36, -inf  ;;  %v1717_v40 = vsel %vm1701_vm5, %v11688_v35, -inf }
 0x219   :  { %v10580_v41 = vpop.f32.mrf.mxu0  ;;  %1721 = vmax.xlane.f32.xlu1 %v1720_v37  ;;  %1718 = vmax.xlane.f32.xlu0 %v1717_v40  ;;  %v10575_v45 = vpop.f32.mrf.mxu1 }
 0x21b   :  { %v11696_v46 = vpop.f32.mrf.mxu1  ;;  %v11698_v49 = vpop.f32.mrf.mxu0 }
 0x21c   :  { %v1726_v50 = vsel %vm1701_vm5, %v11698_v49, -inf  ;;  %v1723_v53 = vsel %vm1701_vm5, %v11696_v46, -inf }
 0x21d   :  { %v10590_v54 = vpop.f32.mrf.mxu0  ;;  %1727 = vmax.xlane.f32.xlu1 %v1726_v50  ;;  %1724 = vmax.xlane.f32.xlu0 %v1723_v53  ;;  %v10585_v58 = vpop.f32.mrf.mxu1 }
 0x21e   :  { %v3373_v58 = vrot.slane %v11551_v39, %v11306_v19  ;;  %v11750_v39 = vpop.permute.xlu0 %2342 }
 0x21f   :  { %v11704_v60 = vpop.f32.mrf.mxu1  ;;  %v11706_v1 = vpop.f32.mrf.mxu0 }
 0x220   :  { %v1732_v4 = vsel %vm1701_vm5, %v11706_v1, -inf  ;;  %v1729_v5 = vsel %vm1701_vm5, %v11704_v60, -inf }
 0x221   :  { %v10600_v9 = vpop.f32.mrf.mxu0  ;;  %1733 = vmax.xlane.f32.xlu1 %v1732_v4  ;;  %1730 = vmax.xlane.f32.xlu0 %v1729_v5  ;;  %v10595_v10 = vpop.f32.mrf.mxu1  ;;  %v3288_v4 = vrot.slane %v11532_v34, %v11306_v19 }
 0x222   :  { %v11746_v5 = vpop.permute.xlu1 %2034 }
 0x223   :  { %v11712_v16 = vpop.f32.mrf.mxu1  ;;  %v11714_v20 = vpop.f32.mrf.mxu0 }
 0x224   :  { %v1738_v21 = vsel %vm1701_vm5, %v11714_v20, -inf  ;;  %v1735_v24 = vsel %vm1701_vm5, %v11712_v16, -inf }
 0x225   :  { %v10610_v30 = vpop.f32.mrf.mxu0  ;;  %1739 = vmax.xlane.f32.xlu1 %v1738_v21  ;;  %1736 = vmax.xlane.f32.xlu0 %v1735_v24  ;;  %v10605_v31 = vpop.f32.mrf.mxu1 }
 0x226   :  { %v11748_v9 = vpop.permute.xlu1 %2188  ;;  %v11754_v21 = vpop.permute.xlu0 %2496 }
 0x227   :  { %v11720_v32 = vpop.f32.mrf.mxu1  ;;  %v11722_v33 = vpop.f32.mrf.mxu0  ;;  %14040 = vst [vmem:[#allocation3_spill] sm:$0xff] %v11754_v21 }
 0x228   :  { %v1744_v37 = vsel %vm1701_vm5, %v11722_v33, -inf  ;;  %v1741_v40 = vsel %vm1701_vm5, %v11720_v32, -inf }
 0x229   :  { %v10620_v41 = vpop.f32.mrf.mxu0  ;;  %1745 = vmax.xlane.f32.xlu1 %v1744_v37  ;;  %1742 = vmax.xlane.f32.xlu0 %v1741_v40  ;;  %v10615_v45 = vpop.f32.mrf.mxu1 }
 0x22a   :  { %v11752_v10 = vpop.permute.xlu1 %2265  ;;  %v11758_v30 = vpop.permute.xlu0 %2650 }
 0x22b   :  { %v11728_v50 = vpop.f32.mrf.mxu1  ;;  %14042 = vst [vmem:[#allocation5_spill] sm:$0xff] %v11758_v30 }
 0x22c   :  { %v1747_v53 = vsel %vm1701_vm5, %v11728_v50, -inf }
 0x22d   :  { %1748 = vmax.xlane.f32.xlu0 %v1747_v53  ;;  %v10625_v54 = vpop.f32.mrf.mxu1 }
 0x22e   :  { %v11756_v24 = vpop.permute.xlu1 %2419  ;;  %v11762_v31 = vpop.permute.xlu0 %2804 }
 0x22f   :  { %14041 = vst [vmem:[#allocation4_spill] sm:$0xff] %v11756_v24  ;;  %14044 = vst [vmem:[#allocation7_spill] sm:$0xff] %v11762_v31 }
 0x232   :  { %v11760_v34 = vpop.permute.xlu1 %2573  ;;  %v11766_v40 = vpop.permute.xlu0 %2958 }
 0x233   :  { %14043 = vst [vmem:[#allocation6_spill] sm:$0xff] %v11760_v34  ;;  %14046 = vst [vmem:[#allocation9_spill] sm:$0xff] %v11766_v40 }
 0x236   :  { %v11764_v37 = vpop.permute.xlu1 %2881  ;;  %v11770_v45 = vpop.permute.xlu0 %3121 }
 0x237   :  { %14045 = vst [vmem:[#allocation8_spill] sm:$0xff] %v11764_v37  ;;  %14048 = vst [vmem:[#allocation11_spill] sm:$0xff] %v11770_v45 }
 0x23a   :  { %3376 = vrot.lane.b32.xlu1 %v11394_v0, %s11187_s28  ;;  %v11768_v41 = vpop.permute.xlu1 %3035  ;;  %v11774_v54 = vpop.permute.xlu0 %3119 }
 0x23b   :  { %14047 = vst [vmem:[#allocation10_spill] sm:$0xff] %v11768_v41  ;;  %14050 = vst [vmem:[#allocation13_spill] sm:$0xff] %v11774_v54 }
 0x23e   :  { %3374 = vrot.lane.b32.xlu1 %v3373_v58, %s11188_s29  ;;  %v11772_v53 = vpop.permute.xlu1 %3206 }
 0x23f   :  { %14049 = vst [vmem:[#allocation12_spill] sm:$0xff] %v11772_v53 }
 0x242   :  { %3546 = vrot.lane.b32.xlu1 %v11413_v6, %s11187_s28  ;;  %v11776_v58 = vpop.permute.xlu1 %2727 }
 0x243   :  { %3291 = vrot.lane.b32.xlu0 %v11375_v59, %s11187_s28  ;;  %14051 = vst [vmem:[#allocation14_spill] sm:$0xff] %v11776_v58 }
 0x246   :  { %v11780_v44 = vpop.permute.xlu1 %3204 }
 0x247   :  { %3289 = vrot.lane.b32.xlu0 %v3288_v4, %s11188_s29  ;;  %v11778_v4 = vpop.permute.xlu0 %2111  ;;  %14052 = vst [vmem:[#allocation15_spill] sm:$0xff] %v11780_v44 }
 0x24b   :  { %3461 = vrot.lane.b32.xlu0 %v11398_v2, %s11187_s28 }
 0x296   :  { %v1704_v12 = vpop.xlane.xlu0 %1703 }
 0x297   :  { %v1750_v31 = vsub.f32 %v11668_v8, %v1704_v12 }
 0x299   :  { %v1766_v37 = vmul.f32 1.442695, %v1750_v31 }
 0x29a   :  { %v1710_v34 = vpop.xlane.xlu0 %1709  ;;  %v1707_v40 = vpop.xlane.xlu1 %1706 }
 0x29b   :  { %11022 = vpow2.f32 %v1766_v37  ;;  %v1752_v41 = vsub.f32 %v11672_v14, %v1710_v34  ;;  %v1751_v45 = vsub.f32 %v11674_v15, %v1707_v40 }
 0x29d   :  { %v1770_v53 = vmul.f32 1.442695, %v1752_v41  ;;  %v1768_v30 = vmul.f32 1.442695, %v1751_v45 }
 0x29e   :  { %v1716_v54 = vpop.xlane.xlu1 %1715  ;;  %v1713_v24 = vpop.xlane.xlu0 %1712 }
 0x29f   :  { %11024 = vpow2.f32 %v1770_v53  ;;  %v1754_v58 = vsub.f32 %v11682_v29, %v1716_v54  ;;  %v1753_v44 = vsub.f32 %v11680_v28, %v1713_v24 }
 0x2a0   :  { %11026 = vpow2.f32 %v1768_v30 }
 0x2a1   :  { %v1774_v21 = vmul.f32 1.442695, %v1754_v58  ;;  %v1772_v12 = vmul.f32 1.442695, %v1753_v44 }
 0x2a2   :  { %v1722_v8 = vpop.xlane.xlu1 %1721  ;;  %v1719_v31 = vpop.xlane.xlu0 %1718 }
 0x2a3   :  { %11028 = vpow2.f32 %v1774_v21  ;;  %v1756_v37 = vsub.f32 %v11690_v36, %v1722_v8  ;;  %v1755_v14 = vsub.f32 %v11688_v35, %v1719_v31 }
 0x2a4   :  { %11030 = vpow2.f32 %v1772_v12 }
 0x2a5   :  { %v1778_v15 = vmul.f32 1.442695, %v1756_v37  ;;  %v1776_v34 = vmul.f32 1.442695, %v1755_v14 }
 0x2a6   :  { %v1728_v40 = vpop.xlane.xlu1 %1727  ;;  %v1725_v41 = vpop.xlane.xlu0 %1724 }
 0x2a7   :  { %11032 = vpow2.f32 %v1778_v15  ;;  %v1758_v29 = vsub.f32 %v11698_v49, %v1728_v40  ;;  %v1757_v28 = vsub.f32 %v11696_v46, %v1725_v41 }
 0x2a8   :  { %v11791_v24 = vpop.eup %11022  ;;  %11034 = vpow2.f32 %v1776_v34 }
 0x2a9   :  { %v1782_v44 = vmul.f32 1.442695, %v1758_v29  ;;  %v1780_v30 = vmul.f32 1.442695, %v1757_v28  ;;  %v1798_v36 = vsel %vm1701_vm5, %v11791_v24, 0.0 }
 0x2aa   :  { %v1734_v21 = vpop.xlane.xlu1 %1733  ;;  %1799 = vadd.xlane.f32.xlu1 %v1798_v36  ;;  %v1731_v35 = vpop.xlane.xlu0 %1730 }
 0x2ab   :  { %11036 = vpow2.f32 %v1782_v44  ;;  %v1760_v45 = vsub.f32 %v11706_v1, %v1734_v21  ;;  %v1759_v53 = vsub.f32 %v11704_v60, %v1731_v35 }
 0x2ac   :  { %v11797_v54 = vpop.eup %11024  ;;  %11038 = vpow2.f32 %v1780_v30 }
 0x2ad   :  { %v11799_v46 = vpop.eup %11026  ;;  %v1786_v49 = vmul.f32 1.442695, %v1760_v45  ;;  %v1784_v58 = vmul.f32 1.442695, %v1759_v53  ;;  %v1804_v12 = vsel %vm1701_vm5, %v11797_v54, 0.0 }
 0x2ae   :  { %v1740_v8 = vpop.xlane.xlu1 %1739  ;;  %1805 = vadd.xlane.f32.xlu1 %v1804_v12  ;;  %v1737_v31 = vpop.xlane.xlu0 %1736  ;;  %v1801_v37 = vsel %vm1701_vm5, %v11799_v46, 0.0 }
 0x2af   :  { %11040 = vpow2.f32 %v1786_v49  ;;  %v1762_v1 = vsub.f32 %v11714_v20, %v1740_v8  ;;  %v1761_v60 = vsub.f32 %v11712_v16, %v1737_v31  ;;  %1802 = vadd.xlane.f32.xlu0 %v1801_v37 }
 0x2b0   :  { %v11807_v14 = vpop.eup %11028  ;;  %11042 = vpow2.f32 %v1784_v58 }
 0x2b1   :  { %v11809_v15 = vpop.eup %11030  ;;  %v1790_v34 = vmul.f32 1.442695, %v1762_v1  ;;  %v1788_v40 = vmul.f32 1.442695, %v1761_v60  ;;  %v1810_v41 = vsel %vm1701_vm5, %v11807_v14, 0.0 }
 0x2b2   :  { %v1746_v29 = vpop.xlane.xlu1 %1745  ;;  %1811 = vadd.xlane.f32.xlu1 %v1810_v41  ;;  %v1743_v28 = vpop.xlane.xlu0 %1742  ;;  %v1807_v44 = vsel %vm1701_vm5, %v11809_v15, 0.0 }
 0x2b3   :  { %11044 = vpow2.f32 %v1790_v34  ;;  %v1764_v16 = vsub.f32 %v11722_v33, %v1746_v29  ;;  %v1763_v20 = vsub.f32 %v11720_v32, %v1743_v28  ;;  %1808 = vadd.xlane.f32.xlu0 %v1807_v44 }
 0x2b4   :  { %v11817_v30 = vpop.eup %11032  ;;  %11046 = vpow2.f32 %v1788_v40 }
 0x2b5   :  { %v11819_v36 = vpop.eup %11034  ;;  %v1794_v21 = vmul.f32 1.442695, %v1764_v16  ;;  %v1792_v35 = vmul.f32 1.442695, %v1763_v20  ;;  %v1816_v45 = vsel %vm1701_vm5, %v11817_v30, 0.0 }
 0x2b6   :  { %1817 = vadd.xlane.f32.xlu1 %v1816_v45  ;;  %v1813_v53 = vsel %vm1701_vm5, %v11819_v36, 0.0  ;;  %v1749_v49 = vpop.xlane.xlu0 %1748  ;;  %v3543_v45 = vrot.slane %v11564_v42, %v11306_v19  ;;  %v3883_v42 = vrot.slane %v11600_v51, %v11306_v19  ;;  %v3798_v51 = vrot.slane %v11585_v48, %v11306_v19 }
 0x2b7   :  { %11048 = vpow2.f32 %v1794_v21  ;;  %1814 = vadd.xlane.f32.xlu0 %v1813_v53  ;;  %v1765_v32 = vsub.f32 %v11728_v50, %v1749_v49  ;;  %v3713_v53 = vrot.slane %v11582_v47, %v11306_v19  ;;  %v3458_v49 = vrot.slane %v11548_v38, %v11306_v19 }
 0x2b8   :  { %v11826_v33 = vpop.eup %11036  ;;  %11050 = vpow2.f32 %v1792_v35  ;;  %v3628_v47 = vrot.slane %v11567_v43, %v11306_v19  ;;  %v4053_v38 = vrot.slane %v11621_v57, %v11306_v19  ;;  %v4223_v43 = vrot.slane %v11636_v62, %v11306_v19 }
 0x2b9   :  { %v11828_v58 = vpop.eup %11038  ;;  %v1796_v12 = vmul.f32 1.442695, %v1765_v32  ;;  %v1822_v8 = vsel %vm1701_vm5, %v11826_v33, 0.0  ;;  %v3968_v57 = vrot.slane %v11603_v52, %v11306_v19  ;;  %v4393_v48 = vrot.slane %v11655_v3, %v11306_v19 }
 0x2ba   :  { %1823 = vadd.xlane.f32.xlu1 %v1822_v8  ;;  %v1819_v31 = vsel %vm1701_vm5, %v11828_v58, 0.0  ;;  %v4138_v62 = vrot.slane %v11618_v56, %v11306_v19  ;;  %v4308_v52 = vrot.slane %v11639_v63, %v11306_v19 }
 0x2bb   :  { %11052 = vpow2.f32 %v1796_v12  ;;  %1820 = vadd.xlane.f32.xlu0 %v1819_v31 }
 0x2bc   :  { %v11834_v37 = vpop.eup %11040 }
 0x2bd   :  { %v11836_v1 = vpop.eup %11042  ;;  %v1828_v50 = vsel %vm1701_vm5, %v11834_v37, 0.0 }
 0x2be   :  { %1829 = vadd.xlane.f32.xlu1 %v1828_v50  ;;  %v1825_v60 = vsel %vm1701_vm5, %v11836_v1, 0.0 }
 0x2bf   :  { %1826 = vadd.xlane.f32.xlu0 %v1825_v60  ;;  %v14053_v60 = vmov 0.0  }
 0x2c0   :  { %v11842_v34 = vpop.eup %11044 }
 0x2c1   :  { %v11844_v40 = vpop.eup %11046  ;;  %v1834_v41 = vsel %vm1701_vm5, %v11842_v34, 0.0 }
 0x2c2   :  { %1835 = vadd.xlane.f32.xlu1 %v1834_v41  ;;  %v1831_v29 = vsel %vm1701_vm5, %v11844_v40, 0.0 }
 0x2c3   :  { %1832 = vadd.xlane.f32.xlu0 %v1831_v29 }
 0x2c4   :  { %v11850_v28 = vpop.eup %11048 }
 0x2c5   :  { %v11852_v44 = vpop.eup %11050  ;;  %v1840_v16 = vsel %vm1701_vm5, %v11850_v28, 0.0 }
 0x2c6   :  { %1841 = vadd.xlane.f32.xlu1 %v1840_v16  ;;  %v1837_v20 = vsel %vm1701_vm5, %v11852_v44, 0.0 }
 0x2c7   :  { %1838 = vadd.xlane.f32.xlu0 %v1837_v20 }
 0x2c8   :  { %v11858_v21 = vpop.eup %11052 }
 0x2c9   :  { %v1843_v35 = vsel %vm1701_vm5, %v11858_v21, 0.0 }
 0x2cb   :  { %1844 = vadd.xlane.f32.xlu0 %v1843_v35 }
 0x2d7   :  { %3544 = vrot.lane.b32.xlu1 %v3543_v45, %s11188_s29 }
 0x2db   :  { %3716 = vrot.lane.b32.xlu1 %v11432_v11, %s11187_s28 }
 0x2df   :  { %3714 = vrot.lane.b32.xlu1 %v3713_v53, %s11188_s29 }
 0x2e1   :  { %3459 = vrot.lane.b32.xlu0 %v3458_v49, %s11188_s29 }
 0x2e3   :  { %3886 = vrot.lane.b32.xlu1 %v11451_v17, %s11187_s28 }
 0x2e5   :  { %3631 = vrot.lane.b32.xlu0 %v11419_v7, %s11187_s28 }
 0x2e7   :  { %3884 = vrot.lane.b32.xlu1 %v3883_v42, %s11188_s29  ;;  %v14054_v42 = vld [vmem:[#allocation3_spill] sm:$0xff] }
 0x2e9   :  { %3629 = vrot.lane.b32.xlu0 %v3628_v47, %s11188_s29  ;;  %v14055_v47 = vld [vmem:[#allocation4_spill] sm:$0xff] }
 0x2eb   :  { %4056 = vrot.lane.b32.xlu1 %v11470_v22, %s11187_s28 }
 0x2ed   :  { %3801 = vrot.lane.b32.xlu0 %v11436_v13, %s11187_s28 }
 0x2ef   :  { %4054 = vrot.lane.b32.xlu1 %v4053_v38, %s11188_s29 }
 0x2f1   :  { %3799 = vrot.lane.b32.xlu0 %v3798_v51, %s11188_s29 }
 0x2f3   :  { %4226 = vrot.lane.b32.xlu1 %v11486_v25, %s11187_s28 }
 0x2f5   :  { %3971 = vrot.lane.b32.xlu0 %v11457_v18, %s11187_s28 }
 0x2f7   :  { %4224 = vrot.lane.b32.xlu1 %v4223_v43, %s11188_s29 }
 0x2f9   :  { %3969 = vrot.lane.b32.xlu0 %v3968_v57, %s11188_s29 }
 0x2fb   :  { %4396 = vrot.lane.b32.xlu1 %v11498_v27, %s11187_s28 }
 0x2fd   :  { %4141 = vrot.lane.b32.xlu0 %v11474_v23, %s11187_s28 }
 0x2ff   :  { %4394 = vrot.lane.b32.xlu1 %v4393_v48, %s11188_s29  ;;  %v14056_v48 = vld [vmem:[#allocation5_spill] sm:$0xff] }
 0x301   :  { %4139 = vrot.lane.b32.xlu0 %v4138_v62, %s11188_s29  ;;  %v14057_v62 = vld [vmem:[#allocation6_spill] sm:$0xff] }
 0x303   :  { %4648 = vrot.lane.b32.xlu1 %v11362_v55, %s11189_s30  ;;  %v11938_v55 = vpop.permute.xlu1 %3376 }
 0x305   :  { %4311 = vrot.lane.b32.xlu0 %v11492_v26, %s11187_s28 }
 0x307   :  { %4802 = vrot.lane.b32.xlu1 %v11375_v59, %s11189_s30  ;;  %v11940_v59 = vpop.permute.xlu0 %3291 }
 0x309   :  { %4309 = vrot.lane.b32.xlu0 %v4308_v52, %s11188_s29 }
 0x30b   :  { %4956 = vrot.lane.b32.xlu1 %v11398_v2, %s11189_s30  ;;  %v11944_v2 = vpop.permute.xlu0 %3289 }
 0x30d   :  { %4725 = vrot.lane.b32.xlu0 %v11381_v61, %s11189_s30  ;;  %v11942_v61 = vpop.permute.xlu1 %3374 }
 0x30f   :  { %5110 = vrot.lane.b32.xlu1 %v11419_v7, %s11189_s30 }
 0x311   :  { %4879 = vrot.lane.b32.xlu0 %v11394_v0, %s11189_s30  ;;  %v11946_v0 = vpop.permute.xlu1 %3546 }
 0x313   :  { %5264 = vrot.lane.b32.xlu1 %v11436_v13, %s11189_s30  ;;  %v11948_v13 = vpop.permute.xlu0 %3461 }
 0x315   :  { %5033 = vrot.lane.b32.xlu0 %v11413_v6, %s11189_s30 }
 0x317   :  { %5341 = vrot.lane.b32.xlu1 %v11451_v17, %s11189_s30 }
 0x319   :  { %5187 = vrot.lane.b32.xlu0 %v11432_v11, %s11189_s30 }
 0x333   :  { %v1800_v7 = vpop.xlane.xlu1 %1799 }
 0x334   :  { %11054 = vrcp.f32 %v1800_v7 }
 0x337   :  { %v1806_v6 = vpop.xlane.xlu1 %1805 }
 0x338   :  { %11056 = vrcp.f32 %v1806_v6  ;;  %v1803_v17 = vpop.xlane.xlu0 %1802 }
 0x339   :  { %11058 = vrcp.f32 %v1803_v17 }
 0x33b   :  { %v1812_v56 = vpop.xlane.xlu1 %1811 }
 0x33c   :  { %11060 = vrcp.f32 %v1812_v56  ;;  %v1809_v11 = vpop.xlane.xlu0 %1808  ;;  %v14058_v56 = vld [vmem:[#allocation7_spill] sm:$0xff] }
 0x33d   :  { %11062 = vrcp.f32 %v1809_v11  ;;  %v14059_v11 = vld [vmem:[#allocation14_spill] sm:$0xff] }
 0x33f   :  { %v1818_v63 = vpop.xlane.xlu1 %1817 }
 0x340   :  { %11064 = vrcp.f32 %v1818_v63  ;;  %v1815_v3 = vpop.xlane.xlu0 %1814 }
 0x341   :  { %v11055_v32 = vpop.eup %11054  ;;  %11066 = vrcp.f32 %v1815_v3 }
 0x342   :  { %v1862_v12 = vmul.f32 %v11055_v32, %v11791_v24 }
 0x343   :  { %v1824_v8 = vpop.xlane.xlu1 %1823 }
 0x344   :  { %11068 = vrcp.f32 %v1824_v8  ;;  %v1821_v31 = vpop.xlane.xlu0 %1820  ;;  %10629 = vmatmul.mubr.msk.f32.vlgmr.msra.gmra.mxu0 %vm1880_vm6, %v1862_v12  ;;  %v14060_v8 = vld [vmem:[#allocation9_spill] sm:$0xff] }
 0x345   :  { %v11057_v50 = vpop.eup %11056  ;;  %11070 = vrcp.f32 %v1821_v31  ;;  %10637 = vmatpush3.msk.msra.mxu0 %vm1884_vm4, %v11746_v5  ;;  %10638 = vmatprep.mubr.msk.f32.mxu0 %vm11184_vm2, %v14053_v60  ;;  %v14061_v31 = vld [vmem:[#allocation8_spill] sm:$0xff] }
 0x346   :  { %v11059_v41 = vpop.eup %11058  ;;  %10646 = vmatprep.subr.mxu0 %v14053_v60  ;;  %v1864_v29 = vmul.f32 %v11057_v50, %v11797_v54 }
 0x347   :  { %v1830_v16 = vpop.xlane.xlu1 %1829  ;;  %v1863_v24 = vmul.f32 %v11059_v41, %v11799_v46 }
 0x348   :  { %11072 = vrcp.f32 %v1830_v16  ;;  %v1827_v20 = vpop.xlane.xlu0 %1826  ;;  %10639 = vmatmul.mubr.msk.f32.vlgmr.msra.gmra.mxu0 %vm1880_vm6, %v1864_v29  ;;  %v14062_v16 = vld [vmem:[#allocation11_spill] sm:$0xff] }
 0x349   :  { %v11061_v35 = vpop.eup %11060  ;;  %11074 = vrcp.f32 %v1827_v20  ;;  %10634 = vmatmul.mubr.msk.f32.vlgmr.msra.gmra.mxu1 %vm1880_vm6, %v1863_v24  ;;  %10647 = vmatpush3.msk.msra.mxu0 %vm1884_vm4, %v11748_v9 }
 0x34a   :  { %v11063_v5 = vpop.eup %11062  ;;  %10642 = vmatpush3.msk.msra.mxu1 %vm1884_vm4, %v11778_v4  ;;  %10648 = vmatprep.mubr.msk.f32.mxu0 %vm11184_vm2, %v14053_v60  ;;  %v1866_v54 = vmul.f32 %v11061_v35, %v11807_v14 }
 0x34b   :  { %10656 = vmatprep.subr.mxu0 %v14053_v60  ;;  %v1836_v46 = vpop.xlane.xlu1 %1835  ;;  %10643 = vmatprep.mubr.msk.f32.mxu1 %vm11184_vm2, %v14053_v60  ;;  %v1865_v45 = vmul.f32 %v11063_v5, %v11809_v15  ;;  %v14064_v5 = vld [vmem:[#allocation13_spill] sm:$0xff] }
 0x34c   :  { %11076 = vrcp.f32 %v1836_v46  ;;  %10651 = vmatprep.subr.mxu1 %v14053_v60  ;;  %v1833_v9 = vpop.xlane.xlu0 %1832  ;;  %10649 = vmatmul.mubr.msk.f32.vlgmr.msra.gmra.mxu0 %vm1880_vm6, %v1866_v54  ;;  %v14065_v54 = vld [vmem:[#allocation12_spill] sm:$0xff] }
 0x34d   :  { %v11065_v4 = vpop.eup %11064  ;;  %11078 = vrcp.f32 %v1833_v9  ;;  %10644 = vmatmul.mubr.msk.f32.vlgmr.msra.gmra.mxu1 %vm1880_vm6, %v1865_v45  ;;  %10657 = vmatpush3.msk.msra.mxu0 %vm1884_vm4, %v11750_v39  ;;  %v14066_v45 = vld [vmem:[#allocation15_spill] sm:$0xff] }
 0x34e   :  { %v11067_v14 = vpop.eup %11066  ;;  %10652 = vmatpush3.msk.msra.mxu1 %vm1884_vm4, %v11752_v10  ;;  %10658 = vmatprep.mubr.msk.f32.mxu0 %vm11184_vm2, %v14053_v60  ;;  %v1868_v15 = vmul.f32 %v11065_v4, %v11817_v30 }
 0x34f   :  { %10666 = vmatprep.subr.mxu0 %v14053_v60  ;;  %v1842_v53 = vpop.xlane.xlu1 %1841  ;;  %10653 = vmatprep.mubr.msk.f32.mxu1 %vm11184_vm2, %v14053_v60  ;;  %v1867_v49 = vmul.f32 %v11067_v14, %v11819_v36 }
 0x350   :  { %11080 = vrcp.f32 %v1842_v53  ;;  %10661 = vmatprep.subr.mxu1 %v14053_v60  ;;  %v1839_v39 = vpop.xlane.xlu0 %1838  ;;  %10659 = vmatmul.mubr.msk.f32.vlgmr.msra.gmra.mxu0 %vm1880_vm6, %v1868_v15 }
 0x351   :  { %v11069_v10 = vpop.eup %11068  ;;  %11082 = vrcp.f32 %v1839_v39  ;;  %10654 = vmatmul.mubr.msk.f32.vlgmr.msra.gmra.mxu1 %vm1880_vm6, %v1867_v49  ;;  %10667 = vmatpush3.msk.msra.mxu0 %vm1884_vm4, %v14054_v42 }
 0x352   :  { %v11071_v30 = vpop.eup %11070  ;;  %10662 = vmatpush3.msk.msra.mxu1 %vm1884_vm4, %v14055_v47  ;;  %10668 = vmatprep.mubr.msk.f32.mxu0 %vm11184_vm2, %v14053_v60  ;;  %v1870_v36 = vmul.f32 %v11069_v10, %v11826_v33 }
 0x353   :  { %10676 = vmatprep.subr.mxu0 %v14053_v60  ;;  %v11997_v38 = vpop.permute.xlu1 %3544  ;;  %10663 = vmatprep.mubr.msk.f32.mxu1 %vm11184_vm2, %v14053_v60  ;;  %v1869_v51 = vmul.f32 %v11071_v30, %v11828_v58 }
 0x354   :  { %10671 = vmatprep.subr.mxu1 %v14053_v60  ;;  %v1845_v43 = vpop.xlane.xlu0 %1844  ;;  %10669 = vmatmul.mubr.msk.f32.vlgmr.msra.gmra.mxu0 %vm1880_vm6, %v1870_v36 }
 0x355   :  { %v11073_v57 = vpop.eup %11072  ;;  %11084 = vrcp.f32 %v1845_v43  ;;  %10664 = vmatmul.mubr.msk.f32.vlgmr.msra.gmra.mxu1 %vm1880_vm6, %v1869_v51  ;;  %10677 = vmatpush3.msk.msra.mxu0 %vm1884_vm4, %v14056_v48 }
 0x356   :  { %v11075_v33 = vpop.eup %11074  ;;  %10672 = vmatpush3.msk.msra.mxu1 %vm1884_vm4, %v14057_v62  ;;  %10678 = vmatprep.mubr.msk.f32.mxu0 %vm11184_vm2, %v14053_v60  ;;  %v1872_v58 = vmul.f32 %v11073_v57, %v11834_v37 }
 0x357   :  { %10686 = vmatprep.subr.mxu0 %v14053_v60  ;;  %v12013_v52 = vpop.permute.xlu1 %3716  ;;  %10673 = vmatprep.mubr.msk.f32.mxu1 %vm11184_vm2, %v14053_v60  ;;  %v1871_v7 = vmul.f32 %v11075_v33, %v11836_v1 }
 0x358   :  { %10681 = vmatprep.subr.mxu1 %v14053_v60  ;;  %v3460_v6 = vpop.permute.xlu0 %3459  ;;  %10679 = vmatmul.mubr.msk.f32.vlgmr.msra.gmra.mxu0 %vm1880_vm6, %v1872_v58 }
 0x359   :  { %v11077_v17 = vpop.eup %11076  ;;  %10674 = vmatmul.mubr.msk.f32.vlgmr.msra.gmra.mxu1 %vm1880_vm6, %v1871_v7  ;;  %10687 = vmatpush3.msk.msra.mxu0 %vm1884_vm4, %v14058_v56 }
 0x35a   :  { %v11079_v37 = vpop.eup %11078  ;;  %10682 = vmatpush3.msk.msra.mxu1 %vm1884_vm4, %v14059_v11  ;;  %10688 = vmatprep.mubr.msk.f32.mxu0 %vm11184_vm2, %v14053_v60  ;;  %v1874_v1 = vmul.f32 %v11077_v17, %v11842_v34 }
 0x35b   :  { %10696 = vmatprep.subr.mxu0 %v14053_v60  ;;  %v12029_v63 = vpop.permute.xlu1 %3714  ;;  %10683 = vmatprep.mubr.msk.f32.mxu1 %vm11184_vm2, %v14053_v60  ;;  %v1873_v3 = vmul.f32 %v11079_v37, %v11844_v40 }
 0x35c   :  { %10691 = vmatprep.subr.mxu1 %v14053_v60  ;;  %v3632_v32 = vpop.permute.xlu0 %3631  ;;  %10689 = vmatmul.mubr.msk.f32.vlgmr.msra.gmra.mxu0 %vm1880_vm6, %v1874_v1 }
 0x35d   :  { %v11081_v12 = vpop.eup %11080  ;;  %10684 = vmatmul.mubr.msk.f32.vlgmr.msra.gmra.mxu1 %vm1880_vm6, %v1873_v3  ;;  %10697 = vmatpush3.msk.msra.mxu0 %vm1884_vm4, %v14060_v8 }
 0x35e   :  { %v11083_v34 = vpop.eup %11082  ;;  %10692 = vmatpush3.msk.msra.mxu1 %vm1884_vm4, %v14061_v31  ;;  %10698 = vmatprep.mubr.msk.f32.mxu0 %vm11184_vm2, %v14053_v60  ;;  %v1876_v40 = vmul.f32 %v11081_v12, %v11850_v28  ;;  %v14063_v28 = vld [vmem:[#allocation10_spill] sm:$0xff] }
 0x35f   :  { %10706 = vmatprep.subr.mxu0 %v14053_v60  ;;  %v3887_v50 = vpop.permute.xlu1 %3886  ;;  %10693 = vmatprep.mubr.msk.f32.mxu1 %vm11184_vm2, %v14053_v60  ;;  %v1875_v41 = vmul.f32 %v11083_v34, %v11852_v44 }
 0x360   :  { %10701 = vmatprep.subr.mxu1 %v14053_v60  ;;  %v3630_v29 = vpop.permute.xlu0 %3629  ;;  %10699 = vmatmul.mubr.msk.f32.vlgmr.msra.gmra.mxu0 %vm1880_vm6, %v1876_v40 }
 0x361   :  { %10694 = vmatmul.mubr.msk.f32.vlgmr.msra.gmra.mxu1 %vm1880_vm6, %v1875_v41  ;;  %10707 = vmatpush3.xpose.msk.msra.mxu0 %vm365_vm3, %v14062_v16 }
 0x362   :  { %v11085_v24 = vpop.eup %11084  ;;  %10702 = vmatpush3.msk.msra.mxu1 %vm1884_vm4, %v14063_v28  ;;  %10708 = vmatprep.mubr.msk.f32.mxu0 %vm11184_vm2, %v14053_v60 }
 0x363   :  { %10716 = vmatprep.subr.mxu0 %v14053_v60  ;;  %v3885_v44 = vpop.permute.xlu1 %3884  ;;  %10703 = vmatprep.mubr.msk.f32.mxu1 %vm11184_vm2, %v14053_v60  ;;  %v1877_v20 = vmul.f32 %v11085_v24, %v11858_v21 }
 0x364   :  { %10711 = vmatprep.subr.mxu1 %v14053_v60  ;;  %v3802_v35 = vpop.permute.xlu0 %3801  ;;  %10709 = vmatmul.mubr.msk.f32.vlgmr.msra.gmra.mxu0 %vm365_vm3, %v14064_v5 }
 0x365   :  { %10704 = vmatmul.mubr.msk.f32.vlgmr.msra.gmra.mxu1 %vm1880_vm6, %v1877_v20  ;;  %10717 = vmatpush3.xpose.msk.msra.mxu0 %vm365_vm3, %v11940_v59 }
 0x366   :  { %10712 = vmatpush3.xpose.msk.msra.mxu1 %vm365_vm3, %v14065_v54  ;;  %10718 = vmatprep.mubr.msk.f32.mxu0 %vm11184_vm2, %v14053_v60 }
 0x367   :  { %v4057_v46 = vpop.permute.xlu1 %4056  ;;  %10713 = vmatprep.mubr.msk.f32.mxu1 %vm11184_vm2, %v14053_v60  ;;  %10721 = vmatprep.subr.mxu1 %v14053_v60 }
 0x368   :  { %10726 = vmatprep.subr.mxu0 %v14053_v60  ;;  %v3800_v21 = vpop.permute.xlu0 %3799  ;;  %10719 = vmatmul.mubr.msk.f32.vlgmr.msra.gmra.mxu0 %vm365_vm3, %v11944_v2 }
 0x369   :  { %10714 = vmatmul.mubr.msk.f32.vlgmr.msra.gmra.mxu1 %vm365_vm3, %v14066_v45  ;;  %10727 = vmatpush3.xpose.msk.msra.mxu0 %vm365_vm3, %v11948_v13 }
 0x36a   :  { %10722 = vmatpush3.xpose.msk.msra.mxu1 %vm365_vm3, %v11938_v55  ;;  %10723 = vmatprep.mubr.msk.f32.mxu1 %vm11184_vm2, %v14053_v60 }
 0x36b   :  { %v4055_v59 = vpop.permute.xlu1 %4054  ;;  %10728 = vmatprep.mubr.msk.f32.mxu0 %vm11184_vm2, %v14053_v60  ;;  %10731 = vmatprep.subr.mxu1 %v14053_v60 }
 0x36c   :  { %10736 = vmatprep.subr.mxu0 %v14053_v60  ;;  %v3972_v2 = vpop.permute.xlu0 %3971  ;;  %10729 = vmatmul.mubr.msk.f32.vlgmr.msra.gmra.mxu0 %vm365_vm3, %v3460_v6 }
 0x36d   :  { %10724 = vmatmul.mubr.msk.f32.vlgmr.msra.gmra.mxu1 %vm365_vm3, %v11942_v61  ;;  %10737 = vmatpush3.xpose.msk.msra.mxu0 %vm365_vm3, %v3632_v32 }
 0x36e   :  { %10732 = vmatpush3.xpose.msk.msra.mxu1 %vm365_vm3, %v11946_v0  ;;  %10733 = vmatprep.mubr.msk.f32.mxu1 %vm11184_vm2, %v14053_v60 }
 0x36f   :  { %v4227_v55 = vpop.permute.xlu1 %4226  ;;  %10738 = vmatprep.mubr.msk.f32.mxu0 %vm11184_vm2, %v14053_v60  ;;  %10741 = vmatprep.subr.mxu1 %v14053_v60 }
 0x370   :  { %10746 = vmatprep.subr.mxu0 %v14053_v60  ;;  %v3970_v13 = vpop.permute.xlu0 %3969  ;;  %10739 = vmatmul.mubr.msk.f32.vlgmr.msra.gmra.mxu0 %vm365_vm3, %v3630_v29 }
 0x371   :  { %10734 = vmatmul.mubr.msk.f32.vlgmr.msra.gmra.mxu1 %vm365_vm3, %v11997_v38  ;;  %10747 = vmatpush3.xpose.msk.msra.mxu0 %vm365_vm3, %v3802_v35 }
 0x372   :  { %10742 = vmatpush3.xpose.msk.msra.mxu1 %vm365_vm3, %v12013_v52  ;;  %10743 = vmatprep.mubr.msk.f32.mxu1 %vm11184_vm2, %v14053_v60 }
 0x373   :  { %v4225_v61 = vpop.permute.xlu1 %4224  ;;  %10748 = vmatprep.mubr.msk.f32.mxu0 %vm11184_vm2, %v14053_v60  ;;  %10751 = vmatprep.subr.mxu1 %v14053_v60 }
 0x374   :  { %10756 = vmatprep.subr.mxu0 %v14053_v60  ;;  %v4142_v0 = vpop.permute.xlu0 %4141  ;;  %10749 = vmatmul.mubr.msk.f32.vlgmr.msra.gmra.mxu0 %vm365_vm3, %v3800_v21 }
 0x375   :  { %10744 = vmatmul.mubr.msk.f32.vlgmr.msra.gmra.mxu1 %vm365_vm3, %v12029_v63  ;;  %10757 = vmatpush3.xpose.msk.msra.mxu0 %vm365_vm3, %v3972_v2 }
 0x376   :  { %10752 = vmatpush3.xpose.msk.msra.mxu1 %vm365_vm3, %v3887_v50  ;;  %10753 = vmatprep.mubr.msk.f32.mxu1 %vm11184_vm2, %v14053_v60 }
 0x377   :  { %v4397_v9 = vpop.permute.xlu1 %4396  ;;  %10758 = vmatprep.mubr.msk.f32.mxu0 %vm11184_vm2, %v14053_v60  ;;  %10761 = vmatprep.subr.mxu1 %v14053_v60 }
 0x378   :  { %10766 = vmatprep.subr.mxu0 %v14053_v60  ;;  %v4140_v4 = vpop.permute.xlu0 %4139  ;;  %10759 = vmatmul.mubr.msk.f32.vlgmr.msra.gmra.mxu0 %vm365_vm3, %v3970_v13 }
 0x379   :  { %10754 = vmatmul.mubr.msk.f32.vlgmr.msra.gmra.mxu1 %vm365_vm3, %v3885_v44  ;;  %10767 = vmatpush3.xpose.msk.msra.mxu0 %vm365_vm3, %v4142_v0 }
 0x37a   :  { %10762 = vmatpush3.xpose.msk.msra.mxu1 %vm365_vm3, %v4057_v46  ;;  %10763 = vmatprep.mubr.msk.f32.mxu1 %vm11184_vm2, %v14053_v60 }
 0x37b   :  { %v4395_v14 = vpop.permute.xlu1 %4394  ;;  %10768 = vmatprep.mubr.msk.f32.mxu0 %vm11184_vm2, %v14053_v60  ;;  %10771 = vmatprep.subr.mxu1 %v14053_v60 }
 0x37c   :  { %10776 = vmatprep.subr.mxu0 %v14053_v60  ;;  %v4312_v15 = vpop.permute.xlu0 %4311  ;;  %10769 = vmatmul.mubr.msk.f32.vlgmr.msra.gmra.mxu0 %vm365_vm3, %v4140_v4 }
 0x37d   :  { %10764 = vmatmul.mubr.msk.f32.vlgmr.msra.gmra.mxu1 %vm365_vm3, %v4055_v59  ;;  %10777 = vmatpush3.xpose.msk.msra.mxu0 %vm365_vm3, %v4312_v15 }
 0x37e   :  { %10772 = vmatpush3.xpose.msk.msra.mxu1 %vm365_vm3, %v4227_v55  ;;  %10773 = vmatprep.mubr.msk.f32.mxu1 %vm11184_vm2, %v14053_v60 }
 0x37f   :  { %v4649_v53 = vpop.permute.xlu1 %4648  ;;  %10778 = vmatprep.mubr.msk.f32.mxu0 %vm11184_vm2, %v14053_v60  ;;  %10781 = vmatprep.subr.mxu1 %v14053_v60 }
 0x380   :  { %10786 = vmatprep.subr.mxu0 %v14053_v60  ;;  %v4310_v49 = vpop.permute.xlu0 %4309 }
 0x381   :  { %10774 = vmatmul.mubr.msk.f32.vlgmr.msra.gmra.mxu1 %vm365_vm3, %v4225_v61  ;;  %10779 = vmatmul.mubr.msk.f32.vlgmr.msra.gmra.mxu0 %vm365_vm3, %v4310_v49 }
 0x382   :  { %10782 = vmatpush3.xpose.msk.msra.mxu1 %vm365_vm3, %v4397_v9  ;;  %10787 = vmatpush3.msk.msra.mxu0 %vm1884_vm4, %v4649_v53 }
 0x383   :  { %10783 = vmatprep.mubr.msk.f32.mxu1 %vm11184_vm2, %v14053_v60  ;;  %10791 = vmatprep.subr.mxu1 %v14053_v60 }
 0x384   :  { %v4726_v39 = vpop.permute.xlu0 %4725  ;;  %10788 = vmatprep.mubr.msk.f32.mxu0 %vm11184_vm2, %v14053_v60  ;;  %10796 = vmatprep.subr.mxu0 %v14053_v60 }
 0x385   :  { %10784 = vmatmul.mubr.msk.f32.vlgmr.msra.gmra.mxu1 %vm365_vm3, %v4395_v14 }
 0x386   :  { %10792 = vmatpush3.msk.msra.mxu1 %vm1884_vm4, %v4726_v39  ;;  %10793 = vmatprep.mubr.msk.f32.mxu1 %vm11184_vm2, %v14053_v60 }
 0x387   :  { %10801 = vmatprep.subr.mxu1 %v14053_v60 }
 0x404   :  { %v12159_v10 = vpop.f32.mrf.mxu0 }
 0x406   :  { %v10630_v42 = vpop.f32.mrf.mxu0 }
 0x408   :  { %v12161_v30 = vpop.f32.mrf.mxu0 }
 0x409   :  { %v12163_v47 = vpop.f32.mrf.mxu1 }
 0x40a   :  { %v10640_v36 = vpop.f32.mrf.mxu0 }
 0x40b   :  { %v10635_v38 = vpop.f32.mrf.mxu1 }
 0x40c   :  { %v12165_v51 = vpop.f32.mrf.mxu0 }
 0x40d   :  { %v12167_v43 = vpop.f32.mrf.mxu1 }
 0x40e   :  { %v10650_v57 = vpop.f32.mrf.mxu0 }
 0x40f   :  { %v10645_v48 = vpop.f32.mrf.mxu1 }
 0x410   :  { %v12169_v33 = vpop.f32.mrf.mxu0 }
 0x411   :  { %v12171_v62 = vpop.f32.mrf.mxu1 }
 0x412   :  { %v10660_v58 = vpop.f32.mrf.mxu0 }
 0x413   :  { %v10655_v52 = vpop.f32.mrf.mxu1 }
 0x414   :  { %v12173_v7 = vpop.f32.mrf.mxu0 }
 0x415   :  { %v12175_v6 = vpop.f32.mrf.mxu1 }
 0x416   :  { %v10670_v17 = vpop.f32.mrf.mxu0 }
 0x417   :  { %v10665_v56 = vpop.f32.mrf.mxu1 }
 0x418   :  { %v12177_v37 = vpop.f32.mrf.mxu0 }
 0x419   :  { %v12179_v11 = vpop.f32.mrf.mxu1 }
 0x41a   :  { %v10680_v1 = vpop.f32.mrf.mxu0 }
 0x41b   :  { %v10675_v63 = vpop.f32.mrf.mxu1 }
 0x41c   :  { %v12181_v3 = vpop.f32.mrf.mxu0 }
 0x41d   :  { %v12183_v32 = vpop.f32.mrf.mxu1 }
 0x41e   :  { %v10690_v12 = vpop.f32.mrf.mxu0 }
 0x41f   :  { %v10685_v8 = vpop.f32.mrf.mxu1 }
 0x420   :  { %v12185_v34 = vpop.f32.mrf.mxu0 }
 0x421   :  { %v12187_v31 = vpop.f32.mrf.mxu1 }
 0x422   :  { %v10700_v40 = vpop.f32.mrf.mxu0 }
 0x423   :  { %v10695_v50 = vpop.f32.mrf.mxu1 }
 0x424   :  { %v12189_v41 = vpop.f32.mrf.mxu0 }
 0x425   :  { %v12191_v29 = vpop.f32.mrf.mxu1  ;;  %v4472_v16 = vsel %vm1701_vm5, %v12189_v41, -inf }
 0x426   :  { %v10710_v24 = vpop.f32.mrf.mxu0  ;;  %4473 = vmax.xlane.f32.xlu0 %v4472_v16 }
 0x427   :  { %v10705_v28 = vpop.f32.mrf.mxu1 }
 0x428   :  { %v12195_v44 = vpop.f32.mrf.mxu0 }
 0x429   :  { %v12197_v20 = vpop.f32.mrf.mxu1  ;;  %v4478_v35 = vsel %vm1701_vm5, %v12195_v44, -inf }
 0x42a   :  { %4479 = vmax.xlane.f32.xlu0 %v4478_v35  ;;  %v10720_v5 = vpop.f32.mrf.mxu0  ;;  %v4475_v54 = vsel %vm1701_vm5, %v12197_v20, -inf }
 0x42b   :  { %4476 = vmax.xlane.f32.xlu1 %v4475_v54  ;;  %v10715_v46 = vpop.f32.mrf.mxu1 }
 0x42c   :  { %v12203_v21 = vpop.f32.mrf.mxu0 }
 0x42d   :  { %v12205_v45 = vpop.f32.mrf.mxu1  ;;  %v4484_v59 = vsel %vm1701_vm5, %v12203_v21, -inf }
 0x42e   :  { %v10730_v2 = vpop.f32.mrf.mxu0  ;;  %v4481_v55 = vsel %vm1701_vm5, %v12205_v45, -inf }
 0x42f   :  { %4485 = vmax.xlane.f32.xlu1 %v4484_v59  ;;  %4482 = vmax.xlane.f32.xlu0 %v4481_v55  ;;  %v10725_v13 = vpop.f32.mrf.mxu1  ;;  %v12259_v55 = vpop.permute.xlu1 %4802 }
 0x430   :  { %v12211_v61 = vpop.f32.mrf.mxu0 }
 0x431   :  { %v12213_v0 = vpop.f32.mrf.mxu1  ;;  %v4490_v9 = vsel %vm1701_vm5, %v12211_v61, -inf }
 0x432   :  { %v10740_v4 = vpop.f32.mrf.mxu0  ;;  %v4487_v14 = vsel %vm1701_vm5, %v12213_v0, -inf }
 0x433   :  { %4491 = vmax.xlane.f32.xlu1 %v4490_v9  ;;  %4488 = vmax.xlane.f32.xlu0 %v4487_v14  ;;  %v10735_v15 = vpop.f32.mrf.mxu1  ;;  %v12261_v13 = vpop.permute.xlu1 %4956 }
 0x434   :  { %v12219_v53 = vpop.f32.mrf.mxu0  ;;  %v12263_v9 = vpop.permute.xlu0 %4879 }
 0x435   :  { %v12221_v49 = vpop.f32.mrf.mxu1  ;;  %v4496_v39 = vsel %vm1701_vm5, %v12219_v53, -inf }
 0x436   :  { %v10750_v42 = vpop.f32.mrf.mxu0  ;;  %v4493_v36 = vsel %vm1701_vm5, %v12221_v49, -inf }
 0x437   :  { %4497 = vmax.xlane.f32.xlu1 %v4496_v39  ;;  %4494 = vmax.xlane.f32.xlu0 %v4493_v36  ;;  %v10745_v38 = vpop.f32.mrf.mxu1  ;;  %v12265_v4 = vpop.permute.xlu1 %5110 }
 0x438   :  { %v12227_v57 = vpop.f32.mrf.mxu0  ;;  %v12267_v14 = vpop.permute.xlu0 %5033 }
 0x439   :  { %v12229_v48 = vpop.f32.mrf.mxu1  ;;  %v4502_v58 = vsel %vm1701_vm5, %v12227_v57, -inf }
 0x43a   :  { %v10760_v52 = vpop.f32.mrf.mxu0  ;;  %v4499_v17 = vsel %vm1701_vm5, %v12229_v48, -inf }
 0x43b   :  { %4503 = vmax.xlane.f32.xlu1 %v4502_v58  ;;  %4500 = vmax.xlane.f32.xlu0 %v4499_v17  ;;  %v10755_v56 = vpop.f32.mrf.mxu1  ;;  %v12269_v15 = vpop.permute.xlu1 %5264 }
 0x43c   :  { %v12235_v1 = vpop.f32.mrf.mxu0  ;;  %v12271_v39 = vpop.permute.xlu0 %5187 }
 0x43d   :  { %v12237_v63 = vpop.f32.mrf.mxu1  ;;  %v4508_v12 = vsel %vm1701_vm5, %v12235_v1, -inf }
 0x43e   :  { %v10770_v8 = vpop.f32.mrf.mxu0  ;;  %v4505_v40 = vsel %vm1701_vm5, %v12237_v63, -inf }
 0x43f   :  { %4509 = vmax.xlane.f32.xlu1 %v4508_v12  ;;  %4506 = vmax.xlane.f32.xlu0 %v4505_v40  ;;  %v10765_v50 = vpop.f32.mrf.mxu1  ;;  %v12273_v36 = vpop.permute.xlu1 %5341 }
 0x441   :  { %v12243_v16 = vpop.f32.mrf.mxu1  ;;  %v12245_v24 = vpop.f32.mrf.mxu0 }
 0x442   :  { %v4514_v28 = vsel %vm1701_vm5, %v12245_v24, -inf  ;;  %v4511_v35 = vsel %vm1701_vm5, %v12243_v16, -inf }
 0x443   :  { %v10780_v5 = vpop.f32.mrf.mxu0  ;;  %4515 = vmax.xlane.f32.xlu1 %v4514_v28  ;;  %4512 = vmax.xlane.f32.xlu0 %v4511_v35  ;;  %v10775_v54 = vpop.f32.mrf.mxu1 }
 0x445   :  { %v12251_v46 = vpop.f32.mrf.mxu1 }
 0x446   :  { %v4517_v59 = vsel %vm1701_vm5, %v12251_v46, -inf }
 0x447   :  { %4518 = vmax.xlane.f32.xlu0 %v4517_v59  ;;  %v10785_v2 = vpop.f32.mrf.mxu1 }
 0x454   :  { %5495 = vrot.lane.b32.xlu1 %v11470_v22, %s11189_s30 }
 0x45d   :  { %5418 = vrot.lane.b32.xlu0 %v11457_v18, %s11189_s30 }
 0x4af   :  { %v4474_v42 = vpop.xlane.xlu0 %4473 }
 0x4b0   :  { %v4520_v22 = vsub.f32 %v12189_v41, %v4474_v42 }
 0x4b2   :  { %v4536_v18 = vmul.f32 1.442695, %v4520_v22 }
 0x4b3   :  { %v4480_v38 = vpop.xlane.xlu0 %4479 }
 0x4b4   :  { %11086 = vpow2.f32 %v4536_v18  ;;  %v4522_v58 = vsub.f32 %v12195_v44, %v4480_v38  ;;  %v4477_v52 = vpop.xlane.xlu1 %4476 }
 0x4b5   :  { %v4521_v17 = vsub.f32 %v12197_v20, %v4477_v52 }
 0x4b6   :  { %v4540_v56 = vmul.f32 1.442695, %v4522_v58 }
 0x4b7   :  { %v4538_v12 = vmul.f32 1.442695, %v4521_v17 }
 0x4b8   :  { %11088 = vpow2.f32 %v4540_v56  ;;  %v4486_v8 = vpop.xlane.xlu1 %4485  ;;  %v4483_v40 = vpop.xlane.xlu0 %4482 }
 0x4b9   :  { %11090 = vpow2.f32 %v4538_v12  ;;  %v4524_v50 = vsub.f32 %v12203_v21, %v4486_v8  ;;  %v4523_v28 = vsub.f32 %v12205_v45, %v4483_v40 }
 0x4bb   :  { %v4544_v35 = vmul.f32 1.442695, %v4524_v50  ;;  %v4542_v41 = vmul.f32 1.442695, %v4523_v28 }
 0x4bc   :  { %v4492_v5 = vpop.xlane.xlu1 %4491  ;;  %v4489_v54 = vpop.xlane.xlu0 %4488 }
 0x4bd   :  { %11092 = vpow2.f32 %v4544_v35  ;;  %v4526_v44 = vsub.f32 %v12211_v61, %v4492_v5  ;;  %v4525_v59 = vsub.f32 %v12213_v0, %v4489_v54 }
 0x4be   :  { %11094 = vpow2.f32 %v4542_v41 }
 0x4bf   :  { %v4548_v20 = vmul.f32 1.442695, %v4526_v44  ;;  %v4546_v2 = vmul.f32 1.442695, %v4525_v59 }
 0x4c0   :  { %v4495_v42 = vpop.xlane.xlu0 %4494  ;;  %v4498_v41 = vpop.xlane.xlu1 %4497 }
 0x4c1   :  { %v12282_v22 = vpop.eup %11086  ;;  %11096 = vpow2.f32 %v4548_v20  ;;  %v4527_v21 = vsub.f32 %v12221_v49, %v4495_v42  ;;  %v4528_v44 = vsub.f32 %v12219_v53, %v4498_v41 }
 0x4c2   :  { %11098 = vpow2.f32 %v4546_v2  ;;  %v4568_v45 = vsel %vm1701_vm5, %v12282_v22, 0.0 }
 0x4c3   :  { %v4550_v18 = vmul.f32 1.442695, %v4527_v21  ;;  %4569 = vadd.xlane.f32.xlu1 %v4568_v45  ;;  %v4552_v2 = vmul.f32 1.442695, %v4528_v44 }
 0x4c4   :  { %v4501_v5 = vpop.xlane.xlu0 %4500  ;;  %v4504_v54 = vpop.xlane.xlu1 %4503 }
 0x4c5   :  { %v12287_v38 = vpop.eup %11088  ;;  %11100 = vpow2.f32 %v4550_v18  ;;  %v4530_v42 = vsub.f32 %v12227_v57, %v4504_v54  ;;  %v4529_v21 = vsub.f32 %v12229_v48, %v4501_v5 }
 0x4c6   :  { %v12289_v61 = vpop.eup %11090  ;;  %v4574_v0 = vsel %vm1701_vm5, %v12287_v38, 0.0  ;;  %11102 = vpow2.f32 %v4552_v2 }
 0x4c7   :  { %4575 = vadd.xlane.f32.xlu1 %v4574_v0  ;;  %v4571_v58 = vsel %vm1701_vm5, %v12289_v61, 0.0  ;;  %v4556_v45 = vmul.f32 1.442695, %v4530_v42  ;;  %v4554_v0 = vmul.f32 1.442695, %v4529_v21 }
 0x4c8   :  { %4572 = vadd.xlane.f32.xlu0 %v4571_v58  ;;  %v4507_v59 = vpop.xlane.xlu0 %4506  ;;  %v4510_v20 = vpop.xlane.xlu1 %4509 }
 0x4c9   :  { %v4532_v18 = vsub.f32 %v12235_v1, %v4510_v20  ;;  %v4531_v58 = vsub.f32 %v12237_v63, %v4507_v59  ;;  %11104 = vpow2.f32 %v4556_v45 }
 0x4ca   :  { %v12295_v49 = vpop.eup %11092  ;;  %11106 = vpow2.f32 %v4554_v0 }
 0x4cb   :  { %v12297_v52 = vpop.eup %11094  ;;  %v4580_v17 = vsel %vm1701_vm5, %v12295_v49, 0.0 }
 0x4cc   :  { %4581 = vadd.xlane.f32.xlu1 %v4580_v17  ;;  %v4577_v56 = vsel %vm1701_vm5, %v12297_v52, 0.0  ;;  %v4516_v17 = vpop.xlane.xlu1 %4515 }
 0x4cd   :  { %4578 = vadd.xlane.f32.xlu0 %v4577_v56  ;;  %v4534_v53 = vsub.f32 %v12245_v24, %v4516_v17  ;;  %v4558_v56 = vmul.f32 1.442695, %v4531_v58 }
 0x4ce   :  { %v12303_v12 = vpop.eup %11096 }
 0x4cf   :  { %v12305_v8 = vpop.eup %11098  ;;  %v4586_v40 = vsel %vm1701_vm5, %v12303_v12, 0.0  ;;  %v4564_v48 = vmul.f32 1.442695, %v4534_v53 }
 0x4d0   :  { %4587 = vadd.xlane.f32.xlu1 %v4586_v40  ;;  %v4583_v50 = vsel %vm1701_vm5, %v12305_v8, 0.0  ;;  %v12363_v0 = vpop.permute.xlu1 %5495 }
 0x4d1   :  { %4584 = vadd.xlane.f32.xlu0 %v4583_v50 }
 0x4d2   :  { %v12311_v28 = vpop.eup %11100 }
 0x4d3   :  { %v4589_v35 = vsel %vm1701_vm5, %v12311_v28, 0.0 }
 0x4d5   :  { %4590 = vadd.xlane.f32.xlu0 %v4589_v35  ;;  %v12327_v35 = vpop.eup %11102 }
 0x4d6   :  { %v4592_v41 = vsel %vm1701_vm5, %v12327_v35, 0.0  ;;  %v12331_v24 = vpop.eup %11104 }
 0x4d7   :  { %v4598_v5 = vsel %vm1701_vm5, %v12331_v24, 0.0 }
 0x4e1   :  { %5649 = vrot.lane.b32.xlu1 %v11486_v25, %s11189_s30  ;;  %v4513_v25 = vpop.xlane.xlu0 %4512 }
 0x4e2   :  { %v4533_v40 = vsub.f32 %v12243_v16, %v4513_v25  ;;  %v12333_v16 = vpop.eup %11106 }
 0x4e4   :  { %v4562_v50 = vmul.f32 1.442695, %v4533_v40 }
 0x4e5   :  { %v4519_v57 = vpop.xlane.xlu0 %4518 }
 0x4e6   :  { %v4535_v1 = vsub.f32 %v12251_v46, %v4519_v57  ;;  %v4595_v46 = vsel %vm1701_vm5, %v12333_v16, 0.0 }
 0x4e8   :  { %v4566_v63 = vmul.f32 1.442695, %v4535_v1 }
 0x4e9   :  { %v12365_v17 = vpop.permute.xlu0 %5418 }
 0x4eb   :  { %5572 = vrot.lane.b32.xlu0 %v11474_v23, %s11189_s30  ;;  %v4560_v23 = vmul.f32 1.442695, %v4532_v18 }
 0x4ed   :  { %11108 = vpow2.f32 %v4560_v23 }
 0x4ee   :  { %11110 = vpow2.f32 %v4558_v56 }
 0x4ef   :  { %11112 = vpow2.f32 %v4564_v48 }
 0x4f0   :  { %11114 = vpow2.f32 %v4562_v50 }
 0x4f1   :  { %11116 = vpow2.f32 %v4566_v63 }
 0x4fa   :  { %v12337_v54 = vpop.eup %11108 }
 0x4fb   :  { %v12341_v44 = vpop.eup %11110  ;;  %v4604_v59 = vsel %vm1701_vm5, %v12337_v54, 0.0 }
 0x4fc   :  { %v12345_v20 = vpop.eup %11112  ;;  %v4601_v2 = vsel %vm1701_vm5, %v12341_v44, 0.0 }
 0x4fd   :  { %v12349_v42 = vpop.eup %11114  ;;  %v4610_v21 = vsel %vm1701_vm5, %v12345_v20, 0.0 }
 0x4fe   :  { %v4607_v45 = vsel %vm1701_vm5, %v12349_v42, 0.0  ;;  %v12355_v18 = vpop.eup %11116 }
 0x4ff   :  { %v4613_v25 = vsel %vm1701_vm5, %v12355_v18, 0.0 }
 0x505   :  { %4593 = vadd.xlane.f32.xlu1 %v4592_v41 }
 0x509   :  { %4599 = vadd.xlane.f32.xlu1 %v4598_v5 }
 0x50a   :  { %4596 = vadd.xlane.f32.xlu0 %v4595_v46 }
 0x50d   :  { %4605 = vadd.xlane.f32.xlu1 %v4604_v59 }
 0x50e   :  { %4602 = vadd.xlane.f32.xlu0 %v4601_v2 }
 0x511   :  { %4611 = vadd.xlane.f32.xlu1 %v4610_v21 }
 0x512   :  { %4608 = vadd.xlane.f32.xlu0 %v4607_v45 }
 0x516   :  { %4614 = vadd.xlane.f32.xlu0 %v4613_v25 }
 0x522   :  { %5803 = vrot.lane.b32.xlu1 %v11498_v27, %s11189_s30 }
 0x52c   :  { %5726 = vrot.lane.b32.xlu0 %v11492_v26, %s11189_s30 }
 0x54c   :  { %v4570_v58 = vpop.xlane.xlu1 %4569 }
 0x54d   :  { %11118 = vrcp.f32 %v4570_v58 }
 0x550   :  { %v4576_v23 = vpop.xlane.xlu1 %4575 }
 0x551   :  { %11120 = vrcp.f32 %v4576_v23  ;;  %v4573_v53 = vpop.xlane.xlu0 %4572 }
 0x552   :  { %11122 = vrcp.f32 %v4573_v53 }
 0x555   :  { %v4582_v56 = vpop.xlane.xlu1 %4581 }
 0x556   :  { %11124 = vrcp.f32 %v4582_v56  ;;  %v4579_v40 = vpop.xlane.xlu0 %4578 }
 0x557   :  { %11126 = vrcp.f32 %v4579_v40 }
 0x559   :  { %v4588_v57 = vpop.xlane.xlu1 %4587 }
 0x55a   :  { %v11119_v48 = vpop.eup %11118  ;;  %11128 = vrcp.f32 %v4588_v57  ;;  %v4585_v27 = vpop.xlane.xlu0 %4584 }
 0x55b   :  { %11130 = vrcp.f32 %v4585_v27  ;;  %v4632_v26 = vmul.f32 %v11119_v48, %v12282_v22 }
 0x55d   :  { %10789 = vmatmul.mubr.msk.f32.vlgmr.msra.gmra.mxu0 %vm1880_vm6, %v4632_v26 }
 0x55e   :  { %v11121_v50 = vpop.eup %11120  ;;  %v4591_v1 = vpop.xlane.xlu0 %4590  ;;  %10797 = vmatpush3.msk.msra.mxu0 %vm1884_vm4, %v12259_v55  ;;  %10798 = vmatprep.mubr.msk.f32.mxu0 %vm11184_vm2, %v14053_v60 }
 0x55f   :  { %v11123_v63 = vpop.eup %11122  ;;  %11132 = vrcp.f32 %v4591_v1  ;;  %10806 = vmatprep.subr.mxu0 %v14053_v60  ;;  %v4634_v41 = vmul.f32 %v11121_v50, %v12287_v38 }
 0x560   :  { %v4633_v5 = vmul.f32 %v11123_v63, %v12289_v61 }
 0x561   :  { %10799 = vmatmul.mubr.msk.f32.vlgmr.msra.gmra.mxu0 %vm1880_vm6, %v4634_v41 }
 0x562   :  { %10794 = vmatmul.mubr.msk.f32.vlgmr.msra.gmra.mxu1 %vm1880_vm6, %v4633_v5  ;;  %10807 = vmatpush3.msk.msra.mxu0 %vm1884_vm4, %v12261_v13 }
 0x563   :  { %v11125_v22 = vpop.eup %11124  ;;  %10802 = vmatpush3.msk.msra.mxu1 %vm1884_vm4, %v12263_v9  ;;  %10803 = vmatprep.mubr.msk.f32.mxu1 %vm11184_vm2, %v14053_v60 }
 0x564   :  { %v11127_v55 = vpop.eup %11126  ;;  %10808 = vmatprep.mubr.msk.f32.mxu0 %vm11184_vm2, %v14053_v60  ;;  %10811 = vmatprep.subr.mxu1 %v14053_v60  ;;  %v4636_v38 = vmul.f32 %v11125_v22, %v12295_v49 }
 0x565   :  { %10816 = vmatprep.subr.mxu0 %v14053_v60  ;;  %v4635_v61 = vmul.f32 %v11127_v55, %v12297_v52  ;;  %v5961_v55 = vld [vmem:[%s14002_s3 + $0x8] sm:$0xf] }
 0x566   :  { %10809 = vmatmul.mubr.msk.f32.vlgmr.msra.gmra.mxu0 %vm1880_vm6, %v4636_v38  ;;  %v5960_v38 = vld [vmem:[%s14002_s3] sm:$0xff] }
 0x567   :  { %v11129_v13 = vpop.eup %11128  ;;  %10804 = vmatmul.mubr.msk.f32.vlgmr.msra.gmra.mxu1 %vm1880_vm6, %v4635_v61  ;;  %10817 = vmatpush3.msk.msra.mxu0 %vm1884_vm4, %v12265_v4 }
 0x568   :  { %v11131_v9 = vpop.eup %11130  ;;  %10812 = vmatpush3.msk.msra.mxu1 %vm1884_vm4, %v12267_v14  ;;  %10813 = vmatprep.mubr.msk.f32.mxu1 %vm11184_vm2, %v14053_v60  ;;  %v4638_v49 = vmul.f32 %v11129_v13, %v12303_v12  ;;  %v5573_v12 = vpop.permute.xlu0 %5572 }
 0x569   :  { %10818 = vmatprep.mubr.msk.f32.mxu0 %vm11184_vm2, %v14053_v60  ;;  %10821 = vmatprep.subr.mxu1 %v14053_v60  ;;  %v4637_v52 = vmul.f32 %v11131_v9, %v12305_v8 }
 0x56a   :  { %10826 = vmatprep.subr.mxu0 %v14053_v60  ;;  %10819 = vmatmul.mubr.msk.f32.vlgmr.msra.gmra.mxu0 %vm1880_vm6, %v4638_v49 }
 0x56b   :  { %10814 = vmatmul.mubr.msk.f32.vlgmr.msra.gmra.mxu1 %vm1880_vm6, %v4637_v52  ;;  %10827 = vmatpush3.msk.msra.mxu0 %vm1884_vm4, %v12269_v15  ;;  %v5650_v15 = vpop.permute.xlu1 %5649 }
 0x56c   :  { %v11133_v4 = vpop.eup %11132  ;;  %10822 = vmatpush3.msk.msra.mxu1 %vm1884_vm4, %v12271_v39  ;;  %10823 = vmatprep.mubr.msk.f32.mxu1 %vm11184_vm2, %v14053_v60 }
 0x56d   :  { %10831 = vmatprep.subr.mxu1 %v14053_v60  ;;  %v4639_v14 = vmul.f32 %v11133_v4, %v12311_v28  ;;  %10828 = vmatprep.mubr.msk.f32.mxu0 %vm11184_vm2, %v14053_v60 }
 0x56e   :  { %10836 = vmatprep.subr.mxu0 %v14053_v60 }
 0x56f   :  { %10824 = vmatmul.mubr.msk.f32.vlgmr.msra.gmra.mxu1 %vm1880_vm6, %v4639_v14 }
 0x570   :  { %10832 = vmatpush3.msk.msra.mxu1 %vm1884_vm4, %v12273_v36  ;;  %10833 = vmatprep.mubr.msk.f32.mxu1 %vm11184_vm2, %v14053_v60 }
 0x571   :  { %10841 = vmatprep.subr.mxu1 %v14053_v60 }
 0x58e   :  { %v4594_v39 = vpop.xlane.xlu1 %4593 }
 0x58f   :  { %11134 = vrcp.f32 %v4594_v39 }
 0x592   :  { %v4600_v8 = vpop.xlane.xlu1 %4599 }
 0x593   :  { %11136 = vrcp.f32 %v4600_v8  ;;  %v4597_v28 = vpop.xlane.xlu0 %4596 }
 0x594   :  { %11138 = vrcp.f32 %v4597_v28 }
 0x596   :  { %v4606_v46 = vpop.xlane.xlu1 %4605 }
 0x597   :  { %11140 = vrcp.f32 %v4606_v46  ;;  %v4603_v59 = vpop.xlane.xlu0 %4602 }
 0x598   :  { %11142 = vrcp.f32 %v4603_v59 }
 0x59a   :  { %v4612_v2 = vpop.xlane.xlu1 %4611 }
 0x59b   :  { %11144 = vrcp.f32 %v4612_v2  ;;  %v4609_v36 = vpop.xlane.xlu0 %4608 }
 0x59c   :  { %v11135_v21 = vpop.eup %11134  ;;  %11146 = vrcp.f32 %v4609_v36 }
 0x59d   :  { %v4640_v45 = vmul.f32 %v11135_v21, %v12327_v35 }
 0x59e   :  { %v5804_v48 = vpop.permute.xlu1 %5803 }
 0x59f   :  { %v4615_v25 = vpop.xlane.xlu0 %4614  ;;  %10829 = vmatmul.mubr.msk.f32.vlgmr.msra.gmra.mxu0 %vm1880_vm6, %v4640_v45 }
 0x5a0   :  { %v11137_v58 = vpop.eup %11136  ;;  %11148 = vrcp.f32 %v4615_v25  ;;  %10837 = vmatpush3.msk.msra.mxu0 %vm1884_vm4, %v12365_v17  ;;  %10838 = vmatprep.mubr.msk.f32.mxu0 %vm11184_vm2, %v14053_v60 }
 0x5a1   :  { %v11139_v23 = vpop.eup %11138  ;;  %10846 = vmatprep.subr.mxu0 %v14053_v60  ;;  %v4642_v53 = vmul.f32 %v11137_v58, %v12331_v24 }
 0x5a2   :  { %v4641_v56 = vmul.f32 %v11139_v23, %v12333_v16 }
 0x5a3   :  { %10839 = vmatmul.mubr.msk.f32.vlgmr.msra.gmra.mxu0 %vm1880_vm6, %v4642_v53  ;;  %v5727_v16 = vpop.permute.xlu0 %5726 }
 0x5a4   :  { %v11141_v35 = vpop.eup %11140  ;;  %10834 = vmatmul.mubr.msk.f32.vlgmr.msra.gmra.mxu1 %vm1880_vm6, %v4641_v56  ;;  %10847 = vmatpush3.msk.msra.mxu0 %vm1884_vm4, %v5573_v12 }
 0x5a5   :  { %v11143_v40 = vpop.eup %11142  ;;  %10842 = vmatpush3.msk.msra.mxu1 %vm1884_vm4, %v12363_v0  ;;  %10843 = vmatprep.mubr.msk.f32.mxu1 %vm11184_vm2, %v14053_v60  ;;  %v4644_v17 = vmul.f32 %v11141_v35, %v12337_v54 }
 0x5a6   :  { %10848 = vmatprep.mubr.msk.f32.mxu0 %vm11184_vm2, %v14053_v60  ;;  %10851 = vmatprep.subr.mxu1 %v14053_v60  ;;  %v4643_v24 = vmul.f32 %v11143_v40, %v12341_v44 }
 0x5a7   :  { %10856 = vmatprep.subr.mxu0 %v14053_v60  ;;  %10849 = vmatmul.mubr.msk.f32.vlgmr.msra.gmra.mxu0 %vm1880_vm6, %v4644_v17 }
 0x5a8   :  { %v11145_v57 = vpop.eup %11144  ;;  %10844 = vmatmul.mubr.msk.f32.vlgmr.msra.gmra.mxu1 %vm1880_vm6, %v4643_v24  ;;  %10857 = vmatpush3.msk.msra.mxu0 %vm1884_vm4, %v5727_v16 }
 0x5a9   :  { %v11147_v0 = vpop.eup %11146  ;;  %10852 = vmatpush3.msk.msra.mxu1 %vm1884_vm4, %v5650_v15  ;;  %10853 = vmatprep.mubr.msk.f32.mxu1 %vm11184_vm2, %v14053_v60  ;;  %v4646_v54 = vmul.f32 %v11145_v57, %v12345_v20 }
 0x5aa   :  { %10858 = vmatprep.mubr.msk.f32.mxu0 %vm11184_vm2, %v14053_v60  ;;  %10861 = vmatprep.subr.mxu1 %v14053_v60  ;;  %v4645_v44 = vmul.f32 %v11147_v0, %v12349_v42 }
 0x5ab   :  { %10859 = vmatmul.mubr.msk.f32.vlgmr.msra.gmra.mxu0 %vm1880_vm6, %v4646_v54  ;;  %10866 = vmatprep.subr.msk.mxu0 %vm163_vm0, %v5961_v55 }
 0x5ac   :  { %10854 = vmatmul.mubr.msk.f32.vlgmr.msra.gmra.mxu1 %vm1880_vm6, %v4645_v44  ;;  %10867 = vmatpush3.msk.msra.mxu0 %vm163_vm0, %v5961_v55 }
 0x5ad   :  { %v11149_v27 = vpop.eup %11148  ;;  %10862 = vmatpush3.msk.msra.mxu1 %vm1884_vm4, %v5804_v48  ;;  %10863 = vmatprep.mubr.msk.f32.mxu1 %vm11184_vm2, %v14053_v60 }
 0x5ae   :  { %v4647_v20 = vmul.f32 %v11149_v27, %v12355_v18  ;;  %10868 = vmatprep.subr.mxu0 %v5960_v38 }
 0x5af   :  { %10869 = vmatpush3.msra.mxu0 %v5960_v38 }
 0x5b0   :  { %10864 = vmatmul.mubr.msk.f32.vlgmr.msra.gmra.mxu1 %vm1880_vm6, %v4647_v20 }
 0x61d   :  { %v4721_v26 = vpop.f32.mrf.mxu0 }
 0x61e   :  { %5896 = vrot.lane.b32.xlu0 %v4721_v26, %s11190_s14 }
 0x61f   :  { %v10790_v42 = vpop.f32.mrf.mxu0 }
 0x621   :  { %v4875_v50 = vpop.f32.mrf.mxu0 }
 0x622   :  { %v4798_v1 = vpop.f32.mrf.mxu1  ;;  %5900 = vrot.lane.b32.xlu0 %v4875_v50, %s11190_s14 }
 0x623   :  { %5898 = vrot.lane.b32.xlu1 %v4798_v1, %s11190_s14  ;;  %v10800_v63 = vpop.f32.mrf.mxu0 }
 0x624   :  { %v10795_v41 = vpop.f32.mrf.mxu1 }
 0x626   :  { %v5029_v5 = vpop.f32.mrf.mxu0 }
 0x627   :  { %v4952_v22 = vpop.f32.mrf.mxu1  ;;  %5904 = vrot.lane.b32.xlu0 %v5029_v5, %s11190_s14 }
 0x628   :  { %5902 = vrot.lane.b32.xlu1 %v4952_v22, %s11190_s14  ;;  %v10810_v60 = vpop.f32.mrf.mxu0 }
 0x629   :  { %v10805_v18 = vpop.f32.mrf.mxu1 }
 0x62a   :  { %v5183_v61 = vpop.f32.mrf.mxu0 }
 0x62b   :  { %v5106_v13 = vpop.f32.mrf.mxu1  ;;  %5908 = vrot.lane.b32.xlu0 %v5183_v61, %s11190_s14 }
 0x62c   :  { %5906 = vrot.lane.b32.xlu1 %v5106_v13, %s11190_s14  ;;  %v10820_v9 = vpop.f32.mrf.mxu0 }
 0x62d   :  { %v10815_v49 = vpop.f32.mrf.mxu1 }
 0x62f   :  { %v5260_v52 = vpop.f32.mrf.mxu1 }
 0x630   :  { %5910 = vrot.lane.b32.xlu1 %v5260_v52, %s11190_s14 }
 0x631   :  { %v10825_v4 = vpop.f32.mrf.mxu1 }
 0x65f   :  { %v5337_v14 = vpop.f32.mrf.mxu0 }
 0x660   :  { %5912 = vrot.lane.b32.xlu0 %v5337_v14, %s11190_s14 }
 0x661   :  { %v10830_v15 = vpop.f32.mrf.mxu0 }
 0x663   :  { %v5491_v39 = vpop.f32.mrf.mxu0 }
 0x664   :  { %v5414_v12 = vpop.f32.mrf.mxu1  ;;  %5916 = vrot.lane.b32.xlu0 %v5491_v39, %s11190_s14 }
 0x665   :  { %5914 = vrot.lane.b32.xlu1 %v5414_v12, %s11190_s14  ;;  %v10840_v8 = vpop.f32.mrf.mxu0 }
 0x666   :  { %v10835_v28 = vpop.f32.mrf.mxu1 }
 0x667   :  { %v5645_v46 = vpop.f32.mrf.mxu0 }
 0x668   :  { %v5568_v59 = vpop.f32.mrf.mxu1  ;;  %5920 = vrot.lane.b32.xlu0 %v5645_v46, %s11190_s14 }
 0x669   :  { %5918 = vrot.lane.b32.xlu1 %v5568_v59, %s11190_s14  ;;  %v10850_v2 = vpop.f32.mrf.mxu0 }
 0x66a   :  { %v10845_v36 = vpop.f32.mrf.mxu1 }
 0x66b   :  { %v5799_v21 = vpop.f32.mrf.mxu0 }
 0x66c   :  { %v5722_v45 = vpop.f32.mrf.mxu1  ;;  %5924 = vrot.lane.b32.xlu0 %v5799_v21, %s11190_s14 }
 0x66d   :  { %5922 = vrot.lane.b32.xlu1 %v5722_v45, %s11190_s14  ;;  %v10860_v25 = vpop.f32.mrf.mxu0 }
 0x66e   :  { %v10855_v58 = vpop.f32.mrf.mxu1 }
 0x670   :  { %v5876_v23 = vpop.f32.mrf.mxu1 }
 0x671   :  { %5926 = vrot.lane.b32.xlu1 %v5876_v23, %s11190_s14 }
 0x672   :  { %v10865_v53 = vpop.f32.mrf.mxu1 }
 0x690   :  { %v5897_v56 = vpop.permute.xlu0 %5896 }
 0x691   :  { %v5944_v24 = vsel %vm365_vm3, %v12159_v10, %v5897_v56 }
 0x694   :  { %v5901_v35 = vpop.permute.xlu0 %5900 }
 0x695   :  { %v5899_v40 = vpop.permute.xlu1 %5898  ;;  %v5946_v54 = vsel %vm365_vm3, %v12161_v30, %v5901_v35  ;;  %v11166_v35 = vld [vmem:[%s14000_s0 + $0x8] sm:$0x3] }
 0x696   :  { %v5945_v17 = vsel %vm365_vm3, %v12163_v47, %v5899_v40 }
 0x697   :  { %v5985_v16 = vcombine.low %v5944_v24, %v5945_v17  ;;  %v11167_v17 = vld [vmem:[%s14000_s0 + $0xa] sm:$0x3] }
 0x699   :  { %v5905_v57 = vpop.permute.xlu0 %5904  ;;  %v5993_v27 = vrot.slane %v5985_v16, %v11306_v19 }
 0x69a   :  { %v5903_v0 = vpop.permute.xlu1 %5902  ;;  %v5948_v50 = vsel %vm365_vm3, %v12165_v51, %v5905_v57 }
 0x69b   :  { %v5947_v44 = vsel %vm365_vm3, %v12167_v43, %v5903_v0  ;;  %v11168_v0 = vld [vmem:[%s14000_s0 + $0xc] sm:$0x3] }
 0x69c   :  { %v5986_v48 = vcombine.low %v5946_v54, %v5947_v44  ;;  %v11169_v44 = vld [vmem:[%s14000_s0 + $0xe] sm:$0x3] }
 0x69d   :  { %v5909_v10 = vpop.permute.xlu0 %5908 }
 0x69e   :  { %v6000_v20 = vrot.slane %v5986_v48, %v11306_v19  ;;  %v5907_v26 = vpop.permute.xlu1 %5906  ;;  %v5950_v43 = vsel %vm365_vm3, %v12169_v33, %v5909_v10 }
 0x69f   :  { %v5949_v47 = vsel %vm365_vm3, %v12171_v62, %v5907_v26  ;;  %v11170_v26 = vld [vmem:[%s14000_s0] sm:$0x3] }
 0x6a0   :  { %v6001_v42 = vcombine.low %v5993_v27, %v6000_v20  ;;  %v6002_v1 = vcombine.low %v5948_v50, %v5949_v47  ;;  %v11172_v50 = vld [vmem:[%s14000_s0 + $0x4] sm:$0x3] }
 0x6a2   :  { %10870 = vmatprep.mubr.msk.f32.mxu0 %vm154_vm1, %v6001_v42  ;;  %v5911_v30 = vpop.permute.xlu1 %5910  ;;  %v6010_v5 = vrot.slane %v6002_v1, %v11306_v19  ;;  %v11171_v42 = vld [vmem:[%s14000_s0 + $0x2] sm:$0x3] }
 0x6a3   :  { %v5951_v63 = vsel %vm365_vm3, %v12175_v6, %v5911_v30  ;;  %v11173_v30 = vld [vmem:[%s14000_s0 + $0x6] sm:$0x3] }
 0x6a4   :  { %v6003_v41 = vcombine.low %v5950_v43, %v5951_v63 }
 0x6a6   :  { %v6017_v62 = vrot.slane %v6003_v41, %v11306_v19 }
 0x6a8   :  { %v6018_v22 = vcombine.low %v6010_v5, %v6017_v62 }
 0x6aa   :  { %10871 = vmatmul.mubr.msk.f32.vlgmr.msra.gmra.mxu0 %vm154_vm1, %v6018_v22 }
 0x6d2   :  { %v5913_v60 = vpop.permute.xlu0 %5912 }
 0x6d3   :  { %v5952_v33 = vsel %vm365_vm3, %v12173_v7, %v5913_v60 }
 0x6d6   :  { %v5917_v51 = vpop.permute.xlu0 %5916 }
 0x6d7   :  { %v5915_v18 = vpop.permute.xlu1 %5914  ;;  %v5954_v13 = vsel %vm365_vm3, %v12177_v37, %v5917_v51 }
 0x6d8   :  { %v5953_v55 = vsel %vm365_vm3, %v12179_v11, %v5915_v18 }
 0x6d9   :  { %v6019_v38 = vcombine.low %v5952_v33, %v5953_v55 }
 0x6da   :  { %v5921_v61 = vpop.permute.xlu0 %5920 }
 0x6db   :  { %v5919_v6 = vpop.permute.xlu1 %5918  ;;  %v6027_v52 = vrot.slane %v6019_v38, %v11306_v19  ;;  %v5956_v39 = vsel %vm365_vm3, %v12181_v3, %v5921_v61  ;;  %v9993_v3 = vld [vmem:[%s14003_s4] ss:$0 sm:$0xff] }
 0x6dc   :  { %v5955_v9 = vsel %vm365_vm3, %v12183_v32, %v5919_v6 }
 0x6dd   :  { %v6020_v49 = vcombine.low %v5954_v13, %v5955_v9 }
 0x6de   :  { %v5925_v7 = vpop.permute.xlu0 %5924 }
 0x6df   :  { %v6034_v4 = vrot.slane %v6020_v49, %v11306_v19  ;;  %v5923_v14 = vpop.permute.xlu1 %5922  ;;  %v5958_v32 = vsel %vm365_vm3, %v12185_v34, %v5925_v7 }
 0x6e0   :  { %v5957_v11 = vsel %vm365_vm3, %v12187_v31, %v5923_v14 }
 0x6e1   :  { %v6035_v15 = vcombine.low %v6027_v52, %v6034_v4  ;;  %v6036_v12 = vcombine.low %v5956_v39, %v5957_v11 }
 0x6e3   :  { %10873 = vmatprep.mubr.msk.f32.mxu0 %vm154_vm1, %v6035_v15  ;;  %v5927_v37 = vpop.permute.xlu1 %5926  ;;  %v6044_v46 = vrot.slane %v6036_v12, %v11306_v19 }
 0x6e4   :  { %v5959_v8 = vsel %vm365_vm3, %v12191_v29, %v5927_v37  ;;  %v11174_v37 = vld [vmem:[%s14000_s0 + $0x1a] sm:$0x3] }
 0x6e5   :  { %v6037_v28 = vcombine.low %v5958_v32, %v5959_v8  ;;  %v11175_v8 = vld [vmem:[%s14000_s0 + $0x1c] sm:$0x3] }
 0x6e7   :  { %v6051_v31 = vrot.slane %v6037_v28, %v11306_v19 }
 0x6e9   :  { %v6052_v59 = vcombine.low %v6044_v46, %v6051_v31  ;;  %v11176_v46 = vld [vmem:[%s14000_s0 + $0x1e] sm:$0x3] }
 0x6eb   :  { %10874 = vmatmul.mubr.msk.f32.gmra.mxu0 %vm154_vm1, %v6052_v59 }
 0x76a   :  { %v10872_v2 = vpop.f32.mrf.mxu0 }
 0x76b   :  { %v6136_v36 = vadd.f32 %v10872_v2, %v9993_v3 }
 0x76c   :  { %v6130_v21 = vpop.f32.mrf.mxu0 }
 0x76d   :  { %v6170_v45 = vcombine.high %v6136_v36, %v6136_v36  ;;  %v6177_v34 = vrot.slane %v6136_v36, %v11306_v19  ;;  %v6131_v25 = vadd.f32 %v9993_v3, %v6130_v21  ;;  %v11178_v36 = vld [vmem:[%s14000_s0 + $0x12] sm:$0x3] }
 0x76f   :  { %v6184_v29 = vrot.slane %v6170_v45, %v11306_v19  ;;  %v6185_v58 = vcombine.high %v6177_v34, %v6177_v34  ;;  %v6153_v23 = vcombine.high %v6131_v25, %v6131_v25  ;;  %v6160_v53 = vrot.slane %v6131_v25, %v11306_v19  ;;  %v11179_v45 = vld [vmem:[%s14000_s0 + $0x18] sm:$0x3]  ;;  %v11180_v25 = vld [vmem:[%s14000_s0 + $0x14] sm:$0x3] }
 0x770   :  { %v12540_v40 = vadd.f32 %v11166_v35, %v6177_v34 }
 0x771   :  { %v6186_v56 = vcombine.high %v6184_v29, %v6184_v29  ;;  %v12545_v24 = vadd.f32 %v11167_v17, %v6185_v58  ;;  %v6167_v16 = vrot.slane %v6153_v23, %v11306_v19  ;;  %v6168_v57 = vcombine.high %v6160_v53, %v6160_v53  ;;  %v11181_v58 = vld [vmem:[%s14000_s0 + $0x16] sm:$0x3] }
 0x772   :  { %v12551_v54 = vadd.f32 %v11168_v0, %v6184_v29  ;;  %v12563_v47 = vadd.f32 %v11170_v26, %v6160_v53 }
 0x773   :  { %v12556_v48 = vadd.f32 %v11169_v44, %v6186_v56  ;;  %v6288_v27 = vcombine.low %v12540_v40, %v12545_v24  ;;  %v6169_v20 = vcombine.high %v6167_v16, %v6167_v16  ;;  %v12568_v10 = vadd.f32 %v11171_v42, %v6168_v57 }
 0x774   :  { %v12573_v1 = vadd.f32 %v11172_v50, %v6167_v16  ;;  %v11191_v50 = vmov 269488144  }
 0x775   :  { %v12578_v43 = vadd.f32 %v11173_v30, %v6169_v20  ;;  %v6289_v63 = vcombine.low %v12551_v54, %v12556_v48  ;;  %v6271_v41 = vcombine.low %v12563_v47, %v12568_v10  ;;  %v6296_v5 = vrot.slane %v6288_v27, %v11306_v19 }
 0x776   :  { %v6365_v30 = vunpack.c.l.s4 %v11191_v50 }
 0x777   :  { %v6303_v62 = vrot.slane %v6289_v63, %v11306_v19  ;;  %v6272_v22 = vcombine.low %v12573_v1, %v12578_v43  ;;  %v6279_v51 = vrot.slane %v6271_v41, %v11306_v19  ;;  %v11192_v63 = vmov 842150450  }
 0x778   :  { %v6372_v41 = vunpack.c.l.s4 %v11192_v63  ;;  %v6958_v63 = vld [vmem:[%s14004_s5] sm:$0xff] }
 0x779   :  { %v6304_v60 = vcombine.low %v6296_v5, %v6303_v62  ;;  %v6286_v18 = vrot.slane %v6272_v22, %v11306_v19  ;;  %v11193_v5 = vmov 1414812756   ;;  %v11194_v22 = vmov 1987475062  }
 0x77a   :  { %v6379_v62 = vunpack.c.l.s4 %v11193_v5  ;;  %v6959_v5 = vld [vmem:[%s14004_s5 + $0x8] sm:$0xff] }
 0x77b   :  { %v6346_v55 = vsel %vm154_vm1, %v6304_v60, 0.0  ;;  %v6287_v33 = vcombine.low %v6279_v51, %v6286_v18  ;;  %v6386_v60 = vunpack.c.l.s4 %v11194_v22  ;;  %v6366_v51 = vunpack.c.0.s8 %v6365_v30 }
 0x77c   :  { %6347 = vadd.xlane.f32.xlu1 %v6346_v55  ;;  %v6373_v18 = vunpack.c.0.s8 %v6372_v41  ;;  %v6380_v55 = vunpack.c.0.s8 %v6379_v62  ;;  %v6966_v41 = vld [vmem:[%s14004_s5 + $0x40] sm:$0x33]  ;;  %v11195_v62 = vmov 0  }
 0x77d   :  { %v6343_v38 = vsel %vm154_vm1, %v6287_v33, 0.0  ;;  %v6387_v33 = vunpack.c.0.s8 %v6386_v60  ;;  %7209 = vmatprep.mubr.bf16.mxu1 %v11195_v62  ;;  %7262 = vmatprep.mubr.bf16.mxu0 %v11195_v62  ;;  %v10002_v22 = vcombine.high %v6958_v63, %v6966_v41  ;;  %v6967_v60 = vld [vmem:[%s14004_s5 + $0x48] sm:$0x33] }
 0x77e   :  { %6344 = vadd.xlane.f32.xlu0 %v6343_v38  ;;  %v14067_v38 = vld [vmem:[#allocation2_spill] sm:$0xff] }
 0x77f   :  { %10017 = vmatprep.subr.msk.bf16.mxu1 %vm7128_vm7, %v10002_v22  ;;  %v12801_v22 = vld [vmem:[%s14004_s5 + $0x18] sm:$0xff] }
 0x7ab   :  { %v10875_v61 = vpop.f32.mrf.mxu0 }
 0x7ac   :  { %v6146_v6 = vadd.f32 %v10875_v61, %v9993_v3  ;;  %v12651_v61 = vsub.s32 %v6366_v51, %v14067_v38  ;;  %v10001_v51 = vcombine.low %v6958_v63, %v6966_v41  ;;  %v12791_v41 = vld [vmem:[%s14004_s5 + $0x10] sm:$0xff] }
 0x7ad   :  { %v6140_v13 = vpop.f32.mrf.mxu0 }
 0x7ae   :  { %v6204_v9 = vcombine.high %v6146_v6, %v6146_v6  ;;  %v6211_v49 = vrot.slane %v6146_v6, %v11306_v19  ;;  %v6141_v52 = vadd.f32 %v9993_v3, %v6140_v13  ;;  %v11177_v3 = vld [vmem:[%s14000_s0 + $0x10] sm:$0x3]  ;;  %14068 = vst [vmem:[#allocation3_spill] sm:$0xff] %v12651_v61  ;;  %v12654_v6 = vsub.s32 %v6373_v18, %v14067_v38 }
 0x7af   :  { %v12657_v13 = vsub.s32 %v6380_v55, %v14067_v38  ;;  %v10004_v18 = vcombine.high %v6959_v5, %v6967_v60  ;;  %v10003_v55 = vcombine.low %v6959_v5, %v6967_v60  ;;  %v12796_v5 = vld [vmem:[%s14004_s5 + $0x50] sm:$0x33] }
 0x7b0   :  { %v6218_v4 = vrot.slane %v6204_v9, %v11306_v19  ;;  %v6219_v14 = vcombine.high %v6211_v49, %v6211_v49  ;;  %v6187_v11 = vcombine.high %v6141_v52, %v6141_v52  ;;  %v6194_v15 = vrot.slane %v6141_v52, %v11306_v19  ;;  %14069 = vst [vmem:[#allocation4_spill] sm:$0xff] %v12654_v6 }
 0x7b1   :  { %v12624_v34 = vadd.f32 %v11179_v45, %v6211_v49  ;;  %14070 = vst [vmem:[#allocation5_spill] sm:$0xff] %v12657_v13  ;;  %v12660_v9 = vsub.s32 %v6387_v33, %v14067_v38  ;;  %v7130_v33 = vsel %vm7128_vm7, %v10001_v51, 0  ;;  %10020 = vmatprep.subr.msk.bf16.mxu0 %vm7128_vm7, %v10004_v18  ;;  %v10006_v60 = vcombine.high %v12791_v41, %v12796_v5  ;;  %v12810_v18 = vld [vmem:[%s14004_s5 + $0x58] sm:$0x33] }
 0x7b2   :  { %v6220_v7 = vcombine.high %v6218_v4, %v6218_v4  ;;  %v6201_v39 = vrot.slane %v6187_v11, %v11306_v19  ;;  %v6202_v12 = vcombine.high %v6194_v15, %v6194_v15  ;;  %v12599_v32 = vadd.f32 %v11174_v37, %v6219_v14  ;;  %7192 = vmatpush1.bf16.msra.mxu1 %v7130_v33 }
 0x7b3   :  { %v12604_v28 = vadd.f32 %v11175_v8, %v6218_v4  ;;  %v12614_v2 = vadd.f32 %v11177_v3, %v6194_v15  ;;  %14071 = vst [vmem:[#allocation6_spill] sm:$0xff] %v12660_v9  ;;  %v10005_v51 = vcombine.low %v12791_v41, %v12796_v5  ;;  %v10007_v33 = vcombine.low %v12801_v22, %v12810_v18 }
 0x7b4   :  { %v12609_v31 = vadd.f32 %v11176_v46, %v6220_v7  ;;  %v6203_v59 = vcombine.high %v6201_v39, %v6201_v39  ;;  %v12619_v21 = vadd.f32 %v11178_v36, %v6202_v12  ;;  %v12629_v29 = vadd.f32 %v11180_v25, %v6201_v39  ;;  %10023 = vmatprep.subr.msk.bf16.mxu1 %vm7128_vm7, %v10006_v60 }
 0x7b5   :  { %v6322_v35 = vcombine.low %v12624_v34, %v12599_v32 }
 0x7b6   :  { %v12634_v23 = vadd.f32 %v11181_v58, %v6203_v59  ;;  %v6323_v53 = vcombine.low %v12604_v28, %v12609_v31  ;;  %v6305_v56 = vcombine.low %v12614_v2, %v12619_v21 }
 0x7b7   :  { %v6330_v27 = vrot.slane %v6322_v35, %v11306_v19 }
 0x7b8   :  { %v6306_v17 = vcombine.low %v12629_v29, %v12634_v23  ;;  %v6313_v16 = vrot.slane %v6305_v56, %v11306_v19  ;;  %v6337_v0 = vrot.slane %v6323_v53, %v11306_v19 }
 0x7ba   :  { %v6320_v57 = vrot.slane %v6306_v17, %v11306_v19  ;;  %v6338_v26 = vcombine.low %v6330_v27, %v6337_v0 }
 0x7bc   :  { %v6321_v44 = vcombine.low %v6313_v16, %v6320_v57  ;;  %v6352_v42 = vsel %vm154_vm1, %v6338_v26, 0.0 }
 0x7be   :  { %v6349_v20 = vsel %vm154_vm1, %v6321_v44, 0.0 }
 0x7bf   :  { %6350 = vadd.xlane.f32.xlu0 %v6349_v20 }
 0x7c3   :  { %6353 = vadd.xlane.f32.xlu0 %v6352_v42 }
 0x805   :  { %v6348_v49 = vpop.xlane.xlu1 %6347 }
 0x806   :  { %v6357_v52 = vmul.f32 0.083333336, %v6348_v49  ;;  %v7136_v49 = vsel %vm7128_vm7, %v10003_v55, 0  ;;  %v10008_v55 = vcombine.high %v12801_v22, %v12810_v18 }
 0x807   :  { %v6345_v4 = vpop.xlane.xlu0 %6344  ;;  %7245 = vmatpush1.bf16.msra.mxu0 %v7136_v49  ;;  %v12821_v49 = vld [vmem:[%s14004_s5 + $0x20] sm:$0xff] }
 0x808   :  { %v6398_v14 = vrot.slane %v6357_v52, %v12651_v61  ;;  %v6405_v11 = vrot.slane %v6357_v52, %v12654_v6  ;;  %v6412_v15 = vrot.slane %v6357_v52, %v12657_v13  ;;  %v6419_v7 = vrot.slane %v6357_v52, %v12660_v9  ;;  %10026 = vmatprep.subr.msk.bf16.mxu0 %vm7128_vm7, %v10008_v55 }
 0x809   :  { %v6356_v39 = vmul.f32 0.083333336, %v6345_v4 }
 0x80a   :  { %v12667_v12 = vsub.f32 %v12540_v40, %v6398_v14  ;;  %v12670_v37 = vsub.f32 %v12545_v24, %v6405_v11  ;;  %v12673_v8 = vsub.f32 %v12551_v54, %v6412_v15  ;;  %v12676_v46 = vsub.f32 %v12556_v48, %v6419_v7 }
 0x80b   :  { %v6370_v59 = vrot.slane %v6356_v39, %v12651_v61  ;;  %v6377_v3 = vrot.slane %v6356_v39, %v12654_v6  ;;  %v6384_v36 = vrot.slane %v6356_v39, %v12657_v13  ;;  %v6391_v45 = vrot.slane %v6356_v39, %v12660_v9 }
 0x80c   :  { %v6512_v40 = vmul.f32 %v12667_v12, %v12667_v12  ;;  %v6513_v24 = vmul.f32 %v12670_v37, %v12670_v37  ;;  %v6514_v54 = vmul.f32 %v12673_v8, %v12673_v8  ;;  %v6515_v48 = vmul.f32 %v12676_v46, %v12676_v46 }
 0x80d   :  { %v12691_v25 = vsub.f32 %v12563_v47, %v6370_v59  ;;  %v12694_v58 = vsub.f32 %v12568_v10, %v6377_v3  ;;  %v12697_v53 = vsub.f32 %v12573_v1, %v6384_v36  ;;  %v12700_v56 = vsub.f32 %v12578_v43, %v6391_v45 }
 0x80e   :  { %v6557_v35 = vcombine.low %v6512_v40, %v6513_v24  ;;  %v6558_v17 = vcombine.low %v6514_v54, %v6515_v48 }
 0x80f   :  { %v6508_v16 = vmul.f32 %v12691_v25, %v12691_v25  ;;  %v6509_v57 = vmul.f32 %v12694_v58, %v12694_v58  ;;  %v6510_v47 = vmul.f32 %v12697_v53, %v12697_v53  ;;  %v6511_v10 = vmul.f32 %v12700_v56, %v12700_v56 }
 0x810   :  { %v6565_v1 = vrot.slane %v6557_v35, %v11306_v19  ;;  %v6572_v0 = vrot.slane %v6558_v17, %v11306_v19 }
 0x811   :  { %v6540_v43 = vcombine.low %v6508_v16, %v6509_v57  ;;  %v6541_v44 = vcombine.low %v6510_v47, %v6511_v10 }
 0x812   :  { %v6573_v27 = vcombine.low %v6565_v1, %v6572_v0 }
 0x813   :  { %v6548_v20 = vrot.slane %v6540_v43, %v11306_v19  ;;  %v6555_v26 = vrot.slane %v6541_v44, %v11306_v19 }
 0x814   :  { %v6615_v42 = vsel %vm154_vm1, %v6573_v27, 0.0 }
 0x815   :  { %6616 = vadd.xlane.f32.xlu0 %v6615_v42  ;;  %v6556_v50 = vcombine.low %v6548_v20, %v6555_v26 }
 0x817   :  { %v6612_v30 = vsel %vm154_vm1, %v6556_v50, 0.0 }
 0x818   :  { %6613 = vadd.xlane.f32.xlu1 %v6612_v30 }
 0x848   :  { %v6351_v52 = vpop.xlane.xlu0 %6350 }
 0x849   :  { %v6358_v4 = vmul.f32 0.083333336, %v6351_v52  ;;  %v12826_v52 = vld [vmem:[%s14004_s5 + $0x60] sm:$0x33] }
 0x84b   :  { %v6426_v14 = vrot.slane %v6358_v4, %v12651_v61  ;;  %v6433_v11 = vrot.slane %v6358_v4, %v12654_v6  ;;  %v6440_v15 = vrot.slane %v6358_v4, %v12657_v13  ;;  %v6447_v7 = vrot.slane %v6358_v4, %v12660_v9  ;;  %v12831_v4 = vld [vmem:[%s14004_s5 + $0x28] sm:$0xff] }
 0x84c   :  { %v6354_v39 = vpop.xlane.xlu0 %6353 }
 0x84d   :  { %v12739_v59 = vsub.f32 %v12614_v2, %v6426_v14  ;;  %v12742_v3 = vsub.f32 %v12619_v21, %v6433_v11  ;;  %v12745_v36 = vsub.f32 %v12629_v29, %v6440_v15  ;;  %v12748_v45 = vsub.f32 %v12634_v23, %v6447_v7  ;;  %v12836_v14 = vld [vmem:[%s14004_s5 + $0x68] sm:$0x33] }
 0x84e   :  { %v6359_v40 = vmul.f32 0.083333336, %v6354_v39  ;;  %v10009_v11 = vcombine.low %v12821_v49, %v12826_v52  ;;  %v10011_v15 = vcombine.low %v12831_v4, %v12836_v14 }
 0x84f   :  { %v6516_v24 = vmul.f32 %v12739_v59, %v12739_v59  ;;  %v6517_v54 = vmul.f32 %v12742_v3, %v12742_v3  ;;  %v6518_v2 = vmul.f32 %v12745_v36, %v12745_v36  ;;  %v6519_v21 = vmul.f32 %v12748_v45, %v12748_v45 }
 0x850   :  { %v6454_v48 = vrot.slane %v6359_v40, %v12651_v61  ;;  %v6461_v29 = vrot.slane %v6359_v40, %v12654_v6  ;;  %v6468_v23 = vrot.slane %v6359_v40, %v12657_v13  ;;  %v6475_v35 = vrot.slane %v6359_v40, %v12660_v9 }
 0x851   :  { %v6574_v17 = vcombine.low %v6516_v24, %v6517_v54  ;;  %v6575_v16 = vcombine.low %v6518_v2, %v6519_v21  ;;  %v9999_v21 = vld [vmem:[%s14005_s9] ss:$0 sm:$0xff] }
 0x852   :  { %v12763_v57 = vsub.f32 %v12624_v34, %v6454_v48  ;;  %v12766_v47 = vsub.f32 %v12599_v32, %v6461_v29  ;;  %v12769_v10 = vsub.f32 %v12604_v28, %v6468_v23  ;;  %v12772_v1 = vsub.f32 %v12609_v31, %v6475_v35  ;;  %v10000_v48 = vld [vmem:[%s14006_s10] ss:$0 sm:$0xff] }
 0x853   :  { %v6582_v0 = vrot.slane %v6574_v17, %v11306_v19  ;;  %v6589_v43 = vrot.slane %v6575_v16, %v11306_v19  ;;  %v6789_v29 = vcombine.high %v9999_v21, %v9999_v21  ;;  %v6831_v23 = vcombine.high %v10000_v48, %v10000_v48 }
 0x854   :  { %v6520_v44 = vmul.f32 %v12763_v57, %v12763_v57  ;;  %v6521_v34 = vmul.f32 %v12766_v47, %v12766_v47  ;;  %v6522_v32 = vmul.f32 %v12769_v10, %v12769_v10  ;;  %v6523_v28 = vmul.f32 %v12772_v1, %v12772_v1 }
 0x855   :  { %v6590_v27 = vcombine.low %v6582_v0, %v6589_v43  ;;  %v12849_v35 = vrot.slane %v9999_v21, %v11306_v19  ;;  %v12852_v17 = vrot.slane %v6789_v29, %v11306_v19  ;;  %v12855_v16 = vrot.slane %v10000_v48, %v11306_v19 }
 0x856   :  { %v6591_v20 = vcombine.low %v6520_v44, %v6521_v34  ;;  %v6592_v31 = vcombine.low %v6522_v32, %v6523_v28  ;;  %v12858_v0 = vrot.slane %v6831_v23, %v11306_v19 }
 0x857   :  { %v6618_v26 = vsel %vm154_vm1, %v6590_v27, 0.0  ;;  %v12862_v44 = vcombine.high %v12849_v35, %v12849_v35  ;;  %v12866_v34 = vcombine.high %v12852_v17, %v12852_v17 }
 0x858   :  { %6619 = vadd.xlane.f32.xlu1 %v6618_v26  ;;  %v6599_v42 = vrot.slane %v6591_v20, %v11306_v19  ;;  %v6606_v50 = vrot.slane %v6592_v31, %v11306_v19  ;;  %v12874_v31 = vcombine.high %v12855_v16, %v12855_v16  ;;  %v12878_v26 = vcombine.high %v12858_v0, %v12858_v0 }
 0x85a   :  { %v6607_v30 = vcombine.low %v6599_v42, %v6606_v50 }
 0x85c   :  { %v6621_v63 = vsel %vm154_vm1, %v6607_v30, 0.0 }
 0x85d   :  { %6622 = vadd.xlane.f32.xlu0 %v6621_v63 }
 0x89e   :  { %v6617_v7 = vpop.xlane.xlu0 %6616 }
 0x89f   :  { %v6625_v39 = vmul.f32 0.083333336, %v6617_v7 }
 0x8a1   :  { %v6629_v40 = vadd.f32 1e-05, %v6625_v39  ;;  %v6614_v24 = vpop.xlane.xlu1 %6613 }
 0x8a2   :  { %v6624_v54 = vmul.f32 0.083333336, %v6614_v24 }
 0x8a3   :  { %11150 = vrsqrt.f32 %v6629_v40 }
 0x8a4   :  { %v6628_v2 = vadd.f32 1e-05, %v6624_v54 }
 0x8a6   :  { %11152 = vrsqrt.f32 %v6628_v2 }
 0x8b0   :  { %v11151_v43 = vpop.eup %11150 }
 0x8b1   :  { %v6674_v32 = vrot.slane %v11151_v43, %v12651_v61  ;;  %v6681_v28 = vrot.slane %v11151_v43, %v12654_v6  ;;  %v6688_v27 = vrot.slane %v11151_v43, %v12657_v13  ;;  %v6695_v20 = vrot.slane %v11151_v43, %v12660_v9 }
 0x8b3   :  { %v11153_v42 = vpop.eup %11152  ;;  %v6772_v50 = vmul.f32 %v6674_v32, %v12667_v12  ;;  %v6773_v30 = vmul.f32 %v6681_v28, %v12670_v37  ;;  %v6774_v63 = vmul.f32 %v6688_v27, %v12673_v8  ;;  %v6775_v60 = vmul.f32 %v6695_v20, %v12676_v46 }
 0x8b4   :  { %v6646_v55 = vrot.slane %v11153_v42, %v12651_v61  ;;  %v6653_v7 = vrot.slane %v11153_v42, %v12654_v6  ;;  %v6660_v39 = vrot.slane %v11153_v42, %v12657_v13  ;;  %v6667_v40 = vrot.slane %v11153_v42, %v12660_v9 }
 0x8b5   :  { %v6814_v24 = vmul.f32 %v12849_v35, %v6772_v50  ;;  %v6815_v54 = vmul.f32 %v12862_v44, %v6773_v30  ;;  %v6816_v12 = vmul.f32 %v12852_v17, %v6774_v63  ;;  %v6817_v37 = vmul.f32 %v12866_v34, %v6775_v60 }
 0x8b6   :  { %v6768_v8 = vmul.f32 %v6646_v55, %v12691_v25  ;;  %v6769_v46 = vmul.f32 %v6653_v7, %v12694_v58  ;;  %v6770_v2 = vmul.f32 %v6660_v39, %v12697_v53  ;;  %v6771_v21 = vmul.f32 %v6667_v40, %v12700_v56 }
 0x8b7   :  { %v12897_v48 = vadd.f32 %v12855_v16, %v6814_v24  ;;  %v12900_v29 = vadd.f32 %v12874_v31, %v6815_v54  ;;  %v12903_v23 = vadd.f32 %v12858_v0, %v6816_v12  ;;  %v12906_v43 = vadd.f32 %v12878_v26, %v6817_v37 }
 0x8b8   :  { %v6810_v25 = vmul.f32 %v12849_v35, %v6768_v8  ;;  %v6811_v58 = vmul.f32 %v12862_v44, %v6769_v46  ;;  %v6812_v53 = vmul.f32 %v12852_v17, %v6770_v2  ;;  %v6813_v56 = vmul.f32 %v12866_v34, %v6771_v21 }
 0x8b9   :  { %14072 = vst [vmem:[#allocation7_spill] sm:$0xff] %v12897_v48  ;;  %14073 = vst [vmem:[#allocation14_spill] sm:$0xff] %v12900_v29  ;;  %v6901_v32 = vcombine.low %v12897_v48, %v12900_v29  ;;  %v6902_v28 = vcombine.low %v12903_v23, %v12906_v43  ;;  %v7142_v12 = vsel %vm7128_vm7, %v10005_v51, 0  ;;  %v7148_v37 = vsel %vm7128_vm7, %v10007_v33, 0 }
 0x8ba   :  { %14074 = vst [vmem:[#allocation9_spill] sm:$0xff] %v12903_v23  ;;  %14075 = vst [vmem:[#allocation8_spill] sm:$0xff] %v12906_v43  ;;  %v12917_v27 = vadd.f32 %v12855_v16, %v6810_v25  ;;  %v12920_v20 = vadd.f32 %v12874_v31, %v6811_v58  ;;  %v12923_v42 = vadd.f32 %v12858_v0, %v6812_v53 }
 0x8bb   :  { %v12926_v50 = vadd.f32 %v12878_v26, %v6813_v56  ;;  %v6909_v60 = vrot.slane %v6901_v32, %v11306_v19  ;;  %v6916_v55 = vrot.slane %v6902_v28, %v11306_v19  ;;  %v10010_v8 = vcombine.high %v12821_v49, %v12826_v52 }
 0x8bc   :  { %14076 = vst [vmem:[#allocation11_spill] sm:$0xff] %v12923_v42  ;;  %v6884_v30 = vcombine.low %v12917_v27, %v12920_v20  ;;  %v10012_v46 = vcombine.high %v12831_v4, %v12836_v14 }
 0x8bd   :  { %14077 = vst [vmem:[#allocation10_spill] sm:$0xff] %v12926_v50  ;;  %v6885_v63 = vcombine.low %v12923_v42, %v12926_v50  ;;  %v6917_v24 = vcombine.low %v6909_v60, %v6916_v55 }
 0x8be   :  { %v6892_v7 = vrot.slane %v6884_v30, %v11306_v19 }
 0x8bf   :  { %v6899_v39 = vrot.slane %v6885_v63, %v11306_v19 }
 0x8c1   :  { %v6900_v40 = vcombine.low %v6892_v7, %v6899_v39 }
 0x8c3   :  { %v12936_v54 = vpack.c.bf16 %v6917_v24, %v6900_v40 }
 0x8c5   :  { %10018 = vmatmul.mubr.msk.bf16.vlgmr.msra.gmra.mxu1 %vm154_vm1, %v12936_v54  ;;  %10021 = vmatmul.mubr.msk.bf16.vlgmr.msra.gmra.mxu0 %vm154_vm1, %v12936_v54 }
 0x8c6   :  { %7298 = vmatpush1.bf16.msra.mxu1 %v7142_v12  ;;  %7351 = vmatpush1.bf16.msra.mxu0 %v7148_v37 }
 0x8c7   :  { %7219 = vmatprep.mubr.bf16.mxu1 %v11195_v62  ;;  %7272 = vmatprep.mubr.bf16.mxu0 %v11195_v62 }
 0x8c8   :  { %10029 = vmatprep.subr.msk.bf16.mxu1 %vm7128_vm7, %v10010_v8  ;;  %10032 = vmatprep.subr.msk.bf16.mxu0 %vm7128_vm7, %v10012_v46 }
 0x8e1   :  { %v6620_v41 = vpop.xlane.xlu1 %6619 }
 0x8e2   :  { %v6626_v5 = vmul.f32 0.083333336, %v6620_v41 }
 0x8e4   :  { %v6630_v22 = vadd.f32 1e-05, %v6626_v5 }
 0x8e6   :  { %11154 = vrsqrt.f32 %v6630_v22  ;;  %v6623_v51 = vpop.xlane.xlu0 %6622 }
 0x8e7   :  { %v6627_v18 = vmul.f32 0.083333336, %v6623_v51 }
 0x8e9   :  { %v6631_v33 = vadd.f32 1e-05, %v6627_v18 }
 0x8eb   :  { %11156 = vrsqrt.f32 %v6631_v33 }
 0x8f3   :  { %v11155_v2 = vpop.eup %11154 }
 0x8f4   :  { %v6702_v21 = vrot.slane %v11155_v2, %v12651_v61  ;;  %v6709_v25 = vrot.slane %v11155_v2, %v12654_v6  ;;  %v6716_v58 = vrot.slane %v11155_v2, %v12657_v13  ;;  %v6723_v53 = vrot.slane %v11155_v2, %v12660_v9 }
 0x8f6   :  { %v6776_v56 = vmul.f32 %v6702_v21, %v12739_v59  ;;  %v6777_v32 = vmul.f32 %v6709_v25, %v12742_v3  ;;  %v6778_v28 = vmul.f32 %v6716_v58, %v12745_v36  ;;  %v6779_v30 = vmul.f32 %v6723_v53, %v12748_v45  ;;  %v6972_v53 = vld [vmem:[%s14004_s5 + $0x70] sm:$0x33] }
 0x8f8   :  { %v11157_v63 = vpop.eup %11156  ;;  %v6818_v60 = vmul.f32 %v12849_v35, %v6776_v56  ;;  %v6819_v55 = vmul.f32 %v12862_v44, %v6777_v32  ;;  %v6820_v7 = vmul.f32 %v12852_v17, %v6778_v28  ;;  %v6821_v39 = vmul.f32 %v12866_v34, %v6779_v30  ;;  %v6965_v56 = vld [vmem:[%s14004_s5 + $0x38] sm:$0xff] }
 0x8f9   :  { %v6730_v40 = vrot.slane %v11157_v63, %v12651_v61  ;;  %v6737_v24 = vrot.slane %v11157_v63, %v12654_v6  ;;  %v6744_v59 = vrot.slane %v11157_v63, %v12657_v13  ;;  %v6751_v3 = vrot.slane %v11157_v63, %v12660_v9  ;;  %v6973_v32 = vld [vmem:[%s14004_s5 + $0x78] sm:$0x33] }
 0x8fa   :  { %v12975_v36 = vadd.f32 %v12855_v16, %v6818_v60  ;;  %v12978_v45 = vadd.f32 %v12874_v31, %v6819_v55  ;;  %v12981_v12 = vadd.f32 %v12858_v0, %v6820_v7  ;;  %v12984_v37 = vadd.f32 %v12878_v26, %v6821_v39  ;;  %v10896_v55 = vld [vmem:[%s14007_s7 + $0x38] sm:$0xff]   ;;  %v10898_v39 = vld [vmem:[%s14007_s7 + $0x70] sm:$0xff]  }
 0x8fb   :  { %v6780_v8 = vmul.f32 %v6730_v40, %v12763_v57  ;;  %v6781_v46 = vmul.f32 %v6737_v24, %v12766_v47  ;;  %v6782_v41 = vmul.f32 %v6744_v59, %v12769_v10  ;;  %v6783_v5 = vmul.f32 %v6751_v3, %v12772_v1  ;;  %v10897_v7 = vld [vmem:[%s14007_s7 + $0xb8] sm:$0xff]   ;;  %v10899_v40 = vld [vmem:[%s14007_s7 + $0xf0] sm:$0xff]   ;;  %v10904_v3 = vld [vmem:[%s14007_s7 + $0x28] sm:$0xff]  }
 0x8fc   :  { %14078 = vst [vmem:[#allocation13_spill] sm:$0xff] %v12975_v36  ;;  %14079 = vst [vmem:[#allocation12_spill] sm:$0xff] %v12978_v45  ;;  %v6918_v22 = vcombine.low %v12975_v36, %v12978_v45  ;;  %v6919_v51 = vcombine.low %v12981_v12, %v12984_v37  ;;  %v7154_v28 = vsel %vm7128_vm7, %v10009_v11, 0  ;;  %v7160_v30 = vsel %vm7128_vm7, %v10011_v15, 0  ;;  %v10894_v11 = vld [vmem:[%s14007_s7 + $0x78] sm:$0xff]   ;;  %v10900_v24 = vld [vmem:[%s14007_s7 + $0x30] sm:$0xff]  }
 0x8fd   :  { %14080 = vst [vmem:[#allocation15_spill] sm:$0xff] %v12981_v12  ;;  %14081 = vst [vmem:[#allocation2_spill] sm:$0xff] %v12984_v37  ;;  %v6822_v18 = vmul.f32 %v12849_v35, %v6780_v8  ;;  %v6823_v33 = vmul.f32 %v12862_v44, %v6781_v46  ;;  %v6824_v2 = vmul.f32 %v12852_v17, %v6782_v41  ;;  %v10895_v15 = vld [vmem:[%s14007_s7 + $0xf8] sm:$0xff]   ;;  %v10901_v59 = vld [vmem:[%s14007_s7 + $0xb0] sm:$0xff]  }
 0x8fe   :  { %v6825_v57 = vmul.f32 %v12866_v34, %v6783_v5  ;;  %v6926_v35 = vrot.slane %v6918_v22, %v11306_v19  ;;  %v6933_v44 = vrot.slane %v6919_v51, %v11306_v19  ;;  %v10016_v60 = vcombine.high %v6965_v56, %v6973_v32  ;;  %v10905_v8 = vld [vmem:[%s14007_s7 + $0xa8] sm:$0xff]   ;;  %v10906_v46 = vld [vmem:[%s14007_s7 + $0x60] sm:$0xff]   ;;  %v10910_v51 = vld [vmem:[%s14007_s7 + $0x58] sm:$0xff]  }
 0x8ff   :  { %v12999_v47 = vadd.f32 %v12855_v16, %v6822_v18  ;;  %v13002_v10 = vadd.f32 %v12874_v31, %v6823_v33  ;;  %v13005_v1 = vadd.f32 %v12858_v0, %v6824_v2  ;;  %v10015_v52 = vcombine.low %v6965_v56, %v6973_v32  ;;  %v10907_v41 = vld [vmem:[%s14007_s7 + $0xe0] sm:$0xff]   ;;  %v10911_v18 = vld [vmem:[%s14007_s7 + $0xd8] sm:$0xff]  }
 0x900   :  { %v13008_v21 = vadd.f32 %v12878_v26, %v6825_v57  ;;  %v6934_v25 = vcombine.low %v6926_v35, %v6933_v44  ;;  %v6964_v26 = vld [vmem:[%s14004_s5 + $0x30] sm:$0xff]  ;;  %v10908_v5 = vld [vmem:[%s14007_s7 + $0x20] sm:$0xff]   ;;  %v10912_v33 = vld [vmem:[%s14007_s7 + $0x18] sm:$0xff]  }
 0x901   :  { %14082 = vst [vmem:[#allocation16_spill] sm:$0xff] %v12999_v47  ;;  %14083 = vst [vmem:[#allocation17_spill] sm:$0xff] %v13002_v10  ;;  %v6935_v17 = vcombine.low %v12999_v47, %v13002_v10  ;;  %v10014_v63 = vcombine.high %v6964_v26, %v6972_v53  ;;  %v10013_v49 = vcombine.low %v6964_v26, %v6972_v53  ;;  %v7172_v14 = vsel %vm7128_vm7, %v10015_v52, 0  ;;  %v10909_v22 = vld [vmem:[%s14007_s7 + $0xa0] sm:$0xff]   ;;  %v10913_v2 = vld [vmem:[%s14007_s7 + $0x98] sm:$0xff]  }
 0x902   :  { %14084 = vst [vmem:[#allocation18_spill] sm:$0xff] %v13005_v1  ;;  %14085 = vst [vmem:[#allocation19_spill] sm:$0xff] %v13008_v21  ;;  %v6936_v16 = vcombine.low %v13005_v1, %v13008_v21  ;;  %v10914_v57 = vld [vmem:[%s14007_s7 + $0x50] sm:$0xff]   ;;  %v10924_v26 = vld [vmem:[%s14007_s7] sm:$0xff]  }
 0x903   :  { %v6943_v34 = vrot.slane %v6935_v17, %v11306_v19  ;;  %v7166_v4 = vsel %vm7128_vm7, %v10013_v49, 0  ;;  %v10915_v35 = vld [vmem:[%s14007_s7 + $0xd0] sm:$0xff]   ;;  %v10925_v53 = vld [vmem:[%s14007_s7 + $0x80] sm:$0xff]   ;;  %v10926_v56 = vld [vmem:[%s14007_s7 + $0x178] sm:$0xff]  }
 0x904   :  { %v6950_v31 = vrot.slane %v6936_v16, %v11306_v19  ;;  %v10916_v44 = vld [vmem:[%s14007_s7 + $0x10] sm:$0xff]   ;;  %v10918_v16 = vld [vmem:[%s14007_s7 + $0x48] sm:$0xff]   ;;  %v10927_v32 = vld [vmem:[%s14007_s7 + $0x1f8] sm:$0xff]  }
 0x905   :  { %v10917_v17 = vld [vmem:[%s14007_s7 + $0x90] sm:$0xff]   ;;  %v13193_v49 = vld [vmem:[%s14008_s6] sm:$0xff] }
 0x906   :  { %v6951_v0 = vcombine.low %v6943_v34, %v6950_v31  ;;  %v10919_v34 = vld [vmem:[%s14007_s7 + $0xc8] sm:$0xff]  }
 0x907   :  { %v10920_v31 = vld [vmem:[%s14007_s7 + $0x8] sm:$0xff]  }
 0x908   :  { %v13018_v58 = vpack.c.bf16 %v6951_v0, %v6934_v25  ;;  %v10921_v25 = vld [vmem:[%s14007_s7 + $0x88] sm:$0xff]   ;;  %v10922_v0 = vld [vmem:[%s14007_s7 + $0x40] sm:$0xff]  }
 0x90a   :  { %10019 = vmatmul.mubr.msk.bf16.gmra.mxu1 %vm154_vm1, %v13018_v58  ;;  %10022 = vmatmul.mubr.msk.bf16.gmra.mxu0 %vm154_vm1, %v13018_v58 }
 0x90b   :  { %7315 = vmatprep.mubr.bf16.mxu1 %v11195_v62  ;;  %7368 = vmatprep.mubr.bf16.mxu0 %v11195_v62 }
 0x912   :  { %10024 = vmatmul.mubr.msk.bf16.vlgmr.msra.gmra.mxu1 %vm154_vm1, %v12936_v54  ;;  %10027 = vmatmul.mubr.msk.bf16.vlgmr.msra.gmra.mxu0 %vm154_vm1, %v12936_v54 }
 0x913   :  { %7325 = vmatprep.mubr.bf16.mxu1 %v11195_v62  ;;  %7378 = vmatprep.mubr.bf16.mxu0 %v11195_v62 }
 0x914   :  { %7404 = vmatpush1.bf16.msra.mxu1 %v7154_v28  ;;  %7457 = vmatpush1.bf16.msra.mxu0 %v7160_v30  ;;  %v6984_v28 = vsub.s32 1, %v14067_v38  ;;  %v6992_v30 = vsub.s32 3, %v14067_v38 }
 0x915   :  { %10035 = vmatprep.subr.msk.bf16.mxu1 %vm7128_vm7, %v10014_v63  ;;  %10038 = vmatprep.subr.msk.bf16.mxu0 %vm7128_vm7, %v10016_v60  ;;  %v6980_v63 = vsub.s32 0, %v14067_v38  ;;  %v6988_v60 = vsub.s32 2, %v14067_v38 }
 0x91a   :  { %10025 = vmatmul.mubr.msk.bf16.gmra.mxu1 %vm154_vm1, %v13018_v58  ;;  %10028 = vmatmul.mubr.msk.bf16.gmra.mxu0 %vm154_vm1, %v13018_v58 }
 0x91b   :  { %7421 = vmatprep.mubr.bf16.mxu1 %v11195_v62  ;;  %7474 = vmatprep.mubr.bf16.mxu0 %v11195_v62 }
 0x922   :  { %10030 = vmatmul.mubr.msk.bf16.vlgmr.msra.gmra.mxu1 %vm154_vm1, %v12936_v54  ;;  %10033 = vmatmul.mubr.msk.bf16.vlgmr.msra.gmra.mxu0 %vm154_vm1, %v12936_v54 }
 0x923   :  { %7431 = vmatprep.mubr.bf16.mxu1 %v11195_v62  ;;  %7484 = vmatprep.mubr.bf16.mxu0 %v11195_v62 }
 0x924   :  { %7510 = vmatpush1.bf16.msra.mxu1 %v7166_v4  ;;  %7563 = vmatpush1.bf16.msra.mxu0 %v7172_v14  ;;  %v13198_v14 = vrot.slane %v13193_v49, %v6984_v28 }
 0x925   :  { %10312 = vmatprep.subr.bf16.mxu1 %v10894_v11  ;;  %10340 = vmatprep.subr.bf16.mxu0 %v10895_v15  ;;  %v13203_v11 = vrot.slane %v13193_v49, %v6992_v30  ;;  %v13208_v15 = vrot.slane %v13193_v49, %v6980_v63 }
 0x92a   :  { %10031 = vmatmul.mubr.msk.bf16.gmra.mxu1 %vm154_vm1, %v13018_v58  ;;  %10034 = vmatmul.mubr.msk.bf16.gmra.mxu0 %vm154_vm1, %v13018_v58 }
 0x92b   :  { %7527 = vmatprep.mubr.bf16.mxu1 %v11195_v62  ;;  %7580 = vmatprep.mubr.bf16.mxu0 %v11195_v62 }
 0x932   :  { %10036 = vmatmul.mubr.msk.bf16.vlgmr.msra.gmra.mxu1 %vm154_vm1, %v12936_v54  ;;  %10039 = vmatmul.mubr.msk.bf16.vlgmr.msra.gmra.mxu0 %vm154_vm1, %v12936_v54  ;;  %v10902_v54 = vld [vmem:[%s14007_s7 + $0x68] sm:$0xff]  }
 0x933   :  { %7537 = vmatprep.mubr.bf16.mxu1 %v11195_v62  ;;  %7590 = vmatprep.mubr.bf16.mxu0 %v11195_v62  ;;  %v10903_v62 = vld [vmem:[%s14007_s7 + $0xe8] sm:$0xff]  }
 0x934   :  { %10313 = vmatpush3.bf16.msra.mxu1 %v10896_v55  ;;  %10341 = vmatpush3.bf16.msra.mxu0 %v10897_v7  ;;  %v13213_v55 = vrot.slane %v13193_v49, %v6988_v60 }
 0x935   :  { %10314 = vmatprep.subr.bf16.mxu1 %v10898_v39  ;;  %10342 = vmatprep.subr.bf16.mxu0 %v10899_v40 }
 0x938   :  { %10315 = vmatpush3.bf16.msra.mxu1 %v10900_v24  ;;  %10343 = vmatpush3.bf16.msra.mxu0 %v10901_v59 }
 0x939   :  { %10316 = vmatprep.subr.bf16.mxu1 %v10902_v54  ;;  %10344 = vmatprep.subr.bf16.mxu0 %v10903_v62 }
 0x93a   :  { %10037 = vmatmul.mubr.msk.bf16.gmra.mxu1 %vm154_vm1, %v13018_v58  ;;  %10040 = vmatmul.mubr.msk.bf16.gmra.mxu0 %vm154_vm1, %v13018_v58  ;;  %v10923_v58 = vld [vmem:[%s14007_s7 + $0xc0] sm:$0xff]  }
 0x93c   :  { %10317 = vmatpush3.bf16.msra.mxu1 %v10904_v3  ;;  %10345 = vmatpush3.bf16.msra.mxu0 %v10905_v8 }
 0x93d   :  { %10318 = vmatprep.subr.bf16.mxu1 %v10906_v46  ;;  %10346 = vmatprep.subr.bf16.mxu0 %v10907_v41 }
 0x940   :  { %10319 = vmatpush3.bf16.msra.mxu1 %v10908_v5  ;;  %10347 = vmatpush3.bf16.msra.mxu0 %v10909_v22 }
 0x941   :  { %10320 = vmatprep.subr.bf16.mxu1 %v10910_v51  ;;  %10348 = vmatprep.subr.bf16.mxu0 %v10911_v18 }
 0x944   :  { %10321 = vmatpush3.bf16.msra.mxu1 %v10912_v33  ;;  %10349 = vmatpush3.bf16.msra.mxu0 %v10913_v2 }
 0x945   :  { %10322 = vmatprep.subr.bf16.mxu1 %v10914_v57  ;;  %10350 = vmatprep.subr.bf16.mxu0 %v10915_v35 }
 0x948   :  { %10323 = vmatpush3.bf16.msra.mxu1 %v10916_v44  ;;  %10351 = vmatpush3.bf16.msra.mxu0 %v10917_v17 }
 0x949   :  { %10324 = vmatprep.subr.bf16.mxu1 %v10918_v16  ;;  %10352 = vmatprep.subr.bf16.mxu0 %v10919_v34 }
 0x94c   :  { %10325 = vmatpush3.bf16.msra.mxu1 %v10920_v31  ;;  %10353 = vmatpush3.bf16.msra.mxu0 %v10921_v25  ;;  %v10928_v25 = vld [vmem:[%s14007_s7 + $0x138] sm:$0xff]  }
 0x94d   :  { %10326 = vmatprep.subr.bf16.mxu1 %v10922_v0  ;;  %10354 = vmatprep.subr.bf16.mxu0 %v10923_v58  ;;  %v10929_v0 = vld [vmem:[%s14007_s7 + $0x1b8] sm:$0xff]  }
 0x950   :  { %10327 = vmatpush3.bf16.msra.mxu1 %v10924_v26  ;;  %10355 = vmatpush3.bf16.msra.mxu0 %v10925_v53  ;;  %v10930_v53 = vld [vmem:[%s14007_s7 + $0x170] sm:$0xff]  }
 0x951   :  { %10368 = vmatprep.subr.bf16.mxu1 %v10926_v56  ;;  %10396 = vmatprep.subr.bf16.mxu0 %v10927_v32  ;;  %v10931_v56 = vld [vmem:[%s14007_s7 + $0x1f0] sm:$0xff]  }
 0x952   :  { %v10932_v32 = vld [vmem:[%s14007_s7 + $0x130] sm:$0xff]  }
 0x985   :  { %v7211_v52 = vpop.f32.mrf.mxu1  ;;  %v7264_v4 = vpop.f32.mrf.mxu0 }
 0x986   :  { %v7212_v8 = vadd.f32 %v7211_v52, %v13208_v15  ;;  %v7265_v46 = vadd.f32 %v7264_v4, %v13213_v55  ;;  %v10933_v52 = vld [vmem:[%s14007_s7 + $0x1b0] sm:$0xff]   ;;  %v10934_v4 = vld [vmem:[%s14007_s7 + $0x168] sm:$0xff]  }
 0x987   :  { %v7213_v7 = vpop.f32.mrf.mxu1  ;;  %v7266_v39 = vpop.f32.mrf.mxu0 }
 0x988   :  { %v7214_v59 = vadd.f32 %v7213_v7, %v13198_v14  ;;  %v7267_v54 = vadd.f32 %v7266_v39, %v13203_v11  ;;  %v7601_v17 = vmax.f32 %v7212_v8, 0.0  ;;  %v7603_v16 = vmax.f32 %v7265_v46, 0.0  ;;  %v10935_v7 = vld [vmem:[%s14007_s7 + $0x1e8] sm:$0xff]   ;;  %v10943_v8 = vld [vmem:[%s14007_s7 + $0x1d8] sm:$0xff]  }
 0x989   :  { %v7215_v40 = vpop.f32.mrf.mxu1  ;;  %v7268_v24 = vpop.f32.mrf.mxu0  ;;  %v10936_v39 = vld [vmem:[%s14007_s7 + $0x128] sm:$0xff]   ;;  %v10944_v46 = vld [vmem:[%s14007_s7 + $0x118] sm:$0xff]  }
 0x98a   :  { %v7216_v62 = vadd.f32 %v7215_v40, %v13208_v15  ;;  %v7269_v3 = vadd.f32 %v7268_v24, %v13213_v55  ;;  %v7602_v2 = vmax.f32 %v7214_v59, 0.0  ;;  %v7604_v57 = vmax.f32 %v7267_v54, 0.0  ;;  %v10937_v40 = vld [vmem:[%s14007_s7 + $0x1a8] sm:$0xff]   ;;  %v10938_v24 = vld [vmem:[%s14007_s7 + $0x160] sm:$0xff]  }
 0x98b   :  { %v7217_v41 = vpop.f32.mrf.mxu1  ;;  %v7270_v5 = vpop.f32.mrf.mxu0  ;;  %v10939_v59 = vld [vmem:[%s14007_s7 + $0x1e0] sm:$0xff]  }
 0x98c   :  { %v7218_v22 = vadd.f32 %v7217_v41, %v13198_v14  ;;  %v7271_v51 = vadd.f32 %v7270_v5, %v13203_v11  ;;  %v7617_v18 = vmax.f32 %v7216_v62, 0.0  ;;  %v7619_v33 = vmax.f32 %v7269_v3, 0.0  ;;  %v10940_v54 = vld [vmem:[%s14007_s7 + $0x120] sm:$0xff]   ;;  %v10942_v3 = vld [vmem:[%s14007_s7 + $0x158] sm:$0xff]   ;;  %v10946_v5 = vld [vmem:[%s14007_s7 + $0x150] sm:$0xff]  }
 0x98d   :  { %v10941_v62 = vld [vmem:[%s14007_s7 + $0x1a0] sm:$0xff]   ;;  %v10945_v41 = vld [vmem:[%s14007_s7 + $0x198] sm:$0xff]  }
 0x98e   :  { %v7618_v35 = vmax.f32 %v7218_v22, 0.0  ;;  %v7620_v44 = vmax.f32 %v7271_v51, 0.0  ;;  %v7665_v58 = vpack.c.bf16 %v7617_v18, %v7601_v17  ;;  %v7667_v26 = vpack.c.bf16 %v7619_v33, %v7603_v16  ;;  %v10947_v22 = vld [vmem:[%s14007_s7 + $0x1d0] sm:$0xff]   ;;  %v10950_v33 = vld [vmem:[%s14007_s7 + $0x148] sm:$0xff]   ;;  %v10955_v17 = vld [vmem:[%s14007_s7 + $0x1c0] sm:$0xff]  }
 0x98f   :  { %v10948_v51 = vld [vmem:[%s14007_s7 + $0x110] sm:$0xff]   ;;  %v10956_v16 = vld [vmem:[%s14007_s7 + $0x100] sm:$0xff]  }
 0x990   :  { %v7666_v34 = vpack.c.bf16 %v7618_v35, %v7602_v2  ;;  %v7668_v31 = vpack.c.bf16 %v7620_v44, %v7604_v57  ;;  %v10949_v18 = vld [vmem:[%s14007_s7 + $0x190] sm:$0xff]   ;;  %v10951_v2 = vld [vmem:[%s14007_s7 + $0x1c8] sm:$0xff]   ;;  %v10954_v44 = vld [vmem:[%s14007_s7 + $0x140] sm:$0xff]  }
 0x991   :  { %v10952_v57 = vld [vmem:[%s14007_s7 + $0x108] sm:$0xff]  }
 0x992   :  { %8760 = vmatprep.mubr.bf16.mxu1 %v7666_v34  ;;  %8809 = vmatprep.mubr.bf16.mxu0 %v7668_v31  ;;  %v10953_v35 = vld [vmem:[%s14007_s7 + $0x188] sm:$0xff]   ;;  %v10957_v34 = vld [vmem:[%s14007_s7 + $0x180] sm:$0xff]   ;;  %v10958_v31 = vld [vmem:[%s14007_s7 + $0x278] sm:$0xff]  }
 0x993   :  { %8761 = vmatmul.mubr.bf16.vlgmr.msra.gmra.mxu1 %v7665_v58  ;;  %8810 = vmatmul.mubr.bf16.vlgmr.msra.gmra.mxu0 %v7667_v26 }
 0x994   :  { %10369 = vmatpush3.bf16.msra.mxu1 %v10928_v25  ;;  %10397 = vmatpush3.bf16.msra.mxu0 %v10929_v0  ;;  %v10959_v25 = vld [vmem:[%s14007_s7 + $0x2f8] sm:$0xff]  }
 0x995   :  { %10370 = vmatprep.subr.bf16.mxu1 %v10930_v53  ;;  %10398 = vmatprep.subr.bf16.mxu0 %v10931_v56 }
 0x998   :  { %10371 = vmatpush3.bf16.msra.mxu1 %v10932_v32  ;;  %10399 = vmatpush3.bf16.msra.mxu0 %v10933_v52  ;;  %v7000_v52 = vsub.s32 5, %v14067_v38 }
 0x999   :  { %10372 = vmatprep.subr.bf16.mxu1 %v10934_v4  ;;  %10400 = vmatprep.subr.bf16.mxu0 %v10935_v7  ;;  %v7008_v4 = vsub.s32 7, %v14067_v38 }
 0x99c   :  { %10373 = vmatpush3.bf16.msra.mxu1 %v10936_v39  ;;  %10401 = vmatpush3.bf16.msra.mxu0 %v10937_v40 }
 0x99d   :  { %10374 = vmatprep.subr.bf16.mxu1 %v10938_v24  ;;  %10402 = vmatprep.subr.bf16.mxu0 %v10939_v59 }
 0x9a0   :  { %10375 = vmatpush3.bf16.msra.mxu1 %v10940_v54  ;;  %10403 = vmatpush3.bf16.msra.mxu0 %v10941_v62 }
 0x9a1   :  { %10376 = vmatprep.subr.bf16.mxu1 %v10942_v3  ;;  %10404 = vmatprep.subr.bf16.mxu0 %v10943_v8  ;;  %v6996_v8 = vsub.s32 4, %v14067_v38 }
 0x9a4   :  { %10377 = vmatpush3.bf16.msra.mxu1 %v10944_v46  ;;  %10405 = vmatpush3.bf16.msra.mxu0 %v10945_v41  ;;  %v7004_v46 = vsub.s32 6, %v14067_v38  ;;  %v11018_v38 = vld [vmem:[%s14007_s7 + $0x340] sm:$0xff]  }
 0x9a5   :  { %10378 = vmatprep.subr.bf16.mxu1 %v10946_v5  ;;  %10406 = vmatprep.subr.bf16.mxu0 %v10947_v22 }
 0x9a8   :  { %10379 = vmatpush3.bf16.msra.mxu1 %v10948_v51  ;;  %10407 = vmatpush3.bf16.msra.mxu0 %v10949_v18 }
 0x9a9   :  { %10380 = vmatprep.subr.bf16.mxu1 %v10950_v33  ;;  %10408 = vmatprep.subr.bf16.mxu0 %v10951_v2 }
 0x9ac   :  { %10381 = vmatpush3.bf16.msra.mxu1 %v10952_v57  ;;  %10409 = vmatpush3.bf16.msra.mxu0 %v10953_v35 }
 0x9ad   :  { %10382 = vmatprep.subr.bf16.mxu1 %v10954_v44  ;;  %10410 = vmatprep.subr.bf16.mxu0 %v10955_v17  ;;  %v6997_v17 = vrot.slane %v13193_v49, %v6996_v8 }
 0x9b0   :  { %10383 = vmatpush3.bf16.msra.mxu1 %v10956_v16  ;;  %10411 = vmatpush3.bf16.msra.mxu0 %v10957_v34  ;;  %v7005_v16 = vrot.slane %v13193_v49, %v7004_v46 }
 0x9b1   :  { %10424 = vmatprep.subr.bf16.mxu1 %v10958_v31  ;;  %10452 = vmatprep.subr.bf16.mxu0 %v10959_v25 }
 0x9ca   :  { %v7221_v0 = vpop.f32.mrf.mxu1  ;;  %v7274_v58 = vpop.f32.mrf.mxu0 }
 0x9cb   :  { %v7222_v59 = vadd.f32 %v7221_v0, %v13208_v15  ;;  %v7275_v54 = vadd.f32 %v7274_v58, %v13213_v55 }
 0x9cc   :  { %v7223_v26 = vpop.f32.mrf.mxu1  ;;  %v7276_v53 = vpop.f32.mrf.mxu0 }
 0x9cd   :  { %v7224_v7 = vadd.f32 %v7223_v26, %v13198_v14  ;;  %v7277_v39 = vadd.f32 %v7276_v53, %v13203_v11  ;;  %v7633_v44 = vmax.f32 %v7222_v59, 0.0 }
 0x9ce   :  { %v7225_v56 = vpop.f32.mrf.mxu1  ;;  %v7278_v32 = vpop.f32.mrf.mxu0 }
 0x9cf   :  { %v7226_v40 = vadd.f32 %v7225_v56, %v13208_v15  ;;  %v7279_v24 = vadd.f32 %v7278_v32, %v13213_v55  ;;  %v13334_v15 = vrot.slane %v13193_v49, %v7000_v52  ;;  %v13339_v55 = vrot.slane %v13193_v49, %v7008_v4 }
 0x9d0   :  { %v7227_v62 = vpop.f32.mrf.mxu1  ;;  %v7280_v3 = vpop.f32.mrf.mxu0  ;;  %v7634_v2 = vmax.f32 %v7224_v7, 0.0  ;;  %v7636_v57 = vmax.f32 %v7277_v39, 0.0 }
 0x9d1   :  { %v7228_v41 = vadd.f32 %v7227_v62, %v13198_v14  ;;  %v7281_v5 = vadd.f32 %v7280_v3, %v13203_v11  ;;  %v7649_v22 = vmax.f32 %v7226_v40, 0.0  ;;  %v7651_v51 = vmax.f32 %v7279_v24, 0.0 }
 0x9d2   :  { %v7317_v18 = vpop.f32.mrf.mxu1  ;;  %v7370_v33 = vpop.f32.mrf.mxu0  ;;  %v7635_v11 = vmax.f32 %v7275_v54, 0.0 }
 0x9d3   :  { %v7650_v35 = vmax.f32 %v7228_v41, 0.0  ;;  %v7652_v14 = vmax.f32 %v7281_v5, 0.0  ;;  %v7681_v58 = vpack.c.bf16 %v7649_v22, %v7633_v44  ;;  %v7318_v24 = vadd.f32 %v7317_v18, %v6997_v17 }
 0x9d4   :  { %v7319_v34 = vpop.f32.mrf.mxu1  ;;  %v7372_v31 = vpop.f32.mrf.mxu0  ;;  %v7683_v26 = vpack.c.bf16 %v7651_v51, %v7635_v11  ;;  %v7371_v59 = vadd.f32 %v7370_v33, %v7005_v16 }
 0x9d5   :  { %v7682_v25 = vpack.c.bf16 %v7650_v35, %v7634_v2  ;;  %v7684_v0 = vpack.c.bf16 %v7652_v14, %v7636_v57  ;;  %v7320_v53 = vadd.f32 %v7319_v34, %v13334_v15  ;;  %v7373_v7 = vadd.f32 %v7372_v31, %v13339_v55 }
 0x9d6   :  { %v7321_v56 = vpop.f32.mrf.mxu1  ;;  %v7374_v32 = vpop.f32.mrf.mxu0  ;;  %v7605_v44 = vmax.f32 %v7318_v24, 0.0  ;;  %v7607_v11 = vmax.f32 %v7371_v59, 0.0 }
 0x9d7   :  { %v7322_v39 = vadd.f32 %v7321_v56, %v6997_v17  ;;  %v7375_v40 = vadd.f32 %v7374_v32, %v7005_v16  ;;  %8768 = vmatprep.mubr.bf16.mxu1 %v7682_v25  ;;  %8817 = vmatprep.mubr.bf16.mxu0 %v7684_v0  ;;  %v7606_v2 = vmax.f32 %v7320_v53, 0.0  ;;  %v7608_v57 = vmax.f32 %v7373_v7, 0.0  ;;  %v10960_v25 = vld [vmem:[%s14007_s7 + $0x238] sm:$0xff]   ;;  %v10962_v7 = vld [vmem:[%s14007_s7 + $0x270] sm:$0xff]  }
 0x9d8   :  { %v7323_v54 = vpop.f32.mrf.mxu1  ;;  %v7376_v49 = vpop.f32.mrf.mxu0  ;;  %8769 = vmatmul.mubr.bf16.gmra.mxu1 %v7681_v58  ;;  %8818 = vmatmul.mubr.bf16.gmra.mxu0 %v7683_v26  ;;  %v10961_v0 = vld [vmem:[%s14007_s7 + $0x2b8] sm:$0xff]  }
 0x9d9   :  { %v7324_v62 = vadd.f32 %v7323_v54, %v13334_v15  ;;  %v7377_v3 = vadd.f32 %v7376_v49, %v13339_v55  ;;  %v7621_v41 = vmax.f32 %v7322_v39, 0.0  ;;  %v7623_v5 = vmax.f32 %v7375_v40, 0.0  ;;  %v10963_v39 = vld [vmem:[%s14007_s7 + $0x2f0] sm:$0xff]  }
 0x9da   :  { %v7327_v22 = vpop.f32.mrf.mxu1  ;;  %v7380_v51 = vpop.f32.mrf.mxu0 }
 0x9db   :  { %v7622_v35 = vmax.f32 %v7324_v62, 0.0  ;;  %v7624_v14 = vmax.f32 %v7377_v3, 0.0  ;;  %v7669_v58 = vpack.c.bf16 %v7621_v41, %v7605_v44  ;;  %v7671_v26 = vpack.c.bf16 %v7623_v5, %v7607_v11 }
 0x9dc   :  { %v7329_v18 = vpop.f32.mrf.mxu1  ;;  %v7382_v33 = vpop.f32.mrf.mxu0  ;;  %v7328_v54 = vadd.f32 %v7327_v22, %v6997_v17  ;;  %v7381_v3 = vadd.f32 %v7380_v51, %v7005_v16  ;;  %v10965_v51 = vld [vmem:[%s14007_s7 + $0x2b0] sm:$0xff]  }
 0x9dd   :  { %v7670_v34 = vpack.c.bf16 %v7622_v35, %v7606_v2  ;;  %v7672_v31 = vpack.c.bf16 %v7624_v14, %v7608_v57  ;;  %v7330_v53 = vadd.f32 %v7329_v18, %v13334_v15  ;;  %v7383_v40 = vadd.f32 %v7382_v33, %v13339_v55  ;;  %v13370_v2 = vld [vmem:[%s14008_s6 + $0x8] sm:$0xff] }
 0x9de   :  { %v7331_v56 = vpop.f32.mrf.mxu1  ;;  %v7384_v32 = vpop.f32.mrf.mxu0  ;;  %v10966_v14 = vld [vmem:[%s14007_s7 + $0x268] sm:$0xff]  }
 0x9df   :  { %v7332_v24 = vadd.f32 %v7331_v56, %v6997_v17  ;;  %v7385_v59 = vadd.f32 %v7384_v32, %v7005_v16  ;;  %8858 = vmatprep.mubr.bf16.mxu1 %v7670_v34  ;;  %8907 = vmatprep.mubr.bf16.mxu0 %v7672_v31  ;;  %v10964_v17 = vld [vmem:[%s14007_s7 + $0x230] sm:$0xff]   ;;  %v7638_v22 = vmax.f32 %v7330_v53, 0.0  ;;  %v7640_v44 = vmax.f32 %v7383_v40, 0.0 }
 0x9e0   :  { %v7333_v49 = vpop.f32.mrf.mxu1  ;;  %v7386_v62 = vpop.f32.mrf.mxu0  ;;  %8859 = vmatmul.mubr.bf16.vlgmr.msra.gmra.mxu1 %v7669_v58  ;;  %8908 = vmatmul.mubr.bf16.vlgmr.msra.gmra.mxu0 %v7671_v26  ;;  %v7637_v34 = vmax.f32 %v7328_v54, 0.0  ;;  %v10968_v26 = vld [vmem:[%s14007_s7 + $0x228] sm:$0xff]   ;;  %v10971_v54 = vld [vmem:[%s14007_s7 + $0x2e0] sm:$0xff]  }
 0x9e1   :  { %v7334_v41 = vadd.f32 %v7333_v49, %v13334_v15  ;;  %v7387_v5 = vadd.f32 %v7386_v62, %v13339_v55  ;;  %10425 = vmatpush3.bf16.msra.mxu1 %v10960_v25  ;;  %10453 = vmatpush3.bf16.msra.mxu0 %v10961_v0  ;;  %v7653_v57 = vmax.f32 %v7332_v24, 0.0  ;;  %v13382_v15 = vrot.slane %v13370_v2, %v6984_v28 }
 0x9e2   :  { %v13375_v35 = vpop.f32.mrf.mxu1  ;;  %v13377_v16 = vpop.f32.mrf.mxu0  ;;  %10426 = vmatprep.subr.bf16.mxu1 %v10962_v7  ;;  %10454 = vmatprep.subr.bf16.mxu0 %v10963_v39  ;;  %v13387_v55 = vrot.slane %v13370_v2, %v6992_v30  ;;  %v7655_v11 = vmax.f32 %v7385_v59, 0.0  ;;  %v10967_v30 = vld [vmem:[%s14007_s7 + $0x2e8] sm:$0xff]   ;;  %v7639_v25 = vmax.f32 %v7381_v3, 0.0  ;;  %v10970_v39 = vld [vmem:[%s14007_s7 + $0x260] sm:$0xff]  }
 0x9e3   :  { %v7654_v18 = vmax.f32 %v7334_v41, 0.0  ;;  %v7656_v33 = vmax.f32 %v7387_v5, 0.0  ;;  %v7685_v53 = vpack.c.bf16 %v7653_v57, %v7637_v34  ;;  %v10969_v7 = vld [vmem:[%s14007_s7 + $0x2a8] sm:$0xff]   ;;  %v10972_v5 = vld [vmem:[%s14007_s7 + $0x220] sm:$0xff]  }
 0x9e4   :  { %v7425_v28 = vpop.f32.mrf.mxu1  ;;  %v7478_v31 = vpop.f32.mrf.mxu0  ;;  %v7687_v40 = vpack.c.bf16 %v7655_v11, %v7639_v25  ;;  %v10973_v57 = vld [vmem:[%s14007_s7 + $0x2a0] sm:$0xff]   ;;  %v10976_v25 = vld [vmem:[%s14007_s7 + $0x218] sm:$0xff]  }
 0x9e5   :  { %v7686_v0 = vpack.c.bf16 %v7654_v18, %v7638_v22  ;;  %v7688_v58 = vpack.c.bf16 %v7656_v33, %v7640_v44  ;;  %10427 = vmatpush3.bf16.msra.mxu1 %v10964_v17  ;;  %10455 = vmatpush3.bf16.msra.mxu0 %v10965_v51  ;;  %v7426_v24 = vadd.f32 %v7425_v28, %v13382_v15  ;;  %v10974_v51 = vld [vmem:[%s14007_s7 + $0x258] sm:$0xff]  }
 0x9e6   :  { %v13401_v56 = vpop.f32.mrf.mxu1  ;;  %v13403_v32 = vpop.f32.mrf.mxu0  ;;  %10428 = vmatprep.subr.bf16.mxu1 %v10966_v14  ;;  %v7479_v59 = vadd.f32 %v7478_v31, %v13387_v55  ;;  %10456 = vmatprep.subr.bf16.mxu0 %v10967_v30  ;;  %v10975_v33 = vld [vmem:[%s14007_s7 + $0x2d8] sm:$0xff]  }
 0x9e7   :  { %8866 = vmatprep.mubr.bf16.mxu1 %v7686_v0  ;;  %8915 = vmatprep.mubr.bf16.mxu0 %v7688_v58  ;;  %v7610_v14 = vmax.f32 %v7426_v24, 0.0  ;;  %v10980_v24 = vld [vmem:[%s14007_s7 + $0x210] sm:$0xff]  }
 0x9e8   :  { %v7429_v49 = vpop.f32.mrf.mxu1  ;;  %v7482_v62 = vpop.f32.mrf.mxu0  ;;  %8867 = vmatmul.mubr.bf16.gmra.mxu1 %v7685_v53  ;;  %8916 = vmatmul.mubr.bf16.gmra.mxu0 %v7687_v40  ;;  %v7612_v44 = vmax.f32 %v7479_v59, 0.0  ;;  %v10978_v53 = vld [vmem:[%s14007_s7 + $0x250] sm:$0xff]  }
 0x9e9   :  { %v7430_v3 = vadd.f32 %v7429_v49, %v13382_v15  ;;  %v7483_v41 = vadd.f32 %v7482_v62, %v13387_v55  ;;  %10429 = vmatpush3.bf16.msra.mxu1 %v10968_v26  ;;  %10457 = vmatpush3.bf16.msra.mxu0 %v10969_v7  ;;  %v10977_v26 = vld [vmem:[%s14007_s7 + $0x298] sm:$0xff]   ;;  %v10979_v7 = vld [vmem:[%s14007_s7 + $0x2d0] sm:$0xff]   ;;  %v10982_v62 = vld [vmem:[%s14007_s7 + $0x248] sm:$0xff]  }
 0x9ea   :  { %v13421_v17 = vpop.f32.mrf.mxu1  ;;  %v13423_v22 = vpop.f32.mrf.mxu0  ;;  %10430 = vmatprep.subr.bf16.mxu1 %v10970_v39  ;;  %10458 = vmatprep.subr.bf16.mxu0 %v10971_v54  ;;  %v10981_v49 = vld [vmem:[%s14007_s7 + $0x290] sm:$0xff]  }
 0x9eb   :  { %v7626_v11 = vmax.f32 %v7430_v3, 0.0  ;;  %v7628_v18 = vmax.f32 %v7483_v41, 0.0  ;;  %v10983_v3 = vld [vmem:[%s14007_s7 + $0x2c8] sm:$0xff]   ;;  %v7013_v41 = vrot.slane %v13370_v2, %v6980_v63  ;;  %v10986_v63 = vld [vmem:[%s14007_s7 + $0x240] sm:$0xff]  }
 0x9ec   :  { %v7435_v34 = vpop.f32.mrf.mxu1  ;;  %v7488_v28 = vpop.f32.mrf.mxu0 }
 0x9ed   :  { %v7674_v31 = vpack.c.bf16 %v7626_v11, %v7610_v14  ;;  %v7676_v30 = vpack.c.bf16 %v7628_v18, %v7612_v44  ;;  %10431 = vmatpush3.bf16.msra.mxu1 %v10972_v5  ;;  %10459 = vmatpush3.bf16.msra.mxu0 %v10973_v57  ;;  %v7021_v57 = vrot.slane %v13370_v2, %v6988_v60  ;;  %v10984_v14 = vld [vmem:[%s14007_s7 + $0x208] sm:$0xff]  }
 0x9ee   :  { %v13437_v0 = vpop.f32.mrf.mxu1  ;;  %v13439_v58 = vpop.f32.mrf.mxu0  ;;  %10432 = vmatprep.subr.bf16.mxu1 %v10974_v51  ;;  %10460 = vmatprep.subr.bf16.mxu0 %v10975_v33  ;;  %v7428_v44 = vadd.f32 %v13401_v56, %v7013_v41  ;;  %v10985_v11 = vld [vmem:[%s14007_s7 + $0x288] sm:$0xff]   ;;  %v10987_v33 = vld [vmem:[%s14007_s7 + $0x2c0] sm:$0xff]   ;;  %v7424_v56 = vadd.f32 %v13375_v35, %v7013_v41 }
 0x9ef   :  { %8956 = vmatprep.mubr.bf16.mxu1 %v7674_v31  ;;  %9005 = vmatprep.mubr.bf16.mxu0 %v7676_v30  ;;  %v7481_v60 = vadd.f32 %v13403_v32, %v7021_v57  ;;  %v10988_v32 = vld [vmem:[%s14007_s7 + $0x200] sm:$0xff]  }
 0x9f0   :  { %v7439_v39 = vpop.f32.mrf.mxu1  ;;  %v7492_v40 = vpop.f32.mrf.mxu0  ;;  %v10989_v35 = vld [vmem:[%s14007_s7 + $0x280] sm:$0xff]  }
 0x9f1   :  { %10433 = vmatpush3.bf16.msra.mxu1 %v10976_v25  ;;  %10461 = vmatpush3.bf16.msra.mxu0 %v10977_v26  ;;  %v7440_v18 = vadd.f32 %v7439_v39, %v13382_v15  ;;  %v7493_v31 = vadd.f32 %v7492_v40, %v13387_v55  ;;  %v7477_v25 = vadd.f32 %v13377_v16, %v7021_v57  ;;  %v10990_v16 = vld [vmem:[%s14007_s7 + $0x378] sm:$0xff]  }
 0x9f2   :  { %v13453_v59 = vpop.f32.mrf.mxu1  ;;  %v13455_v54 = vpop.f32.mrf.mxu0  ;;  %10434 = vmatprep.subr.bf16.mxu1 %v10978_v53  ;;  %10462 = vmatprep.subr.bf16.mxu0 %v10979_v7  ;;  %v7436_v26 = vadd.f32 %v7435_v34, %v13382_v15  ;;  %v7625_v7 = vmax.f32 %v7428_v44, 0.0  ;;  %v7489_v39 = vadd.f32 %v7488_v28, %v13387_v55  ;;  %v7627_v15 = vmax.f32 %v7481_v60, 0.0  ;;  %v10991_v40 = vld [vmem:[%s14007_s7 + $0x3f8] sm:$0xff]  }
 0x9f3   :  { %v7658_v34 = vmax.f32 %v7440_v18, 0.0  ;;  %v7611_v28 = vmax.f32 %v7477_v25, 0.0  ;;  %v13517_v60 = vrot.slane %v13370_v2, %v7008_v4  ;;  %v10992_v18 = vld [vmem:[%s14007_s7 + $0x338] sm:$0xff]   ;;  %v10994_v4 = vld [vmem:[%s14007_s7 + $0x370] sm:$0xff]   ;;  %v7434_v25 = vadd.f32 %v13421_v17, %v7013_v41 }
 0x9f4   :  { %v7531_v5 = vpop.f32.mrf.mxu1  ;;  %v7584_v51 = vpop.f32.mrf.mxu0  ;;  %v10996_v17 = vld [vmem:[%s14007_s7 + $0x330] sm:$0xff]  }
 0x9f5   :  { %10435 = vmatpush3.bf16.msra.mxu1 %v10980_v24  ;;  %10463 = vmatpush3.bf16.msra.mxu0 %v10981_v49  ;;  %v7609_v24 = vmax.f32 %v7424_v56, 0.0  ;;  %v7660_v49 = vmax.f32 %v7493_v31, 0.0 }
 0x9f6   :  { %10436 = vmatprep.subr.bf16.mxu1 %v10982_v62  ;;  %10464 = vmatprep.subr.bf16.mxu0 %v10983_v3  ;;  %v13489_v30 = vpop.f32.mrf.mxu1  ;;  %v13493_v53 = vpop.f32.mrf.mxu0  ;;  %v7642_v62 = vmax.f32 %v7436_v26, 0.0  ;;  %v13511_v3 = vrot.slane %v13370_v2, %v7000_v52  ;;  %v7491_v52 = vadd.f32 %v13439_v58, %v7021_v57  ;;  %v10995_v58 = vld [vmem:[%s14007_s7 + $0x3f0] sm:$0xff]  }
 0x9f7   :  { %v7673_v44 = vpack.c.bf16 %v7625_v7, %v7609_v24  ;;  %v7487_v7 = vadd.f32 %v13423_v22, %v7021_v57  ;;  %v10997_v22 = vld [vmem:[%s14007_s7 + $0x3b0] sm:$0xff]   ;;  %v7641_v57 = vmax.f32 %v7434_v25, 0.0 }
 0x9f8   :  { %v7535_v55 = vpop.f32.mrf.mxu1  ;;  %v7690_v56 = vpack.c.bf16 %v7658_v34, %v7642_v62  ;;  %v10999_v34 = vld [vmem:[%s14007_s7 + $0x3e8] sm:$0xff]  }
 0x9f9   :  { %10437 = vmatpush3.bf16.msra.mxu1 %v10984_v14  ;;  %10465 = vmatpush3.bf16.msra.mxu0 %v10985_v11  ;;  %v7588_v14 = vpop.f32.mrf.mxu0  ;;  %v7644_v11 = vmax.f32 %v7489_v39, 0.0  ;;  %v7536_v31 = vadd.f32 %v7535_v55, %v13511_v3  ;;  %v7532_v39 = vadd.f32 %v7531_v5, %v13511_v3  ;;  %v10998_v5 = vld [vmem:[%s14007_s7 + $0x368] sm:$0xff]  }
 0x9fa   :  { %10438 = vmatprep.subr.bf16.mxu1 %v10986_v63  ;;  %10466 = vmatprep.subr.bf16.mxu0 %v10987_v33  ;;  %v7438_v63 = vadd.f32 %v13437_v0, %v7013_v41  ;;  %v7675_v33 = vpack.c.bf16 %v7627_v15, %v7611_v28  ;;  %v10993_v0 = vld [vmem:[%s14007_s7 + $0x3b8] sm:$0xff]   ;;  %v7659_v41 = vmax.f32 %v7491_v52, 0.0  ;;  %v11000_v28 = vld [vmem:[%s14007_s7 + $0x328] sm:$0xff]  }
 0x9fb   :  { %v7692_v26 = vpack.c.bf16 %v7660_v49, %v7644_v11  ;;  %v7630_v15 = vmax.f32 %v7536_v31, 0.0  ;;  %v7614_v24 = vmax.f32 %v7532_v39, 0.0  ;;  %v11002_v11 = vld [vmem:[%s14007_s7 + $0x360] sm:$0xff]   ;;  %v13564_v52 = vpop.f32.mrf.mxu0  ;;  %v11011_v39 = vld [vmem:[%s14007_s7 + $0x3d0] sm:$0xff]  }
 0x9fc   :  { %v11005_v31 = vld [vmem:[%s14007_s7 + $0x3a0] sm:$0xff]  }
 0x9fd   :  { %10439 = vmatpush3.bf16.msra.mxu1 %v10988_v32  ;;  %10467 = vmatpush3.bf16.msra.mxu0 %v10989_v35  ;;  %v7589_v32 = vadd.f32 %v7588_v14, %v13517_v60  ;;  %v7657_v35 = vmax.f32 %v7438_v63, 0.0  ;;  %v7678_v14 = vpack.c.bf16 %v7630_v15, %v7614_v24  ;;  %v11014_v15 = vld [vmem:[%s14007_s7 + $0x348] sm:$0xff]  }
 0x9fe   :  { %10480 = vmatprep.subr.bf16.mxu1 %v10990_v16  ;;  %10508 = vmatprep.subr.bf16.mxu0 %v10991_v40  ;;  %v7585_v16 = vadd.f32 %v7584_v51, %v13517_v60  ;;  %v7643_v40 = vmax.f32 %v7487_v7, 0.0  ;;  %v11010_v7 = vld [vmem:[%s14007_s7 + $0x350] sm:$0xff]  }
 0x9ff   :  { %v7632_v51 = vmax.f32 %v7589_v32, 0.0  ;;  %v7689_v49 = vpack.c.bf16 %v7657_v35, %v7641_v57  ;;  %v11008_v32 = vld [vmem:[%s14007_s7 + $0x318] sm:$0xff]  }
 0xa00   :  { %8957 = vmatmul.mubr.bf16.vlgmr.msra.gmra.mxu1 %v7673_v44  ;;  %9006 = vmatmul.mubr.bf16.vlgmr.msra.gmra.mxu0 %v7675_v33  ;;  %v7616_v55 = vmax.f32 %v7585_v16, 0.0  ;;  %v7691_v62 = vpack.c.bf16 %v7659_v41, %v7643_v40  ;;  %v11001_v44 = vld [vmem:[%s14007_s7 + $0x3a8] sm:$0xff]   ;;  %v13562_v33 = vpop.f32.mrf.mxu1  ;;  %v11013_v41 = vld [vmem:[%s14007_s7 + $0x390] sm:$0xff]  }
 0xa01   :  { %8964 = vmatprep.mubr.bf16.mxu1 %v7690_v56  ;;  %9013 = vmatprep.mubr.bf16.mxu0 %v7692_v26  ;;  %v11004_v56 = vld [vmem:[%s14007_s7 + $0x320] sm:$0xff]   ;;  %v7594_v26 = vpop.f32.mrf.mxu0  ;;  %v11016_v40 = vld [vmem:[%s14007_s7 + $0x308] sm:$0xff]  }
 0xa02   :  { %10481 = vmatpush3.bf16.msra.mxu1 %v10992_v18  ;;  %10509 = vmatpush3.bf16.msra.mxu0 %v10993_v0  ;;  %v7680_v63 = vpack.c.bf16 %v7632_v51, %v7616_v55  ;;  %v11003_v18 = vld [vmem:[%s14007_s7 + $0x3e0] sm:$0xff]   ;;  %v11006_v0 = vld [vmem:[%s14007_s7 + $0x358] sm:$0xff]   ;;  %v7541_v25 = vpop.f32.mrf.mxu1  ;;  %v7037_v51 = vrot.slane %v13370_v2, %v7004_v46 }
 0xa03   :  { %10482 = vmatprep.subr.bf16.mxu1 %v10994_v4  ;;  %10510 = vmatprep.subr.bf16.mxu0 %v10995_v58  ;;  %v11007_v4 = vld [vmem:[%s14007_s7 + $0x3d8] sm:$0xff]   ;;  %v7596_v16 = vpop.f32.mrf.mxu0 }
 0xa04   :  { %v11009_v58 = vld [vmem:[%s14007_s7 + $0x398] sm:$0xff]   ;;  %v7543_v35 = vpop.f32.mrf.mxu1 }
 0xa06   :  { %10483 = vmatpush3.bf16.msra.mxu1 %v10996_v17  ;;  %10511 = vmatpush3.bf16.msra.mxu0 %v10997_v22  ;;  %v11012_v17 = vld [vmem:[%s14007_s7 + $0x310] sm:$0xff]   ;;  %v11015_v22 = vld [vmem:[%s14007_s7 + $0x3c8] sm:$0xff]   ;;  %v7545_v57 = vpop.f32.mrf.mxu1 }
 0xa07   :  { %10484 = vmatprep.subr.bf16.mxu1 %v10998_v5  ;;  %10512 = vmatprep.subr.bf16.mxu0 %v10999_v34  ;;  %v7029_v5 = vrot.slane %v13370_v2, %v6996_v8  ;;  %v7598_v34 = vpop.f32.mrf.mxu0  ;;  %v7587_v8 = vadd.f32 %v13493_v53, %v7037_v51  ;;  %v7546_v46 = vadd.f32 %v7545_v57, %v13511_v3  ;;  %v11019_v2 = vld [vmem:[%s14007_s7 + $0x3c0] sm:$0xff]  }
 0xa08   :  { %8965 = vmatmul.mubr.bf16.gmra.mxu1 %v7689_v49  ;;  %9014 = vmatmul.mubr.bf16.gmra.mxu0 %v7691_v62  ;;  %v11017_v49 = vld [vmem:[%s14007_s7 + $0x388] sm:$0xff]   ;;  %v7599_v55 = vadd.f32 %v7598_v34, %v13517_v60  ;;  %v7542_v62 = vadd.f32 %v7541_v25, %v13511_v3  ;;  %v11020_v53 = vld [vmem:[%s14007_s7 + $0x300] sm:$0xff]  }
 0xa09   :  { %9054 = vmatprep.mubr.bf16.mxu1 %v7678_v14  ;;  %9103 = vmatprep.mubr.bf16.mxu0 %v7680_v63  ;;  %v7534_v24 = vadd.f32 %v13489_v30, %v7029_v5  ;;  %v7530_v30 = vadd.f32 %v13453_v59, %v7029_v5  ;;  %v11021_v59 = vld [vmem:[%s14007_s7 + $0x380] sm:$0xff]   ;;  %v7662_v63 = vmax.f32 %v7546_v46, 0.0 }
 0xa0a   :  { %10485 = vmatpush3.bf16.msra.mxu1 %v11000_v28  ;;  %10513 = vmatpush3.bf16.msra.mxu0 %v11001_v44  ;;  %v7583_v28 = vadd.f32 %v13455_v54, %v7037_v51  ;;  %v7595_v44 = vadd.f32 %v7594_v26, %v13517_v60  ;;  %v7597_v60 = vadd.f32 %v7596_v16, %v7037_v51 }
 0xa0b   :  { %10486 = vmatprep.subr.bf16.mxu1 %v11002_v11  ;;  %10514 = vmatprep.subr.bf16.mxu0 %v11003_v18  ;;  %v7629_v14 = vmax.f32 %v7534_v24, 0.0  ;;  %v7631_v11 = vmax.f32 %v7587_v8, 0.0  ;;  %v7613_v54 = vmax.f32 %v7530_v30, 0.0  ;;  %v7664_v18 = vmax.f32 %v7599_v55, 0.0 }
 0xa0c   :  { %v7615_v3 = vmax.f32 %v7583_v28, 0.0 }
 0xa0e   :  { %10487 = vmatpush3.bf16.msra.mxu1 %v11004_v56  ;;  %10515 = vmatpush3.bf16.msra.mxu0 %v11005_v31  ;;  %v7646_v56 = vmax.f32 %v7542_v62, 0.0  ;;  %v7677_v31 = vpack.c.bf16 %v7629_v14, %v7613_v54  ;;  %v7679_v25 = vpack.c.bf16 %v7631_v11, %v7615_v3 }
 0xa0f   :  { %10488 = vmatprep.subr.bf16.mxu1 %v11006_v0  ;;  %10516 = vmatprep.subr.bf16.mxu0 %v11007_v4  ;;  %v7648_v0 = vmax.f32 %v7595_v44, 0.0  ;;  %v7544_v4 = vadd.f32 %v7543_v35, %v7029_v5 }
 0xa10   :  { %v7694_v26 = vpack.c.bf16 %v7662_v63, %v7646_v56 }
 0xa12   :  { %10489 = vmatpush3.bf16.msra.mxu1 %v11008_v32  ;;  %10517 = vmatpush3.bf16.msra.mxu0 %v11009_v58  ;;  %v7540_v32 = vadd.f32 %v13562_v33, %v7029_v5  ;;  %v7696_v58 = vpack.c.bf16 %v7664_v18, %v7648_v0 }
 0xa13   :  { %10490 = vmatprep.subr.bf16.mxu1 %v11010_v7  ;;  %10518 = vmatprep.subr.bf16.mxu0 %v11011_v39  ;;  %v7593_v7 = vadd.f32 %v13564_v52, %v7037_v51  ;;  %v7661_v39 = vmax.f32 %v7544_v4, 0.0 }
 0xa16   :  { %10491 = vmatpush3.bf16.msra.mxu1 %v11012_v17  ;;  %10519 = vmatpush3.bf16.msra.mxu0 %v11013_v41  ;;  %v7663_v17 = vmax.f32 %v7597_v60, 0.0  ;;  %v7645_v41 = vmax.f32 %v7540_v32, 0.0 }
 0xa17   :  { %10492 = vmatprep.subr.bf16.mxu1 %v11014_v15  ;;  %10520 = vmatprep.subr.bf16.mxu0 %v11015_v22  ;;  %v7647_v15 = vmax.f32 %v7593_v7, 0.0 }
 0xa18   :  { %v7693_v22 = vpack.c.bf16 %v7661_v39, %v7645_v41 }
 0xa19   :  { %v7695_v57 = vpack.c.bf16 %v7663_v17, %v7647_v15 }
 0xa1a   :  { %10493 = vmatpush3.bf16.msra.mxu1 %v11016_v40  ;;  %10521 = vmatpush3.bf16.msra.mxu0 %v11017_v49 }
 0xa1b   :  { %10494 = vmatprep.subr.bf16.mxu1 %v11018_v38  ;;  %10522 = vmatprep.subr.bf16.mxu0 %v11019_v2 }
 0xa1e   :  { %10495 = vmatpush3.bf16.msra.mxu1 %v11020_v53  ;;  %10523 = vmatpush3.bf16.msra.mxu0 %v11021_v59 }
 0xa21   :  { %9055 = vmatmul.mubr.bf16.vlgmr.msra.gmra.mxu1 %v7677_v31  ;;  %9104 = vmatmul.mubr.bf16.vlgmr.msra.gmra.mxu0 %v7679_v25 }
 0xa22   :  { %9062 = vmatprep.mubr.bf16.mxu1 %v7694_v26  ;;  %9111 = vmatprep.mubr.bf16.mxu0 %v7696_v58 }
 0xa29   :  { %9063 = vmatmul.mubr.bf16.gmra.mxu1 %v7693_v22  ;;  %9112 = vmatmul.mubr.bf16.gmra.mxu0 %v7695_v57  ;;  %v10041_v22 = vld [vmem:[%s14009_s8] ss:$0 sm:$0xff] }
 0xa53   :  { %v10328_v35 = vpop.f32.mrf.mxu1  ;;  %v10356_v16 = vpop.f32.mrf.mxu0 }
 0xa55   :  { %v10329_v34 = vpop.f32.mrf.mxu1  ;;  %v10357_v40 = vpop.f32.mrf.mxu0 }
 0xa56   :  { %v10330_v41 = vadd.f32 %v10329_v34, %v10328_v35  ;;  %v10358_v61 = vadd.f32 %v10357_v40, %v10356_v16 }
 0xa57   :  { %v10331_v33 = vpop.f32.mrf.mxu1  ;;  %v10359_v5 = vpop.f32.mrf.mxu0 }
 0xa58   :  { %v8763_v9 = vadd.f32 %v10330_v41, %v10041_v22 }
 0xa59   :  { %v10332_v24 = vpop.f32.mrf.mxu1  ;;  %v10360_v49 = vpop.f32.mrf.mxu0 }
 0xa5a   :  { %v10333_v13 = vadd.f32 %v10332_v24, %v10331_v33  ;;  %v8812_v10 = vadd.f32 %v10358_v61, %v8763_v9  ;;  %v10361_v36 = vadd.f32 %v10360_v49, %v10359_v5 }
 0xa5c   :  { %v8766_v47 = vadd.f32 %v10333_v13, %v10041_v22 }
 0xa5e   :  { %v8815_v23 = vadd.f32 %v10361_v36, %v8766_v47 }
 0xa98   :  { %v10334_v52 = vpop.f32.mrf.mxu1  ;;  %v10362_v51 = vpop.f32.mrf.mxu0 }
 0xa9a   :  { %v10335_v38 = vpop.f32.mrf.mxu1  ;;  %v10363_v8 = vpop.f32.mrf.mxu0 }
 0xa9b   :  { %v10336_v12 = vadd.f32 %v10335_v38, %v10334_v52  ;;  %v10364_v16 = vadd.f32 %v10363_v8, %v10362_v51 }
 0xa9c   :  { %v10337_v46 = vpop.f32.mrf.mxu1  ;;  %v10365_v2 = vpop.f32.mrf.mxu0 }
 0xa9d   :  { %v8771_v41 = vadd.f32 %v10336_v12, %v10041_v22 }
 0xa9e   :  { %v10338_v30 = vpop.f32.mrf.mxu1  ;;  %v10366_v55 = vpop.f32.mrf.mxu0 }
 0xa9f   :  { %v10339_v45 = vadd.f32 %v10338_v30, %v10337_v46  ;;  %v10367_v40 = vadd.f32 %v10366_v55, %v10365_v2 }
 0xaa0   :  { %v10384_v28 = vpop.f32.mrf.mxu1  ;;  %v10412_v62 = vpop.f32.mrf.mxu0 }
 0xaa1   :  { %v8774_v33 = vadd.f32 %v10339_v45, %v10041_v22 }
 0xaa2   :  { %v10385_v53 = vpop.f32.mrf.mxu1  ;;  %v10413_v14 = vpop.f32.mrf.mxu0 }
 0xaa3   :  { %v10386_v21 = vadd.f32 %v10385_v53, %v10384_v28  ;;  %v10414_v29 = vadd.f32 %v10413_v14, %v10412_v62 }
 0xaa4   :  { %v10387_v44 = vpop.f32.mrf.mxu1  ;;  %v10415_v59 = vpop.f32.mrf.mxu0 }
 0xaa5   :  { %v8861_v35 = vadd.f32 %v10386_v21, %v8812_v10  ;;  %v8820_v10 = vadd.f32 %v10364_v16, %v8771_v41  ;;  %v8823_v21 = vadd.f32 %v10367_v40, %v8774_v33 }
 0xaa6   :  { %v10388_v11 = vpop.f32.mrf.mxu1  ;;  %v10416_v63 = vpop.f32.mrf.mxu0 }
 0xaa7   :  { %v10389_v34 = vadd.f32 %v10388_v11, %v10387_v44  ;;  %v8910_v24 = vadd.f32 %v10414_v29, %v8861_v35  ;;  %v10417_v9 = vadd.f32 %v10416_v63, %v10415_v59 }
 0xaa8   :  { %v10390_v54 = vpop.f32.mrf.mxu1  ;;  %v13636_v18 = vpop.f32.mrf.mxu0 }
 0xaa9   :  { %v8864_v42 = vadd.f32 %v10389_v34, %v8815_v23 }
 0xaaa   :  { %v10391_v3 = vpop.f32.mrf.mxu1  ;;  %v10419_v56 = vpop.f32.mrf.mxu0 }
 0xaab   :  { %v10392_v28 = vadd.f32 %v10391_v3, %v10390_v54  ;;  %v8913_v36 = vadd.f32 %v10417_v9, %v8864_v42  ;;  %v10420_v2 = vadd.f32 %v10419_v56, %v13636_v18 }
 0xaac   :  { %v10393_v31 = vpop.f32.mrf.mxu1  ;;  %v10421_v0 = vpop.f32.mrf.mxu0 }
 0xaad   :  { %v8869_v30 = vadd.f32 %v10392_v28, %v8820_v10 }
 0xaae   :  { %v10394_v4 = vpop.f32.mrf.mxu1  ;;  %v10422_v25 = vpop.f32.mrf.mxu0 }
 0xaaf   :  { %v10395_v61 = vadd.f32 %v10394_v4, %v10393_v31  ;;  %v10423_v55 = vadd.f32 %v10422_v25, %v10421_v0  ;;  %v8918_v42 = vadd.f32 %v10420_v2, %v8869_v30 }
 0xab1   :  { %v8872_v12 = vadd.f32 %v10395_v61, %v8823_v21  ;;  %v14087_v21 = vld [vmem:[#allocation10_spill] sm:$0xff] }
 0xab3   :  { %v8921_v63 = vadd.f32 %v10423_v55, %v8872_v12 }
 0xac0   :  { %v10440_v60 = vpop.f32.mrf.mxu1  ;;  %v10468_v26 = vpop.f32.mrf.mxu0 }
 0xac2   :  { %v10441_v32 = vpop.f32.mrf.mxu1  ;;  %v10469_v58 = vpop.f32.mrf.mxu0 }
 0xac3   :  { %v10442_v48 = vadd.f32 %v10441_v32, %v10440_v60  ;;  %v10470_v47 = vadd.f32 %v10469_v58, %v10468_v26 }
 0xac4   :  { %v10443_v7 = vpop.f32.mrf.mxu1  ;;  %v10471_v39 = vpop.f32.mrf.mxu0 }
 0xac5   :  { %v8959_v52 = vadd.f32 %v10442_v48, %v8910_v24 }
 0xac6   :  { %v10444_v17 = vpop.f32.mrf.mxu1  ;;  %v10472_v15 = vpop.f32.mrf.mxu0 }
 0xac7   :  { %v10445_v38 = vadd.f32 %v10444_v17, %v10443_v7  ;;  %v9008_v29 = vadd.f32 %v10470_v47, %v8959_v52  ;;  %v10473_v14 = vadd.f32 %v10472_v15, %v10471_v39 }
 0xac8   :  { %v10446_v57 = vpop.f32.mrf.mxu1  ;;  %v13641_v6 = vpop.f32.mrf.mxu0 }
 0xac9   :  { %v8962_v23 = vadd.f32 %v10445_v38, %v8913_v36  ;;  %v14088_v36 = vld [vmem:[#allocation7_spill] sm:$0xff] }
 0xaca   :  { %v10447_v1 = vpop.f32.mrf.mxu1  ;;  %v10475_v37 = vpop.f32.mrf.mxu0 }
 0xacb   :  { %v10448_v62 = vadd.f32 %v10447_v1, %v10446_v57  ;;  %v9011_v3 = vadd.f32 %v10473_v14, %v8962_v23  ;;  %v10476_v0 = vadd.f32 %v10475_v37, %v13641_v6  ;;  %v14089_v23 = vld [vmem:[#allocation14_spill] sm:$0xff] }
 0xacc   :  { %v10449_v43 = vpop.f32.mrf.mxu1  ;;  %v10477_v50 = vpop.f32.mrf.mxu0 }
 0xacd   :  { %v8967_v26 = vadd.f32 %v10448_v62, %v8918_v42 }
 0xace   :  { %v10450_v13 = vpop.f32.mrf.mxu1  ;;  %v10478_v5 = vpop.f32.mrf.mxu0 }
 0xacf   :  { %v10451_v48 = vadd.f32 %v10450_v13, %v10449_v43  ;;  %v10479_v25 = vadd.f32 %v10478_v5, %v10477_v50  ;;  %v9016_v35 = vadd.f32 %v10476_v0, %v8967_v26  ;;  %v14086_v50 = vld [vmem:[#allocation11_spill] sm:$0xff]  ;;  %v14092_v26 = vld [vmem:[#allocation13_spill] sm:$0xff] }
 0xad1   :  { %v8970_v32 = vadd.f32 %v10451_v48, %v8921_v63 }
 0xad3   :  { %v9019_v34 = vadd.f32 %v10479_v25, %v8970_v32 }
 0xae1   :  { %v10496_v49 = vpop.f32.mrf.mxu1  ;;  %v10524_v46 = vpop.f32.mrf.mxu0 }
 0xae3   :  { %v10497_v45 = vpop.f32.mrf.mxu1  ;;  %v10525_v8 = vpop.f32.mrf.mxu0 }
 0xae4   :  { %v10498_v51 = vadd.f32 %v10497_v45, %v10496_v49  ;;  %v10526_v59 = vadd.f32 %v10525_v8, %v10524_v46  ;;  %v14090_v8 = vld [vmem:[#allocation9_spill] sm:$0xff] }
 0xae5   :  { %v10499_v53 = vpop.f32.mrf.mxu1  ;;  %v10527_v11 = vpop.f32.mrf.mxu0 }
 0xae6   :  { %v9057_v44 = vadd.f32 %v10498_v51, %v9008_v29 }
 0xae7   :  { %v10500_v54 = vpop.f32.mrf.mxu1  ;;  %v10528_v60 = vpop.f32.mrf.mxu0 }
 0xae8   :  { %v9106_v31 = vadd.f32 %v10526_v59, %v9057_v44  ;;  %v10501_v4 = vadd.f32 %v10500_v54, %v10499_v53  ;;  %v10529_v43 = vadd.f32 %v10528_v60, %v10527_v11  ;;  %v14091_v44 = vld [vmem:[#allocation8_spill] sm:$0xff] }
 0xae9   :  { %v10502_v58 = vpop.f32.mrf.mxu1  ;;  %v10530_v56 = vpop.f32.mrf.mxu0 }
 0xaea   :  { %v9124_v7 = vcombine.high %v9106_v31, %v9106_v31  ;;  %v9131_v18 = vrot.slane %v9106_v31, %v11306_v19  ;;  %v9060_v1 = vadd.f32 %v10501_v4, %v9011_v3 }
 0xaeb   :  { %v10503_v39 = vpop.f32.mrf.mxu1  ;;  %v10531_v57 = vpop.f32.mrf.mxu0 }
 0xaec   :  { %v9138_v17 = vrot.slane %v9124_v7, %v11306_v19  ;;  %v9139_v15 = vcombine.high %v9131_v18, %v9131_v18  ;;  %v9109_v22 = vadd.f32 %v10529_v43, %v9060_v1  ;;  %v10504_v41 = vadd.f32 %v10503_v39, %v10502_v58  ;;  %v14093_v58 = vld [vmem:[#allocation12_spill] sm:$0xff] }
 0xaed   :  { %v10505_v33 = vpop.f32.mrf.mxu1  ;;  %v13648_v16 = vadd.f32 %v9131_v18, %v12917_v27  ;;  %v10533_v6 = vpop.f32.mrf.mxu0  ;;  %v10532_v9 = vadd.f32 %v10531_v57, %v10530_v56  ;;  %v14094_v18 = vld [vmem:[#allocation15_spill] sm:$0xff] }
 0xaee   :  { %v9140_v24 = vcombine.high %v9138_v17, %v9138_v17  ;;  %v13651_v40 = vadd.f32 %v9139_v15, %v12920_v20  ;;  %v9141_v28 = vcombine.high %v9109_v22, %v9109_v22  ;;  %v13654_v37 = vadd.f32 %v9138_v17, %v14086_v50  ;;  %v14095_v17 = vld [vmem:[#allocation2_spill] sm:$0xff] }
 0xaef   :  { %v9148_v61 = vrot.slane %v9109_v22, %v11306_v19  ;;  %v9065_v13 = vadd.f32 %v10504_v41, %v9016_v35  ;;  %v10506_v52 = vpop.f32.mrf.mxu1  ;;  %v10534_v10 = vpop.f32.mrf.mxu0  ;;  %v14096_v35 = vld [vmem:[#allocation16_spill] sm:$0xff]  ;;  %v14097_v41 = vld [vmem:[#allocation17_spill] sm:$0xff] }
 0xaf0   :  { %v9155_v38 = vrot.slane %v9141_v28, %v11306_v19  ;;  %v10507_v5 = vadd.f32 %v10506_v52, %v10505_v33  ;;  %v13659_v27 = vadd.f32 %v9140_v24, %v14087_v21  ;;  %v9242_v20 = vcombine.low %v13648_v16, %v13651_v40 }
 0xaf1   :  { %v9156_v49 = vcombine.high %v9148_v61, %v9148_v61  ;;  %v13664_v47 = vadd.f32 %v9148_v61, %v14088_v36  ;;  %v9114_v46 = vadd.f32 %v10532_v9, %v9065_v13  ;;  %v10535_v45 = vadd.f32 %v10534_v10, %v10533_v6  ;;  %v14098_v6 = vld [vmem:[#allocation18_spill] sm:$0xff]  ;;  %v14099_v61 = vld [vmem:[#allocation19_spill] sm:$0xff] }
 0xaf2   :  { %v9157_v30 = vcombine.high %v9155_v38, %v9155_v38  ;;  %v9068_v12 = vadd.f32 %v10507_v5, %v9019_v34  ;;  %v9243_v29 = vcombine.low %v13654_v37, %v13659_v27  ;;  %v13672_v2 = vadd.f32 %v9155_v38, %v14090_v8  ;;  %v14101_v8 = vld [vmem:[#allocation4_spill] sm:$0xff] }
 0xaf3   :  { %v13669_v51 = vadd.f32 %v9156_v49, %v14089_v23  ;;  %v9158_v55 = vcombine.high %v9114_v46, %v9114_v46  ;;  %v9165_v62 = vrot.slane %v9114_v46, %v11306_v19  ;;  %v9250_v53 = vrot.slane %v9242_v20, %v11306_v19 }
 0xaf4   :  { %v9117_v48 = vadd.f32 %v10535_v45, %v9068_v12  ;;  %v9257_v14 = vrot.slane %v9243_v29, %v11306_v19  ;;  %v13678_v59 = vadd.f32 %v9157_v30, %v14091_v44  ;;  %v14100_v29 = vld [vmem:[#allocation3_spill] sm:$0xff] }
 0xaf5   :  { %v9172_v11 = vrot.slane %v9158_v55, %v11306_v19  ;;  %v9173_v42 = vcombine.high %v9165_v62, %v9165_v62  ;;  %v9259_v63 = vcombine.low %v13664_v47, %v13669_v51  ;;  %v13687_v32 = vadd.f32 %v9165_v62, %v14092_v26  ;;  %v14102_v62 = vld [vmem:[#allocation5_spill] sm:$0xff] }
 0xaf6   :  { %v9175_v54 = vcombine.high %v9117_v48, %v9117_v48  ;;  %v9182_v3 = vrot.slane %v9117_v48, %v11306_v19  ;;  %v9258_v31 = vcombine.low %v9250_v53, %v9257_v14  ;;  %v9260_v4 = vcombine.low %v13672_v2, %v13678_v59  ;;  %v14103_v53 = vld [vmem:[#allocation6_spill] sm:$0xff] }
 0xaf7   :  { %v9174_v60 = vcombine.high %v9172_v11, %v9172_v11  ;;  %v13690_v7 = vadd.f32 %v9173_v42, %v14093_v58  ;;  %v13693_v1 = vadd.f32 %v9172_v11, %v14094_v18  ;;  %v9267_v25 = vrot.slane %v9259_v63, %v11306_v19 }
 0xaf8   :  { %v9189_v43 = vrot.slane %v9175_v54, %v11306_v19  ;;  %v9190_v56 = vcombine.high %v9182_v3, %v9182_v3  ;;  %v9314_v0 = vsel %vm154_vm1, %v9258_v31, 0.0  ;;  %v9274_v39 = vrot.slane %v9260_v4, %v11306_v19 }
 0xaf9   :  { %9315 = vadd.xlane.f32.xlu1 %v9314_v0  ;;  %v13700_v15 = vadd.f32 %v9174_v60, %v14095_v17  ;;  %v9276_v22 = vcombine.low %v13687_v32, %v13690_v7  ;;  %v13705_v34 = vadd.f32 %v9182_v3, %v14096_v35 }
 0xafa   :  { %v9191_v57 = vcombine.high %v9189_v43, %v9189_v43  ;;  %v13708_v33 = vadd.f32 %v9190_v56, %v14097_v41  ;;  %v9275_v24 = vcombine.low %v9267_v25, %v9274_v39  ;;  %v13713_v50 = vadd.f32 %v9189_v43, %v14098_v6 }
 0xafb   :  { %v9277_v28 = vcombine.low %v13693_v1, %v13700_v15  ;;  %v9284_v38 = vrot.slane %v9276_v22, %v11306_v19 }
 0xafc   :  { %v13716_v13 = vadd.f32 %v9191_v57, %v14099_v61  ;;  %v9293_v9 = vcombine.low %v13705_v34, %v13708_v33  ;;  %v9317_v52 = vsel %vm154_vm1, %v9275_v24, 0.0 }
 0xafd   :  { %v9291_v5 = vrot.slane %v9277_v28, %v11306_v19  ;;  %9318 = vadd.xlane.f32.xlu0 %v9317_v52 }
 0xafe   :  { %v9294_v10 = vcombine.low %v13713_v50, %v13716_v13  ;;  %v9301_v20 = vrot.slane %v9293_v9, %v11306_v19 }
 0xaff   :  { %v9292_v21 = vcombine.low %v9284_v38, %v9291_v5 }
 0xb00   :  { %v9308_v49 = vrot.slane %v9294_v10, %v11306_v19 }
 0xb01   :  { %v9320_v36 = vsel %vm154_vm1, %v9292_v21, 0.0 }
 0xb02   :  { %9321 = vadd.xlane.f32.xlu1 %v9320_v36  ;;  %v9309_v46 = vcombine.low %v9301_v20, %v9308_v49 }
 0xb04   :  { %v9323_v30 = vsel %vm154_vm1, %v9309_v46, 0.0 }
 0xb05   :  { %9324 = vadd.xlane.f32.xlu0 %v9323_v30 }
 0xb82   :  { %v9316_v12 = vpop.xlane.xlu1 %9315 }
 0xb83   :  { %v9326_v45 = vmul.f32 0.083333336, %v9316_v12 }
 0xb85   :  { %v9340_v23 = vrot.slane %v9326_v45, %v14100_v29  ;;  %v9347_v55 = vrot.slane %v9326_v45, %v14101_v8  ;;  %v9354_v48 = vrot.slane %v9326_v45, %v14102_v62  ;;  %v9361_v14 = vrot.slane %v9326_v45, %v14103_v53 }
 0xb86   :  { %v9319_v54 = vpop.xlane.xlu0 %9318 }
 0xb87   :  { %v13734_v44 = vsub.f32 %v13648_v16, %v9340_v23  ;;  %v13737_v11 = vsub.f32 %v13651_v40, %v9347_v55  ;;  %v13740_v42 = vsub.f32 %v13654_v37, %v9354_v48  ;;  %v13743_v63 = vsub.f32 %v13659_v27, %v9361_v14 }
 0xb88   :  { %v9327_v3 = vmul.f32 0.083333336, %v9319_v54 }
 0xb89   :  { %v9478_v31 = vmul.f32 %v13734_v44, %v13734_v44  ;;  %v9479_v4 = vmul.f32 %v13737_v11, %v13737_v11  ;;  %v9480_v16 = vmul.f32 %v13740_v42, %v13740_v42  ;;  %v9481_v40 = vmul.f32 %v13743_v63, %v13743_v63 }
 0xb8a   :  { %v9368_v37 = vrot.slane %v9327_v3, %v14100_v29  ;;  %v9375_v60 = vrot.slane %v9327_v3, %v14101_v8  ;;  %v9382_v27 = vrot.slane %v9327_v3, %v14102_v62  ;;  %v9389_v26 = vrot.slane %v9327_v3, %v14103_v53 }
 0xb8b   :  { %v9322_v58 = vpop.xlane.xlu1 %9321  ;;  %v9510_v18 = vcombine.low %v9478_v31, %v9479_v4  ;;  %v9511_v43 = vcombine.low %v9480_v16, %v9481_v40 }
 0xb8c   :  { %v13758_v56 = vsub.f32 %v13664_v47, %v9368_v37  ;;  %v13761_v0 = vsub.f32 %v13669_v51, %v9375_v60  ;;  %v13764_v25 = vsub.f32 %v13672_v2, %v9382_v27  ;;  %v13767_v39 = vsub.f32 %v13678_v59, %v9389_v26 }
 0xb8d   :  { %v9328_v17 = vmul.f32 0.083333336, %v9322_v58  ;;  %v9518_v22 = vrot.slane %v9510_v18, %v11306_v19  ;;  %v9525_v57 = vrot.slane %v9511_v43, %v11306_v19 }
 0xb8e   :  { %v9325_v35 = vpop.xlane.xlu0 %9324  ;;  %v9482_v41 = vmul.f32 %v13758_v56, %v13758_v56  ;;  %v9483_v47 = vmul.f32 %v13761_v0, %v13761_v0  ;;  %v9484_v51 = vmul.f32 %v13764_v25, %v13764_v25  ;;  %v9485_v2 = vmul.f32 %v13767_v39, %v13767_v39 }
 0xb8f   :  { %v9396_v59 = vrot.slane %v9328_v17, %v14100_v29  ;;  %v9403_v24 = vrot.slane %v9328_v17, %v14101_v8  ;;  %v9410_v28 = vrot.slane %v9328_v17, %v14102_v62  ;;  %v9417_v6 = vrot.slane %v9328_v17, %v14103_v53 }
 0xb90   :  { %v9329_v61 = vmul.f32 0.083333336, %v9325_v35  ;;  %v9526_v9 = vcombine.low %v9518_v22, %v9525_v57  ;;  %v9527_v52 = vcombine.low %v9482_v41, %v9483_v47  ;;  %v9528_v38 = vcombine.low %v9484_v51, %v9485_v2  ;;  %v10170_v2 = vld [vmem:[%s14010_s11] ss:$0 sm:$0xff] }
 0xb91   :  { %v13784_v5 = vsub.f32 %v13687_v32, %v9396_v59  ;;  %v13787_v10 = vsub.f32 %v13690_v7, %v9403_v24  ;;  %v13790_v21 = vsub.f32 %v13693_v1, %v9410_v28  ;;  %v13793_v20 = vsub.f32 %v13700_v15, %v9417_v6  ;;  %v10171_v24 = vld [vmem:[%s14011_s12] ss:$0 sm:$0xff] }
 0xb92   :  { %v9424_v49 = vrot.slane %v9329_v61, %v14100_v29  ;;  %v9431_v36 = vrot.slane %v9329_v61, %v14101_v8  ;;  %v9438_v46 = vrot.slane %v9329_v61, %v14102_v62  ;;  %v9445_v30 = vrot.slane %v9329_v61, %v14103_v53 }
 0xb93   :  { %v9582_v32 = vsel %vm154_vm1, %v9526_v9, 0.0  ;;  %v9535_v12 = vrot.slane %v9527_v52, %v11306_v19  ;;  %v9542_v7 = vrot.slane %v9528_v38, %v11306_v19  ;;  %v9486_v1 = vmul.f32 %v13784_v5, %v13784_v5 }
 0xb94   :  { %v13805_v15 = vsub.f32 %v13705_v34, %v9424_v49  ;;  %v13808_v45 = vsub.f32 %v13708_v33, %v9431_v36  ;;  %v13811_v23 = vsub.f32 %v13713_v50, %v9438_v46  ;;  %v13814_v55 = vsub.f32 %v13716_v13, %v9445_v30  ;;  %9583 = vadd.xlane.f32.xlu1 %v9582_v32 }
 0xb95   :  { %v9543_v48 = vcombine.low %v9535_v12, %v9542_v7  ;;  %v9487_v14 = vmul.f32 %v13787_v10, %v13787_v10  ;;  %v9488_v54 = vmul.f32 %v13790_v21, %v13790_v21  ;;  %v9489_v34 = vmul.f32 %v13793_v20, %v13793_v20 }
 0xb96   :  { %v9490_v33 = vmul.f32 %v13805_v15, %v13805_v15  ;;  %v9491_v50 = vmul.f32 %v13808_v45, %v13808_v45  ;;  %v9492_v13 = vmul.f32 %v13811_v23, %v13811_v23  ;;  %v9493_v3 = vmul.f32 %v13814_v55, %v13814_v55 }
 0xb97   :  { %v9585_v31 = vsel %vm154_vm1, %v9543_v48, 0.0  ;;  %v9544_v4 = vcombine.low %v9486_v1, %v9487_v14  ;;  %v9545_v16 = vcombine.low %v9488_v54, %v9489_v34  ;;  %v9759_v28 = vcombine.high %v10170_v2, %v10170_v2 }
 0xb98   :  { %9586 = vadd.xlane.f32.xlu0 %v9585_v31  ;;  %v9561_v40 = vcombine.low %v9490_v33, %v9491_v50  ;;  %v9562_v37 = vcombine.low %v9492_v13, %v9493_v3  ;;  %v9801_v52 = vcombine.high %v10171_v24, %v10171_v24  ;;  %v13844_v36 = vrot.slane %v10170_v2, %v11306_v19 }
 0xb99   :  { %v9552_v60 = vrot.slane %v9544_v4, %v11306_v19  ;;  %v9559_v27 = vrot.slane %v9545_v16, %v11306_v19  ;;  %v13847_v46 = vrot.slane %v9759_v28, %v11306_v19  ;;  %v13850_v32 = vrot.slane %v10171_v24, %v11306_v19 }
 0xb9a   :  { %v9569_v26 = vrot.slane %v9561_v40, %v11306_v19  ;;  %v9576_v58 = vrot.slane %v9562_v37, %v11306_v19  ;;  %v13853_v12 = vrot.slane %v9801_v52, %v11306_v19  ;;  %v13857_v1 = vcombine.high %v13844_v36, %v13844_v36 }
 0xb9b   :  { %v9560_v18 = vcombine.low %v9552_v60, %v9559_v27  ;;  %v13861_v48 = vcombine.high %v13847_v46, %v13847_v46  ;;  %v13869_v19 = vcombine.high %v13850_v32, %v13850_v32 }
 0xb9c   :  { %v9577_v43 = vcombine.low %v9569_v26, %v9576_v58  ;;  %v13873_v50 = vcombine.high %v13853_v12, %v13853_v12 }
 0xb9d   :  { %v9588_v17 = vsel %vm154_vm1, %v9560_v18, 0.0 }
 0xb9e   :  { %9589 = vadd.xlane.f32.xlu1 %v9588_v17  ;;  %v9591_v22 = vsel %vm154_vm1, %v9577_v43, 0.0 }
 0xb9f   :  { %9592 = vadd.xlane.f32.xlu0 %v9591_v22 }
 0xc1d   :  { %v9584_v57 = vpop.xlane.xlu1 %9583 }
 0xc1e   :  { %v9594_v35 = vmul.f32 0.083333336, %v9584_v57 }
 0xc20   :  { %v9598_v41 = vadd.f32 1e-05, %v9594_v35 }
 0xc21   :  { %v9587_v47 = vpop.xlane.xlu0 %9586 }
 0xc22   :  { %11158 = vrsqrt.f32 %v9598_v41  ;;  %v9595_v51 = vmul.f32 0.083333336, %v9587_v47 }
 0xc24   :  { %v9599_v59 = vadd.f32 1e-05, %v9595_v51 }
 0xc26   :  { %11160 = vrsqrt.f32 %v9599_v59 }
 0xc27   :  { %v9590_v6 = vpop.xlane.xlu1 %9589 }
 0xc28   :  { %v9596_v61 = vmul.f32 0.083333336, %v9590_v6  ;;  %v9593_v9 = vpop.xlane.xlu0 %9592 }
 0xc29   :  { %v9597_v38 = vmul.f32 0.083333336, %v9593_v9 }
 0xc2a   :  { %v9600_v49 = vadd.f32 1e-05, %v9596_v61 }
 0xc2b   :  { %v9601_v30 = vadd.f32 1e-05, %v9597_v38 }
 0xc2c   :  { %11162 = vrsqrt.f32 %v9600_v49 }
 0xc2d   :  { %11164 = vrsqrt.f32 %v9601_v30 }
 0xc2f   :  { %v11159_v7 = vpop.eup %11158 }
 0xc30   :  { %v9616_v14 = vrot.slane %v11159_v7, %v14100_v29  ;;  %v9623_v54 = vrot.slane %v11159_v7, %v14101_v8  ;;  %v9630_v34 = vrot.slane %v11159_v7, %v14102_v62  ;;  %v9637_v33 = vrot.slane %v11159_v7, %v14103_v53 }
 0xc32   :  { %v9738_v13 = vmul.f32 %v9616_v14, %v13734_v44  ;;  %v9739_v3 = vmul.f32 %v9623_v54, %v13737_v11  ;;  %v9740_v31 = vmul.f32 %v9630_v34, %v13740_v42  ;;  %v9741_v4 = vmul.f32 %v9637_v33, %v13743_v63 }
 0xc33   :  { %v11161_v16 = vpop.eup %11160 }
 0xc34   :  { %v9780_v40 = vmul.f32 %v13844_v36, %v9738_v13  ;;  %v9781_v37 = vmul.f32 %v13857_v1, %v9739_v3  ;;  %v9782_v60 = vmul.f32 %v13847_v46, %v9740_v31  ;;  %v9783_v27 = vmul.f32 %v13861_v48, %v9741_v4 }
 0xc35   :  { %v9644_v26 = vrot.slane %v11161_v16, %v14100_v29  ;;  %v9651_v44 = vrot.slane %v11161_v16, %v14101_v8  ;;  %v9658_v11 = vrot.slane %v11161_v16, %v14102_v62  ;;  %v9665_v42 = vrot.slane %v11161_v16, %v14103_v53 }
 0xc36   :  { %v9822_v63 = vadd.f32 %v13850_v32, %v9780_v40  ;;  %v9823_v58 = vadd.f32 %v13869_v19, %v9781_v37  ;;  %v9824_v18 = vadd.f32 %v13853_v12, %v9782_v60  ;;  %v9825_v43 = vadd.f32 %v13873_v50, %v9783_v27 }
 0xc37   :  { %v9742_v17 = vmul.f32 %v9644_v26, %v13758_v56  ;;  %v9743_v22 = vmul.f32 %v9651_v44, %v13761_v0  ;;  %v9744_v57 = vmul.f32 %v9658_v11, %v13764_v25  ;;  %v9745_v35 = vmul.f32 %v9665_v42, %v13767_v39 }
 0xc38   :  { %9839 = vst.msk [vmem:[%s14012_s13] sm:$0x3] %vm9838_vm8, %v9822_v63  ;;  %9840 = vst.msk [vmem:[%s14012_s13 + $0x2] sm:$0x3] %vm9838_vm8, %v9823_v58 }
 0xc39   :  { %9841 = vst.msk [vmem:[%s14012_s13 + $0x4] sm:$0x3] %vm9838_vm8, %v9824_v18  ;;  %9842 = vst.msk [vmem:[%s14012_s13 + $0x6] sm:$0x3] %vm9838_vm8, %v9825_v43  ;;  %v11163_v56 = vpop.eup %11162  ;;  %v9784_v0 = vmul.f32 %v13844_v36, %v9742_v17  ;;  %v9785_v25 = vmul.f32 %v13857_v1, %v9743_v22  ;;  %v9786_v39 = vmul.f32 %v13847_v46, %v9744_v57 }
 0xc3a   :  { %v9787_v41 = vmul.f32 %v13861_v48, %v9745_v35  ;;  %v11165_v47 = vpop.eup %11164  ;;  %v9672_v51 = vrot.slane %v11163_v56, %v14100_v29  ;;  %v9679_v2 = vrot.slane %v11163_v56, %v14101_v8  ;;  %v9686_v59 = vrot.slane %v11163_v56, %v14102_v62 }
 0xc3b   :  { %v9693_v24 = vrot.slane %v11163_v56, %v14103_v53  ;;  %v9826_v28 = vadd.f32 %v13850_v32, %v9784_v0  ;;  %v9827_v6 = vadd.f32 %v13869_v19, %v9785_v25  ;;  %v9828_v61 = vadd.f32 %v13853_v12, %v9786_v39 }
 0xc3c   :  { %v9829_v9 = vadd.f32 %v13873_v50, %v9787_v41  ;;  %v9746_v52 = vmul.f32 %v9672_v51, %v13784_v5  ;;  %v9747_v38 = vmul.f32 %v9679_v2, %v13787_v10  ;;  %v9748_v49 = vmul.f32 %v9686_v59, %v13790_v21 }
 0xc3d   :  { %v9749_v30 = vmul.f32 %v9693_v24, %v13793_v20  ;;  %9843 = vst.msk [vmem:[%s14012_s13 + $0x8] sm:$0x3] %vm9838_vm8, %v9826_v28  ;;  %9844 = vst.msk [vmem:[%s14012_s13 + $0xa] sm:$0x3] %vm9838_vm8, %v9827_v6  ;;  %v9700_v5 = vrot.slane %v11165_v47, %v14100_v29  ;;  %v9707_v10 = vrot.slane %v11165_v47, %v14101_v8 }
 0xc3e   :  { %9845 = vst.msk [vmem:[%s14012_s13 + $0xc] sm:$0x3] %vm9838_vm8, %v9828_v61  ;;  %9846 = vst.msk [vmem:[%s14012_s13 + $0xe] sm:$0x3] %vm9838_vm8, %v9829_v9  ;;  %v9714_v21 = vrot.slane %v11165_v47, %v14102_v62  ;;  %v9721_v20 = vrot.slane %v11165_v47, %v14103_v53  ;;  %v9788_v7 = vmul.f32 %v13844_v36, %v9746_v52 }
 0xc3f   :  { %v9789_v14 = vmul.f32 %v13857_v1, %v9747_v38  ;;  %v9790_v54 = vmul.f32 %v13847_v46, %v9748_v49  ;;  %v9791_v34 = vmul.f32 %v13861_v48, %v9749_v30  ;;  %v9750_v33 = vmul.f32 %v9700_v5, %v13805_v15 }
 0xc40   :  { %v9751_v13 = vmul.f32 %v9707_v10, %v13808_v45  ;;  %v9752_v29 = vmul.f32 %v9714_v21, %v13811_v23  ;;  %v9753_v8 = vmul.f32 %v9721_v20, %v13814_v55  ;;  %v9830_v62 = vadd.f32 %v13850_v32, %v9788_v7 }
 0xc41   :  { %v9831_v53 = vadd.f32 %v13869_v19, %v9789_v14  ;;  %v9832_v3 = vadd.f32 %v13853_v12, %v9790_v54  ;;  %v9833_v31 = vadd.f32 %v13873_v50, %v9791_v34  ;;  %v9792_v4 = vmul.f32 %v13844_v36, %v9750_v33 }
 0xc42   :  { %v9793_v16 = vmul.f32 %v13857_v1, %v9751_v13  ;;  %v9794_v15 = vmul.f32 %v13847_v46, %v9752_v29  ;;  %v9795_v45 = vmul.f32 %v13861_v48, %v9753_v8  ;;  %9847 = vst.msk [vmem:[%s14012_s13 + $0x10] sm:$0x3] %vm9838_vm8, %v9830_v62 }
 0xc43   :  { %9848 = vst.msk [vmem:[%s14012_s13 + $0x12] sm:$0x3] %vm9838_vm8, %v9831_v53  ;;  %9849 = vst.msk [vmem:[%s14012_s13 + $0x14] sm:$0x3] %vm9838_vm8, %v9832_v3  ;;  %v9834_v23 = vadd.f32 %v13850_v32, %v9792_v4 }
 0xc44   :  { %9850 = vst.msk [vmem:[%s14012_s13 + $0x16] sm:$0x3] %vm9838_vm8, %v9833_v31  ;;  %v9835_v55 = vadd.f32 %v13869_v19, %v9793_v16  ;;  %v9836_v36 = vadd.f32 %v13853_v12, %v9794_v15  ;;  %v9837_v46 = vadd.f32 %v13873_v50, %v9795_v45 }
 0xc45   :  { %9851 = vst.msk [vmem:[%s14012_s13 + $0x18] sm:$0x3] %vm9838_vm8, %v9834_v23 }
 0xc46   :  { %9852 = vst.msk [vmem:[%s14012_s13 + $0x1a] sm:$0x3] %vm9838_vm8, %v9835_v55  ;;  %9853 = vst.msk [vmem:[%s14012_s13 + $0x1c] sm:$0x3] %vm9838_vm8, %v9836_v36 }
 0xc47   :  { %9854 = vst.msk [vmem:[%s14012_s13 + $0x1e] sm:$0x3] %vm9838_vm8, %v9837_v46 }

</bundles_post_ra>
